<compile_context>
chip_gen: v5e
topology: v5e:2x2
jax: 0.10.0
libtpu: 0.0.40
codegen_flags: <defaults>
</compile_context>

<pallas_src>
import jax
import jax.numpy as jnp
from jax.experimental import pallas as pl
from jax.experimental.pallas import tpu as pltpu


# ---------------------------------------------------------------------------
# In-kernel conv core: fused 3x3 dilated conv (+ fused channel concat) +
# folded-BN bias + ReLU (+ optional residual), one row tile per grid step.
# ---------------------------------------------------------------------------
def _rebnconv_core(x_pairs, w_refs, b_ref, res_ref, o_ref):
    # x_pairs[i] = (main_ref, halo_ref):
    #   main_ref: (1, TH, W+2d, Cin_i)  padded-input rows [i*TH, i*TH+TH)
    #   halo_ref: (1, 2d, W+2d, Cin_i)  padded-input rows [i*TH+TH, i*TH+TH+2d)
    # w_refs[i]: (9*Cin_i, Cout)  BN-scale-folded weights, tap-major / channel-minor
    # b_ref    : (1, Cout)        folded bias (f32)
    # res_ref  : (1, TH, W, Cout) optional residual row tile (added after ReLU)
    # o_ref    : (1, TH, W, Cout) output row tile
    th, wo, cout = o_ref.shape[1], o_ref.shape[2], o_ref.shape[3]
    d = (x_pairs[0][0].shape[2] - wo) // 2      # dilation == 'same' padding (static)

    acc = None
    for (xm_ref, xh_ref), w_ref in zip(x_pairs, w_refs):
        cin = xm_ref.shape[3]
        # (TH+2d, W+2d, Cin) halo tile: main rows ++ bottom-halo rows.  Major-dim
        # concat -> cheap VMEM move, no lane relayout.
        halo = jnp.concatenate([xm_ref[0], xh_ref[0]], axis=0)
        if cin >= 128:
            # Large Cin: 9 accumulated dots with K=Cin already fill the MXU and
            # avoid materializing a 9x im2col buffer (store/relayout-bound).
            for t in range(9):
                ky, kx = t // 3, t % 3
                tap = halo[ky * d:ky * d + th, kx * d:kx * d + wo, :]
                part = jnp.dot(tap.reshape(th * wo, cin),
                               w_ref[t * cin:(t + 1) * cin, :],
                               preferred_element_type=jnp.float32)
                acc = part if acc is None else acc + part
        else:
            # Small Cin: single matmul with K=9*Cin for better MXU fill.
            taps = [halo[ky * d:ky * d + th, kx * d:kx * d + wo, :]
                    for ky in range(3) for kx in range(3)]
            patch = jnp.concatenate(taps, axis=-1).reshape(th * wo, 9 * cin)
            part = jnp.dot(patch, w_ref[...], preferred_element_type=jnp.float32)
            acc = part if acc is None else acc + part

    # Folded BN (scale already in the weights): bias + ReLU on the f32 accumulator.
    y = jnp.maximum(acc + b_ref[0], 0.0)
    y = y.reshape(th, wo, cout)
    if res_ref is not None:
        y = y + res_ref[0].astype(jnp.float32)   # residual fused (added post-ReLU)
    o_ref[0] = y.astype(o_ref.dtype)


def _make_rebnconv_kernel(n_inputs, has_residual):
    def kernel(*refs):
        x_pairs = tuple((refs[2 * i], refs[2 * i + 1]) for i in range(n_inputs))
        w_refs = refs[2 * n_inputs:3 * n_inputs]
        b_ref = refs[3 * n_inputs]
        res_ref = refs[3 * n_inputs + 1] if has_residual else None
        o_ref = refs[-1]
        _rebnconv_core(x_pairs, w_refs, b_ref, res_ref, o_ref)
    return kernel


# ---------------------------------------------------------------------------
# Tiling / VMEM budgeting helpers
# ---------------------------------------------------------------------------
def _vmem_cap_bytes():
    # Generation-aware budget: <= 3/4 of per-core physical VMEM
    # (v7x 64 MiB -> 48 MiB; v5e/v6e 128 MiB -> 96 MiB).  Conservative fallback.
    try:
        return int(pltpu.get_tpu_info().vmem_capacity_bytes) * 3 // 4
    except Exception:
        return 48 * 2**20


def _estimate_vmem(th, w, d, cins, cout, in_bytes, has_res):
    wpad = w + 2 * d
    b = 0
    for c in cins:
        b += 2 * (th + 2 * d) * wpad * c * in_bytes     # main + halo blocks, x2 buffers
        b += (th + 2 * d) * wpad * c * in_bytes         # in-kernel halo concat temp
        b += 2 * 9 * c * cout * in_bytes                # weights (double-buffered)
        if c < 128:
            b += th * w * 9 * c * in_bytes              # im2col patch temp
    b += 2 * th * w * cout * in_bytes                   # output tile (double-buffered)
    if has_res:
        b += 2 * th * w * cout * in_bytes               # residual tile
    b += 2 * th * w * cout * 4                          # f32 accumulator + epilogue temp
    b += 4 * cout
    return b


def _pick_tile_rows(h, d, per_row_bytes, target_bytes=2 << 20):
    """Row-tile height: ~target-sized tiles, multiple of 2*d (halo decomposition),
    and at least two row tiles per image when possible (v7x TC sharding)."""
    q = 2 * d
    th = int(target_bytes // max(per_row_bytes, 1))
    th = max(q, (th // q) * q)
    if h > q:                                  # prefer >= 2 row tiles
        half = -(-h // 2)
        half = -(-half // q) * q
        th = min(th, half)
    th = min(th, -(-h // q) * q)               # never taller than the rounded image
    return max(q, th)


# ---------------------------------------------------------------------------
# REBNCONV wrapper
# ---------------------------------------------------------------------------
def rebnconv(xs, params, dirate, residual=None, compute_dtype=jnp.bfloat16):
    """Fused REBNCONV (3x3 dilated conv + folded BatchNorm + ReLU).

    xs: one NHWC array or a tuple whose channels, concatenated, form the conv
        input (the concat is fused into the kernel as a split-K sum).
    residual: optional NHWC array added after the ReLU (fused into the kernel).
    """
    if not isinstance(xs, (tuple, list)):
        xs = (xs,)
    xs = [x.astype(compute_dtype) for x in xs]
    N, H, W = xs[0].shape[0], xs[0].shape[1], xs[0].shape[2]
    cins = [int(x.shape[3]) for x in xs]
    Cout = int(params["bias"].shape[0])
    d = int(dirate)
    in_bytes = jnp.dtype(compute_dtype).itemsize
    has_res = residual is not None

    # Fold the BN scale into the weights; kernel epilogue becomes bias + ReLU.
    w9 = (params["w"] * params["scale"][None, None, :]).astype(compute_dtype)

    # Row-tile height: ~1-2 MiB tiles, multiple of 2*d, shrunk to fit VMEM budget.
    per_row = W * Cout * (2 * in_bytes + 4)
    for c in cins:
        per_row += 3 * (W + 2 * d) * c * in_bytes
        if c < 128:
            per_row += 9 * W * c * in_bytes
    th = _pick_tile_rows(H, d, per_row)
    cap = _vmem_cap_bytes()
    while th > 2 * d and (_estimate_vmem(th, W, d, cins, Cout, in_bytes, has_res)
                          * 5 // 4 + (4 << 20)) > cap:
        th -= 2 * d
    num_i = pl.cdiv(H, th)

    # 'same' padding == dilation; the bottom is additionally padded so the last
    # row tile's halo block stays in bounds (the extra zero rows are dropped by
    # the masked output store).
    pad_b = num_i * th - H + d
    xps = [jnp.pad(x, ((0, 0), (d, pad_b), (d, d), (0, 0))) for x in xs]
    # TODO(synk): fuse the zero-pad into the kernel (masked boundary rows/cols) to
    # save one full-activation HBM round trip per layer per input.

    # Split the weights along Cin (fused channel concat == split-K) and flatten to
    # (9*Cin_i, Cout), tap-major / channel-minor, matching the in-kernel ordering.
    ws, off = [], 0
    for c in cins:
        ws.append(w9[:, off:off + c, :].reshape(9 * c, Cout))
        off += c
    bias = params["bias"].reshape(1, Cout).astype(jnp.float32)

    halo_stride = th // (2 * d)     # bottom-halo block index step per row tile
    wpad = W + 2 * d

    in_specs, args = [], []
    for xp, c in zip(xps, cins):
        # Main rows [i*th, i*th+th) and bottom-halo rows [(i+1)*th, (i+1)*th+2d) of
        # the padded input: together they form the halo tile while keeping both
        # specs plain "blocked" (auto double-buffered, megacore-friendly).
        in_specs.append(pl.BlockSpec((1, th, wpad, c), lambda n, i: (n, i, 0, 0)))
        args.append(xp)
        in_specs.append(pl.BlockSpec(
            (1, 2 * d, wpad, c),
            lambda n, i, s=halo_stride: (n, (i + 1) * s, 0, 0)))
        args.append(xp)
    # TODO(synk): weights/bias are grid-invariant; single-buffering them
    # (pipeline_mode=pl.Buffered(1)) would halve their VMEM footprint.
    for w, c in zip(ws, cins):
        in_specs.append(pl.BlockSpec((9 * c, Cout), lambda n, i: (0, 0)))
        args.append(w)
    in_specs.append(pl.BlockSpec((1, Cout), lambda n, i: (0, 0)))
    args.append(bias)
    if has_res:
        in_specs.append(pl.BlockSpec((1, th, W, Cout), lambda n, i: (n, i, 0, 0)))
        args.append(residual.astype(compute_dtype))

    est = _estimate_vmem(th, W, d, cins, Cout, in_bytes, has_res) * 5 // 4 + (4 << 20)
    vmem_limit = int(min(cap, max(32 << 20, est)))

    kernel = _make_rebnconv_kernel(len(xs), has_res)
    return pl.pallas_call(
        kernel,
        out_shape=jax.ShapeDtypeStruct((N, H, W, Cout), compute_dtype),
        grid=(N, num_i),
        in_specs=in_specs,
        out_specs=pl.BlockSpec((1, th, W, Cout), lambda n, i: (n, i, 0, 0)),
        compiler_params=pltpu.CompilerParams(
            dimension_semantics=("parallel", "parallel"),
            vmem_limit_bytes=vmem_limit,
        ),
    )(*args)


# ---------------------------------------------------------------------------
# Glue ops (plain JAX): maxpool, bilinear upsample
# ---------------------------------------------------------------------------
def maxpool2x2_ceil(x):
    """MaxPool2d(2, stride=2, ceil_mode=True) on NHWC."""
    # TODO(synk): fuse the pool into the producing conv kernel (emit pooled tiles)
    # to drop one full-activation HBM round trip per level.
    N, H, W, C = x.shape
    ph, pw = (-H) % 2, (-W) % 2
    if ph or pw:
        x = jnp.pad(x, ((0, 0), (0, ph), (0, pw), (0, 0)),
                    constant_values=-jnp.inf)
    H2, W2 = (H + ph) // 2, (W + pw) // 2
    return x.reshape(N, H2, 2, W2, 2, C).max(axis=(2, 4))


def upsample_like(src, tar):
    """F.interpolate(mode='bilinear', align_corners=False) to tar's spatial size."""
    # TODO(synk): fold the bilinear upsample into the consuming conv's row tiling
    # (in-kernel row replication + lerp) to save another HBM round trip.
    N, _, _, C = src.shape
    Ht, Wt = tar.shape[1], tar.shape[2]
    return jax.image.resize(src, (N, Ht, Wt, C), method="bilinear")


# ---------------------------------------------------------------------------
# Parameter construction (deterministic, synthetic)
# ---------------------------------------------------------------------------
def init_rebnconv(key, in_ch, out_ch):
    k1, k2, k3, k4 = jax.random.split(key, 4)
    fan_in = 3 * 3 * in_ch
    w = jax.random.normal(k1, (3, 3, in_ch, out_ch), jnp.float32) / jnp.sqrt(fan_in)
    conv_b = 0.1 * jax.random.normal(k2, (out_ch,), jnp.float32)
    gamma = 1.0 + 0.1 * jax.random.normal(k3, (out_ch,), jnp.float32)
    beta = 0.1 * jax.random.normal(k4, (out_ch,), jnp.float32)
    # BatchNorm in inference mode with fresh running stats (mean=0, var=1, eps=1e-5)
    eps = 1e-5
    run_mean = jnp.zeros((out_ch,), jnp.float32)
    run_var = jnp.ones((out_ch,), jnp.float32)
    scale = gamma / jnp.sqrt(run_var + eps)
    bias = beta - scale * run_mean + scale * conv_b
    return {"w": w.reshape(9, in_ch, out_ch), "scale": scale, "bias": bias}


def init_rsu4(key, in_ch, mid_ch, out_ch):
    keys = jax.random.split(key, 9)
    return {
        "rebnconvin": init_rebnconv(keys[0], in_ch, out_ch),
        "rebnconv1": init_rebnconv(keys[1], out_ch, mid_ch),
        "rebnconv2": init_rebnconv(keys[2], mid_ch, mid_ch),
        "rebnconv3": init_rebnconv(keys[3], mid_ch, mid_ch),
        "rebnconv4": init_rebnconv(keys[4], mid_ch, mid_ch),
        "rebnconv3d": init_rebnconv(keys[5], 2 * mid_ch, mid_ch),
        "rebnconv2d": init_rebnconv(keys[6], 2 * mid_ch, mid_ch),
        "rebnconv1d": init_rebnconv(keys[7], 2 * mid_ch, out_ch),
    }


# ---------------------------------------------------------------------------
# RSU4 forward
# ---------------------------------------------------------------------------
@jax.jit
def rsu4_forward(params, x_nchw):
    dt = jnp.bfloat16   # MXU-native operands; accumulation/epilogue stay f32 in-kernel
    x = jnp.transpose(x_nchw, (0, 2, 3, 1)).astype(dt)   # NCHW -> NHWC

    hxin = rebnconv(x, params["rebnconvin"], 1, compute_dtype=dt)
    hx1 = rebnconv(hxin, params["rebnconv1"], 1, compute_dtype=dt)
    hx = maxpool2x2_ceil(hx1)
    hx2 = rebnconv(hx, params["rebnconv2"], 1, compute_dtype=dt)
    hx = maxpool2x2_ceil(hx2)
    hx3 = rebnconv(hx, params["rebnconv3"], 1, compute_dtype=dt)
    hx4 = rebnconv(hx3, params["rebnconv4"], 2, compute_dtype=dt)

    # Decoder: channel concat fused into the conv kernels (split-K sum).
    hx3d = rebnconv((hx4, hx3), params["rebnconv3d"], 1, compute_dtype=dt)
    hx3dup = upsample_like(hx3d, hx2)
    hx2d = rebnconv((hx3dup, hx2), params["rebnconv2d"], 1, compute_dtype=dt)
    hx2dup = upsample_like(hx2d, hx1)
    # Residual add (hx1d + hxin) is fused into the last conv kernel.
    hx1d = rebnconv((hx2dup, hx1), params["rebnconv1d"], 1, residual=hxin,
                    compute_dtype=dt)

    return jnp.transpose(hx1d, (0, 3, 1, 2)).astype(x_nchw.dtype)  # NHWC -> NCHW


if __name__ == "__main__":
    N, IN_CH, MID_CH, OUT_CH, H, W = 2, 4, 8, 4, 16, 16

    key = jax.random.PRNGKey(0)
    kx, kp = jax.random.split(key)
    x = jax.random.normal(kx, (N, IN_CH, H, W), jnp.float32)  # NCHW like PyTorch
    params = init_rsu4(kp, IN_CH, MID_CH, OUT_CH)

    out = rsu4_forward(params, x)
    out = jax.block_until_ready(out)
    assert out.shape == (N, OUT_CH, H, W), out.shape
    assert jnp.all(jnp.isfinite(out))
    print("KERNEL_OK")
</pallas_src>

<mosaic_0001>
module attributes {stable_mosaic.version = 11 : i64} {
  func.func @kernel(%arg0: i32, %arg1: i32, %arg2: memref<1x8x18x4xbf16, #tpu.memory_space<vmem>>, %arg3: memref<1x2x18x4xbf16, #tpu.memory_space<vmem>>, %arg4: memref<36x4xbf16, #tpu.memory_space<vmem>>, %arg5: memref<1x4xf32, #tpu.memory_space<vmem>>, %arg6: memref<1x8x16x4xbf16, #tpu.memory_space<vmem>>) attributes {dimension_semantics = [#tpu.dimension_semantics<parallel>, #tpu.dimension_semantics<parallel>], iteration_bounds = array<i64: 2, 2>, scalar_prefetch = 0 : i64, scratch_operands = 0 : i64, tpu.core_type = #tpu.core_type<tc>, window_params = [{transform_indices = @transform_0, window_bounds = array<i64: 1, 8, 18, 4>}, {transform_indices = @transform_1, window_bounds = array<i64: 1, 2, 18, 4>}, {pipeline_mode = #tpu.pipeline_mode<synchronous>, transform_indices = @transform_2, window_bounds = array<i64: 36, 4>}, {pipeline_mode = #tpu.pipeline_mode<synchronous>, transform_indices = @transform_3, window_bounds = array<i64: 1, 4>}, {transform_indices = @transform_4, window_bounds = array<i64: 1, 8, 16, 4>}]} {
    %c0 = arith.constant 0 : index
    %c0_0 = arith.constant 0 : index
    %c0_1 = arith.constant 0 : index
    %c0_2 = arith.constant 0 : index
    %0 = vector.load %arg2[%c0, %c0_0, %c0_1, %c0_2] : memref<1x8x18x4xbf16, #tpu.memory_space<vmem>>, vector<1x8x18x4xbf16>
    %1 = vector.shape_cast %0 : vector<1x8x18x4xbf16> to vector<8x18x4xbf16>
    %c0_3 = arith.constant 0 : index
    %c0_4 = arith.constant 0 : index
    %c0_5 = arith.constant 0 : index
    %c0_6 = arith.constant 0 : index
    %2 = vector.load %arg3[%c0_3, %c0_4, %c0_5, %c0_6] : memref<1x2x18x4xbf16, #tpu.memory_space<vmem>>, vector<1x2x18x4xbf16>
    %3 = vector.shape_cast %2 : vector<1x2x18x4xbf16> to vector<2x18x4xbf16>
    %4 = tpu.concatenate %1, %3 in 0 : vector<8x18x4xbf16>, vector<2x18x4xbf16> -> vector<10x18x4xbf16>
    %5 = vector.extract_strided_slice %4 {offsets = [0, 0, 0], sizes = [8, 16, 4], strides = [1, 1, 1]} : vector<10x18x4xbf16> to vector<8x16x4xbf16>
    %6 = vector.extract_strided_slice %4 {offsets = [0, 1, 0], sizes = [8, 16, 4], strides = [1, 1, 1]} : vector<10x18x4xbf16> to vector<8x16x4xbf16>
    %7 = vector.extract_strided_slice %4 {offsets = [0, 2, 0], sizes = [8, 16, 4], strides = [1, 1, 1]} : vector<10x18x4xbf16> to vector<8x16x4xbf16>
    %8 = vector.extract_strided_slice %4 {offsets = [1, 0, 0], sizes = [8, 16, 4], strides = [1, 1, 1]} : vector<10x18x4xbf16> to vector<8x16x4xbf16>
    %9 = vector.extract_strided_slice %4 {offsets = [1, 1, 0], sizes = [8, 16, 4], strides = [1, 1, 1]} : vector<10x18x4xbf16> to vector<8x16x4xbf16>
    %10 = vector.extract_strided_slice %4 {offsets = [1, 2, 0], sizes = [8, 16, 4], strides = [1, 1, 1]} : vector<10x18x4xbf16> to vector<8x16x4xbf16>
    %11 = vector.extract_strided_slice %4 {offsets = [2, 0, 0], sizes = [8, 16, 4], strides = [1, 1, 1]} : vector<10x18x4xbf16> to vector<8x16x4xbf16>
    %12 = vector.extract_strided_slice %4 {offsets = [2, 1, 0], sizes = [8, 16, 4], strides = [1, 1, 1]} : vector<10x18x4xbf16> to vector<8x16x4xbf16>
    %13 = vector.extract_strided_slice %4 {offsets = [2, 2, 0], sizes = [8, 16, 4], strides = [1, 1, 1]} : vector<10x18x4xbf16> to vector<8x16x4xbf16>
    %14 = tpu.concatenate %5, %6, %7, %8, %9, %10, %11, %12, %13 in 2 : vector<8x16x4xbf16>, vector<8x16x4xbf16>, vector<8x16x4xbf16>, vector<8x16x4xbf16>, vector<8x16x4xbf16>, vector<8x16x4xbf16>, vector<8x16x4xbf16>, vector<8x16x4xbf16>, vector<8x16x4xbf16> -> vector<8x16x36xbf16>
    %15 = vector.shape_cast %14 : vector<8x16x36xbf16> to vector<128x36xbf16>
    %c0_7 = arith.constant 0 : index
    %c0_8 = arith.constant 0 : index
    %16 = vector.load %arg4[%c0_7, %c0_8] : memref<36x4xbf16, #tpu.memory_space<vmem>>, vector<36x4xbf16>
    %cst = arith.constant dense<0.000000e+00> : vector<128x4xf32>
    %17 = tpu.matmul %15, %16, %cst {dimension_numbers = #tpu.dot_dimension_numbers<[1], [0], [0], [1], [0, 0, 1, 1], [], []>} : vector<128x36xbf16>, vector<36x4xbf16>, vector<128x4xf32> -> vector<128x4xf32>
    %c0_9 = arith.constant 0 : index
    %c0_10 = arith.constant 0 : index
    %18 = vector.load %arg5[%c0_9, %c0_10] : memref<1x4xf32, #tpu.memory_space<vmem>>, vector<1x4xf32>
    %19 = vector.shape_cast %18 : vector<1x4xf32> to vector<4xf32>
    %20 = vector.shape_cast %19 : vector<4xf32> to vector<1x4xf32>
    %21 = vector.broadcast %20 : vector<1x4xf32> to vector<128x4xf32>
    %22 = arith.addf %17, %21 : vector<128x4xf32>
    %cst_11 = arith.constant 0.000000e+00 : f32
    %23 = vector.broadcast %cst_11 : f32 to vector<128x4xf32>
    %24 = arith.maximumf %22, %23 : vector<128x4xf32>
    %25 = vector.shape_cast %24 : vector<128x4xf32> to vector<8x16x4xf32>
    %26 = arith.truncf %25 : vector<8x16x4xf32> to vector<8x16x4xbf16>
    %c0_12 = arith.constant 0 : index
    %c0_13 = arith.constant 0 : index
    %c0_14 = arith.constant 0 : index
    %c0_15 = arith.constant 0 : index
    %27 = vector.load %arg6[%c0_12, %c0_13, %c0_14, %c0_15] : memref<1x8x16x4xbf16, #tpu.memory_space<vmem>>, vector<1x8x16x4xbf16>
    %28 = vector.shape_cast %27 : vector<1x8x16x4xbf16> to vector<8x16x4xbf16>
    %29 = vector.shape_cast %26 : vector<8x16x4xbf16> to vector<1x8x16x4xbf16>
    tpu.vector_store %arg6[%c0_12, %c0_13, %c0_14, %c0_15], %29 {strides = array<i32>} : memref<1x8x16x4xbf16, #tpu.memory_space<vmem>>, vector<1x8x16x4xbf16>,
    return
  }
  func.func @transform_0(%arg0: i32, %arg1: i32) -> (i32, i32, i32, i32) {
    %c0_i32 = arith.constant 0 : i32
    %c0_i32_0 = arith.constant 0 : i32
    %c0_i32_1 = arith.constant 0 : i32
    return %arg0, %arg1, %c0_i32, %c0_i32_0 : i32, i32, i32, i32
  }
  func.func @transform_1(%arg0: i32, %arg1: i32) -> (i32, i32, i32, i32) {
    %c1_i32 = arith.constant 1 : i32
    %0 = arith.addi %arg1, %c1_i32 : i32
    %c4_i32 = arith.constant 4 : i32
    %1 = arith.muli %0, %c4_i32 : i32
    %c0_i32 = arith.constant 0 : i32
    %c0_i32_0 = arith.constant 0 : i32
    %c0_i32_1 = arith.constant 0 : i32
    return %arg0, %1, %c0_i32, %c0_i32_0 : i32, i32, i32, i32
  }
  func.func @transform_2(%arg0: i32, %arg1: i32) -> (i32, i32) {
    %c0_i32 = arith.constant 0 : i32
    %c0_i32_0 = arith.constant 0 : i32
    %c0_i32_1 = arith.constant 0 : i32
    return %c0_i32, %c0_i32_0 : i32, i32
  }
  func.func @transform_3(%arg0: i32, %arg1: i32) -> (i32, i32) {
    %c0_i32 = arith.constant 0 : i32
    %c0_i32_0 = arith.constant 0 : i32
    %c0_i32_1 = arith.constant 0 : i32
    return %c0_i32, %c0_i32_0 : i32, i32
  }
  func.func @transform_4(%arg0: i32, %arg1: i32) -> (i32, i32, i32, i32) {
    %c0_i32 = arith.constant 0 : i32
    %c0_i32_0 = arith.constant 0 : i32
    %c0_i32_1 = arith.constant 0 : i32
    return %arg0, %arg1, %c0_i32, %c0_i32_0 : i32, i32, i32, i32
  }
}

module attributes {stable_mosaic.version = 11 : i64} {
  func.func @kernel(%arg0: i32, %arg1: i32, %arg2: memref<1x8x18x4xbf16, #tpu.memory_space<vmem>>, %arg3: memref<1x2x18x4xbf16, #tpu.memory_space<vmem>>, %arg4: memref<36x8xbf16, #tpu.memory_space<vmem>>, %arg5: memref<1x8xf32, #tpu.memory_space<vmem>>, %arg6: memref<1x8x16x8xbf16, #tpu.memory_space<vmem>>) attributes {dimension_semantics = [#tpu.dimension_semantics<parallel>, #tpu.dimension_semantics<parallel>], iteration_bounds = array<i64: 2, 2>, scalar_prefetch = 0 : i64, scratch_operands = 0 : i64, tpu.core_type = #tpu.core_type<tc>, window_params = [{transform_indices = @transform_0, window_bounds = array<i64: 1, 8, 18, 4>}, {transform_indices = @transform_1, window_bounds = array<i64: 1, 2, 18, 4>}, {pipeline_mode = #tpu.pipeline_mode<synchronous>, transform_indices = @transform_2, window_bounds = array<i64: 36, 8>}, {pipeline_mode = #tpu.pipeline_mode<synchronous>, transform_indices = @transform_3, window_bounds = array<i64: 1, 8>}, {transform_indices = @transform_4, window_bounds = array<i64: 1, 8, 16, 8>}]} {
    %c0 = arith.constant 0 : index
    %c0_0 = arith.constant 0 : index
    %c0_1 = arith.constant 0 : index
    %c0_2 = arith.constant 0 : index
    %0 = vector.load %arg2[%c0, %c0_0, %c0_1, %c0_2] : memref<1x8x18x4xbf16, #tpu.memory_space<vmem>>, vector<1x8x18x4xbf16>
    %1 = vector.shape_cast %0 : vector<1x8x18x4xbf16> to vector<8x18x4xbf16>
    %c0_3 = arith.constant 0 : index
    %c0_4 = arith.constant 0 : index
    %c0_5 = arith.constant 0 : index
    %c0_6 = arith.constant 0 : index
    %2 = vector.load %arg3[%c0_3, %c0_4, %c0_5, %c0_6] : memref<1x2x18x4xbf16, #tpu.memory_space<vmem>>, vector<1x2x18x4xbf16>
    %3 = vector.shape_cast %2 : vector<1x2x18x4xbf16> to vector<2x18x4xbf16>
    %4 = tpu.concatenate %1, %3 in 0 : vector<8x18x4xbf16>, vector<2x18x4xbf16> -> vector<10x18x4xbf16>
    %5 = vector.extract_strided_slice %4 {offsets = [0, 0, 0], sizes = [8, 16, 4], strides = [1, 1, 1]} : vector<10x18x4xbf16> to vector<8x16x4xbf16>
    %6 = vector.extract_strided_slice %4 {offsets = [0, 1, 0], sizes = [8, 16, 4], strides = [1, 1, 1]} : vector<10x18x4xbf16> to vector<8x16x4xbf16>
    %7 = vector.extract_strided_slice %4 {offsets = [0, 2, 0], sizes = [8, 16, 4], strides = [1, 1, 1]} : vector<10x18x4xbf16> to vector<8x16x4xbf16>
    %8 = vector.extract_strided_slice %4 {offsets = [1, 0, 0], sizes = [8, 16, 4], strides = [1, 1, 1]} : vector<10x18x4xbf16> to vector<8x16x4xbf16>
    %9 = vector.extract_strided_slice %4 {offsets = [1, 1, 0], sizes = [8, 16, 4], strides = [1, 1, 1]} : vector<10x18x4xbf16> to vector<8x16x4xbf16>
    %10 = vector.extract_strided_slice %4 {offsets = [1, 2, 0], sizes = [8, 16, 4], strides = [1, 1, 1]} : vector<10x18x4xbf16> to vector<8x16x4xbf16>
    %11 = vector.extract_strided_slice %4 {offsets = [2, 0, 0], sizes = [8, 16, 4], strides = [1, 1, 1]} : vector<10x18x4xbf16> to vector<8x16x4xbf16>
    %12 = vector.extract_strided_slice %4 {offsets = [2, 1, 0], sizes = [8, 16, 4], strides = [1, 1, 1]} : vector<10x18x4xbf16> to vector<8x16x4xbf16>
    %13 = vector.extract_strided_slice %4 {offsets = [2, 2, 0], sizes = [8, 16, 4], strides = [1, 1, 1]} : vector<10x18x4xbf16> to vector<8x16x4xbf16>
    %14 = tpu.concatenate %5, %6, %7, %8, %9, %10, %11, %12, %13 in 2 : vector<8x16x4xbf16>, vector<8x16x4xbf16>, vector<8x16x4xbf16>, vector<8x16x4xbf16>, vector<8x16x4xbf16>, vector<8x16x4xbf16>, vector<8x16x4xbf16>, vector<8x16x4xbf16>, vector<8x16x4xbf16> -> vector<8x16x36xbf16>
    %15 = vector.shape_cast %14 : vector<8x16x36xbf16> to vector<128x36xbf16>
    %c0_7 = arith.constant 0 : index
    %c0_8 = arith.constant 0 : index
    %16 = vector.load %arg4[%c0_7, %c0_8] : memref<36x8xbf16, #tpu.memory_space<vmem>>, vector<36x8xbf16>
    %cst = arith.constant dense<0.000000e+00> : vector<128x8xf32>
    %17 = tpu.matmul %15, %16, %cst {dimension_numbers = #tpu.dot_dimension_numbers<[1], [0], [0], [1], [0, 0, 1, 1], [], []>} : vector<128x36xbf16>, vector<36x8xbf16>, vector<128x8xf32> -> vector<128x8xf32>
    %c0_9 = arith.constant 0 : index
    %c0_10 = arith.constant 0 : index
    %18 = vector.load %arg5[%c0_9, %c0_10] : memref<1x8xf32, #tpu.memory_space<vmem>>, vector<1x8xf32>
    %19 = vector.shape_cast %18 : vector<1x8xf32> to vector<8xf32>
    %20 = vector.shape_cast %19 : vector<8xf32> to vector<1x8xf32>
    %21 = vector.broadcast %20 : vector<1x8xf32> to vector<128x8xf32>
    %22 = arith.addf %17, %21 : vector<128x8xf32>
    %cst_11 = arith.constant 0.000000e+00 : f32
    %23 = vector.broadcast %cst_11 : f32 to vector<128x8xf32>
    %24 = arith.maximumf %22, %23 : vector<128x8xf32>
    %25 = vector.shape_cast %24 : vector<128x8xf32> to vector<8x16x8xf32>
    %26 = arith.truncf %25 : vector<8x16x8xf32> to vector<8x16x8xbf16>
    %c0_12 = arith.constant 0 : index
    %c0_13 = arith.constant 0 : index
    %c0_14 = arith.constant 0 : index
    %c0_15 = arith.constant 0 : index
    %27 = vector.load %arg6[%c0_12, %c0_13, %c0_14, %c0_15] : memref<1x8x16x8xbf16, #tpu.memory_space<vmem>>, vector<1x8x16x8xbf16>
    %28 = vector.shape_cast %27 : vector<1x8x16x8xbf16> to vector<8x16x8xbf16>
    %29 = vector.shape_cast %26 : vector<8x16x8xbf16> to vector<1x8x16x8xbf16>
    tpu.vector_store %arg6[%c0_12, %c0_13, %c0_14, %c0_15], %29 {strides = array<i32>} : memref<1x8x16x8xbf16, #tpu.memory_space<vmem>>, vector<1x8x16x8xbf16>,
    return
  }
  func.func @transform_0(%arg0: i32, %arg1: i32) -> (i32, i32, i32, i32) {
    %c0_i32 = arith.constant 0 : i32
    %c0_i32_0 = arith.constant 0 : i32
    %c0_i32_1 = arith.constant 0 : i32
    return %arg0, %arg1, %c0_i32, %c0_i32_0 : i32, i32, i32, i32
  }
  func.func @transform_1(%arg0: i32, %arg1: i32) -> (i32, i32, i32, i32) {
    %c1_i32 = arith.constant 1 : i32
    %0 = arith.addi %arg1, %c1_i32 : i32
    %c4_i32 = arith.constant 4 : i32
    %1 = arith.muli %0, %c4_i32 : i32
    %c0_i32 = arith.constant 0 : i32
    %c0_i32_0 = arith.constant 0 : i32
    %c0_i32_1 = arith.constant 0 : i32
    return %arg0, %1, %c0_i32, %c0_i32_0 : i32, i32, i32, i32
  }
  func.func @transform_2(%arg0: i32, %arg1: i32) -> (i32, i32) {
    %c0_i32 = arith.constant 0 : i32
    %c0_i32_0 = arith.constant 0 : i32
    %c0_i32_1 = arith.constant 0 : i32
    return %c0_i32, %c0_i32_0 : i32, i32
  }
  func.func @transform_3(%arg0: i32, %arg1: i32) -> (i32, i32) {
    %c0_i32 = arith.constant 0 : i32
    %c0_i32_0 = arith.constant 0 : i32
    %c0_i32_1 = arith.constant 0 : i32
    return %c0_i32, %c0_i32_0 : i32, i32
  }
  func.func @transform_4(%arg0: i32, %arg1: i32) -> (i32, i32, i32, i32) {
    %c0_i32 = arith.constant 0 : i32
    %c0_i32_0 = arith.constant 0 : i32
    %c0_i32_1 = arith.constant 0 : i32
    return %arg0, %arg1, %c0_i32, %c0_i32_0 : i32, i32, i32, i32
  }
}

module attributes {stable_mosaic.version = 11 : i64} {
  func.func @kernel(%arg0: i32, %arg1: i32, %arg2: memref<1x4x10x8xbf16, #tpu.memory_space<vmem>>, %arg3: memref<1x2x10x8xbf16, #tpu.memory_space<vmem>>, %arg4: memref<72x8xbf16, #tpu.memory_space<vmem>>, %arg5: memref<1x8xf32, #tpu.memory_space<vmem>>, %arg6: memref<1x4x8x8xbf16, #tpu.memory_space<vmem>>) attributes {dimension_semantics = [#tpu.dimension_semantics<parallel>, #tpu.dimension_semantics<parallel>], iteration_bounds = array<i64: 2, 2>, scalar_prefetch = 0 : i64, scratch_operands = 0 : i64, tpu.core_type = #tpu.core_type<tc>, window_params = [{transform_indices = @transform_0, window_bounds = array<i64: 1, 4, 10, 8>}, {transform_indices = @transform_1, window_bounds = array<i64: 1, 2, 10, 8>}, {pipeline_mode = #tpu.pipeline_mode<synchronous>, transform_indices = @transform_2, window_bounds = array<i64: 72, 8>}, {pipeline_mode = #tpu.pipeline_mode<synchronous>, transform_indices = @transform_3, window_bounds = array<i64: 1, 8>}, {transform_indices = @transform_4, window_bounds = array<i64: 1, 4, 8, 8>}]} {
    %c0 = arith.constant 0 : index
    %c0_0 = arith.constant 0 : index
    %c0_1 = arith.constant 0 : index
    %c0_2 = arith.constant 0 : index
    %0 = vector.load %arg2[%c0, %c0_0, %c0_1, %c0_2] : memref<1x4x10x8xbf16, #tpu.memory_space<vmem>>, vector<1x4x10x8xbf16>
    %1 = vector.shape_cast %0 : vector<1x4x10x8xbf16> to vector<4x10x8xbf16>
    %c0_3 = arith.constant 0 : index
    %c0_4 = arith.constant 0 : index
    %c0_5 = arith.constant 0 : index
    %c0_6 = arith.constant 0 : index
    %2 = vector.load %arg3[%c0_3, %c0_4, %c0_5, %c0_6] : memref<1x2x10x8xbf16, #tpu.memory_space<vmem>>, vector<1x2x10x8xbf16>
    %3 = vector.shape_cast %2 : vector<1x2x10x8xbf16> to vector<2x10x8xbf16>
    %4 = tpu.concatenate %1, %3 in 0 : vector<4x10x8xbf16>, vector<2x10x8xbf16> -> vector<6x10x8xbf16>
    %5 = vector.extract_strided_slice %4 {offsets = [0, 0, 0], sizes = [4, 8, 8], strides = [1, 1, 1]} : vector<6x10x8xbf16> to vector<4x8x8xbf16>
    %6 = vector.extract_strided_slice %4 {offsets = [0, 1, 0], sizes = [4, 8, 8], strides = [1, 1, 1]} : vector<6x10x8xbf16> to vector<4x8x8xbf16>
    %7 = vector.extract_strided_slice %4 {offsets = [0, 2, 0], sizes = [4, 8, 8], strides = [1, 1, 1]} : vector<6x10x8xbf16> to vector<4x8x8xbf16>
    %8 = vector.extract_strided_slice %4 {offsets = [1, 0, 0], sizes = [4, 8, 8], strides = [1, 1, 1]} : vector<6x10x8xbf16> to vector<4x8x8xbf16>
    %9 = vector.extract_strided_slice %4 {offsets = [1, 1, 0], sizes = [4, 8, 8], strides = [1, 1, 1]} : vector<6x10x8xbf16> to vector<4x8x8xbf16>
    %10 = vector.extract_strided_slice %4 {offsets = [1, 2, 0], sizes = [4, 8, 8], strides = [1, 1, 1]} : vector<6x10x8xbf16> to vector<4x8x8xbf16>
    %11 = vector.extract_strided_slice %4 {offsets = [2, 0, 0], sizes = [4, 8, 8], strides = [1, 1, 1]} : vector<6x10x8xbf16> to vector<4x8x8xbf16>
    %12 = vector.extract_strided_slice %4 {offsets = [2, 1, 0], sizes = [4, 8, 8], strides = [1, 1, 1]} : vector<6x10x8xbf16> to vector<4x8x8xbf16>
    %13 = vector.extract_strided_slice %4 {offsets = [2, 2, 0], sizes = [4, 8, 8], strides = [1, 1, 1]} : vector<6x10x8xbf16> to vector<4x8x8xbf16>
    %14 = tpu.concatenate %5, %6, %7, %8, %9, %10, %11, %12, %13 in 2 : vector<4x8x8xbf16>, vector<4x8x8xbf16>, vector<4x8x8xbf16>, vector<4x8x8xbf16>, vector<4x8x8xbf16>, vector<4x8x8xbf16>, vector<4x8x8xbf16>, vector<4x8x8xbf16>, vector<4x8x8xbf16> -> vector<4x8x72xbf16>
    %15 = vector.shape_cast %14 : vector<4x8x72xbf16> to vector<32x72xbf16>
    %c0_7 = arith.constant 0 : index
    %c0_8 = arith.constant 0 : index
    %16 = vector.load %arg4[%c0_7, %c0_8] : memref<72x8xbf16, #tpu.memory_space<vmem>>, vector<72x8xbf16>
    %cst = arith.constant dense<0.000000e+00> : vector<32x8xf32>
    %17 = tpu.matmul %15, %16, %cst {dimension_numbers = #tpu.dot_dimension_numbers<[1], [0], [0], [1], [0, 0, 1, 1], [], []>} : vector<32x72xbf16>, vector<72x8xbf16>, vector<32x8xf32> -> vector<32x8xf32>
    %c0_9 = arith.constant 0 : index
    %c0_10 = arith.constant 0 : index
    %18 = vector.load %arg5[%c0_9, %c0_10] : memref<1x8xf32, #tpu.memory_space<vmem>>, vector<1x8xf32>
    %19 = vector.shape_cast %18 : vector<1x8xf32> to vector<8xf32>
    %20 = vector.shape_cast %19 : vector<8xf32> to vector<1x8xf32>
    %21 = vector.broadcast %20 : vector<1x8xf32> to vector<32x8xf32>
    %22 = arith.addf %17, %21 : vector<32x8xf32>
    %cst_11 = arith.constant 0.000000e+00 : f32
    %23 = vector.broadcast %cst_11 : f32 to vector<32x8xf32>
    %24 = arith.maximumf %22, %23 : vector<32x8xf32>
    %25 = vector.shape_cast %24 : vector<32x8xf32> to vector<4x8x8xf32>
    %26 = arith.truncf %25 : vector<4x8x8xf32> to vector<4x8x8xbf16>
    %c0_12 = arith.constant 0 : index
    %c0_13 = arith.constant 0 : index
    %c0_14 = arith.constant 0 : index
    %c0_15 = arith.constant 0 : index
    %27 = vector.load %arg6[%c0_12, %c0_13, %c0_14, %c0_15] : memref<1x4x8x8xbf16, #tpu.memory_space<vmem>>, vector<1x4x8x8xbf16>
    %28 = vector.shape_cast %27 : vector<1x4x8x8xbf16> to vector<4x8x8xbf16>
    %29 = vector.shape_cast %26 : vector<4x8x8xbf16> to vector<1x4x8x8xbf16>
    tpu.vector_store %arg6[%c0_12, %c0_13, %c0_14, %c0_15], %29 {strides = array<i32>} : memref<1x4x8x8xbf16, #tpu.memory_space<vmem>>, vector<1x4x8x8xbf16>,
    return
  }
  func.func @transform_0(%arg0: i32, %arg1: i32) -> (i32, i32, i32, i32) {
    %c0_i32 = arith.constant 0 : i32
    %c0_i32_0 = arith.constant 0 : i32
    %c0_i32_1 = arith.constant 0 : i32
    return %arg0, %arg1, %c0_i32, %c0_i32_0 : i32, i32, i32, i32
  }
  func.func @transform_1(%arg0: i32, %arg1: i32) -> (i32, i32, i32, i32) {
    %c1_i32 = arith.constant 1 : i32
    %0 = arith.addi %arg1, %c1_i32 : i32
    %c2_i32 = arith.constant 2 : i32
    %1 = arith.muli %0, %c2_i32 : i32
    %c0_i32 = arith.constant 0 : i32
    %c0_i32_0 = arith.constant 0 : i32
    %c0_i32_1 = arith.constant 0 : i32
    return %arg0, %1, %c0_i32, %c0_i32_0 : i32, i32, i32, i32
  }
  func.func @transform_2(%arg0: i32, %arg1: i32) -> (i32, i32) {
    %c0_i32 = arith.constant 0 : i32
    %c0_i32_0 = arith.constant 0 : i32
    %c0_i32_1 = arith.constant 0 : i32
    return %c0_i32, %c0_i32_0 : i32, i32
  }
  func.func @transform_3(%arg0: i32, %arg1: i32) -> (i32, i32) {
    %c0_i32 = arith.constant 0 : i32
    %c0_i32_0 = arith.constant 0 : i32
    %c0_i32_1 = arith.constant 0 : i32
    return %c0_i32, %c0_i32_0 : i32, i32
  }
  func.func @transform_4(%arg0: i32, %arg1: i32) -> (i32, i32, i32, i32) {
    %c0_i32 = arith.constant 0 : i32
    %c0_i32_0 = arith.constant 0 : i32
    %c0_i32_1 = arith.constant 0 : i32
    return %arg0, %arg1, %c0_i32, %c0_i32_0 : i32, i32, i32, i32
  }
}

module attributes {stable_mosaic.version = 11 : i64} {
  func.func @kernel(%arg0: i32, %arg1: i32, %arg2: memref<1x4x8x8xbf16, #tpu.memory_space<vmem>>, %arg3: memref<1x4x8x8xbf16, #tpu.memory_space<vmem>>, %arg4: memref<72x8xbf16, #tpu.memory_space<vmem>>, %arg5: memref<1x8xf32, #tpu.memory_space<vmem>>, %arg6: memref<1x4x4x8xbf16, #tpu.memory_space<vmem>>) attributes {dimension_semantics = [#tpu.dimension_semantics<parallel>, #tpu.dimension_semantics<parallel>], iteration_bounds = array<i64: 2, 1>, scalar_prefetch = 0 : i64, scratch_operands = 0 : i64, tpu.core_type = #tpu.core_type<tc>, window_params = [{transform_indices = @transform_0, window_bounds = array<i64: 1, 4, 8, 8>}, {transform_indices = @transform_1, window_bounds = array<i64: 1, 4, 8, 8>}, {pipeline_mode = #tpu.pipeline_mode<synchronous>, transform_indices = @transform_2, window_bounds = array<i64: 72, 8>}, {pipeline_mode = #tpu.pipeline_mode<synchronous>, transform_indices = @transform_3, window_bounds = array<i64: 1, 8>}, {transform_indices = @transform_4, window_bounds = array<i64: 1, 4, 4, 8>}]} {
    %c0 = arith.constant 0 : index
    %c0_0 = arith.constant 0 : index
    %c0_1 = arith.constant 0 : index
    %c0_2 = arith.constant 0 : index
    %0 = vector.load %arg2[%c0, %c0_0, %c0_1, %c0_2] : memref<1x4x8x8xbf16, #tpu.memory_space<vmem>>, vector<1x4x8x8xbf16>
    %1 = vector.shape_cast %0 : vector<1x4x8x8xbf16> to vector<4x8x8xbf16>
    %c0_3 = arith.constant 0 : index
    %c0_4 = arith.constant 0 : index
    %c0_5 = arith.constant 0 : index
    %c0_6 = arith.constant 0 : index
    %2 = vector.load %arg3[%c0_3, %c0_4, %c0_5, %c0_6] : memref<1x4x8x8xbf16, #tpu.memory_space<vmem>>, vector<1x4x8x8xbf16>
    %3 = vector.shape_cast %2 : vector<1x4x8x8xbf16> to vector<4x8x8xbf16>
    %4 = tpu.concatenate %1, %3 in 0 : vector<4x8x8xbf16>, vector<4x8x8xbf16> -> vector<8x8x8xbf16>
    %5 = vector.extract_strided_slice %4 {offsets = [0, 0, 0], sizes = [4, 4, 8], strides = [1, 1, 1]} : vector<8x8x8xbf16> to vector<4x4x8xbf16>
    %6 = vector.extract_strided_slice %4 {offsets = [0, 2, 0], sizes = [4, 4, 8], strides = [1, 1, 1]} : vector<8x8x8xbf16> to vector<4x4x8xbf16>
    %7 = vector.extract_strided_slice %4 {offsets = [0, 4, 0], sizes = [4, 4, 8], strides = [1, 1, 1]} : vector<8x8x8xbf16> to vector<4x4x8xbf16>
    %8 = vector.extract_strided_slice %4 {offsets = [2, 0, 0], sizes = [4, 4, 8], strides = [1, 1, 1]} : vector<8x8x8xbf16> to vector<4x4x8xbf16>
    %9 = vector.extract_strided_slice %4 {offsets = [2, 2, 0], sizes = [4, 4, 8], strides = [1, 1, 1]} : vector<8x8x8xbf16> to vector<4x4x8xbf16>
    %10 = vector.extract_strided_slice %4 {offsets = [2, 4, 0], sizes = [4, 4, 8], strides = [1, 1, 1]} : vector<8x8x8xbf16> to vector<4x4x8xbf16>
    %11 = vector.extract_strided_slice %4 {offsets = [4, 0, 0], sizes = [4, 4, 8], strides = [1, 1, 1]} : vector<8x8x8xbf16> to vector<4x4x8xbf16>
    %12 = vector.extract_strided_slice %4 {offsets = [4, 2, 0], sizes = [4, 4, 8], strides = [1, 1, 1]} : vector<8x8x8xbf16> to vector<4x4x8xbf16>
    %13 = vector.extract_strided_slice %4 {offsets = [4, 4, 0], sizes = [4, 4, 8], strides = [1, 1, 1]} : vector<8x8x8xbf16> to vector<4x4x8xbf16>
    %14 = tpu.concatenate %5, %6, %7, %8, %9, %10, %11, %12, %13 in 2 : vector<4x4x8xbf16>, vector<4x4x8xbf16>, vector<4x4x8xbf16>, vector<4x4x8xbf16>, vector<4x4x8xbf16>, vector<4x4x8xbf16>, vector<4x4x8xbf16>, vector<4x4x8xbf16>, vector<4x4x8xbf16> -> vector<4x4x72xbf16>
    %15 = vector.shape_cast %14 : vector<4x4x72xbf16> to vector<16x72xbf16>
    %c0_7 = arith.constant 0 : index
    %c0_8 = arith.constant 0 : index
    %16 = vector.load %arg4[%c0_7, %c0_8] : memref<72x8xbf16, #tpu.memory_space<vmem>>, vector<72x8xbf16>
    %cst = arith.constant dense<0.000000e+00> : vector<16x8xf32>
    %17 = tpu.matmul %15, %16, %cst {dimension_numbers = #tpu.dot_dimension_numbers<[1], [0], [0], [1], [0, 0, 1, 1], [], []>} : vector<16x72xbf16>, vector<72x8xbf16>, vector<16x8xf32> -> vector<16x8xf32>
    %c0_9 = arith.constant 0 : index
    %c0_10 = arith.constant 0 : index
    %18 = vector.load %arg5[%c0_9, %c0_10] : memref<1x8xf32, #tpu.memory_space<vmem>>, vector<1x8xf32>
    %19 = vector.shape_cast %18 : vector<1x8xf32> to vector<8xf32>
    %20 = vector.shape_cast %19 : vector<8xf32> to vector<1x8xf32>
    %21 = vector.broadcast %20 : vector<1x8xf32> to vector<16x8xf32>
    %22 = arith.addf %17, %21 : vector<16x8xf32>
    %cst_11 = arith.constant 0.000000e+00 : f32
    %23 = vector.broadcast %cst_11 : f32 to vector<16x8xf32>
    %24 = arith.maximumf %22, %23 : vector<16x8xf32>
    %25 = vector.shape_cast %24 : vector<16x8xf32> to vector<4x4x8xf32>
    %26 = arith.truncf %25 : vector<4x4x8xf32> to vector<4x4x8xbf16>
    %c0_12 = arith.constant 0 : index
    %c0_13 = arith.constant 0 : index
    %c0_14 = arith.constant 0 : index
    %c0_15 = arith.constant 0 : index
    %27 = vector.load %arg6[%c0_12, %c0_13, %c0_14, %c0_15] : memref<1x4x4x8xbf16, #tpu.memory_space<vmem>>, vector<1x4x4x8xbf16>
    %28 = vector.shape_cast %27 : vector<1x4x4x8xbf16> to vector<4x4x8xbf16>
    %29 = vector.shape_cast %26 : vector<4x4x8xbf16> to vector<1x4x4x8xbf16>
    tpu.vector_store %arg6[%c0_12, %c0_13, %c0_14, %c0_15], %29 {strides = array<i32>} : memref<1x4x4x8xbf16, #tpu.memory_space<vmem>>, vector<1x4x4x8xbf16>,
    return
  }
  func.func @transform_0(%arg0: i32, %arg1: i32) -> (i32, i32, i32, i32) {
    %c0_i32 = arith.constant 0 : i32
    %c0_i32_0 = arith.constant 0 : i32
    %c0_i32_1 = arith.constant 0 : i32
    return %arg0, %arg1, %c0_i32, %c0_i32_0 : i32, i32, i32, i32
  }
  func.func @transform_1(%arg0: i32, %arg1: i32) -> (i32, i32, i32, i32) {
    %c1_i32 = arith.constant 1 : i32
    %0 = arith.addi %arg1, %c1_i32 : i32
    %c1_i32_0 = arith.constant 1 : i32
    %1 = arith.muli %0, %c1_i32_0 : i32
    %c0_i32 = arith.constant 0 : i32
    %c0_i32_1 = arith.constant 0 : i32
    %c0_i32_2 = arith.constant 0 : i32
    return %arg0, %1, %c0_i32, %c0_i32_1 : i32, i32, i32, i32
  }
  func.func @transform_2(%arg0: i32, %arg1: i32) -> (i32, i32) {
    %c0_i32 = arith.constant 0 : i32
    %c0_i32_0 = arith.constant 0 : i32
    %c0_i32_1 = arith.constant 0 : i32
    return %c0_i32, %c0_i32_0 : i32, i32
  }
  func.func @transform_3(%arg0: i32, %arg1: i32) -> (i32, i32) {
    %c0_i32 = arith.constant 0 : i32
    %c0_i32_0 = arith.constant 0 : i32
    %c0_i32_1 = arith.constant 0 : i32
    return %c0_i32, %c0_i32_0 : i32, i32
  }
  func.func @transform_4(%arg0: i32, %arg1: i32) -> (i32, i32, i32, i32) {
    %c0_i32 = arith.constant 0 : i32
    %c0_i32_0 = arith.constant 0 : i32
    %c0_i32_1 = arith.constant 0 : i32
    return %arg0, %arg1, %c0_i32, %c0_i32_0 : i32, i32, i32, i32
  }
}

module attributes {stable_mosaic.version = 11 : i64} {
  func.func @kernel(%arg0: i32, %arg1: i32, %arg2: memref<1x2x6x8xbf16, #tpu.memory_space<vmem>>, %arg3: memref<1x2x6x8xbf16, #tpu.memory_space<vmem>>, %arg4: memref<1x2x6x8xbf16, #tpu.memory_space<vmem>>, %arg5: memref<1x2x6x8xbf16, #tpu.memory_space<vmem>>, %arg6: memref<72x8xbf16, #tpu.memory_space<vmem>>, %arg7: memref<72x8xbf16, #tpu.memory_space<vmem>>, %arg8: memref<1x8xf32, #tpu.memory_space<vmem>>, %arg9: memref<1x2x4x8xbf16, #tpu.memory_space<vmem>>) attributes {dimension_semantics = [#tpu.dimension_semantics<parallel>, #tpu.dimension_semantics<parallel>], iteration_bounds = array<i64: 2, 2>, scalar_prefetch = 0 : i64, scratch_operands = 0 : i64, tpu.core_type = #tpu.core_type<tc>, window_params = [{transform_indices = @transform_0, window_bounds = array<i64: 1, 2, 6, 8>}, {transform_indices = @transform_1, window_bounds = array<i64: 1, 2, 6, 8>}, {transform_indices = @transform_2, window_bounds = array<i64: 1, 2, 6, 8>}, {transform_indices = @transform_3, window_bounds = array<i64: 1, 2, 6, 8>}, {pipeline_mode = #tpu.pipeline_mode<synchronous>, transform_indices = @transform_4, window_bounds = array<i64: 72, 8>}, {pipeline_mode = #tpu.pipeline_mode<synchronous>, transform_indices = @transform_5, window_bounds = array<i64: 72, 8>}, {pipeline_mode = #tpu.pipeline_mode<synchronous>, transform_indices = @transform_6, window_bounds = array<i64: 1, 8>}, {transform_indices = @transform_7, window_bounds = array<i64: 1, 2, 4, 8>}]} {
    %c0 = arith.constant 0 : index
    %c0_0 = arith.constant 0 : index
    %c0_1 = arith.constant 0 : index
    %c0_2 = arith.constant 0 : index
    %0 = vector.load %arg2[%c0, %c0_0, %c0_1, %c0_2] : memref<1x2x6x8xbf16, #tpu.memory_space<vmem>>, vector<1x2x6x8xbf16>
    %1 = vector.shape_cast %0 : vector<1x2x6x8xbf16> to vector<2x6x8xbf16>
    %c0_3 = arith.constant 0 : index
    %c0_4 = arith.constant 0 : index
    %c0_5 = arith.constant 0 : index
    %c0_6 = arith.constant 0 : index
    %2 = vector.load %arg3[%c0_3, %c0_4, %c0_5, %c0_6] : memref<1x2x6x8xbf16, #tpu.memory_space<vmem>>, vector<1x2x6x8xbf16>
    %3 = vector.shape_cast %2 : vector<1x2x6x8xbf16> to vector<2x6x8xbf16>
    %4 = tpu.concatenate %1, %3 in 0 : vector<2x6x8xbf16>, vector<2x6x8xbf16> -> vector<4x6x8xbf16>
    %5 = vector.extract_strided_slice %4 {offsets = [0, 0, 0], sizes = [2, 4, 8], strides = [1, 1, 1]} : vector<4x6x8xbf16> to vector<2x4x8xbf16>
    %6 = vector.extract_strided_slice %4 {offsets = [0, 1, 0], sizes = [2, 4, 8], strides = [1, 1, 1]} : vector<4x6x8xbf16> to vector<2x4x8xbf16>
    %7 = vector.extract_strided_slice %4 {offsets = [0, 2, 0], sizes = [2, 4, 8], strides = [1, 1, 1]} : vector<4x6x8xbf16> to vector<2x4x8xbf16>
    %8 = vector.extract_strided_slice %4 {offsets = [1, 0, 0], sizes = [2, 4, 8], strides = [1, 1, 1]} : vector<4x6x8xbf16> to vector<2x4x8xbf16>
    %9 = vector.extract_strided_slice %4 {offsets = [1, 1, 0], sizes = [2, 4, 8], strides = [1, 1, 1]} : vector<4x6x8xbf16> to vector<2x4x8xbf16>
    %10 = vector.extract_strided_slice %4 {offsets = [1, 2, 0], sizes = [2, 4, 8], strides = [1, 1, 1]} : vector<4x6x8xbf16> to vector<2x4x8xbf16>
    %11 = vector.extract_strided_slice %4 {offsets = [2, 0, 0], sizes = [2, 4, 8], strides = [1, 1, 1]} : vector<4x6x8xbf16> to vector<2x4x8xbf16>
    %12 = vector.extract_strided_slice %4 {offsets = [2, 1, 0], sizes = [2, 4, 8], strides = [1, 1, 1]} : vector<4x6x8xbf16> to vector<2x4x8xbf16>
    %13 = vector.extract_strided_slice %4 {offsets = [2, 2, 0], sizes = [2, 4, 8], strides = [1, 1, 1]} : vector<4x6x8xbf16> to vector<2x4x8xbf16>
    %14 = tpu.concatenate %5, %6, %7, %8, %9, %10, %11, %12, %13 in 2 : vector<2x4x8xbf16>, vector<2x4x8xbf16>, vector<2x4x8xbf16>, vector<2x4x8xbf16>, vector<2x4x8xbf16>, vector<2x4x8xbf16>, vector<2x4x8xbf16>, vector<2x4x8xbf16>, vector<2x4x8xbf16> -> vector<2x4x72xbf16>
    %15 = vector.shape_cast %14 : vector<2x4x72xbf16> to vector<8x72xbf16>
    %c0_7 = arith.constant 0 : index
    %c0_8 = arith.constant 0 : index
    %16 = vector.load %arg6[%c0_7, %c0_8] : memref<72x8xbf16, #tpu.memory_space<vmem>>, vector<72x8xbf16>
    %cst = arith.constant dense<0.000000e+00> : vector<8x8xf32>
    %17 = tpu.matmul %15, %16, %cst {dimension_numbers = #tpu.dot_dimension_numbers<[1], [0], [0], [1], [0, 0, 1, 1], [], []>} : vector<8x72xbf16>, vector<72x8xbf16>, vector<8x8xf32> -> vector<8x8xf32>
    %c0_9 = arith.constant 0 : index
    %c0_10 = arith.constant 0 : index
    %c0_11 = arith.constant 0 : index
    %c0_12 = arith.constant 0 : index
    %18 = vector.load %arg4[%c0_9, %c0_10, %c0_11, %c0_12] : memref<1x2x6x8xbf16, #tpu.memory_space<vmem>>, vector<1x2x6x8xbf16>
    %19 = vector.shape_cast %18 : vector<1x2x6x8xbf16> to vector<2x6x8xbf16>
    %c0_13 = arith.constant 0 : index
    %c0_14 = arith.constant 0 : index
    %c0_15 = arith.constant 0 : index
    %c0_16 = arith.constant 0 : index
    %20 = vector.load %arg5[%c0_13, %c0_14, %c0_15, %c0_16] : memref<1x2x6x8xbf16, #tpu.memory_space<vmem>>, vector<1x2x6x8xbf16>
    %21 = vector.shape_cast %20 : vector<1x2x6x8xbf16> to vector<2x6x8xbf16>
    %22 = tpu.concatenate %19, %21 in 0 : vector<2x6x8xbf16>, vector<2x6x8xbf16> -> vector<4x6x8xbf16>
    %23 = vector.extract_strided_slice %22 {offsets = [0, 0, 0], sizes = [2, 4, 8], strides = [1, 1, 1]} : vector<4x6x8xbf16> to vector<2x4x8xbf16>
    %24 = vector.extract_strided_slice %22 {offsets = [0, 1, 0], sizes = [2, 4, 8], strides = [1, 1, 1]} : vector<4x6x8xbf16> to vector<2x4x8xbf16>
    %25 = vector.extract_strided_slice %22 {offsets = [0, 2, 0], sizes = [2, 4, 8], strides = [1, 1, 1]} : vector<4x6x8xbf16> to vector<2x4x8xbf16>
    %26 = vector.extract_strided_slice %22 {offsets = [1, 0, 0], sizes = [2, 4, 8], strides = [1, 1, 1]} : vector<4x6x8xbf16> to vector<2x4x8xbf16>
    %27 = vector.extract_strided_slice %22 {offsets = [1, 1, 0], sizes = [2, 4, 8], strides = [1, 1, 1]} : vector<4x6x8xbf16> to vector<2x4x8xbf16>
    %28 = vector.extract_strided_slice %22 {offsets = [1, 2, 0], sizes = [2, 4, 8], strides = [1, 1, 1]} : vector<4x6x8xbf16> to vector<2x4x8xbf16>
    %29 = vector.extract_strided_slice %22 {offsets = [2, 0, 0], sizes = [2, 4, 8], strides = [1, 1, 1]} : vector<4x6x8xbf16> to vector<2x4x8xbf16>
    %30 = vector.extract_strided_slice %22 {offsets = [2, 1, 0], sizes = [2, 4, 8], strides = [1, 1, 1]} : vector<4x6x8xbf16> to vector<2x4x8xbf16>
    %31 = vector.extract_strided_slice %22 {offsets = [2, 2, 0], sizes = [2, 4, 8], strides = [1, 1, 1]} : vector<4x6x8xbf16> to vector<2x4x8xbf16>
    %32 = tpu.concatenate %23, %24, %25, %26, %27, %28, %29, %30, %31 in 2 : vector<2x4x8xbf16>, vector<2x4x8xbf16>, vector<2x4x8xbf16>, vector<2x4x8xbf16>, vector<2x4x8xbf16>, vector<2x4x8xbf16>, vector<2x4x8xbf16>, vector<2x4x8xbf16>, vector<2x4x8xbf16> -> vector<2x4x72xbf16>
    %33 = vector.shape_cast %32 : vector<2x4x72xbf16> to vector<8x72xbf16>
    %c0_17 = arith.constant 0 : index
    %c0_18 = arith.constant 0 : index
    %34 = vector.load %arg7[%c0_17, %c0_18] : memref<72x8xbf16, #tpu.memory_space<vmem>>, vector<72x8xbf16>
    %cst_19 = arith.constant dense<0.000000e+00> : vector<8x8xf32>
    %35 = tpu.matmul %33, %34, %cst_19 {dimension_numbers = #tpu.dot_dimension_numbers<[1], [0], [0], [1], [0, 0, 1, 1], [], []>} : vector<8x72xbf16>, vector<72x8xbf16>, vector<8x8xf32> -> vector<8x8xf32>
    %36 = arith.addf %17, %35 : vector<8x8xf32>
    %c0_20 = arith.constant 0 : index
    %c0_21 = arith.constant 0 : index
    %37 = vector.load %arg8[%c0_20, %c0_21] : memref<1x8xf32, #tpu.memory_space<vmem>>, vector<1x8xf32>
    %38 = vector.shape_cast %37 : vector<1x8xf32> to vector<8xf32>
    %39 = vector.shape_cast %38 : vector<8xf32> to vector<1x8xf32>
    %40 = vector.broadcast %39 : vector<1x8xf32> to vector<8x8xf32>
    %41 = arith.addf %36, %40 : vector<8x8xf32>
    %cst_22 = arith.constant 0.000000e+00 : f32
    %42 = vector.broadcast %cst_22 : f32 to vector<8x8xf32>
    %43 = arith.maximumf %41, %42 : vector<8x8xf32>
    %44 = vector.shape_cast %43 : vector<8x8xf32> to vector<2x4x8xf32>
    %45 = arith.truncf %44 : vector<2x4x8xf32> to vector<2x4x8xbf16>
    %c0_23 = arith.constant 0 : index
    %c0_24 = arith.constant 0 : index
    %c0_25 = arith.constant 0 : index
    %c0_26 = arith.constant 0 : index
    %46 = vector.load %arg9[%c0_23, %c0_24, %c0_25, %c0_26] : memref<1x2x4x8xbf16, #tpu.memory_space<vmem>>, vector<1x2x4x8xbf16>
    %47 = vector.shape_cast %46 : vector<1x2x4x8xbf16> to vector<2x4x8xbf16>
    %48 = vector.shape_cast %45 : vector<2x4x8xbf16> to vector<1x2x4x8xbf16>
    tpu.vector_store %arg9[%c0_23, %c0_24, %c0_25, %c0_26], %48 {strides = array<i32>} : memref<1x2x4x8xbf16, #tpu.memory_space<vmem>>, vector<1x2x4x8xbf16>,
    return
  }
  func.func @transform_0(%arg0: i32, %arg1: i32) -> (i32, i32, i32, i32) {
    %c0_i32 = arith.constant 0 : i32
    %c0_i32_0 = arith.constant 0 : i32
    %c0_i32_1 = arith.constant 0 : i32
    return %arg0, %arg1, %c0_i32, %c0_i32_0 : i32, i32, i32, i32
  }
  func.func @transform_1(%arg0: i32, %arg1: i32) -> (i32, i32, i32, i32) {
    %c1_i32 = arith.constant 1 : i32
    %0 = arith.addi %arg1, %c1_i32 : i32
    %c1_i32_0 = arith.constant 1 : i32
    %1 = arith.muli %0, %c1_i32_0 : i32
    %c0_i32 = arith.constant 0 : i32
    %c0_i32_1 = arith.constant 0 : i32
    %c0_i32_2 = arith.constant 0 : i32
    return %arg0, %1, %c0_i32, %c0_i32_1 : i32, i32, i32, i32
  }
  func.func @transform_2(%arg0: i32, %arg1: i32) -> (i32, i32, i32, i32) {
    %c0_i32 = arith.constant 0 : i32
    %c0_i32_0 = arith.constant 0 : i32
    %c0_i32_1 = arith.constant 0 : i32
    return %arg0, %arg1, %c0_i32, %c0_i32_0 : i32, i32, i32, i32
  }
  func.func @transform_3(%arg0: i32, %arg1: i32) -> (i32, i32, i32, i32) {
    %c1_i32 = arith.constant 1 : i32
    %0 = arith.addi %arg1, %c1_i32 : i32
    %c1_i32_0 = arith.constant 1 : i32
    %1 = arith.muli %0, %c1_i32_0 : i32
    %c0_i32 = arith.constant 0 : i32
    %c0_i32_1 = arith.constant 0 : i32
    %c0_i32_2 = arith.constant 0 : i32
    return %arg0, %1, %c0_i32, %c0_i32_1 : i32, i32, i32, i32
  }
  func.func @transform_4(%arg0: i32, %arg1: i32) -> (i32, i32) {
    %c0_i32 = arith.constant 0 : i32
    %c0_i32_0 = arith.constant 0 : i32
    %c0_i32_1 = arith.constant 0 : i32
    return %c0_i32, %c0_i32_0 : i32, i32
  }
  func.func @transform_5(%arg0: i32, %arg1: i32) -> (i32, i32) {
    %c0_i32 = arith.constant 0 : i32
    %c0_i32_0 = arith.constant 0 : i32
    %c0_i32_1 = arith.constant 0 : i32
    return %c0_i32, %c0_i32_0 : i32, i32
  }
  func.func @transform_6(%arg0: i32, %arg1: i32) -> (i32, i32) {
    %c0_i32 = arith.constant 0 : i32
    %c0_i32_0 = arith.constant 0 : i32
    %c0_i32_1 = arith.constant 0 : i32
    return %c0_i32, %c0_i32_0 : i32, i32
  }
  func.func @transform_7(%arg0: i32, %arg1: i32) -> (i32, i32, i32, i32) {
    %c0_i32 = arith.constant 0 : i32
    %c0_i32_0 = arith.constant 0 : i32
    %c0_i32_1 = arith.constant 0 : i32
    return %arg0, %arg1, %c0_i32, %c0_i32_0 : i32, i32, i32, i32
  }
}

module attributes {stable_mosaic.version = 11 : i64} {
  func.func @kernel(%arg0: i32, %arg1: i32, %arg2: memref<1x2x6x8xbf16, #tpu.memory_space<vmem>>, %arg3: memref<1x2x6x8xbf16, #tpu.memory_space<vmem>>, %arg4: memref<72x8xbf16, #tpu.memory_space<vmem>>, %arg5: memref<1x8xf32, #tpu.memory_space<vmem>>, %arg6: memref<1x2x4x8xbf16, #tpu.memory_space<vmem>>) attributes {dimension_semantics = [#tpu.dimension_semantics<parallel>, #tpu.dimension_semantics<parallel>], iteration_bounds = array<i64: 2, 2>, scalar_prefetch = 0 : i64, scratch_operands = 0 : i64, tpu.core_type = #tpu.core_type<tc>, window_params = [{transform_indices = @transform_0, window_bounds = array<i64: 1, 2, 6, 8>}, {transform_indices = @transform_1, window_bounds = array<i64: 1, 2, 6, 8>}, {pipeline_mode = #tpu.pipeline_mode<synchronous>, transform_indices = @transform_2, window_bounds = array<i64: 72, 8>}, {pipeline_mode = #tpu.pipeline_mode<synchronous>, transform_indices = @transform_3, window_bounds = array<i64: 1, 8>}, {transform_indices = @transform_4, window_bounds = array<i64: 1, 2, 4, 8>}]} {
    %c0 = arith.constant 0 : index
    %c0_0 = arith.constant 0 : index
    %c0_1 = arith.constant 0 : index
    %c0_2 = arith.constant 0 : index
    %0 = vector.load %arg2[%c0, %c0_0, %c0_1, %c0_2] : memref<1x2x6x8xbf16, #tpu.memory_space<vmem>>, vector<1x2x6x8xbf16>
    %1 = vector.shape_cast %0 : vector<1x2x6x8xbf16> to vector<2x6x8xbf16>
    %c0_3 = arith.constant 0 : index
    %c0_4 = arith.constant 0 : index
    %c0_5 = arith.constant 0 : index
    %c0_6 = arith.constant 0 : index
    %2 = vector.load %arg3[%c0_3, %c0_4, %c0_5, %c0_6] : memref<1x2x6x8xbf16, #tpu.memory_space<vmem>>, vector<1x2x6x8xbf16>
    %3 = vector.shape_cast %2 : vector<1x2x6x8xbf16> to vector<2x6x8xbf16>
    %4 = tpu.concatenate %1, %3 in 0 : vector<2x6x8xbf16>, vector<2x6x8xbf16> -> vector<4x6x8xbf16>
    %5 = vector.extract_strided_slice %4 {offsets = [0, 0, 0], sizes = [2, 4, 8], strides = [1, 1, 1]} : vector<4x6x8xbf16> to vector<2x4x8xbf16>
    %6 = vector.extract_strided_slice %4 {offsets = [0, 1, 0], sizes = [2, 4, 8], strides = [1, 1, 1]} : vector<4x6x8xbf16> to vector<2x4x8xbf16>
    %7 = vector.extract_strided_slice %4 {offsets = [0, 2, 0], sizes = [2, 4, 8], strides = [1, 1, 1]} : vector<4x6x8xbf16> to vector<2x4x8xbf16>
    %8 = vector.extract_strided_slice %4 {offsets = [1, 0, 0], sizes = [2, 4, 8], strides = [1, 1, 1]} : vector<4x6x8xbf16> to vector<2x4x8xbf16>
    %9 = vector.extract_strided_slice %4 {offsets = [1, 1, 0], sizes = [2, 4, 8], strides = [1, 1, 1]} : vector<4x6x8xbf16> to vector<2x4x8xbf16>
    %10 = vector.extract_strided_slice %4 {offsets = [1, 2, 0], sizes = [2, 4, 8], strides = [1, 1, 1]} : vector<4x6x8xbf16> to vector<2x4x8xbf16>
    %11 = vector.extract_strided_slice %4 {offsets = [2, 0, 0], sizes = [2, 4, 8], strides = [1, 1, 1]} : vector<4x6x8xbf16> to vector<2x4x8xbf16>
    %12 = vector.extract_strided_slice %4 {offsets = [2, 1, 0], sizes = [2, 4, 8], strides = [1, 1, 1]} : vector<4x6x8xbf16> to vector<2x4x8xbf16>
    %13 = vector.extract_strided_slice %4 {offsets = [2, 2, 0], sizes = [2, 4, 8], strides = [1, 1, 1]} : vector<4x6x8xbf16> to vector<2x4x8xbf16>
    %14 = tpu.concatenate %5, %6, %7, %8, %9, %10, %11, %12, %13 in 2 : vector<2x4x8xbf16>, vector<2x4x8xbf16>, vector<2x4x8xbf16>, vector<2x4x8xbf16>, vector<2x4x8xbf16>, vector<2x4x8xbf16>, vector<2x4x8xbf16>, vector<2x4x8xbf16>, vector<2x4x8xbf16> -> vector<2x4x72xbf16>
    %15 = vector.shape_cast %14 : vector<2x4x72xbf16> to vector<8x72xbf16>
    %c0_7 = arith.constant 0 : index
    %c0_8 = arith.constant 0 : index
    %16 = vector.load %arg4[%c0_7, %c0_8] : memref<72x8xbf16, #tpu.memory_space<vmem>>, vector<72x8xbf16>
    %cst = arith.constant dense<0.000000e+00> : vector<8x8xf32>
    %17 = tpu.matmul %15, %16, %cst {dimension_numbers = #tpu.dot_dimension_numbers<[1], [0], [0], [1], [0, 0, 1, 1], [], []>} : vector<8x72xbf16>, vector<72x8xbf16>, vector<8x8xf32> -> vector<8x8xf32>
    %c0_9 = arith.constant 0 : index
    %c0_10 = arith.constant 0 : index
    %18 = vector.load %arg5[%c0_9, %c0_10] : memref<1x8xf32, #tpu.memory_space<vmem>>, vector<1x8xf32>
    %19 = vector.shape_cast %18 : vector<1x8xf32> to vector<8xf32>
    %20 = vector.shape_cast %19 : vector<8xf32> to vector<1x8xf32>
    %21 = vector.broadcast %20 : vector<1x8xf32> to vector<8x8xf32>
    %22 = arith.addf %17, %21 : vector<8x8xf32>
    %cst_11 = arith.constant 0.000000e+00 : f32
    %23 = vector.broadcast %cst_11 : f32 to vector<8x8xf32>
    %24 = arith.maximumf %22, %23 : vector<8x8xf32>
    %25 = vector.shape_cast %24 : vector<8x8xf32> to vector<2x4x8xf32>
    %26 = arith.truncf %25 : vector<2x4x8xf32> to vector<2x4x8xbf16>
    %c0_12 = arith.constant 0 : index
    %c0_13 = arith.constant 0 : index
    %c0_14 = arith.constant 0 : index
    %c0_15 = arith.constant 0 : index
    %27 = vector.load %arg6[%c0_12, %c0_13, %c0_14, %c0_15] : memref<1x2x4x8xbf16, #tpu.memory_space<vmem>>, vector<1x2x4x8xbf16>
    %28 = vector.shape_cast %27 : vector<1x2x4x8xbf16> to vector<2x4x8xbf16>
    %29 = vector.shape_cast %26 : vector<2x4x8xbf16> to vector<1x2x4x8xbf16>
    tpu.vector_store %arg6[%c0_12, %c0_13, %c0_14, %c0_15], %29 {strides = array<i32>} : memref<1x2x4x8xbf16, #tpu.memory_space<vmem>>, vector<1x2x4x8xbf16>,
    return
  }
  func.func @transform_0(%arg0: i32, %arg1: i32) -> (i32, i32, i32, i32) {
    %c0_i32 = arith.constant 0 : i32
    %c0_i32_0 = arith.constant 0 : i32
    %c0_i32_1 = arith.constant 0 : i32
    return %arg0, %arg1, %c0_i32, %c0_i32_0 : i32, i32, i32, i32
  }
  func.func @transform_1(%arg0: i32, %arg1: i32) -> (i32, i32, i32, i32) {
    %c1_i32 = arith.constant 1 : i32
    %0 = arith.addi %arg1, %c1_i32 : i32
    %c1_i32_0 = arith.constant 1 : i32
    %1 = arith.muli %0, %c1_i32_0 : i32
    %c0_i32 = arith.constant 0 : i32
    %c0_i32_1 = arith.constant 0 : i32
    %c0_i32_2 = arith.constant 0 : i32
    return %arg0, %1, %c0_i32, %c0_i32_1 : i32, i32, i32, i32
  }
  func.func @transform_2(%arg0: i32, %arg1: i32) -> (i32, i32) {
    %c0_i32 = arith.constant 0 : i32
    %c0_i32_0 = arith.constant 0 : i32
    %c0_i32_1 = arith.constant 0 : i32
    return %c0_i32, %c0_i32_0 : i32, i32
  }
  func.func @transform_3(%arg0: i32, %arg1: i32) -> (i32, i32) {
    %c0_i32 = arith.constant 0 : i32
    %c0_i32_0 = arith.constant 0 : i32
    %c0_i32_1 = arith.constant 0 : i32
    return %c0_i32, %c0_i32_0 : i32, i32
  }
  func.func @transform_4(%arg0: i32, %arg1: i32) -> (i32, i32, i32, i32) {
    %c0_i32 = arith.constant 0 : i32
    %c0_i32_0 = arith.constant 0 : i32
    %c0_i32_1 = arith.constant 0 : i32
    return %arg0, %arg1, %c0_i32, %c0_i32_0 : i32, i32, i32, i32
  }
}

module attributes {stable_mosaic.version = 11 : i64} {
  func.func @kernel(%arg0: i32, %arg1: i32, %arg2: memref<1x4x10x8xbf16, #tpu.memory_space<vmem>>, %arg3: memref<1x2x10x8xbf16, #tpu.memory_space<vmem>>, %arg4: memref<1x4x10x8xbf16, #tpu.memory_space<vmem>>, %arg5: memref<1x2x10x8xbf16, #tpu.memory_space<vmem>>, %arg6: memref<72x8xbf16, #tpu.memory_space<vmem>>, %arg7: memref<72x8xbf16, #tpu.memory_space<vmem>>, %arg8: memref<1x8xf32, #tpu.memory_space<vmem>>, %arg9: memref<1x4x8x8xbf16, #tpu.memory_space<vmem>>) attributes {dimension_semantics = [#tpu.dimension_semantics<parallel>, #tpu.dimension_semantics<parallel>], iteration_bounds = array<i64: 2, 2>, scalar_prefetch = 0 : i64, scratch_operands = 0 : i64, tpu.core_type = #tpu.core_type<tc>, window_params = [{transform_indices = @transform_0, window_bounds = array<i64: 1, 4, 10, 8>}, {transform_indices = @transform_1, window_bounds = array<i64: 1, 2, 10, 8>}, {transform_indices = @transform_2, window_bounds = array<i64: 1, 4, 10, 8>}, {transform_indices = @transform_3, window_bounds = array<i64: 1, 2, 10, 8>}, {pipeline_mode = #tpu.pipeline_mode<synchronous>, transform_indices = @transform_4, window_bounds = array<i64: 72, 8>}, {pipeline_mode = #tpu.pipeline_mode<synchronous>, transform_indices = @transform_5, window_bounds = array<i64: 72, 8>}, {pipeline_mode = #tpu.pipeline_mode<synchronous>, transform_indices = @transform_6, window_bounds = array<i64: 1, 8>}, {transform_indices = @transform_7, window_bounds = array<i64: 1, 4, 8, 8>}]} {
    %c0 = arith.constant 0 : index
    %c0_0 = arith.constant 0 : index
    %c0_1 = arith.constant 0 : index
    %c0_2 = arith.constant 0 : index
    %0 = vector.load %arg2[%c0, %c0_0, %c0_1, %c0_2] : memref<1x4x10x8xbf16, #tpu.memory_space<vmem>>, vector<1x4x10x8xbf16>
    %1 = vector.shape_cast %0 : vector<1x4x10x8xbf16> to vector<4x10x8xbf16>
    %c0_3 = arith.constant 0 : index
    %c0_4 = arith.constant 0 : index
    %c0_5 = arith.constant 0 : index
    %c0_6 = arith.constant 0 : index
    %2 = vector.load %arg3[%c0_3, %c0_4, %c0_5, %c0_6] : memref<1x2x10x8xbf16, #tpu.memory_space<vmem>>, vector<1x2x10x8xbf16>
    %3 = vector.shape_cast %2 : vector<1x2x10x8xbf16> to vector<2x10x8xbf16>
    %4 = tpu.concatenate %1, %3 in 0 : vector<4x10x8xbf16>, vector<2x10x8xbf16> -> vector<6x10x8xbf16>
    %5 = vector.extract_strided_slice %4 {offsets = [0, 0, 0], sizes = [4, 8, 8], strides = [1, 1, 1]} : vector<6x10x8xbf16> to vector<4x8x8xbf16>
    %6 = vector.extract_strided_slice %4 {offsets = [0, 1, 0], sizes = [4, 8, 8], strides = [1, 1, 1]} : vector<6x10x8xbf16> to vector<4x8x8xbf16>
    %7 = vector.extract_strided_slice %4 {offsets = [0, 2, 0], sizes = [4, 8, 8], strides = [1, 1, 1]} : vector<6x10x8xbf16> to vector<4x8x8xbf16>
    %8 = vector.extract_strided_slice %4 {offsets = [1, 0, 0], sizes = [4, 8, 8], strides = [1, 1, 1]} : vector<6x10x8xbf16> to vector<4x8x8xbf16>
    %9 = vector.extract_strided_slice %4 {offsets = [1, 1, 0], sizes = [4, 8, 8], strides = [1, 1, 1]} : vector<6x10x8xbf16> to vector<4x8x8xbf16>
    %10 = vector.extract_strided_slice %4 {offsets = [1, 2, 0], sizes = [4, 8, 8], strides = [1, 1, 1]} : vector<6x10x8xbf16> to vector<4x8x8xbf16>
    %11 = vector.extract_strided_slice %4 {offsets = [2, 0, 0], sizes = [4, 8, 8], strides = [1, 1, 1]} : vector<6x10x8xbf16> to vector<4x8x8xbf16>
    %12 = vector.extract_strided_slice %4 {offsets = [2, 1, 0], sizes = [4, 8, 8], strides = [1, 1, 1]} : vector<6x10x8xbf16> to vector<4x8x8xbf16>
    %13 = vector.extract_strided_slice %4 {offsets = [2, 2, 0], sizes = [4, 8, 8], strides = [1, 1, 1]} : vector<6x10x8xbf16> to vector<4x8x8xbf16>
    %14 = tpu.concatenate %5, %6, %7, %8, %9, %10, %11, %12, %13 in 2 : vector<4x8x8xbf16>, vector<4x8x8xbf16>, vector<4x8x8xbf16>, vector<4x8x8xbf16>, vector<4x8x8xbf16>, vector<4x8x8xbf16>, vector<4x8x8xbf16>, vector<4x8x8xbf16>, vector<4x8x8xbf16> -> vector<4x8x72xbf16>
    %15 = vector.shape_cast %14 : vector<4x8x72xbf16> to vector<32x72xbf16>
    %c0_7 = arith.constant 0 : index
    %c0_8 = arith.constant 0 : index
    %16 = vector.load %arg6[%c0_7, %c0_8] : memref<72x8xbf16, #tpu.memory_space<vmem>>, vector<72x8xbf16>
    %cst = arith.constant dense<0.000000e+00> : vector<32x8xf32>
    %17 = tpu.matmul %15, %16, %cst {dimension_numbers = #tpu.dot_dimension_numbers<[1], [0], [0], [1], [0, 0, 1, 1], [], []>} : vector<32x72xbf16>, vector<72x8xbf16>, vector<32x8xf32> -> vector<32x8xf32>
    %c0_9 = arith.constant 0 : index
    %c0_10 = arith.constant 0 : index
    %c0_11 = arith.constant 0 : index
    %c0_12 = arith.constant 0 : index
    %18 = vector.load %arg4[%c0_9, %c0_10, %c0_11, %c0_12] : memref<1x4x10x8xbf16, #tpu.memory_space<vmem>>, vector<1x4x10x8xbf16>
    %19 = vector.shape_cast %18 : vector<1x4x10x8xbf16> to vector<4x10x8xbf16>
    %c0_13 = arith.constant 0 : index
    %c0_14 = arith.constant 0 : index
    %c0_15 = arith.constant 0 : index
    %c0_16 = arith.constant 0 : index
    %20 = vector.load %arg5[%c0_13, %c0_14, %c0_15, %c0_16] : memref<1x2x10x8xbf16, #tpu.memory_space<vmem>>, vector<1x2x10x8xbf16>
    %21 = vector.shape_cast %20 : vector<1x2x10x8xbf16> to vector<2x10x8xbf16>
    %22 = tpu.concatenate %19, %21 in 0 : vector<4x10x8xbf16>, vector<2x10x8xbf16> -> vector<6x10x8xbf16>
    %23 = vector.extract_strided_slice %22 {offsets = [0, 0, 0], sizes = [4, 8, 8], strides = [1, 1, 1]} : vector<6x10x8xbf16> to vector<4x8x8xbf16>
    %24 = vector.extract_strided_slice %22 {offsets = [0, 1, 0], sizes = [4, 8, 8], strides = [1, 1, 1]} : vector<6x10x8xbf16> to vector<4x8x8xbf16>
    %25 = vector.extract_strided_slice %22 {offsets = [0, 2, 0], sizes = [4, 8, 8], strides = [1, 1, 1]} : vector<6x10x8xbf16> to vector<4x8x8xbf16>
    %26 = vector.extract_strided_slice %22 {offsets = [1, 0, 0], sizes = [4, 8, 8], strides = [1, 1, 1]} : vector<6x10x8xbf16> to vector<4x8x8xbf16>
    %27 = vector.extract_strided_slice %22 {offsets = [1, 1, 0], sizes = [4, 8, 8], strides = [1, 1, 1]} : vector<6x10x8xbf16> to vector<4x8x8xbf16>
    %28 = vector.extract_strided_slice %22 {offsets = [1, 2, 0], sizes = [4, 8, 8], strides = [1, 1, 1]} : vector<6x10x8xbf16> to vector<4x8x8xbf16>
    %29 = vector.extract_strided_slice %22 {offsets = [2, 0, 0], sizes = [4, 8, 8], strides = [1, 1, 1]} : vector<6x10x8xbf16> to vector<4x8x8xbf16>
    %30 = vector.extract_strided_slice %22 {offsets = [2, 1, 0], sizes = [4, 8, 8], strides = [1, 1, 1]} : vector<6x10x8xbf16> to vector<4x8x8xbf16>
    %31 = vector.extract_strided_slice %22 {offsets = [2, 2, 0], sizes = [4, 8, 8], strides = [1, 1, 1]} : vector<6x10x8xbf16> to vector<4x8x8xbf16>
    %32 = tpu.concatenate %23, %24, %25, %26, %27, %28, %29, %30, %31 in 2 : vector<4x8x8xbf16>, vector<4x8x8xbf16>, vector<4x8x8xbf16>, vector<4x8x8xbf16>, vector<4x8x8xbf16>, vector<4x8x8xbf16>, vector<4x8x8xbf16>, vector<4x8x8xbf16>, vector<4x8x8xbf16> -> vector<4x8x72xbf16>
    %33 = vector.shape_cast %32 : vector<4x8x72xbf16> to vector<32x72xbf16>
    %c0_17 = arith.constant 0 : index
    %c0_18 = arith.constant 0 : index
    %34 = vector.load %arg7[%c0_17, %c0_18] : memref<72x8xbf16, #tpu.memory_space<vmem>>, vector<72x8xbf16>
    %cst_19 = arith.constant dense<0.000000e+00> : vector<32x8xf32>
    %35 = tpu.matmul %33, %34, %cst_19 {dimension_numbers = #tpu.dot_dimension_numbers<[1], [0], [0], [1], [0, 0, 1, 1], [], []>} : vector<32x72xbf16>, vector<72x8xbf16>, vector<32x8xf32> -> vector<32x8xf32>
    %36 = arith.addf %17, %35 : vector<32x8xf32>
    %c0_20 = arith.constant 0 : index
    %c0_21 = arith.constant 0 : index
    %37 = vector.load %arg8[%c0_20, %c0_21] : memref<1x8xf32, #tpu.memory_space<vmem>>, vector<1x8xf32>
    %38 = vector.shape_cast %37 : vector<1x8xf32> to vector<8xf32>
    %39 = vector.shape_cast %38 : vector<8xf32> to vector<1x8xf32>
    %40 = vector.broadcast %39 : vector<1x8xf32> to vector<32x8xf32>
    %41 = arith.addf %36, %40 : vector<32x8xf32>
    %cst_22 = arith.constant 0.000000e+00 : f32
    %42 = vector.broadcast %cst_22 : f32 to vector<32x8xf32>
    %43 = arith.maximumf %41, %42 : vector<32x8xf32>
    %44 = vector.shape_cast %43 : vector<32x8xf32> to vector<4x8x8xf32>
    %45 = arith.truncf %44 : vector<4x8x8xf32> to vector<4x8x8xbf16>
    %c0_23 = arith.constant 0 : index
    %c0_24 = arith.constant 0 : index
    %c0_25 = arith.constant 0 : index
    %c0_26 = arith.constant 0 : index
    %46 = vector.load %arg9[%c0_23, %c0_24, %c0_25, %c0_26] : memref<1x4x8x8xbf16, #tpu.memory_space<vmem>>, vector<1x4x8x8xbf16>
    %47 = vector.shape_cast %46 : vector<1x4x8x8xbf16> to vector<4x8x8xbf16>
    %48 = vector.shape_cast %45 : vector<4x8x8xbf16> to vector<1x4x8x8xbf16>
    tpu.vector_store %arg9[%c0_23, %c0_24, %c0_25, %c0_26], %48 {strides = array<i32>} : memref<1x4x8x8xbf16, #tpu.memory_space<vmem>>, vector<1x4x8x8xbf16>,
    return
  }
  func.func @transform_0(%arg0: i32, %arg1: i32) -> (i32, i32, i32, i32) {
    %c0_i32 = arith.constant 0 : i32
    %c0_i32_0 = arith.constant 0 : i32
    %c0_i32_1 = arith.constant 0 : i32
    return %arg0, %arg1, %c0_i32, %c0_i32_0 : i32, i32, i32, i32
  }
  func.func @transform_1(%arg0: i32, %arg1: i32) -> (i32, i32, i32, i32) {
    %c1_i32 = arith.constant 1 : i32
    %0 = arith.addi %arg1, %c1_i32 : i32
    %c2_i32 = arith.constant 2 : i32
    %1 = arith.muli %0, %c2_i32 : i32
    %c0_i32 = arith.constant 0 : i32
    %c0_i32_0 = arith.constant 0 : i32
    %c0_i32_1 = arith.constant 0 : i32
    return %arg0, %1, %c0_i32, %c0_i32_0 : i32, i32, i32, i32
  }
  func.func @transform_2(%arg0: i32, %arg1: i32) -> (i32, i32, i32, i32) {
    %c0_i32 = arith.constant 0 : i32
    %c0_i32_0 = arith.constant 0 : i32
    %c0_i32_1 = arith.constant 0 : i32
    return %arg0, %arg1, %c0_i32, %c0_i32_0 : i32, i32, i32, i32
  }
  func.func @transform_3(%arg0: i32, %arg1: i32) -> (i32, i32, i32, i32) {
    %c1_i32 = arith.constant 1 : i32
    %0 = arith.addi %arg1, %c1_i32 : i32
    %c2_i32 = arith.constant 2 : i32
    %1 = arith.muli %0, %c2_i32 : i32
    %c0_i32 = arith.constant 0 : i32
    %c0_i32_0 = arith.constant 0 : i32
    %c0_i32_1 = arith.constant 0 : i32
    return %arg0, %1, %c0_i32, %c0_i32_0 : i32, i32, i32, i32
  }
  func.func @transform_4(%arg0: i32, %arg1: i32) -> (i32, i32) {
    %c0_i32 = arith.constant 0 : i32
    %c0_i32_0 = arith.constant 0 : i32
    %c0_i32_1 = arith.constant 0 : i32
    return %c0_i32, %c0_i32_0 : i32, i32
  }
  func.func @transform_5(%arg0: i32, %arg1: i32) -> (i32, i32) {
    %c0_i32 = arith.constant 0 : i32
    %c0_i32_0 = arith.constant 0 : i32
    %c0_i32_1 = arith.constant 0 : i32
    return %c0_i32, %c0_i32_0 : i32, i32
  }
  func.func @transform_6(%arg0: i32, %arg1: i32) -> (i32, i32) {
    %c0_i32 = arith.constant 0 : i32
    %c0_i32_0 = arith.constant 0 : i32
    %c0_i32_1 = arith.constant 0 : i32
    return %c0_i32, %c0_i32_0 : i32, i32
  }
  func.func @transform_7(%arg0: i32, %arg1: i32) -> (i32, i32, i32, i32) {
    %c0_i32 = arith.constant 0 : i32
    %c0_i32_0 = arith.constant 0 : i32
    %c0_i32_1 = arith.constant 0 : i32
    return %arg0, %arg1, %c0_i32, %c0_i32_0 : i32, i32, i32, i32
  }
}

module attributes {stable_mosaic.version = 11 : i64} {
  func.func @kernel(%arg0: i32, %arg1: i32, %arg2: memref<1x8x18x8xbf16, #tpu.memory_space<vmem>>, %arg3: memref<1x2x18x8xbf16, #tpu.memory_space<vmem>>, %arg4: memref<1x8x18x8xbf16, #tpu.memory_space<vmem>>, %arg5: memref<1x2x18x8xbf16, #tpu.memory_space<vmem>>, %arg6: memref<72x4xbf16, #tpu.memory_space<vmem>>, %arg7: memref<72x4xbf16, #tpu.memory_space<vmem>>, %arg8: memref<1x4xf32, #tpu.memory_space<vmem>>, %arg9: memref<1x8x16x4xbf16, #tpu.memory_space<vmem>>, %arg10: memref<1x8x16x4xbf16, #tpu.memory_space<vmem>>) attributes {dimension_semantics = [#tpu.dimension_semantics<parallel>, #tpu.dimension_semantics<parallel>], iteration_bounds = array<i64: 2, 2>, scalar_prefetch = 0 : i64, scratch_operands = 0 : i64, tpu.core_type = #tpu.core_type<tc>, window_params = [{transform_indices = @transform_0, window_bounds = array<i64: 1, 8, 18, 8>}, {transform_indices = @transform_1, window_bounds = array<i64: 1, 2, 18, 8>}, {transform_indices = @transform_2, window_bounds = array<i64: 1, 8, 18, 8>}, {transform_indices = @transform_3, window_bounds = array<i64: 1, 2, 18, 8>}, {pipeline_mode = #tpu.pipeline_mode<synchronous>, transform_indices = @transform_4, window_bounds = array<i64: 72, 4>}, {pipeline_mode = #tpu.pipeline_mode<synchronous>, transform_indices = @transform_5, window_bounds = array<i64: 72, 4>}, {pipeline_mode = #tpu.pipeline_mode<synchronous>, transform_indices = @transform_6, window_bounds = array<i64: 1, 4>}, {transform_indices = @transform_7, window_bounds = array<i64: 1, 8, 16, 4>}, {transform_indices = @transform_8, window_bounds = array<i64: 1, 8, 16, 4>}]} {
    %c0 = arith.constant 0 : index
    %c0_0 = arith.constant 0 : index
    %c0_1 = arith.constant 0 : index
    %c0_2 = arith.constant 0 : index
    %0 = vector.load %arg2[%c0, %c0_0, %c0_1, %c0_2] : memref<1x8x18x8xbf16, #tpu.memory_space<vmem>>, vector<1x8x18x8xbf16>
    %1 = vector.shape_cast %0 : vector<1x8x18x8xbf16> to vector<8x18x8xbf16>
    %c0_3 = arith.constant 0 : index
    %c0_4 = arith.constant 0 : index
    %c0_5 = arith.constant 0 : index
    %c0_6 = arith.constant 0 : index
    %2 = vector.load %arg3[%c0_3, %c0_4, %c0_5, %c0_6] : memref<1x2x18x8xbf16, #tpu.memory_space<vmem>>, vector<1x2x18x8xbf16>
    %3 = vector.shape_cast %2 : vector<1x2x18x8xbf16> to vector<2x18x8xbf16>
    %4 = tpu.concatenate %1, %3 in 0 : vector<8x18x8xbf16>, vector<2x18x8xbf16> -> vector<10x18x8xbf16>
    %5 = vector.extract_strided_slice %4 {offsets = [0, 0, 0], sizes = [8, 16, 8], strides = [1, 1, 1]} : vector<10x18x8xbf16> to vector<8x16x8xbf16>
    %6 = vector.extract_strided_slice %4 {offsets = [0, 1, 0], sizes = [8, 16, 8], strides = [1, 1, 1]} : vector<10x18x8xbf16> to vector<8x16x8xbf16>
    %7 = vector.extract_strided_slice %4 {offsets = [0, 2, 0], sizes = [8, 16, 8], strides = [1, 1, 1]} : vector<10x18x8xbf16> to vector<8x16x8xbf16>
    %8 = vector.extract_strided_slice %4 {offsets = [1, 0, 0], sizes = [8, 16, 8], strides = [1, 1, 1]} : vector<10x18x8xbf16> to vector<8x16x8xbf16>
    %9 = vector.extract_strided_slice %4 {offsets = [1, 1, 0], sizes = [8, 16, 8], strides = [1, 1, 1]} : vector<10x18x8xbf16> to vector<8x16x8xbf16>
    %10 = vector.extract_strided_slice %4 {offsets = [1, 2, 0], sizes = [8, 16, 8], strides = [1, 1, 1]} : vector<10x18x8xbf16> to vector<8x16x8xbf16>
    %11 = vector.extract_strided_slice %4 {offsets = [2, 0, 0], sizes = [8, 16, 8], strides = [1, 1, 1]} : vector<10x18x8xbf16> to vector<8x16x8xbf16>
    %12 = vector.extract_strided_slice %4 {offsets = [2, 1, 0], sizes = [8, 16, 8], strides = [1, 1, 1]} : vector<10x18x8xbf16> to vector<8x16x8xbf16>
    %13 = vector.extract_strided_slice %4 {offsets = [2, 2, 0], sizes = [8, 16, 8], strides = [1, 1, 1]} : vector<10x18x8xbf16> to vector<8x16x8xbf16>
    %14 = tpu.concatenate %5, %6, %7, %8, %9, %10, %11, %12, %13 in 2 : vector<8x16x8xbf16>, vector<8x16x8xbf16>, vector<8x16x8xbf16>, vector<8x16x8xbf16>, vector<8x16x8xbf16>, vector<8x16x8xbf16>, vector<8x16x8xbf16>, vector<8x16x8xbf16>, vector<8x16x8xbf16> -> vector<8x16x72xbf16>
    %15 = vector.shape_cast %14 : vector<8x16x72xbf16> to vector<128x72xbf16>
    %c0_7 = arith.constant 0 : index
    %c0_8 = arith.constant 0 : index
    %16 = vector.load %arg6[%c0_7, %c0_8] : memref<72x4xbf16, #tpu.memory_space<vmem>>, vector<72x4xbf16>
    %cst = arith.constant dense<0.000000e+00> : vector<128x4xf32>
    %17 = tpu.matmul %15, %16, %cst {dimension_numbers = #tpu.dot_dimension_numbers<[1], [0], [0], [1], [0, 0, 1, 1], [], []>} : vector<128x72xbf16>, vector<72x4xbf16>, vector<128x4xf32> -> vector<128x4xf32>
    %c0_9 = arith.constant 0 : index
    %c0_10 = arith.constant 0 : index
    %c0_11 = arith.constant 0 : index
    %c0_12 = arith.constant 0 : index
    %18 = vector.load %arg4[%c0_9, %c0_10, %c0_11, %c0_12] : memref<1x8x18x8xbf16, #tpu.memory_space<vmem>>, vector<1x8x18x8xbf16>
    %19 = vector.shape_cast %18 : vector<1x8x18x8xbf16> to vector<8x18x8xbf16>
    %c0_13 = arith.constant 0 : index
    %c0_14 = arith.constant 0 : index
    %c0_15 = arith.constant 0 : index
    %c0_16 = arith.constant 0 : index
    %20 = vector.load %arg5[%c0_13, %c0_14, %c0_15, %c0_16] : memref<1x2x18x8xbf16, #tpu.memory_space<vmem>>, vector<1x2x18x8xbf16>
    %21 = vector.shape_cast %20 : vector<1x2x18x8xbf16> to vector<2x18x8xbf16>
    %22 = tpu.concatenate %19, %21 in 0 : vector<8x18x8xbf16>, vector<2x18x8xbf16> -> vector<10x18x8xbf16>
    %23 = vector.extract_strided_slice %22 {offsets = [0, 0, 0], sizes = [8, 16, 8], strides = [1, 1, 1]} : vector<10x18x8xbf16> to vector<8x16x8xbf16>
    %24 = vector.extract_strided_slice %22 {offsets = [0, 1, 0], sizes = [8, 16, 8], strides = [1, 1, 1]} : vector<10x18x8xbf16> to vector<8x16x8xbf16>
    %25 = vector.extract_strided_slice %22 {offsets = [0, 2, 0], sizes = [8, 16, 8], strides = [1, 1, 1]} : vector<10x18x8xbf16> to vector<8x16x8xbf16>
    %26 = vector.extract_strided_slice %22 {offsets = [1, 0, 0], sizes = [8, 16, 8], strides = [1, 1, 1]} : vector<10x18x8xbf16> to vector<8x16x8xbf16>
    %27 = vector.extract_strided_slice %22 {offsets = [1, 1, 0], sizes = [8, 16, 8], strides = [1, 1, 1]} : vector<10x18x8xbf16> to vector<8x16x8xbf16>
    %28 = vector.extract_strided_slice %22 {offsets = [1, 2, 0], sizes = [8, 16, 8], strides = [1, 1, 1]} : vector<10x18x8xbf16> to vector<8x16x8xbf16>
    %29 = vector.extract_strided_slice %22 {offsets = [2, 0, 0], sizes = [8, 16, 8], strides = [1, 1, 1]} : vector<10x18x8xbf16> to vector<8x16x8xbf16>
    %30 = vector.extract_strided_slice %22 {offsets = [2, 1, 0], sizes = [8, 16, 8], strides = [1, 1, 1]} : vector<10x18x8xbf16> to vector<8x16x8xbf16>
    %31 = vector.extract_strided_slice %22 {offsets = [2, 2, 0], sizes = [8, 16, 8], strides = [1, 1, 1]} : vector<10x18x8xbf16> to vector<8x16x8xbf16>
    %32 = tpu.concatenate %23, %24, %25, %26, %27, %28, %29, %30, %31 in 2 : vector<8x16x8xbf16>, vector<8x16x8xbf16>, vector<8x16x8xbf16>, vector<8x16x8xbf16>, vector<8x16x8xbf16>, vector<8x16x8xbf16>, vector<8x16x8xbf16>, vector<8x16x8xbf16>, vector<8x16x8xbf16> -> vector<8x16x72xbf16>
    %33 = vector.shape_cast %32 : vector<8x16x72xbf16> to vector<128x72xbf16>
    %c0_17 = arith.constant 0 : index
    %c0_18 = arith.constant 0 : index
    %34 = vector.load %arg7[%c0_17, %c0_18] : memref<72x4xbf16, #tpu.memory_space<vmem>>, vector<72x4xbf16>
    %cst_19 = arith.constant dense<0.000000e+00> : vector<128x4xf32>
    %35 = tpu.matmul %33, %34, %cst_19 {dimension_numbers = #tpu.dot_dimension_numbers<[1], [0], [0], [1], [0, 0, 1, 1], [], []>} : vector<128x72xbf16>, vector<72x4xbf16>, vector<128x4xf32> -> vector<128x4xf32>
    %36 = arith.addf %17, %35 : vector<128x4xf32>
    %c0_20 = arith.constant 0 : index
    %c0_21 = arith.constant 0 : index
    %37 = vector.load %arg8[%c0_20, %c0_21] : memref<1x4xf32, #tpu.memory_space<vmem>>, vector<1x4xf32>
    %38 = vector.shape_cast %37 : vector<1x4xf32> to vector<4xf32>
    %39 = vector.shape_cast %38 : vector<4xf32> to vector<1x4xf32>
    %40 = vector.broadcast %39 : vector<1x4xf32> to vector<128x4xf32>
    %41 = arith.addf %36, %40 : vector<128x4xf32>
    %cst_22 = arith.constant 0.000000e+00 : f32
    %42 = vector.broadcast %cst_22 : f32 to vector<128x4xf32>
    %43 = arith.maximumf %41, %42 : vector<128x4xf32>
    %44 = vector.shape_cast %43 : vector<128x4xf32> to vector<8x16x4xf32>
    %c0_23 = arith.constant 0 : index
    %c0_24 = arith.constant 0 : index
    %c0_25 = arith.constant 0 : index
    %c0_26 = arith.constant 0 : index
    %45 = vector.load %arg9[%c0_23, %c0_24, %c0_25, %c0_26] : memref<1x8x16x4xbf16, #tpu.memory_space<vmem>>, vector<1x8x16x4xbf16>
    %46 = vector.shape_cast %45 : vector<1x8x16x4xbf16> to vector<8x16x4xbf16>
    %47 = arith.extf %46 : vector<8x16x4xbf16> to vector<8x16x4xf32>
    %48 = arith.addf %44, %47 : vector<8x16x4xf32>
    %49 = arith.truncf %48 : vector<8x16x4xf32> to vector<8x16x4xbf16>
    %c0_27 = arith.constant 0 : index
    %c0_28 = arith.constant 0 : index
    %c0_29 = arith.constant 0 : index
    %c0_30 = arith.constant 0 : index
    %50 = vector.load %arg10[%c0_27, %c0_28, %c0_29, %c0_30] : memref<1x8x16x4xbf16, #tpu.memory_space<vmem>>, vector<1x8x16x4xbf16>
    %51 = vector.shape_cast %50 : vector<1x8x16x4xbf16> to vector<8x16x4xbf16>
    %52 = vector.shape_cast %49 : vector<8x16x4xbf16> to vector<1x8x16x4xbf16>
    tpu.vector_store %arg10[%c0_27, %c0_28, %c0_29, %c0_30], %52 {strides = array<i32>} : memref<1x8x16x4xbf16, #tpu.memory_space<vmem>>, vector<1x8x16x4xbf16>,
    return
  }
  func.func @transform_0(%arg0: i32, %arg1: i32) -> (i32, i32, i32, i32) {
    %c0_i32 = arith.constant 0 : i32
    %c0_i32_0 = arith.constant 0 : i32
    %c0_i32_1 = arith.constant 0 : i32
    return %arg0, %arg1, %c0_i32, %c0_i32_0 : i32, i32, i32, i32
  }
  func.func @transform_1(%arg0: i32, %arg1: i32) -> (i32, i32, i32, i32) {
    %c1_i32 = arith.constant 1 : i32
    %0 = arith.addi %arg1, %c1_i32 : i32
    %c4_i32 = arith.constant 4 : i32
    %1 = arith.muli %0, %c4_i32 : i32
    %c0_i32 = arith.constant 0 : i32
    %c0_i32_0 = arith.constant 0 : i32
    %c0_i32_1 = arith.constant 0 : i32
    return %arg0, %1, %c0_i32, %c0_i32_0 : i32, i32, i32, i32
  }
  func.func @transform_2(%arg0: i32, %arg1: i32) -> (i32, i32, i32, i32) {
    %c0_i32 = arith.constant 0 : i32
    %c0_i32_0 = arith.constant 0 : i32
    %c0_i32_1 = arith.constant 0 : i32
    return %arg0, %arg1, %c0_i32, %c0_i32_0 : i32, i32, i32, i32
  }
  func.func @transform_3(%arg0: i32, %arg1: i32) -> (i32, i32, i32, i32) {
    %c1_i32 = arith.constant 1 : i32
    %0 = arith.addi %arg1, %c1_i32 : i32
    %c4_i32 = arith.constant 4 : i32
    %1 = arith.muli %0, %c4_i32 : i32
    %c0_i32 = arith.constant 0 : i32
    %c0_i32_0 = arith.constant 0 : i32
    %c0_i32_1 = arith.constant 0 : i32
    return %arg0, %1, %c0_i32, %c0_i32_0 : i32, i32, i32, i32
  }
  func.func @transform_4(%arg0: i32, %arg1: i32) -> (i32, i32) {
    %c0_i32 = arith.constant 0 : i32
    %c0_i32_0 = arith.constant 0 : i32
    %c0_i32_1 = arith.constant 0 : i32
    return %c0_i32, %c0_i32_0 : i32, i32
  }
  func.func @transform_5(%arg0: i32, %arg1: i32) -> (i32, i32) {
    %c0_i32 = arith.constant 0 : i32
    %c0_i32_0 = arith.constant 0 : i32
    %c0_i32_1 = arith.constant 0 : i32
    return %c0_i32, %c0_i32_0 : i32, i32
  }
  func.func @transform_6(%arg0: i32, %arg1: i32) -> (i32, i32) {
    %c0_i32 = arith.constant 0 : i32
    %c0_i32_0 = arith.constant 0 : i32
    %c0_i32_1 = arith.constant 0 : i32
    return %c0_i32, %c0_i32_0 : i32, i32
  }
  func.func @transform_7(%arg0: i32, %arg1: i32) -> (i32, i32, i32, i32) {
    %c0_i32 = arith.constant 0 : i32
    %c0_i32_0 = arith.constant 0 : i32
    %c0_i32_1 = arith.constant 0 : i32
    return %arg0, %arg1, %c0_i32, %c0_i32_0 : i32, i32, i32, i32
  }
  func.func @transform_8(%arg0: i32, %arg1: i32) -> (i32, i32, i32, i32) {
    %c0_i32 = arith.constant 0 : i32
    %c0_i32_0 = arith.constant 0 : i32
    %c0_i32_1 = arith.constant 0 : i32
    return %arg0, %arg1, %c0_i32, %c0_i32_0 : i32, i32, i32, i32
  }
}

</mosaic_0001>

<bundles_post_ra>
// kernel: rsu4_forward.8
= control target key start
LH: loop header
LB: loop body
LE: loop exit
PB: predicated region body
PF: predicated region fallthrough
CT: control target
= control target key end

     0   :  { %s1339_s15 = smov 0   ;;  %s1341_s16 = smov 0   ;;  %s1815_s0 = inlined_call_operand.vmem [shape: bf16[2,18,18,4], index: 0, kind: input, shape index: {}, may-alias: {0,1}]   ;;  %s1816_s1 = inlined_call_operand.vmem [shape: bf16[2,18,18,4], index: 1, kind: input, shape index: {}, may-alias: {0,1}]   ;;  %s1817_s2 = inlined_call_operand.vmem [shape: bf16[36,4], index: 2, kind: input, shape index: {}]   ;;  %s1818_s3 = inlined_call_operand.vmem [shape: f32[1,4], index: 3, kind: input, shape index: {}]   ;;  %s1819_s4 = inlined_call_operand.vmem [shape: bf16[2,16,16,4], index: 4, kind: output, shape index: {}]  }
   0x1   :  { %s1343_s17 = smov 0   ;;  %s1345_s18 = smov 0  }
   0x2   :  { %s1347_s19 = smov 0  }
   0x3 LB: > { %s23_s20 = sadd.s32 1, %s1296_s17  ;;  %s26_s21 = sadd.s32 1, %s1300_s18  ;;  %s1304_s19 = sphi %s1347_s19, %s14_s19   ;;  %s1300_s18 = sphi %s1345_s18, %s1824_s18   ;;  %s1296_s17 = sphi %s1343_s17, %s1823_s17   ;;  %s1292_s16 = sphi %s1341_s16, %s1822_s16   ;;  %s1288_s15 = sphi %s1339_s15, %s1821_s15  }
   0x4   : > { %p24_p0 = scmp.ge.s32.totalorder %s23_s20, 2  ;;  %p1116_p1 = scmp.ge.s32.totalorder %s1304_s19, 1 }
   0x5   : > { %p220_p2 = scmp.lt.s32.totalorder %s1304_s19, 5 }
   0x6   : > { %s1826_s20 = smov (%p24_p0, %s23_s20), 0  ;;  %s1828_s21 = smov (!%p24_p0, %s26_s21), %s1300_s18 }
   0x7   : > { %p221_p3 = pnand %p1116_p1, %p220_p2  ;;  %p28_p4 = scmp.ge.s32.totalorder %s1828_s21, 2 }
   0x8   : > { %s1369_s22 = sshll.u32 (!%p221_p3), %s1288_s15, 3  ;;  %p279_p5 = scmp.lt.s32.totalorder (!%p221_p3), %s1292_s16, 1 }
   0x9   : > { %s1830_s21 = smov (%p28_p4, %s1828_s21), 0  ;;  %224 = sbr.rel (%p221_p3) target bundleno = 457 (0x1c9), region = 36 }
   0xa   : > { %p281_p6 = scmp.lt.s32.totalorder (!%p221_p3), %s1369_s22, 17  ;;  %s1204_s5 = sadd.s32 (!%p221_p3), 8, %s1369_s22 }
   0xb   : > { %s1306_s6 = smov (!%p221_p3), 12   ;;  %p1408_p7 = scmp.lt.s32.totalorder (!%p221_p3), %s1204_s5, 17 }
   0xc   : > { %s1307_s8 = smov (!%p221_p3), 8   ;;  %s1308_s9 = smov (!%p221_p3), 4  }
   0xd   : > { %s1309_s12 = smov (!%p221_p3), 20   ;;  %p312_p8 = scmp.lt.s32.totalorder (!%p221_p3), %s1369_s22, 15 }
   0xe   : > { %s1832_s16 = smov (!%p279_p5, %s1292_s16), 1  ;;  %vm528_vm0 = vcmask 1046528   ;;  %vm415_vm1 = vsmask.f32 7424  ;;  %s1834_s5 = smov (!%p1408_p7, %s1204_s5), 17  ;;  %vm888_vm2 = vcmask 1041408  }
   0xf   : > { %s282_s23 = scalar_select %p281_p6, %s1369_s22, 17  ;;  %vm711_vm3 = vcmask 31744   ;;  %vm728_vm4 = vcmask 64512   ;;  %vm745_vm5 = vcmask 97280   ;;  %vm762_vm6 = vcmask 130048  }
  0x10   : > { %s1215_s24 = smul.u32 54, %s1832_s16  ;;  %vm779_vm7 = vcmask 162816   ;;  %vm796_vm8 = vcmask 195584   ;;  %vm830_vm9 = vcmask 261120   ;;  %vm813_vm10 = vcmask 228352   ;;  %s1836_s22 = smov (!%p312_p8, %s1369_s22), 15 }
  0x11   : > { %s1214_s25 = smul.u32 3, %s282_s23  ;;  %vm871_vm11 = vcmask 293888   ;;  %vm973_vm12 = vcmask 27648  }
  0x12   : > { %s1216_s10 = smul.u32 3, %s1834_s5 }
  0x13   : > { %s285_s26 = sadd.s32 %s1215_s24, %s1214_s25  ;;  %s1311_s25 = smov 24  }
  0x14   : > { %s1118_s27 = sshll.u32 %s285_s26, 2  ;;  %s303_s11 = sadd.s32 %s1216_s10, %s1215_s24 }
  0x15   : > { %s1381_s30 = scalar_lea.vmem %s1815_s0, %s1118_s27  ;;  %s1121_s13 = sshll.u32 %s303_s11, 2 }
  0x16   : > { %v1384_v0 = vld [vmem:[%s1381_s30 + $0x30] sm:$0xff]  ;;  %v335_v1 = vld [vmem:[%s1381_s30 + $0x38] sm:$0x1]  ;;  %v1388_v2 = vld [vmem:[%s1381_s30 + $0x48] sm:$0xff]  ;;  %s1469_s23 = scalar_lea.vmem %s1816_s1, %s1121_s13  ;;  %s1310_s24 = smov 16  }
  0x17   : > { %v403_v3 = vunpack.c.l.b16 %v335_v1  ;;  %v341_v4 = vld [vmem:[%s1381_s30 + $0x50] sm:$0x1]  ;;  %v465_v5 = vshrl.u32 %v1384_v0, 16  ;;  %v467_v6 = vshll.u32 %v1384_v0, 16  ;;  %v344_v8 = vld [vmem:[%s1381_s30 + $0x5c] sm:$0x1] }
  0x18   : > { %v405_v7 = vunpack.c.l.b16 %v341_v4  ;;  %v1395_v9 = vld [vmem:[%s1381_s30 + $0x3c] sm:$0xff]  ;;  %v541_v11 = vrot.slane %v1384_v0, 1  ;;  %v491_v12 = vshll.u32 %v1388_v2, 16  ;;  %v1401_v15 = vld [vmem:[%s1381_s30 + $0x54] sm:$0xff]  ;;  %v406_v18 = vunpack.c.l.b16 %v344_v8  ;;  %v338_v19 = vld [vmem:[%s1381_s30 + $0x44] sm:$0x1] }
  0x19   : > { %v411_v10 = vpack.c.b16 %v403_v3, %v403_v3  ;;  %v469_v13 = vrot.slane %v467_v6, 1  ;;  %582 = vrot.lane.b32.xlu2 %v1395_v9, %s1306_s6  ;;  %v489_v21 = vshrl.u32 %v1388_v2, 16  ;;  %v503_v26 = vshll.u32 %v1401_v15, 16  ;;  %v329_v49 = vld [vmem:[%s1381_s30 + $0x20] sm:$0x1]  ;;  %v1458_v54 = vld [vmem:[%s1381_s30 + $0x18] sm:$0xff] }
  0x1a   : > { %v413_v14 = vpack.c.b16 %v405_v7, %v405_v7  ;;  %v493_v24 = vrot.slane %v491_v12, 1  ;;  %v404_v27 = vunpack.c.l.b16 %v338_v19  ;;  %v547_v29 = vrot.slane %v1388_v2, 1  ;;  %v323_v52 = vld [vmem:[%s1381_s30 + $0x8] sm:$0x1]  ;;  %v1464_v57 = vld [vmem:[%s1381_s30] sm:$0xff]  ;;  %s1312_s26 = smov 28  }
  0x1b   : > { %v542_v16 = vrot.slane %v411_v10, 1  ;;  %v472_v17 = vshll.u32 %v411_v10, 16  ;;  %v470_v20 = vor.u32 %v469_v13, %v465_v5  ;;  %v414_v31 = vpack.c.b16 %v406_v18, %v406_v18  ;;  %v1478_v63 = vld [vmem:[%s1469_s23] sm:$0xff]  ;;  %v347_v4 = vld [vmem:[%s1469_s23 + $0x8] sm:$0x1]  ;;  %s1313_s27 = smov 32  }
  0x1c   : > { %v496_v25 = vshll.u32 %v413_v14, 16  ;;  %v548_v30 = vrot.slane %v413_v14, 1  ;;  %v494_v32 = vor.u32 %v493_v24, %v489_v21  ;;  %v412_v34 = vpack.c.b16 %v404_v27, %v404_v27 }
  0x1d   : > { %v1414_v22 = vsel %vm528_vm0, %v541_v11, %v542_v16  ;;  %v474_v23 = vrot.slane %v472_v17, 1  ;;  %v479_v35 = vshll.u32 %v1395_v9, 16  ;;  %v501_v36 = vshrl.u32 %v1401_v15, 16 }
  0x1e   : > { %561 = vrot.lane.b32.xlu1 %v1414_v22, %s1307_s8  ;;  %v498_v33 = vrot.slane %v496_v25, 1  ;;  %v505_v37 = vrot.slane %v503_v26, 1  ;;  %v1434_v38 = vsel %vm528_vm0, %v547_v29, %v548_v30  ;;  %v508_v39 = vshll.u32 %v414_v31, 16  ;;  %v332_v30 = vld [vmem:[%s1381_s30 + $0x2c] sm:$0x1] }
  0x1f   : > { %v1420_v28 = vsel %vm415_vm1, %v470_v20, %v474_v23  ;;  %v544_v40 = vrot.slane %v1395_v9, 1  ;;  %v545_v41 = vrot.slane %v412_v34, 1  ;;  %v477_v43 = vshrl.u32 %v1395_v9, 16 }
  0x20   : > { %520 = vrot.lane.b32.xlu0 %v1420_v28, %s1308_s9  ;;  %v1438_v42 = vsel %vm415_vm1, %v494_v32, %v498_v33  ;;  %v481_v44 = vrot.slane %v479_v35, 1  ;;  %v484_v45 = vshll.u32 %v412_v34, 16  ;;  %v506_v46 = vor.u32 %v505_v37, %v501_v36  ;;  %v326_v33 = vld [vmem:[%s1381_s30 + $0x14] sm:$0x1]  ;;  %v1512_v37 = vld [vmem:[%s1381_s30 + $0x24] sm:$0xff] }
  0x21   : > { %586 = vrot.lane.b32.xlu2 %v1401_v15, %s1306_s6  ;;  %v510_v47 = vrot.slane %v508_v39, 1  ;;  %v1444_v48 = vsel %vm528_vm0, %v544_v40, %v545_v41  ;;  %v401_v55 = vunpack.c.l.b16 %v329_v49  ;;  %v399_v58 = vunpack.c.l.b16 %v323_v52 }
  0x22   : > { %v482_v50 = vor.u32 %v481_v44, %v477_v43  ;;  %v486_v51 = vrot.slane %v484_v45, 1  ;;  %v443_v60 = vshll.u32 %v1458_v54, 16  ;;  %v550_v61 = vrot.slane %v1401_v15, 1  ;;  %v1518_v43 = vld [vmem:[%s1381_s30 + $0xc] sm:$0xff] }
  0x23   : > { %v1455_v53 = vsel %vm415_vm1, %v506_v46, %v510_v47  ;;  %v409_v59 = vpack.c.b16 %v401_v55, %v401_v55  ;;  %v551_v62 = vrot.slane %v414_v31, 1  ;;  %v407_v1 = vpack.c.b16 %v399_v58, %v399_v58 }
  0x24   : > { %v1461_v56 = vsel %vm415_vm1, %v482_v50, %v486_v51  ;;  %v419_v3 = vshll.u32 %v1464_v57, 16  ;;  %v441_v5 = vshrl.u32 %v1458_v54, 16  ;;  %v445_v6 = vrot.slane %v443_v60, 1 }
  0x25   : > { %v448_v7 = vshll.u32 %v409_v59, 16  ;;  %v1486_v8 = vsel %vm528_vm0, %v550_v61, %v551_v62  ;;  %v417_v10 = vshrl.u32 %v1464_v57, 16  ;;  %v424_v12 = vshll.u32 %v407_v1, 16 }
  0x26   : > { %565 = vrot.lane.b32.xlu1 %v1434_v38, %s1307_s8  ;;  %v421_v11 = vrot.slane %v419_v3, 1  ;;  %v591_v13 = vunpack.c.l.b16 %v347_v4  ;;  %v446_v14 = vor.u32 %v445_v6, %v441_v5  ;;  %v596_v20 = vshll.u32 %v1478_v63, 16 }
  0x27   : > { %v450_v16 = vrot.slane %v448_v7, 1  ;;  %v426_v18 = vrot.slane %v424_v12, 1  ;;  %v535_v23 = vrot.slane %v1458_v54, 1  ;;  %v536_v24 = vrot.slane %v409_v59, 1 }
  0x28   : > { %524 = vrot.lane.b32.xlu0 %v1438_v42, %s1308_s9  ;;  %v422_v17 = vor.u32 %v421_v11, %v417_v10  ;;  %v592_v19 = vpack.c.b16 %v591_v13, %v591_v13  ;;  %v594_v26 = vshrl.u32 %v1478_v63, 16  ;;  %v598_v27 = vrot.slane %v596_v20, 1 }
  0x29   : > { %632 = vrot.lane.b32.xlu2 %v1444_v48, %s1309_s12  ;;  %v1497_v21 = vsel %vm415_vm1, %v446_v14, %v450_v16  ;;  %v529_v31 = vrot.slane %v1464_v57, 1  ;;  %v530_v32 = vrot.slane %v407_v1, 1  ;;  %v1508_v34 = vsel %vm528_vm0, %v535_v23, %v536_v24  ;;  %v1200_v23 = vld [vmem:[%s1469_s23 + $0xc] sm:$0xff] }
  0x2a   : > { %v427_v25 = vsel %vm415_vm1, %v422_v17, %v426_v18  ;;  %v601_v29 = vshll.u32 %v592_v19, 16  ;;  %v599_v35 = vor.u32 %v598_v27, %v594_v26  ;;  %v402_v39 = vunpack.c.l.b16 %v332_v30 }
  0x2b   : > { %v400_v40 = vunpack.c.l.b16 %v326_v33  ;;  %v531_v41 = vsel %vm528_vm0, %v529_v31, %v530_v32  ;;  %v455_v44 = vshll.u32 %v1512_v37, 16  ;;  %v621_v47 = vrot.slane %v1478_v63, 1 }
  0x2c   : > { %v603_v36 = vrot.slane %v601_v29, 1  ;;  %v410_v46 = vpack.c.b16 %v402_v39, %v402_v39  ;;  %v622_v49 = vrot.slane %v592_v19, 1  ;;  %v431_v51 = vshll.u32 %v1518_v43, 16  ;;  %v350_v19 = vld [vmem:[%s1469_s23 + $0x14] sm:$0x1] }
  0x2d   : > { %v408_v50 = vpack.c.b16 %v400_v40, %v400_v40  ;;  %v453_v52 = vshrl.u32 %v1512_v37, 16  ;;  %v457_v55 = vrot.slane %v455_v44, 1  ;;  %v429_v60 = vshrl.u32 %v1518_v43, 16 }
  0x2e   : > { %617 = vrot.lane.b32.xlu1 %v1455_v53, %s1310_s24  ;;  %v604_v45 = vsel %vm415_vm1, %v599_v35, %v603_v36  ;;  %v460_v58 = vshll.u32 %v410_v46, 16  ;;  %v623_v59 = vsel %vm528_vm0, %v621_v47, %v622_v49  ;;  %v433_v61 = vrot.slane %v431_v51, 1  ;;  %v1201_v47 = vld [vmem:[%s1817_s2] sm:$0xff] }
  0x2f   : > { %v436_v62 = vshll.u32 %v408_v50, 16  ;;  %v458_v1 = vor.u32 %v457_v55, %v453_v52  ;;  %v538_v10 = vrot.slane %v1512_v37, 1  ;;  %v539_v11 = vrot.slane %v410_v46, 1 }
  0x30   : > { %613 = vrot.lane.b32.xlu0 %v1461_v56, %s1310_s24  ;;  %v462_v3 = vrot.slane %v460_v58, 1  ;;  %v434_v4 = vor.u32 %v433_v61, %v429_v60  ;;  %v532_v12 = vrot.slane %v1518_v43, 1  ;;  %v533_v13 = vrot.slane %v408_v50, 1 }
  0x31   : > { %657 = vrot.lane.b32.xlu2 %v1478_v63, %s1311_s25  ;;  %v438_v5 = vrot.slane %v436_v62, 1  ;;  %v1548_v14 = vsel %vm528_vm0, %v538_v10, %v539_v11  ;;  %v662_v20 = vunpack.c.l.b16 %v350_v19 }
  0x32   : > { %v1533_v6 = vsel %vm415_vm1, %v458_v1, %v462_v3  ;;  %v1551_v16 = vsel %vm528_vm0, %v532_v12, %v533_v13 }
  0x33   : > { %v439_v7 = vsel %vm415_vm1, %v434_v4, %v438_v5  ;;  %v663_v24 = vpack.c.b16 %v662_v20, %v662_v20 }
  0x35   : > { %v672_v29 = vshll.u32 %v663_v24, 16  ;;  %v693_v50 = vrot.slane %v663_v24, 1 }
  0x36   : > { %653 = vrot.lane.b32.xlu1 %v1388_v2, %s1311_s25 }
  0x37   : > { %v674_v30 = vrot.slane %v672_v29, 1 }
  0x38   : > { %636 = vrot.lane.b32.xlu0 %v1486_v8, %s1309_s12 }
  0x39   : > { %684 = vrot.lane.b32.xlu2 %v1438_v42, %s1312_s26 }
  0x3e   : > { %516 = vrot.lane.b32.xlu1 %v1497_v21, %s1308_s9 }
  0x40   : > { %512 = vrot.lane.b32.xlu0 %v427_v25, %s1308_s9  ;;  %v667_v25 = vshll.u32 %v1200_v23, 16 }
  0x41   : > { %557 = vrot.lane.b32.xlu2 %v1508_v34, %s1307_s8 }
  0x42   : > { %v669_v27 = vrot.slane %v667_v25, 1 }
  0x46   : > { %553 = vrot.lane.b32.xlu1 %v531_v41, %s1307_s8 }
  0x48   : > { %688 = vrot.lane.b32.xlu0 %v604_v45, %s1312_s26 }
  0x49   : > { %574 = vrot.lane.b32.xlu2 %v1518_v43, %s1306_s6 }
  0x4e   : > { %707 = vrot.lane.b32.xlu1 %v623_v59, %s1313_s27 }
  0x50   : > { %703 = vrot.lane.b32.xlu0 %v1434_v38, %s1313_s27 }
  0x51   : > { %609 = vrot.lane.b32.xlu2 %v1533_v6, %s1310_s24 }
  0x56   : > { %605 = vrot.lane.b32.xlu1 %v439_v7, %s1310_s24 }
  0x58   : > { %578 = vrot.lane.b32.xlu0 %v1512_v37, %s1306_s6 }
  0x59   : > { %645 = vrot.lane.b32.xlu2 %v1458_v54, %s1311_s25 }
  0x5e   : > { %628 = vrot.lane.b32.xlu1 %v1548_v14, %s1309_s12 }
  0x60   : > { %624 = vrot.lane.b32.xlu0 %v1551_v16, %s1309_s12 }
  0x61   : > { %680 = vrot.lane.b32.xlu2 %v1420_v28, %s1312_s26 }
  0x66   : > { %676 = vrot.lane.b32.xlu1 %v1497_v21, %s1312_s26 }
  0x68   : > { %649 = vrot.lane.b32.xlu0 %v1384_v0, %s1311_s25 }
  0x69   : > { %522 = vrot.lane.b32.xlu2 %v1461_v56, %s1308_s9 }
  0x6e   : > { %699 = vrot.lane.b32.xlu1 %v1414_v22, %s1313_s27 }
  0x70   : > { %695 = vrot.lane.b32.xlu0 %v1508_v34, %s1313_s27 }
  0x71   : > { %567 = vrot.lane.b32.xlu2 %v1486_v8, %s1307_s8 }
  0x73   : > { %v1571_v17 = vpop.permute.xlu2 %582 }
  0x76   : > { %563 = vrot.lane.b32.xlu1 %v1444_v48, %s1307_s8 }
  0x78   : > { %526 = vrot.lane.b32.xlu0 %v1455_v53, %s1308_s9 }
  0x79   : > { %615 = vrot.lane.b32.xlu2 %v1438_v42, %s1310_s24  ;;  %v665_v42 = vshrl.u32 %v1200_v23, 16 }
  0x7b   : > { %v1579_v18 = vpop.permute.xlu2 %586 }
  0x7e   : > { %588 = vrot.lane.b32.xlu1 %v1478_v63, %s1306_s6  ;;  %v670_v63 = vor.u32 %v669_v27, %v665_v42 }
  0x80   : > { %584 = vrot.lane.b32.xlu0 %v1388_v2, %s1306_s6  ;;  %v675_v32 = vsel %vm415_vm1, %v670_v63, %v674_v30 }
  0x81   : > { %638 = vrot.lane.b32.xlu2 %v623_v59, %s1309_s12 }
  0x83   : > { %v1588_v26 = vpop.permute.xlu2 %632 }
  0x86   : > { %634 = vrot.lane.b32.xlu1 %v1434_v38, %s1309_s12  ;;  %v851_v38 = vld [vmem:[%s1817_s2 + $0x10] sm:$0x3] }
  0x87   : > { %v865_v36 = vunpack.c.l.b16 %v851_v38 }
  0x88   : > { %619 = vrot.lane.b32.xlu0 %v604_v45, %s1310_s24  ;;  %v1202_v45 = vld [vmem:[%s1817_s2 + $0x8] sm:$0xff] }
  0x89   : > { %514 = vrot.lane.b32.xlu2 %v439_v7, %s1308_s9  ;;  %v868_v40 = vpack.c.b16 %v865_v36, %v865_v36 }
  0x8b   : > { %v1594_v31 = vpop.permute.xlu2 %657  ;;  %v890_v41 = vsel %vm888_vm2, %v868_v40, 0 }
  0x8c   : > { %1207 = vmatpush.bf16.msra.mxu3 %v890_v41  ;;  %1206 = vmatpush.bf16.msra.mxu2 %v890_v41 }
  0x8d   : > { %1205 = vmatpush.bf16.msra.mxu1 %v890_v41  ;;  %897 = vmatpush.bf16.msra.mxu0 %v890_v41 }
  0x8e   : > { %659 = vrot.lane.b32.xlu1 %v1200_v23, %s1311_s25 }
  0x90   : > { %v562_v33 = vpop.permute.xlu1 %561  ;;  %655 = vrot.lane.b32.xlu0 %v1401_v15, %s1311_s25  ;;  %1210 = vmatpush.bf16.msra.mxu3 %v1202_v45 }
  0x91   : > { %690 = vrot.lane.b32.xlu2 %v675_v32, %s1312_s26  ;;  %1209 = vmatpush.bf16.msra.mxu2 %v1202_v45 }
  0x92   : > { %v521_v35 = vpop.permute.xlu0 %520  ;;  %1208 = vmatpush.bf16.msra.mxu1 %v1202_v45  ;;  %898 = vmatpush.bf16.msra.mxu0 %v1202_v45 }
  0x93   : > { %v1604_v39 = vpop.permute.xlu2 %684  ;;  %v721_v1 = vsel %vm711_vm3, %v1384_v0, %v521_v35 }
  0x94   : > { %1213 = vmatpush.bf16.msra.mxu3 %v1201_v47 }
  0x95   : > { %1212 = vmatpush.bf16.msra.mxu2 %v1201_v47 }
  0x96   : > { %686 = vrot.lane.b32.xlu1 %v1455_v53, %s1312_s26  ;;  %1211 = vmatpush.bf16.msra.mxu1 %v1201_v47 }
  0x97   : > { %899 = vmatpush.bf16.msra.mxu0 %v1201_v47 }
  0x98   : > { %v566_v44 = vpop.permute.xlu1 %565  ;;  %518 = vrot.lane.b32.xlu0 %v1533_v6, %s1308_s9 }
  0x99   : > { %705 = vrot.lane.b32.xlu2 %v1486_v8, %s1313_s27  ;;  %v692_v8 = vrot.slane %v1200_v23, 1 }
  0x9a   : > { %v525_v46 = vpop.permute.xlu0 %524 }
  0x9b   : > { %v1615_v53 = vpop.permute.xlu2 %557  ;;  %v694_v55 = vsel %vm528_vm0, %v692_v8, %v693_v50 }
  0x9e   : > { %559 = vrot.lane.b32.xlu1 %v1548_v14, %s1307_s8 }
  0xa0   : > { %v618_v49 = vpop.permute.xlu1 %617  ;;  %555 = vrot.lane.b32.xlu0 %v1551_v16, %s1307_s8  ;;  %s1124_s8 = sshll.u32 %s1832_s16, 5 }
  0xa1   : > { %580 = vrot.lane.b32.xlu2 %v1384_v0, %s1306_s6 }
  0xa2   : > { %v614_v51 = vpop.permute.xlu0 %613 }
  0xa3   : > { %v1626_v52 = vpop.permute.xlu2 %574 }
  0xa6   : > { %576 = vrot.lane.b32.xlu1 %v1458_v54, %s1306_s6  ;;  %s1123_s6 = sshll.u32 %s1836_s22, 1 }
  0xa8   : > { %v654_v58 = vpop.permute.xlu1 %653  ;;  %709 = vrot.lane.b32.xlu0 %v694_v55, %s1313_s27 }
  0xa9   : > { %626 = vrot.lane.b32.xlu2 %v1508_v34, %s1309_s12  ;;  %v725_v34 = vsel %vm711_vm3, %v1388_v2, %v525_v46 }
  0xaa   : > { %v637_v59 = vpop.permute.xlu0 %636  ;;  %v742_v3 = vsel %vm728_vm4, %v725_v34, %v566_v44 }
  0xab   : > { %v610_v60 = vpop.permute.xlu2 %609  ;;  %v759_v0 = vsel %vm745_vm5, %v742_v3, %v1579_v18 }
  0xac   : > { %v776_v7 = vsel %vm762_vm6, %v759_v0, %v618_v49 }
  0xad   : > { %v793_v11 = vsel %vm779_vm7, %v776_v7, %v637_v59 }
  0xae   : > { %611 = vrot.lane.b32.xlu1 %v1420_v28, %s1310_s24  ;;  %v738_v28 = vsel %vm728_vm4, %v721_v1, %v562_v33  ;;  %v810_v13 = vsel %vm796_vm8, %v793_v11, %v1594_v31 }
  0xaf   : > { %v755_v2 = vsel %vm745_vm5, %v738_v28, %v1571_v17 }
  0xb0   : > { %v517_v61 = vpop.permute.xlu1 %516  ;;  %607 = vrot.lane.b32.xlu0 %v1497_v21, %s1310_s24  ;;  %v772_v10 = vsel %vm762_vm6, %v755_v2, %v614_v51 }
  0xb1   : > { %651 = vrot.lane.b32.xlu2 %v1395_v9, %s1311_s25  ;;  %v717_v42 = vsel %vm711_vm3, %v1458_v54, %v517_v61 }
  0xb2   : > { %v513_v62 = vpop.permute.xlu0 %512  ;;  %v734_v29 = vsel %vm728_vm4, %v717_v42, %v1615_v53 }
  0xb3   : > { %v646_v21 = vpop.permute.xlu2 %645  ;;  %v713_v63 = vsel %vm711_vm3, %v1464_v57, %v513_v62 }
  0xb6   : > { %647 = vrot.lane.b32.xlu1 %v1512_v37, %s1311_s25 }
  0xb8   : > { %v554_v4 = vpop.permute.xlu1 %553  ;;  %630 = vrot.lane.b32.xlu0 %v1414_v22, %s1309_s12  ;;  %v789_v22 = vsel %vm779_vm7, %v772_v10, %v1588_v26  ;;  %s316_s12 = sadd.s32 %s1124_s8, %s1123_s6 }
  0xb9   : > { %697 = vrot.lane.b32.xlu2 %v1548_v14, %s1313_s27  ;;  %v806_v12 = vsel %vm796_vm8, %v789_v22, %v654_v58  ;;  %v730_v32 = vsel %vm728_vm4, %v713_v63, %v554_v4  ;;  %s1125_s13 = sshll.u32 %s316_s12, 2 }
  0xba   : > { %v689_v5 = vpop.permute.xlu0 %688  ;;  %v747_v38 = vsel %vm745_vm5, %v730_v32, %v1626_v52  ;;  %s1752_s23 = scalar_lea.vmem %s1819_s4, %s1125_s13 }
  0xbb   : > { %v827_v14 = vsel %vm813_vm10, %v810_v13, %v689_v5  ;;  %v681_v18 = vpop.permute.xlu2 %680 }
  0xbe   : > { %682 = vrot.lane.b32.xlu1 %v1461_v56, %s1312_s26  ;;  %v823_v56 = vsel %vm813_vm10, %v806_v12, %v1604_v39 }
  0xc0   : > { %v708_v16 = vpop.permute.xlu1 %707  ;;  %678 = vrot.lane.b32.xlu0 %v1533_v6, %s1312_s26 }
  0xc1   : > { %v844_v17 = vsel %vm830_vm9, %v827_v14, %v708_v16 }
  0xc2   : > { %1180 = vmatmul.msk.bf16.vlgmr.msra.gmra.mxu3 %vm871_vm11, %v844_v17  ;;  %v704_v19 = vpop.permute.xlu0 %703 }
  0xc3   : > { %v840_v20 = vsel %vm830_vm9, %v823_v56, %v704_v19  ;;  %v523_v25 = vpop.permute.xlu2 %522 }
  0xc4   : > { %1178 = vmatmul.msk.bf16.vlgmr.msra.gmra.mxu2 %vm871_vm11, %v840_v20  ;;  %v723_v61 = vsel %vm711_vm3, %v1395_v9, %v523_v25 }
  0xc8   : > { %v606_v23 = vpop.permute.xlu1 %605  ;;  %701 = vrot.lane.b32.xlu0 %v1444_v48, %s1313_s27 }
  0xc9   : > { %v764_v35 = vsel %vm762_vm6, %v747_v38, %v606_v23 }
  0xca   : > { %v579_v24 = vpop.permute.xlu0 %578 }
  0xcb   : > { %v568_v27 = vpop.permute.xlu2 %567  ;;  %v751_v30 = vsel %vm745_vm5, %v734_v29, %v579_v24 }
  0xcc   : > { %v768_v33 = vsel %vm762_vm6, %v751_v30, %v610_v60 }
  0xd0   : > { %v629_v6 = vpop.permute.xlu1 %628 }
  0xd1   : > { %v785_v54 = vsel %vm779_vm7, %v768_v33, %v629_v6 }
  0xd2   : > { %v625_v26 = vpop.permute.xlu0 %624 }
  0xd3   : > { %v781_v39 = vsel %vm779_vm7, %v764_v35, %v625_v26  ;;  %v616_v57 = vpop.permute.xlu2 %615 }
  0xd4   : > { %v798_v44 = vsel %vm796_vm8, %v781_v39, %v646_v21 }
  0xd8   : > { %v677_v31 = vpop.permute.xlu1 %676 }
  0xd9   : > { %v815_v46 = vsel %vm813_vm10, %v798_v44, %v677_v31 }
  0xda   : > { %v650_v48 = vpop.permute.xlu0 %649 }
  0xdb   : > { %v802_v36 = vsel %vm796_vm8, %v785_v54, %v650_v48  ;;  %v639_v8 = vpop.permute.xlu2 %638 }
  0xdc   : > { %v819_v41 = vsel %vm813_vm10, %v802_v36, %v681_v18 }
  0xe0   : > { %v700_v40 = vpop.permute.xlu1 %699 }
  0xe1   : > { %v836_v45 = vsel %vm830_vm9, %v819_v41, %v700_v40 }
  0xe2   : > { %1176 = vmatmul.msk.bf16.vlgmr.msra.gmra.mxu1 %vm871_vm11, %v836_v45  ;;  %v696_v53 = vpop.permute.xlu0 %695 }
  0xe3   : > { %v832_v47 = vsel %vm830_vm9, %v815_v46, %v696_v53  ;;  %v515_v55 = vpop.permute.xlu2 %514  ;;  %v1745_v46 = vld [vmem:[%s1818_s3] ss:$0 sm:$0xff] }
  0xe4   : > { %1174 = vmatmul.msk.bf16.vlgmr.msra.gmra.mxu0 %vm871_vm11, %v832_v47  ;;  %v715_v42 = vsel %vm711_vm3, %v1518_v43, %v515_v55 }
  0xe8   : > { %v564_v49 = vpop.permute.xlu1 %563 }
  0xe9   : > { %v740_v1 = vsel %vm728_vm4, %v723_v61, %v564_v49 }
  0xea   : > { %v527_v50 = vpop.permute.xlu0 %526 }
  0xeb   : > { %v691_v60 = vpop.permute.xlu2 %690  ;;  %v727_v9 = vsel %vm711_vm3, %v1401_v15, %v527_v50 }
  0xec   : > { %v744_v22 = vsel %vm728_vm4, %v727_v9, %v568_v27 }
  0xf0   : > { %v589_v51 = vpop.permute.xlu1 %588 }
  0xf1   : > { %v761_v12 = vsel %vm745_vm5, %v744_v22, %v589_v51 }
  0xf2   : > { %v585_v52 = vpop.permute.xlu0 %584 }
  0xf3   : > { %v757_v28 = vsel %vm745_vm5, %v740_v1, %v585_v52  ;;  %v706_v4 = vpop.permute.xlu2 %705 }
  0xf4   : > { %v774_v3 = vsel %vm762_vm6, %v757_v28, %v616_v57 }
  0xf8   : > { %v635_v58 = vpop.permute.xlu1 %634 }
  0xf9   : > { %v791_v21 = vsel %vm779_vm7, %v774_v3, %v635_v58 }
  0xfa   : > { %v620_v59 = vpop.permute.xlu0 %619 }
  0xfb   : > { %v778_v14 = vsel %vm762_vm6, %v761_v12, %v620_v59  ;;  %v581_v16 = vpop.permute.xlu2 %580 }
  0xfc   : > { %v795_v17 = vsel %vm779_vm7, %v778_v14, %v639_v8 }
 0x100   : > { %v660_v62 = vpop.permute.xlu1 %659 }
 0x101   : > { %v812_v18 = vsel %vm796_vm8, %v795_v17, %v660_v62 }
 0x102   : > { %v656_v34 = vpop.permute.xlu0 %655  ;;  %v829_v19 = vsel %vm813_vm10, %v812_v18, %v691_v60 }
 0x103   : > { %v808_v0 = vsel %vm796_vm8, %v791_v21, %v656_v34  ;;  %v627_v15 = vpop.permute.xlu2 %626 }
 0x108   : > { %v687_v2 = vpop.permute.xlu1 %686 }
 0x109   : > { %v825_v5 = vsel %vm813_vm10, %v808_v0, %v687_v2 }
 0x10a   : > { %v519_v7 = vpop.permute.xlu0 %518  ;;  %v842_v10 = vsel %vm830_vm9, %v825_v5, %v706_v4 }
 0x10b   : > { %1179 = vmatmul.msk.bf16.gmra.mxu2 %vm871_vm11, %v842_v10  ;;  %v652_v6 = vpop.permute.xlu2 %651  ;;  %v719_v31 = vsel %vm711_vm3, %v1512_v37, %v519_v7 }
 0x110   : > { %v560_v11 = vpop.permute.xlu1 %559 }
 0x111   : > { %v736_v32 = vsel %vm728_vm4, %v719_v31, %v560_v11 }
 0x112   : > { %v556_v13 = vpop.permute.xlu0 %555  ;;  %v753_v35 = vsel %vm745_vm5, %v736_v32, %v581_v16 }
 0x113   : > { %v732_v27 = vsel %vm728_vm4, %v715_v42, %v556_v13  ;;  %v698_v33 = vpop.permute.xlu2 %697 }
 0x118   : > { %v577_v56 = vpop.permute.xlu1 %576 }
 0x119   : > { %v749_v29 = vsel %vm745_vm5, %v732_v27, %v577_v56 }
 0x11a   : > { %v710_v20 = vpop.permute.xlu0 %709 }
 0x11b   : > { %v846_v23 = vsel %vm830_vm9, %v829_v19, %v710_v20 }
 0x11c   : > { %1181 = vmatmul.msk.bf16.gmra.mxu3 %vm871_vm11, %v846_v23 }
 0x120   : > { %v612_v25 = vpop.permute.xlu1 %611 }
 0x121   : > { %v770_v39 = vsel %vm762_vm6, %v753_v35, %v612_v25 }
 0x122   : > { %v608_v24 = vpop.permute.xlu0 %607 }
 0x123   : > { %v766_v30 = vsel %vm762_vm6, %v749_v29, %v608_v24 }
 0x124   : > { %v783_v48 = vsel %vm779_vm7, %v766_v30, %v627_v15 }
 0x128   : > { %v648_v63 = vpop.permute.xlu1 %647 }
 0x129   : > { %v800_v38 = vsel %vm796_vm8, %v783_v48, %v648_v63 }
 0x12a   : > { %v631_v26 = vpop.permute.xlu0 %630 }
 0x12b   : > { %v787_v37 = vsel %vm779_vm7, %v770_v39, %v631_v26 }
 0x12c   : > { %v804_v40 = vsel %vm796_vm8, %v787_v37, %v652_v6 }
 0x130   : > { %v683_v57 = vpop.permute.xlu1 %682 }
 0x131   : > { %v821_v41 = vsel %vm813_vm10, %v804_v40, %v683_v57 }
 0x132   : > { %v679_v43 = vpop.permute.xlu0 %678 }
 0x133   : > { %v817_v54 = vsel %vm813_vm10, %v800_v38, %v679_v43 }
 0x134   : > { %v834_v36 = vsel %vm830_vm9, %v817_v54, %v698_v33 }
 0x135   : > { %1175 = vmatmul.msk.bf16.gmra.mxu0 %vm871_vm11, %v834_v36 }
 0x13a   : > { %v702_v44 = vpop.permute.xlu0 %701 }
 0x13b   : > { %v838_v45 = vsel %vm830_vm9, %v821_v41, %v702_v44 }
 0x13c   : > { %1177 = vmatmul.msk.bf16.gmra.mxu1 %vm871_vm11, %v838_v45 }
 0x145   : > { %v931_v53 = vpop.f32.mrf.mxu3 }
 0x146   : > { %v932_v47 = vadd.f32 %v1745_v46, %v931_v53 }
 0x147   : > { %v921_v49 = vpop.f32.mrf.mxu2 }
 0x148   : > { %v953_v8 = vmax.f32 %v932_v47, 0.0  ;;  %v922_v50 = vadd.f32 %v1745_v46, %v921_v49 }
 0x14a   : > { %v969_v51 = vpack.c.bf16 %v953_v8, %v953_v8  ;;  %v949_v52 = vmax.f32 %v922_v50, 0.0 }
 0x14c   : > { %986 = vst.msk [vmem:[%s1752_s23 + $0x30] sm:$0xf] %vm973_vm12, %v969_v51  ;;  %v965_v55 = vpack.c.bf16 %v949_v52, %v949_v52 }
 0x14d   : > { %v933_v58 = vpop.f32.mrf.mxu3 }
 0x14e   : > { %982 = vst.msk [vmem:[%s1752_s23 + $0x20] sm:$0xf] %vm973_vm12, %v965_v55  ;;  %v934_v59 = vadd.f32 %v1745_v46, %v933_v58 }
 0x14f   : > { %v923_v60 = vpop.f32.mrf.mxu2 }
 0x150   : > { %v954_v61 = vmax.f32 %v934_v59, 0.0  ;;  %v924_v62 = vadd.f32 %v1745_v46, %v923_v60 }
 0x152   : > { %v970_v1 = vpack.c.bf16 %v954_v61, %v954_v61  ;;  %v950_v34 = vmax.f32 %v924_v62, 0.0 }
 0x154   : > { %987 = vst.msk [vmem:[%s1752_s23 + $0x34] sm:$0xf] %vm973_vm12, %v970_v1  ;;  %v966_v28 = vpack.c.bf16 %v950_v34, %v950_v34 }
 0x156   : > { %983 = vst.msk [vmem:[%s1752_s23 + $0x24] sm:$0xf] %vm973_vm12, %v966_v28 }
 0x15f   : > { %v911_v3 = vpop.f32.mrf.mxu1 }
 0x160   : > { %v912_v21 = vadd.f32 %v1745_v46, %v911_v3 }
 0x161   : > { %v901_v4 = vpop.f32.mrf.mxu0 }
 0x162   : > { %v945_v0 = vmax.f32 %v912_v21, 0.0  ;;  %v902_v2 = vadd.f32 %v1745_v46, %v901_v4 }
 0x164   : > { %v961_v5 = vpack.c.bf16 %v945_v0, %v945_v0  ;;  %v941_v7 = vmax.f32 %v902_v2, 0.0 }
 0x166   : > { %978 = vst.msk [vmem:[%s1752_s23 + $0x10] sm:$0xf] %vm973_vm12, %v961_v5  ;;  %v957_v10 = vpack.c.bf16 %v941_v7, %v941_v7 }
 0x167   : > { %v913_v9 = vpop.f32.mrf.mxu1 }
 0x168   : > { %974 = vst.msk [vmem:[%s1752_s23] sm:$0xf] %vm973_vm12, %v957_v10  ;;  %v914_v11 = vadd.f32 %v1745_v46, %v913_v9 }
 0x169   : > { %v903_v22 = vpop.f32.mrf.mxu0 }
 0x16a   : > { %v946_v12 = vmax.f32 %v914_v11, 0.0  ;;  %v904_v13 = vadd.f32 %v1745_v46, %v903_v22 }
 0x16c   : > { %v962_v14 = vpack.c.bf16 %v946_v12, %v946_v12  ;;  %v942_v16 = vmax.f32 %v904_v13, 0.0 }
 0x16e   : > { %979 = vst.msk [vmem:[%s1752_s23 + $0x14] sm:$0xf] %vm973_vm12, %v962_v14  ;;  %v958_v17 = vpack.c.bf16 %v942_v16, %v942_v16 }
 0x170   : > { %975 = vst.msk [vmem:[%s1752_s23 + $0x4] sm:$0xf] %vm973_vm12, %v958_v17 }
 0x18e   : > { %v926_v18 = vpop.f32.mrf.mxu2 }
 0x18f   : > { %v927_v56 = vadd.f32 %v1745_v46, %v926_v18 }
 0x191   : > { %v951_v19 = vmax.f32 %v927_v56, 0.0 }
 0x193   : > { %v967_v20 = vpack.c.bf16 %v951_v19, %v951_v19 }
 0x195   : > { %984 = vst.msk [vmem:[%s1752_s23 + $0x28] sm:$0xf] %vm973_vm12, %v967_v20 }
 0x196   : > { %v928_v23 = vpop.f32.mrf.mxu2 }
 0x197   : > { %v929_v15 = vadd.f32 %v1745_v46, %v928_v23 }
 0x199   : > { %v952_v24 = vmax.f32 %v929_v15, 0.0 }
 0x19b   : > { %v968_v25 = vpack.c.bf16 %v952_v24, %v952_v24 }
 0x19d   : > { %985 = vst.msk [vmem:[%s1752_s23 + $0x2c] sm:$0xf] %vm973_vm12, %v968_v25 }
 0x19f   : > { %v936_v6 = vpop.f32.mrf.mxu3 }
 0x1a0   : > { %v937_v26 = vadd.f32 %v1745_v46, %v936_v6 }
 0x1a2   : > { %v955_v42 = vmax.f32 %v937_v26, 0.0 }
 0x1a4   : > { %v971_v27 = vpack.c.bf16 %v955_v42, %v955_v42 }
 0x1a6   : > { %988 = vst.msk [vmem:[%s1752_s23 + $0x38] sm:$0xf] %vm973_vm12, %v971_v27 }
 0x1a7   : > { %v938_v29 = vpop.f32.mrf.mxu3 }
 0x1a8   : > { %v939_v63 = vadd.f32 %v1745_v46, %v938_v29 }
 0x1aa   : > { %v956_v30 = vmax.f32 %v939_v63, 0.0 }
 0x1ac   : > { %v972_v31 = vpack.c.bf16 %v956_v30, %v956_v30 }
 0x1ae   : > { %989 = vst.msk [vmem:[%s1752_s23 + $0x3c] sm:$0xf] %vm973_vm12, %v972_v31 }
 0x1b2   : > { %v906_v32 = vpop.f32.mrf.mxu0 }
 0x1b3   : > { %v907_v48 = vadd.f32 %v1745_v46, %v906_v32 }
 0x1b5   : > { %v943_v33 = vmax.f32 %v907_v48, 0.0 }
 0x1b7   : > { %v959_v38 = vpack.c.bf16 %v943_v33, %v943_v33 }
 0x1b9   : > { %976 = vst.msk [vmem:[%s1752_s23 + $0x8] sm:$0xf] %vm973_vm12, %v959_v38  ;;  %v916_v43 = vpop.f32.mrf.mxu1 }
 0x1ba   : > { %v917_v54 = vadd.f32 %v1745_v46, %v916_v43  ;;  %v908_v35 = vpop.f32.mrf.mxu0 }
 0x1bb   : > { %v909_v36 = vadd.f32 %v1745_v46, %v908_v35 }
 0x1bc   : > { %v947_v39 = vmax.f32 %v917_v54, 0.0 }
 0x1bd   : > { %v944_v37 = vmax.f32 %v909_v36, 0.0 }
 0x1be   : > { %v963_v57 = vpack.c.bf16 %v947_v39, %v947_v39 }
 0x1bf   : > { %v960_v40 = vpack.c.bf16 %v944_v37, %v944_v37 }
 0x1c0   : > { %980 = vst.msk [vmem:[%s1752_s23 + $0x18] sm:$0xf] %vm973_vm12, %v963_v57 }
 0x1c1   : > { %977 = vst.msk [vmem:[%s1752_s23 + $0xc] sm:$0xf] %vm973_vm12, %v960_v40  ;;  %v918_v41 = vpop.f32.mrf.mxu1 }
 0x1c2   : > { %v919_v44 = vadd.f32 %v1745_v46, %v918_v41 }
 0x1c4   : > { %v948_v45 = vmax.f32 %v919_v44, 0.0 }
 0x1c6   : > { %v964_v53 = vpack.c.bf16 %v948_v45, %v948_v45 }
 0x1c8   : > { %981 = vst.msk [vmem:[%s1752_s23 + $0x1c] sm:$0xf] %vm973_vm12, %v964_v53 }
 0x1c9 PF: > { %s14_s19 = sadd.s32 1, %s1304_s19   ;;  %s1821_s15 = smov %s1296_s17 }
 0x1ca   : > { %p11_p9 = scmp.ge.s32.totalorder %s14_s19, 6   ;;  %s1822_s16 = smov %s1300_s18 }
 0x1cb   : > { %s1823_s17 = smov %s1826_s20  ;;  %s1824_s18 = smov %s1830_s21 }
 0x1cc   :  { %13 = sbr.rel (!%p11_p9) target bundleno = 3 (0x3), region = 69 }

// kernel: rsu4_forward.10
= control target key start
LH: loop header
LB: loop body
LE: loop exit
PB: predicated region body
PF: predicated region fallthrough
CT: control target
= control target key end

     0   :  { %s944_s15 = smov 0   ;;  %s946_s16 = smov 0   ;;  %s1124_s0 = inlined_call_operand.vmem [shape: bf16[2,10,10,8], index: 0, kind: input, shape index: {}, may-alias: {0,1}]   ;;  %s1125_s1 = inlined_call_operand.vmem [shape: bf16[2,10,10,8], index: 1, kind: input, shape index: {}, may-alias: {0,1}]   ;;  %s1126_s2 = inlined_call_operand.vmem [shape: bf16[72,8], index: 2, kind: input, shape index: {}]   ;;  %s1127_s3 = inlined_call_operand.vmem [shape: f32[1,8], index: 3, kind: input, shape index: {}]   ;;  %s1128_s4 = inlined_call_operand.vmem [shape: bf16[2,8,8,8], index: 4, kind: output, shape index: {}]  }
   0x1   :  { %s948_s17 = smov 0   ;;  %s950_s18 = smov 0  }
   0x2   :  { %s952_s19 = smov 0  }
   0x3 LB: > { %s23_s20 = sadd.s32 1, %s901_s17  ;;  %s26_s21 = sadd.s32 1, %s905_s18  ;;  %s909_s19 = sphi %s952_s19, %s14_s19   ;;  %s905_s18 = sphi %s950_s18, %s1132_s18   ;;  %s901_s17 = sphi %s948_s17, %s1131_s17   ;;  %s897_s16 = sphi %s946_s16, %s1130_s16   ;;  %s893_s15 = sphi %s944_s15, %s1129_s15  }
   0x4   : > { %p24_p0 = scmp.ge.s32.totalorder %s23_s20, 2  ;;  %p767_p1 = scmp.ge.s32.totalorder %s909_s19, 1 }
   0x5   : > { %p220_p2 = scmp.lt.s32.totalorder %s909_s19, 5 }
   0x6   : > { %s1134_s20 = smov (%p24_p0, %s23_s20), 0  ;;  %s1136_s21 = smov (!%p24_p0, %s26_s21), %s905_s18 }
   0x7   : > { %p221_p3 = pnand %p767_p1, %p220_p2  ;;  %p28_p4 = scmp.ge.s32.totalorder %s1136_s21, 2 }
   0x8   : > { %s974_s22 = sshll.u32 (!%p221_p3), %s893_s15, 2  ;;  %p278_p5 = scmp.lt.s32.totalorder (!%p221_p3), %s897_s16, 1 }
   0x9   : > { %s1138_s21 = smov (%p28_p4, %s1136_s21), 0  ;;  %224 = sbr.rel (%p221_p3) target bundleno = 370 (0x172), region = 36 }
   0xa   : > { %p280_p6 = scmp.lt.s32.totalorder (!%p221_p3), %s974_s22, 9  ;;  %s815_s5 = sadd.s32 (!%p221_p3), 4, %s974_s22 }
   0xb   : > { %p298_p7 = scmp.lt.s32.totalorder (!%p221_p3), %s815_s5, 9  ;;  %s911_s6 = smov (!%p221_p3), 16  }
   0xc   : > { %s912_s9 = smov (!%p221_p3), 24   ;;  %s913_s10 = smov (!%p221_p3), 8  }
   0xd   : > { %s914_s15 = smov (!%p221_p3), 32   ;;  %p311_p8 = scmp.lt.s32.totalorder (!%p221_p3), %s974_s22, 7 }
   0xe   : > { %s1140_s16 = smov (!%p278_p5, %s897_s16), 1  ;;  %s1142_s5 = smov (!%p298_p7, %s815_s5), 9  ;;  %vm478_vm0 = vcmask 64512   ;;  %vm491_vm1 = vcmask 130048   ;;  %vm611_vm2 = vcmask 1043456   ;;  %vm500_vm3 = vcmask 195584  }
   0xf   : > { %s281_s23 = scalar_select %p280_p6, %s974_s22, 9  ;;  %vm509_vm4 = vcmask 261120   ;;  %vm518_vm5 = vcmask 326656   ;;  %vm527_vm6 = vcmask 392192   ;;  %vm536_vm7 = vcmask 457728  }
  0x10   : > { %s821_s24 = smul.u32 20, %s1140_s16  ;;  %s773_s7 = sshll.u32 %s1142_s5, 1  ;;  %vm545_vm8 = vcmask 523264   ;;  %vm604_vm9 = vcmask 588800   ;;  %vm642_vm10 = vcmask 60416  }
  0x11   : > { %s769_s25 = sshll.u32 %s281_s23, 1  ;;  %s915_s23 = smov 40  }
  0x12   : > { %s284_s26 = sadd.s32 %s821_s24, %s769_s25  ;;  %s302_s8 = sadd.s32 %s821_s24, %s773_s7 }
  0x13   : > { %s770_s27 = sshll.u32 %s284_s26, 2  ;;  %s774_s11 = sshll.u32 %s302_s8, 2 }
  0x14   : > { %s986_s30 = scalar_lea.vmem %s1124_s0, %s770_s27  ;;  %s1020_s14 = scalar_lea.vmem %s1125_s1, %s774_s11 }
  0x15   : > { %v990_v0 = vld [vmem:[%s986_s30 + $0x18] sm:$0xf]  ;;  %v326_v1 = vld [vmem:[%s986_s30 + $0x1c] sm:$0x1]  ;;  %v994_v2 = vld [vmem:[%s986_s30 + $0x10] sm:$0xf] }
  0x16   : > { %v345_v3 = vunpack.c.l.b16 %v990_v0  ;;  %v346_v4 = vunpack.c.l.b16 %v326_v1  ;;  %v324_v5 = vld [vmem:[%s986_s30 + $0x14] sm:$0x1]  ;;  %v343_v6 = vunpack.c.l.b16 %v994_v2  ;;  %v780_v7 = vld [vmem:[%s986_s30] sm:$0xf]  ;;  %v809_v8 = vld [vmem:[%s986_s30] sm:$0x10] }
  0x17   : > { %v344_v9 = vunpack.c.l.b16 %v324_v5  ;;  %v781_v10 = vor.u32 %v809_v8, %v780_v7  ;;  %v1002_v11 = vld [vmem:[%s986_s30 + $0x8] sm:$0xf]  ;;  %v322_v12 = vld [vmem:[%s986_s30 + $0xc] sm:$0x1]  ;;  %v327_v39 = vld [vmem:[%s1020_s14] sm:$0xf] }
  0x18   : > { %v350_v13 = vpack.c.b16 %v346_v4, %v345_v3  ;;  %v341_v14 = vunpack.c.l.b16 %v1002_v11  ;;  %v342_v17 = vunpack.c.l.b16 %v322_v12  ;;  %v400_v40 = vunpack.c.l.b16 %v327_v39  ;;  %v328_v41 = vld [vmem:[%s1020_s14 + $0x4] sm:$0x1]  ;;  %v329_v52 = vld [vmem:[%s1020_s14 + $0x8] sm:$0xf]  ;;  %s916_s24 = smov 48   ;;  %s917_s25 = smov 56  }
  0x19   : > { %v349_v15 = vpack.c.b16 %v344_v9, %v343_v6  ;;  %v354_v16 = vshll.u32 %v781_v10, 16  ;;  %v387_v18 = vrot.slane %v781_v10, 1  ;;  %v352_v24 = vshrl.u32 %v781_v10, 16  ;;  %v330_v54 = vld [vmem:[%s1020_s14 + $0xc] sm:$0x1]  ;;  %s918_s26 = smov 64  }
  0x1a   : > { %v1006_v19 = vrot.slane %v350_v13, 1  ;;  %v348_v26 = vpack.c.b16 %v342_v17, %v341_v14  ;;  %v401_v27 = vpack.c.b16 %v341_v14, %v341_v14  ;;  %v375_v29 = vshll.u32 %v350_v13, 16  ;;  %s1144_s22 = smov (!%p311_p8, %s974_s22), 7 }
  0x1b   : > { %v1008_v20 = vrot.slane %v349_v15, 1  ;;  %v368_v21 = vshll.u32 %v349_v15, 16  ;;  %391 = vrot.lane.b32.xlu2 %v387_v18, %s911_s6  ;;  %v366_v22 = vshrl.u32 %v349_v15, 16  ;;  %v356_v25 = vrot.slane %v354_v16, 1  ;;  %v562_v15 = vld [vmem:[%s1126_s2 + $0x20] sm:$0xf] }
  0x1c   : > { %397 = vrot.lane.b32.xlu1 %v1006_v19, %s911_s6  ;;  %v361_v31 = vshll.u32 %v348_v26, 16  ;;  %v373_v32 = vshrl.u32 %v350_v13, 16  ;;  %v377_v33 = vrot.slane %v375_v29, 1  ;;  %v359_v34 = vshrl.u32 %v348_v26, 16  ;;  %v810_v29 = vld [vmem:[%s1126_s2] sm:$0xff] }
  0x1d   : > { %395 = vrot.lane.b32.xlu0 %v1008_v20, %s911_s6  ;;  %v370_v23 = vrot.slane %v368_v21, 1  ;;  %v357_v30 = vor.u32 %v356_v25, %v352_v24  ;;  %v388_v36 = vrot.slane %v348_v26, 1  ;;  %v404_v42 = vpack.c.b16 %v400_v40, %v400_v40  ;;  %v812_v24 = vld [vmem:[%s1126_s2 + $0x10] sm:$0xff]  ;;  %v811_v25 = vld [vmem:[%s1126_s2 + $0x8] sm:$0xff] }
  0x1e   : > { %v363_v35 = vrot.slane %v361_v31, 1  ;;  %v378_v37 = vor.u32 %v377_v33, %v373_v32  ;;  %v403_v43 = vpack.c.b16 %v345_v3, %v345_v3  ;;  %v402_v44 = vpack.c.b16 %v343_v6, %v343_v6 }
  0x1f   : > { %v371_v28 = vor.u32 %v370_v23, %v366_v22  ;;  %v414_v45 = vunpack.c.l.b16 %v328_v41  ;;  %v441_v53 = vunpack.c.l.b16 %v329_v52  ;;  %v452_v56 = vunpack.c.l.b16 %v330_v54 }
  0x20   : > { %v364_v38 = vor.u32 %v363_v35, %v359_v34  ;;  %v594_v16 = vunpack.c.l.b16 %v562_v15  ;;  %v319_v34 = vld [vmem:[%s986_s30] sm:$0xf]  ;;  %s776_s30 = sshll.u32 %s1140_s16, 3 }
  0x21   : > { %v415_v46 = vpack.c.b16 %v414_v45, %v400_v40  ;;  %v442_v55 = vpack.c.b16 %v441_v53, %v441_v53  ;;  %v453_v57 = vpack.c.b16 %v452_v56, %v441_v53  ;;  %s314_s14 = sadd.s32 %s776_s30, %s1144_s22 }
  0x23   : > { %405 = vrot.lane.b32.xlu2 %v401_v27, %s912_s9  ;;  %v419_v47 = vshll.u32 %v415_v46, 16  ;;  %v417_v48 = vshrl.u32 %v415_v46, 16  ;;  %v431_v51 = vrot.slane %v415_v46, 1  ;;  %v457_v58 = vshll.u32 %v453_v57, 16 }
  0x24   : > { %383 = vrot.lane.b32.xlu1 %v371_v28, %s913_s10  ;;  %v455_v59 = vshrl.u32 %v453_v57, 16  ;;  %v469_v62 = vrot.slane %v453_v57, 1 }
  0x25   : > { %379 = vrot.lane.b32.xlu0 %v357_v30, %s913_s10  ;;  %v421_v49 = vrot.slane %v419_v47, 1  ;;  %v459_v60 = vrot.slane %v457_v58, 1 }
  0x27   : > { %v422_v50 = vor.u32 %v421_v49, %v417_v48  ;;  %v460_v61 = vor.u32 %v459_v60, %v455_v59 }
  0x2b   : > { %393 = vrot.lane.b32.xlu2 %v388_v36, %s911_s6 }
  0x2c   : > { %385 = vrot.lane.b32.xlu1 %v378_v37, %s913_s10 }
  0x2d   : > { %381 = vrot.lane.b32.xlu0 %v364_v38, %s913_s10 }
  0x33   : > { %411 = vrot.lane.b32.xlu2 %v404_v42, %s912_s9 }
  0x34   : > { %409 = vrot.lane.b32.xlu1 %v403_v43, %s912_s9 }
  0x35   : > { %407 = vrot.lane.b32.xlu0 %v402_v44, %s912_s9 }
  0x3b   : > { %427 = vrot.lane.b32.xlu2 %v378_v37, %s914_s15 }
  0x3c   : > { %425 = vrot.lane.b32.xlu1 %v371_v28, %s914_s15 }
  0x3d   : > { %423 = vrot.lane.b32.xlu0 %v364_v38, %s914_s15 }
  0x43   : > { %434 = vrot.lane.b32.xlu2 %v1008_v20, %s915_s23 }
  0x44   : > { %432 = vrot.lane.b32.xlu1 %v388_v36, %s915_s23 }
  0x45   : > { %429 = vrot.lane.b32.xlu0 %v422_v50, %s914_s15  ;;  %s777_s15 = sshll.u32 %s314_s14, 2 }
  0x4b   : > { %443 = vrot.lane.b32.xlu2 %v402_v44, %s916_s24 }
  0x4c   : > { %438 = vrot.lane.b32.xlu1 %v431_v51, %s915_s23 }
  0x4d   : > { %436 = vrot.lane.b32.xlu0 %v1006_v19, %s915_s23 }
  0x53   : > { %449 = vrot.lane.b32.xlu2 %v442_v55, %s916_s24 }
  0x54   : > { %447 = vrot.lane.b32.xlu1 %v404_v42, %s916_s24 }
  0x55   : > { %445 = vrot.lane.b32.xlu0 %v403_v43, %s916_s24 }
  0x5b   : > { %465 = vrot.lane.b32.xlu2 %v422_v50, %s917_s25 }
  0x5c   : > { %463 = vrot.lane.b32.xlu1 %v378_v37, %s917_s25 }
  0x5d   : > { %461 = vrot.lane.b32.xlu0 %v371_v28, %s917_s25 }
  0x63   : > { %472 = vrot.lane.b32.xlu2 %v1006_v19, %s918_s26  ;;  %v599_v19 = vpack.c.b16 %v594_v16, %v594_v16 }
  0x64   : > { %470 = vrot.lane.b32.xlu1 %v1008_v20, %s918_s26 }
  0x65   : > { %467 = vrot.lane.b32.xlu0 %v460_v61, %s917_s25  ;;  %v613_v20 = vsel %vm611_vm2, %v599_v19, 0  ;;  %s316_s25 = scalar_lea.vmem %s1128_s4, %s777_s15 }
  0x66   : > { %618 = vmatpush.bf16.msra.mxu0 %v613_v20  ;;  %816 = vmatpush.bf16.msra.mxu1 %v613_v20 }
  0x6c   : > { %476 = vrot.lane.b32.xlu1 %v469_v62, %s918_s26 }
  0x6d   : > { %474 = vrot.lane.b32.xlu0 %v431_v51, %s918_s26 }
  0x75   : > { %v392_v63 = vpop.permute.xlu2 %391 }
  0x7d   : > { %v406_v1 = vpop.permute.xlu2 %405 }
  0x85   : > { %v394_v3 = vpop.permute.xlu2 %393 }
  0x8d   : > { %v1033_v7 = vpop.permute.xlu2 %411 }
  0x8e   : > { %v1031_v4 = vpop.permute.xlu1 %397 }
  0x8f   : > { %v396_v5 = vpop.permute.xlu0 %395 }
  0x95   : > { %v1040_v14 = vpop.permute.xlu2 %427 }
  0x96   : > { %v384_v6 = vpop.permute.xlu1 %383 }
  0x97   : > { %v487_v8 = vsel %vm478_vm0, %v994_v2, %v384_v6  ;;  %v380_v9 = vpop.permute.xlu0 %379  ;;  %v813_v2 = vld [vmem:[%s1126_s2 + $0x18] sm:$0xff] }
  0x98   : > { %v1038_v10 = vsel %vm491_vm1, %v487_v8, %v396_v5  ;;  %619 = vmatpush.bf16.msra.mxu0 %v813_v2  ;;  %817 = vmatpush.bf16.msra.mxu1 %v813_v2  ;;  %v481_v38 = vsel %vm478_vm0, %v319_v34, %v380_v9 }
  0x99   : > { %v493_v41 = vsel %vm491_vm1, %v481_v38, %v392_v63 }
  0x9a   : > { %v502_v45 = vsel %vm500_vm3, %v493_v41, %v406_v1 }
  0x9c   : > { %620 = vmatpush.bf16.msra.mxu0 %v812_v24  ;;  %818 = vmatpush.bf16.msra.mxu1 %v812_v24 }
  0x9d   : > { %v435_v21 = vpop.permute.xlu2 %434 }
  0x9e   : > { %v386_v12 = vpop.permute.xlu1 %385 }
  0x9f   : > { %v382_v13 = vpop.permute.xlu0 %381  ;;  %v490_v48 = vsel %vm478_vm0, %v990_v0, %v386_v12 }
  0xa0   : > { %621 = vmatpush.bf16.msra.mxu0 %v811_v25  ;;  %819 = vmatpush.bf16.msra.mxu1 %v811_v25  ;;  %v484_v36 = vsel %vm478_vm0, %v1002_v11, %v382_v13  ;;  %v499_v52 = vsel %vm491_vm1, %v490_v48, %v1031_v4 }
  0xa1   : > { %v495_v39 = vsel %vm491_vm1, %v484_v36, %v394_v3  ;;  %v508_v59 = vsel %vm500_vm3, %v499_v52, %v1033_v7 }
  0xa4   : > { %622 = vmatpush.bf16.msra.mxu0 %v810_v29  ;;  %820 = vmatpush.bf16.msra.mxu1 %v810_v29 }
  0xa5   : > { %v444_v26 = vpop.permute.xlu2 %443 }
  0xa6   : > { %v410_v17 = vpop.permute.xlu1 %409 }
  0xa7   : > { %v408_v18 = vpop.permute.xlu0 %407  ;;  %v506_v57 = vsel %vm500_vm3, %v1038_v10, %v410_v17  ;;  %v870_v17 = vld [vmem:[%s1127_s3] ss:$0 sm:$0xff] }
  0xa8   : > { %v504_v40 = vsel %vm500_vm3, %v495_v39, %v408_v18  ;;  %v515_v63 = vsel %vm509_vm4, %v506_v57, %v1040_v14 }
  0xad   : > { %v450_v31 = vpop.permute.xlu2 %449 }
  0xae   : > { %v426_v22 = vpop.permute.xlu1 %425 }
  0xaf   : > { %v424_v23 = vpop.permute.xlu0 %423  ;;  %v513_v42 = vsel %vm509_vm4, %v504_v40, %v426_v22 }
  0xb0   : > { %v522_v11 = vsel %vm518_vm5, %v513_v42, %v435_v21  ;;  %v511_v46 = vsel %vm509_vm4, %v502_v45, %v424_v23 }
  0xb5   : > { %v466_v37 = vpop.permute.xlu2 %465 }
  0xb6   : > { %v433_v27 = vpop.permute.xlu1 %432 }
  0xb7   : > { %v430_v28 = vpop.permute.xlu0 %429  ;;  %v520_v49 = vsel %vm518_vm5, %v511_v46, %v433_v27 }
  0xb8   : > { %v529_v53 = vsel %vm527_vm6, %v520_v49, %v444_v26  ;;  %v517_v62 = vsel %vm509_vm4, %v508_v59, %v430_v28 }
  0xbd   : > { %v473_v51 = vpop.permute.xlu2 %472 }
  0xbe   : > { %v439_v30 = vpop.permute.xlu1 %438 }
  0xbf   : > { %v437_v32 = vpop.permute.xlu0 %436  ;;  %v526_v1 = vsel %vm518_vm5, %v517_v62, %v439_v30 }
  0xc0   : > { %v524_v4 = vsel %vm518_vm5, %v515_v63, %v437_v32  ;;  %v535_v6 = vsel %vm527_vm6, %v526_v1, %v450_v31 }
  0xc6   : > { %v448_v33 = vpop.permute.xlu1 %447 }
  0xc7   : > { %v446_v35 = vpop.permute.xlu0 %445  ;;  %v533_v5 = vsel %vm527_vm6, %v524_v4, %v448_v33 }
  0xc8   : > { %v531_v47 = vsel %vm527_vm6, %v522_v11, %v446_v35  ;;  %v542_v9 = vsel %vm536_vm7, %v533_v5, %v466_v37 }
  0xce   : > { %v464_v43 = vpop.permute.xlu1 %463 }
  0xcf   : > { %v462_v44 = vpop.permute.xlu0 %461  ;;  %v540_v50 = vsel %vm536_vm7, %v531_v47, %v464_v43 }
  0xd0   : > { %v549_v54 = vsel %vm545_vm8, %v540_v50, %v473_v51  ;;  %v538_v55 = vsel %vm536_vm7, %v529_v53, %v462_v44 }
  0xd1   : > { %v572_v60 = vunpack.c.l.b16 %v549_v54 }
  0xd6   : > { %v471_v56 = vpop.permute.xlu1 %470 }
  0xd7   : > { %v547_v0 = vsel %vm545_vm8, %v538_v55, %v471_v56  ;;  %v468_v58 = vpop.permute.xlu0 %467 }
  0xd8   : > { %v571_v61 = vunpack.c.l.b16 %v547_v0  ;;  %v544_v7 = vsel %vm536_vm7, %v535_v6, %v468_v58 }
  0xda   : > { %v575_v3 = vpack.c.b16 %v572_v60, %v571_v61 }
  0xdc   : > { %798 = vmatmul.msk.bf16.vlgmr.msra.gmra.mxu0 %vm604_vm9, %v575_v3 }
  0xde   : > { %v477_v8 = vpop.permute.xlu1 %476 }
  0xdf   : > { %v553_v10 = vsel %vm545_vm8, %v544_v7, %v477_v8  ;;  %v475_v12 = vpop.permute.xlu0 %474 }
  0xe0   : > { %v574_v13 = vunpack.c.l.b16 %v553_v10  ;;  %v551_v14 = vsel %vm545_vm8, %v542_v9, %v475_v12 }
  0xe1   : > { %v573_v15 = vunpack.c.l.b16 %v551_v14 }
  0xe3   : > { %v576_v16 = vpack.c.b16 %v574_v13, %v573_v15 }
  0xe5   : > { %799 = vmatmul.msk.bf16.vlgmr.msra.gmra.mxu1 %vm604_vm9, %v576_v16 }
 0x159   : > { %v624_v18 = vpop.f32.mrf.mxu0 }
 0x15a   : > { %v625_v19 = vadd.f32 %v870_v17, %v624_v18 }
 0x15c   : > { %v634_v20 = vmax.f32 %v625_v19, 0.0 }
 0x15e   : > { %v638_v21 = vpack.c.bf16 %v634_v20, %v634_v20 }
 0x160   : > { %643 = vst.msk [vmem:[%s316_s25] sm:$0xf] %vm642_vm10, %v638_v21 }
 0x161   : > { %v626_v2 = vpop.f32.mrf.mxu0 }
 0x162   : > { %v627_v22 = vadd.f32 %v870_v17, %v626_v2  ;;  %v629_v23 = vpop.f32.mrf.mxu1 }
 0x163   : > { %v630_v24 = vadd.f32 %v870_v17, %v629_v23 }
 0x164   : > { %v635_v25 = vmax.f32 %v627_v22, 0.0 }
 0x165   : > { %v636_v26 = vmax.f32 %v630_v24, 0.0 }
 0x166   : > { %v639_v27 = vpack.c.bf16 %v635_v25, %v635_v25 }
 0x167   : > { %v640_v28 = vpack.c.bf16 %v636_v26, %v636_v26 }
 0x168   : > { %644 = vst.msk [vmem:[%s316_s25 + $0x4] sm:$0xf] %vm642_vm10, %v639_v27 }
 0x169   : > { %645 = vst.msk [vmem:[%s316_s25 + $0x8] sm:$0xf] %vm642_vm10, %v640_v28 }
 0x16a   : > { %v631_v29 = vpop.f32.mrf.mxu1 }
 0x16b   : > { %v632_v30 = vadd.f32 %v870_v17, %v631_v29 }
 0x16d   : > { %v637_v31 = vmax.f32 %v632_v30, 0.0 }
 0x16f   : > { %v641_v32 = vpack.c.bf16 %v637_v31, %v637_v31 }
 0x171   : > { %646 = vst.msk [vmem:[%s316_s25 + $0xc] sm:$0xf] %vm642_vm10, %v641_v32 }
 0x172 PF: > { %s14_s19 = sadd.s32 1, %s909_s19   ;;  %s1129_s15 = smov %s901_s17 }
 0x173   : > { %p11_p9 = scmp.ge.s32.totalorder %s14_s19, 6   ;;  %s1130_s16 = smov %s905_s18 }
 0x174   : > { %s1131_s17 = smov %s1134_s20  ;;  %s1132_s18 = smov %s1138_s21 }
 0x175   :  { %13 = sbr.rel (!%p11_p9) target bundleno = 3 (0x3), region = 69 }

// kernel: rsu4_forward.9
= control target key start
LH: loop header
LB: loop body
LE: loop exit
PB: predicated region body
PF: predicated region fallthrough
CT: control target
= control target key end

     0   :  { %s1339_s15 = smov 0   ;;  %s1341_s16 = smov 0   ;;  %s1815_s0 = inlined_call_operand.vmem [shape: bf16[2,18,18,4], index: 0, kind: input, shape index: {}, may-alias: {0,1}]   ;;  %s1816_s1 = inlined_call_operand.vmem [shape: bf16[2,18,18,4], index: 1, kind: input, shape index: {}, may-alias: {0,1}]   ;;  %s1817_s2 = inlined_call_operand.vmem [shape: bf16[36,8], index: 2, kind: input, shape index: {}]   ;;  %s1818_s3 = inlined_call_operand.vmem [shape: f32[1,8], index: 3, kind: input, shape index: {}]   ;;  %s1819_s4 = inlined_call_operand.vmem [shape: bf16[2,16,16,8], index: 4, kind: output, shape index: {}]  }
   0x1   :  { %s1343_s17 = smov 0   ;;  %s1345_s18 = smov 0  }
   0x2   :  { %s1347_s19 = smov 0  }
   0x3 LB: > { %s23_s20 = sadd.s32 1, %s1296_s17  ;;  %s26_s21 = sadd.s32 1, %s1300_s18  ;;  %s1304_s19 = sphi %s1347_s19, %s14_s19   ;;  %s1300_s18 = sphi %s1345_s18, %s1824_s18   ;;  %s1296_s17 = sphi %s1343_s17, %s1823_s17   ;;  %s1292_s16 = sphi %s1341_s16, %s1822_s16   ;;  %s1288_s15 = sphi %s1339_s15, %s1821_s15  }
   0x4   : > { %p24_p0 = scmp.ge.s32.totalorder %s23_s20, 2  ;;  %p1116_p1 = scmp.ge.s32.totalorder %s1304_s19, 1 }
   0x5   : > { %p220_p2 = scmp.lt.s32.totalorder %s1304_s19, 5 }
   0x6   : > { %s1826_s20 = smov (%p24_p0, %s23_s20), 0  ;;  %s1828_s21 = smov (!%p24_p0, %s26_s21), %s1300_s18 }
   0x7   : > { %p221_p3 = pnand %p1116_p1, %p220_p2  ;;  %p28_p4 = scmp.ge.s32.totalorder %s1828_s21, 2 }
   0x8   : > { %s1369_s22 = sshll.u32 (!%p221_p3), %s1288_s15, 3  ;;  %p279_p5 = scmp.lt.s32.totalorder (!%p221_p3), %s1292_s16, 1 }
   0x9   : > { %s1830_s21 = smov (%p28_p4, %s1828_s21), 0  ;;  %224 = sbr.rel (%p221_p3) target bundleno = 457 (0x1c9), region = 36 }
   0xa   : > { %p281_p6 = scmp.lt.s32.totalorder (!%p221_p3), %s1369_s22, 17  ;;  %s1204_s5 = sadd.s32 (!%p221_p3), 8, %s1369_s22 }
   0xb   : > { %s1306_s6 = smov (!%p221_p3), 12   ;;  %p1408_p7 = scmp.lt.s32.totalorder (!%p221_p3), %s1204_s5, 17 }
   0xc   : > { %s1307_s8 = smov (!%p221_p3), 8   ;;  %s1308_s9 = smov (!%p221_p3), 4  }
   0xd   : > { %s1309_s12 = smov (!%p221_p3), 20   ;;  %p312_p8 = scmp.lt.s32.totalorder (!%p221_p3), %s1369_s22, 15 }
   0xe   : > { %s1832_s16 = smov (!%p279_p5, %s1292_s16), 1  ;;  %vm528_vm0 = vcmask 1046528   ;;  %vm415_vm1 = vsmask.f32 7424  ;;  %s1834_s5 = smov (!%p1408_p7, %s1204_s5), 17  ;;  %vm888_vm2 = vcmask 1041408  }
   0xf   : > { %s282_s23 = scalar_select %p281_p6, %s1369_s22, 17  ;;  %vm711_vm3 = vcmask 31744   ;;  %vm728_vm4 = vcmask 64512   ;;  %vm745_vm5 = vcmask 97280   ;;  %vm762_vm6 = vcmask 130048  }
  0x10   : > { %s1215_s24 = smul.u32 54, %s1832_s16  ;;  %vm779_vm7 = vcmask 162816   ;;  %vm796_vm8 = vcmask 195584   ;;  %vm830_vm9 = vcmask 261120   ;;  %vm813_vm10 = vcmask 228352   ;;  %s1836_s22 = smov (!%p312_p8, %s1369_s22), 15 }
  0x11   : > { %s1214_s25 = smul.u32 3, %s282_s23  ;;  %vm871_vm11 = vcmask 293888   ;;  %vm973_vm12 = vcmask 60416  }
  0x12   : > { %s1216_s10 = smul.u32 3, %s1834_s5 }
  0x13   : > { %s285_s26 = sadd.s32 %s1215_s24, %s1214_s25  ;;  %s1311_s25 = smov 24  }
  0x14   : > { %s1118_s27 = sshll.u32 %s285_s26, 2  ;;  %s303_s11 = sadd.s32 %s1216_s10, %s1215_s24 }
  0x15   : > { %s1381_s30 = scalar_lea.vmem %s1815_s0, %s1118_s27  ;;  %s1121_s13 = sshll.u32 %s303_s11, 2 }
  0x16   : > { %v1384_v0 = vld [vmem:[%s1381_s30 + $0x30] sm:$0xff]  ;;  %v335_v1 = vld [vmem:[%s1381_s30 + $0x38] sm:$0x1]  ;;  %v1388_v2 = vld [vmem:[%s1381_s30 + $0x48] sm:$0xff]  ;;  %s1469_s23 = scalar_lea.vmem %s1816_s1, %s1121_s13  ;;  %s1310_s24 = smov 16  }
  0x17   : > { %v403_v3 = vunpack.c.l.b16 %v335_v1  ;;  %v341_v4 = vld [vmem:[%s1381_s30 + $0x50] sm:$0x1]  ;;  %v465_v5 = vshrl.u32 %v1384_v0, 16  ;;  %v467_v6 = vshll.u32 %v1384_v0, 16  ;;  %v344_v8 = vld [vmem:[%s1381_s30 + $0x5c] sm:$0x1] }
  0x18   : > { %v405_v7 = vunpack.c.l.b16 %v341_v4  ;;  %v1395_v9 = vld [vmem:[%s1381_s30 + $0x3c] sm:$0xff]  ;;  %v541_v11 = vrot.slane %v1384_v0, 1  ;;  %v491_v12 = vshll.u32 %v1388_v2, 16  ;;  %v1401_v15 = vld [vmem:[%s1381_s30 + $0x54] sm:$0xff]  ;;  %v406_v18 = vunpack.c.l.b16 %v344_v8  ;;  %v338_v19 = vld [vmem:[%s1381_s30 + $0x44] sm:$0x1] }
  0x19   : > { %v411_v10 = vpack.c.b16 %v403_v3, %v403_v3  ;;  %v469_v13 = vrot.slane %v467_v6, 1  ;;  %582 = vrot.lane.b32.xlu2 %v1395_v9, %s1306_s6  ;;  %v489_v21 = vshrl.u32 %v1388_v2, 16  ;;  %v503_v26 = vshll.u32 %v1401_v15, 16  ;;  %v329_v49 = vld [vmem:[%s1381_s30 + $0x20] sm:$0x1]  ;;  %v1458_v54 = vld [vmem:[%s1381_s30 + $0x18] sm:$0xff] }
  0x1a   : > { %v413_v14 = vpack.c.b16 %v405_v7, %v405_v7  ;;  %v493_v24 = vrot.slane %v491_v12, 1  ;;  %v404_v27 = vunpack.c.l.b16 %v338_v19  ;;  %v547_v29 = vrot.slane %v1388_v2, 1  ;;  %v323_v52 = vld [vmem:[%s1381_s30 + $0x8] sm:$0x1]  ;;  %v1464_v57 = vld [vmem:[%s1381_s30] sm:$0xff]  ;;  %s1312_s26 = smov 28  }
  0x1b   : > { %v542_v16 = vrot.slane %v411_v10, 1  ;;  %v472_v17 = vshll.u32 %v411_v10, 16  ;;  %v470_v20 = vor.u32 %v469_v13, %v465_v5  ;;  %v414_v31 = vpack.c.b16 %v406_v18, %v406_v18  ;;  %v1478_v63 = vld [vmem:[%s1469_s23] sm:$0xff]  ;;  %v347_v4 = vld [vmem:[%s1469_s23 + $0x8] sm:$0x1]  ;;  %s1313_s27 = smov 32  }
  0x1c   : > { %v496_v25 = vshll.u32 %v413_v14, 16  ;;  %v548_v30 = vrot.slane %v413_v14, 1  ;;  %v494_v32 = vor.u32 %v493_v24, %v489_v21  ;;  %v412_v34 = vpack.c.b16 %v404_v27, %v404_v27 }
  0x1d   : > { %v1414_v22 = vsel %vm528_vm0, %v541_v11, %v542_v16  ;;  %v474_v23 = vrot.slane %v472_v17, 1  ;;  %v479_v35 = vshll.u32 %v1395_v9, 16  ;;  %v501_v36 = vshrl.u32 %v1401_v15, 16 }
  0x1e   : > { %561 = vrot.lane.b32.xlu1 %v1414_v22, %s1307_s8  ;;  %v498_v33 = vrot.slane %v496_v25, 1  ;;  %v505_v37 = vrot.slane %v503_v26, 1  ;;  %v1434_v38 = vsel %vm528_vm0, %v547_v29, %v548_v30  ;;  %v508_v39 = vshll.u32 %v414_v31, 16  ;;  %v332_v30 = vld [vmem:[%s1381_s30 + $0x2c] sm:$0x1] }
  0x1f   : > { %v1420_v28 = vsel %vm415_vm1, %v470_v20, %v474_v23  ;;  %v544_v40 = vrot.slane %v1395_v9, 1  ;;  %v545_v41 = vrot.slane %v412_v34, 1  ;;  %v477_v43 = vshrl.u32 %v1395_v9, 16 }
  0x20   : > { %520 = vrot.lane.b32.xlu0 %v1420_v28, %s1308_s9  ;;  %v1438_v42 = vsel %vm415_vm1, %v494_v32, %v498_v33  ;;  %v481_v44 = vrot.slane %v479_v35, 1  ;;  %v484_v45 = vshll.u32 %v412_v34, 16  ;;  %v506_v46 = vor.u32 %v505_v37, %v501_v36  ;;  %v326_v33 = vld [vmem:[%s1381_s30 + $0x14] sm:$0x1]  ;;  %v1512_v37 = vld [vmem:[%s1381_s30 + $0x24] sm:$0xff] }
  0x21   : > { %586 = vrot.lane.b32.xlu2 %v1401_v15, %s1306_s6  ;;  %v510_v47 = vrot.slane %v508_v39, 1  ;;  %v1444_v48 = vsel %vm528_vm0, %v544_v40, %v545_v41  ;;  %v401_v55 = vunpack.c.l.b16 %v329_v49  ;;  %v399_v58 = vunpack.c.l.b16 %v323_v52 }
  0x22   : > { %v482_v50 = vor.u32 %v481_v44, %v477_v43  ;;  %v486_v51 = vrot.slane %v484_v45, 1  ;;  %v443_v60 = vshll.u32 %v1458_v54, 16  ;;  %v550_v61 = vrot.slane %v1401_v15, 1  ;;  %v1518_v43 = vld [vmem:[%s1381_s30 + $0xc] sm:$0xff] }
  0x23   : > { %v1455_v53 = vsel %vm415_vm1, %v506_v46, %v510_v47  ;;  %v409_v59 = vpack.c.b16 %v401_v55, %v401_v55  ;;  %v551_v62 = vrot.slane %v414_v31, 1  ;;  %v407_v1 = vpack.c.b16 %v399_v58, %v399_v58 }
  0x24   : > { %v1461_v56 = vsel %vm415_vm1, %v482_v50, %v486_v51  ;;  %v419_v3 = vshll.u32 %v1464_v57, 16  ;;  %v441_v5 = vshrl.u32 %v1458_v54, 16  ;;  %v445_v6 = vrot.slane %v443_v60, 1 }
  0x25   : > { %v448_v7 = vshll.u32 %v409_v59, 16  ;;  %v1486_v8 = vsel %vm528_vm0, %v550_v61, %v551_v62  ;;  %v417_v10 = vshrl.u32 %v1464_v57, 16  ;;  %v424_v12 = vshll.u32 %v407_v1, 16 }
  0x26   : > { %565 = vrot.lane.b32.xlu1 %v1434_v38, %s1307_s8  ;;  %v421_v11 = vrot.slane %v419_v3, 1  ;;  %v591_v13 = vunpack.c.l.b16 %v347_v4  ;;  %v446_v14 = vor.u32 %v445_v6, %v441_v5  ;;  %v596_v20 = vshll.u32 %v1478_v63, 16 }
  0x27   : > { %v450_v16 = vrot.slane %v448_v7, 1  ;;  %v426_v18 = vrot.slane %v424_v12, 1  ;;  %v535_v23 = vrot.slane %v1458_v54, 1  ;;  %v536_v24 = vrot.slane %v409_v59, 1 }
  0x28   : > { %524 = vrot.lane.b32.xlu0 %v1438_v42, %s1308_s9  ;;  %v422_v17 = vor.u32 %v421_v11, %v417_v10  ;;  %v592_v19 = vpack.c.b16 %v591_v13, %v591_v13  ;;  %v594_v26 = vshrl.u32 %v1478_v63, 16  ;;  %v598_v27 = vrot.slane %v596_v20, 1 }
  0x29   : > { %632 = vrot.lane.b32.xlu2 %v1444_v48, %s1309_s12  ;;  %v1497_v21 = vsel %vm415_vm1, %v446_v14, %v450_v16  ;;  %v529_v31 = vrot.slane %v1464_v57, 1  ;;  %v530_v32 = vrot.slane %v407_v1, 1  ;;  %v1508_v34 = vsel %vm528_vm0, %v535_v23, %v536_v24  ;;  %v1200_v23 = vld [vmem:[%s1469_s23 + $0xc] sm:$0xff] }
  0x2a   : > { %v427_v25 = vsel %vm415_vm1, %v422_v17, %v426_v18  ;;  %v601_v29 = vshll.u32 %v592_v19, 16  ;;  %v599_v35 = vor.u32 %v598_v27, %v594_v26  ;;  %v402_v39 = vunpack.c.l.b16 %v332_v30 }
  0x2b   : > { %v400_v40 = vunpack.c.l.b16 %v326_v33  ;;  %v531_v41 = vsel %vm528_vm0, %v529_v31, %v530_v32  ;;  %v455_v44 = vshll.u32 %v1512_v37, 16  ;;  %v621_v47 = vrot.slane %v1478_v63, 1 }
  0x2c   : > { %v603_v36 = vrot.slane %v601_v29, 1  ;;  %v410_v46 = vpack.c.b16 %v402_v39, %v402_v39  ;;  %v622_v49 = vrot.slane %v592_v19, 1  ;;  %v431_v51 = vshll.u32 %v1518_v43, 16  ;;  %v350_v19 = vld [vmem:[%s1469_s23 + $0x14] sm:$0x1] }
  0x2d   : > { %v408_v50 = vpack.c.b16 %v400_v40, %v400_v40  ;;  %v453_v52 = vshrl.u32 %v1512_v37, 16  ;;  %v457_v55 = vrot.slane %v455_v44, 1  ;;  %v429_v60 = vshrl.u32 %v1518_v43, 16 }
  0x2e   : > { %617 = vrot.lane.b32.xlu1 %v1455_v53, %s1310_s24  ;;  %v604_v45 = vsel %vm415_vm1, %v599_v35, %v603_v36  ;;  %v460_v58 = vshll.u32 %v410_v46, 16  ;;  %v623_v59 = vsel %vm528_vm0, %v621_v47, %v622_v49  ;;  %v433_v61 = vrot.slane %v431_v51, 1  ;;  %v1201_v47 = vld [vmem:[%s1817_s2] sm:$0xff] }
  0x2f   : > { %v436_v62 = vshll.u32 %v408_v50, 16  ;;  %v458_v1 = vor.u32 %v457_v55, %v453_v52  ;;  %v538_v10 = vrot.slane %v1512_v37, 1  ;;  %v539_v11 = vrot.slane %v410_v46, 1 }
  0x30   : > { %613 = vrot.lane.b32.xlu0 %v1461_v56, %s1310_s24  ;;  %v462_v3 = vrot.slane %v460_v58, 1  ;;  %v434_v4 = vor.u32 %v433_v61, %v429_v60  ;;  %v532_v12 = vrot.slane %v1518_v43, 1  ;;  %v533_v13 = vrot.slane %v408_v50, 1 }
  0x31   : > { %657 = vrot.lane.b32.xlu2 %v1478_v63, %s1311_s25  ;;  %v438_v5 = vrot.slane %v436_v62, 1  ;;  %v1548_v14 = vsel %vm528_vm0, %v538_v10, %v539_v11  ;;  %v662_v20 = vunpack.c.l.b16 %v350_v19 }
  0x32   : > { %v1533_v6 = vsel %vm415_vm1, %v458_v1, %v462_v3  ;;  %v1551_v16 = vsel %vm528_vm0, %v532_v12, %v533_v13 }
  0x33   : > { %v439_v7 = vsel %vm415_vm1, %v434_v4, %v438_v5  ;;  %v663_v24 = vpack.c.b16 %v662_v20, %v662_v20 }
  0x35   : > { %v672_v29 = vshll.u32 %v663_v24, 16  ;;  %v693_v50 = vrot.slane %v663_v24, 1 }
  0x36   : > { %653 = vrot.lane.b32.xlu1 %v1388_v2, %s1311_s25 }
  0x37   : > { %v674_v30 = vrot.slane %v672_v29, 1 }
  0x38   : > { %636 = vrot.lane.b32.xlu0 %v1486_v8, %s1309_s12 }
  0x39   : > { %684 = vrot.lane.b32.xlu2 %v1438_v42, %s1312_s26 }
  0x3e   : > { %516 = vrot.lane.b32.xlu1 %v1497_v21, %s1308_s9 }
  0x40   : > { %512 = vrot.lane.b32.xlu0 %v427_v25, %s1308_s9  ;;  %v667_v25 = vshll.u32 %v1200_v23, 16 }
  0x41   : > { %557 = vrot.lane.b32.xlu2 %v1508_v34, %s1307_s8 }
  0x42   : > { %v669_v27 = vrot.slane %v667_v25, 1 }
  0x46   : > { %553 = vrot.lane.b32.xlu1 %v531_v41, %s1307_s8 }
  0x48   : > { %688 = vrot.lane.b32.xlu0 %v604_v45, %s1312_s26 }
  0x49   : > { %574 = vrot.lane.b32.xlu2 %v1518_v43, %s1306_s6 }
  0x4e   : > { %707 = vrot.lane.b32.xlu1 %v623_v59, %s1313_s27 }
  0x50   : > { %703 = vrot.lane.b32.xlu0 %v1434_v38, %s1313_s27 }
  0x51   : > { %609 = vrot.lane.b32.xlu2 %v1533_v6, %s1310_s24 }
  0x56   : > { %605 = vrot.lane.b32.xlu1 %v439_v7, %s1310_s24 }
  0x58   : > { %578 = vrot.lane.b32.xlu0 %v1512_v37, %s1306_s6 }
  0x59   : > { %645 = vrot.lane.b32.xlu2 %v1458_v54, %s1311_s25 }
  0x5e   : > { %628 = vrot.lane.b32.xlu1 %v1548_v14, %s1309_s12 }
  0x60   : > { %624 = vrot.lane.b32.xlu0 %v1551_v16, %s1309_s12 }
  0x61   : > { %680 = vrot.lane.b32.xlu2 %v1420_v28, %s1312_s26 }
  0x66   : > { %676 = vrot.lane.b32.xlu1 %v1497_v21, %s1312_s26 }
  0x68   : > { %649 = vrot.lane.b32.xlu0 %v1384_v0, %s1311_s25 }
  0x69   : > { %522 = vrot.lane.b32.xlu2 %v1461_v56, %s1308_s9 }
  0x6e   : > { %699 = vrot.lane.b32.xlu1 %v1414_v22, %s1313_s27 }
  0x70   : > { %695 = vrot.lane.b32.xlu0 %v1508_v34, %s1313_s27 }
  0x71   : > { %567 = vrot.lane.b32.xlu2 %v1486_v8, %s1307_s8 }
  0x73   : > { %v1571_v17 = vpop.permute.xlu2 %582 }
  0x76   : > { %563 = vrot.lane.b32.xlu1 %v1444_v48, %s1307_s8 }
  0x78   : > { %526 = vrot.lane.b32.xlu0 %v1455_v53, %s1308_s9 }
  0x79   : > { %615 = vrot.lane.b32.xlu2 %v1438_v42, %s1310_s24  ;;  %v665_v42 = vshrl.u32 %v1200_v23, 16 }
  0x7b   : > { %v1579_v18 = vpop.permute.xlu2 %586 }
  0x7e   : > { %588 = vrot.lane.b32.xlu1 %v1478_v63, %s1306_s6  ;;  %v670_v63 = vor.u32 %v669_v27, %v665_v42 }
  0x80   : > { %584 = vrot.lane.b32.xlu0 %v1388_v2, %s1306_s6  ;;  %v675_v32 = vsel %vm415_vm1, %v670_v63, %v674_v30 }
  0x81   : > { %638 = vrot.lane.b32.xlu2 %v623_v59, %s1309_s12 }
  0x83   : > { %v1588_v26 = vpop.permute.xlu2 %632 }
  0x86   : > { %634 = vrot.lane.b32.xlu1 %v1434_v38, %s1309_s12  ;;  %v851_v38 = vld [vmem:[%s1817_s2 + $0x10] sm:$0x3] }
  0x87   : > { %v865_v36 = vunpack.c.l.b16 %v851_v38 }
  0x88   : > { %619 = vrot.lane.b32.xlu0 %v604_v45, %s1310_s24  ;;  %v1202_v45 = vld [vmem:[%s1817_s2 + $0x8] sm:$0xff] }
  0x89   : > { %514 = vrot.lane.b32.xlu2 %v439_v7, %s1308_s9  ;;  %v868_v40 = vpack.c.b16 %v865_v36, %v865_v36 }
  0x8b   : > { %v1594_v31 = vpop.permute.xlu2 %657  ;;  %v890_v41 = vsel %vm888_vm2, %v868_v40, 0 }
  0x8c   : > { %1207 = vmatpush.bf16.msra.mxu3 %v890_v41  ;;  %1206 = vmatpush.bf16.msra.mxu2 %v890_v41 }
  0x8d   : > { %1205 = vmatpush.bf16.msra.mxu1 %v890_v41  ;;  %897 = vmatpush.bf16.msra.mxu0 %v890_v41 }
  0x8e   : > { %659 = vrot.lane.b32.xlu1 %v1200_v23, %s1311_s25 }
  0x90   : > { %v562_v33 = vpop.permute.xlu1 %561  ;;  %655 = vrot.lane.b32.xlu0 %v1401_v15, %s1311_s25  ;;  %1210 = vmatpush.bf16.msra.mxu3 %v1202_v45 }
  0x91   : > { %690 = vrot.lane.b32.xlu2 %v675_v32, %s1312_s26  ;;  %1209 = vmatpush.bf16.msra.mxu2 %v1202_v45 }
  0x92   : > { %v521_v35 = vpop.permute.xlu0 %520  ;;  %1208 = vmatpush.bf16.msra.mxu1 %v1202_v45  ;;  %898 = vmatpush.bf16.msra.mxu0 %v1202_v45 }
  0x93   : > { %v1604_v39 = vpop.permute.xlu2 %684  ;;  %v721_v1 = vsel %vm711_vm3, %v1384_v0, %v521_v35 }
  0x94   : > { %1213 = vmatpush.bf16.msra.mxu3 %v1201_v47 }
  0x95   : > { %1212 = vmatpush.bf16.msra.mxu2 %v1201_v47 }
  0x96   : > { %686 = vrot.lane.b32.xlu1 %v1455_v53, %s1312_s26  ;;  %1211 = vmatpush.bf16.msra.mxu1 %v1201_v47 }
  0x97   : > { %899 = vmatpush.bf16.msra.mxu0 %v1201_v47 }
  0x98   : > { %v566_v44 = vpop.permute.xlu1 %565  ;;  %518 = vrot.lane.b32.xlu0 %v1533_v6, %s1308_s9 }
  0x99   : > { %705 = vrot.lane.b32.xlu2 %v1486_v8, %s1313_s27  ;;  %v692_v8 = vrot.slane %v1200_v23, 1 }
  0x9a   : > { %v525_v46 = vpop.permute.xlu0 %524 }
  0x9b   : > { %v1615_v53 = vpop.permute.xlu2 %557  ;;  %v694_v55 = vsel %vm528_vm0, %v692_v8, %v693_v50 }
  0x9e   : > { %559 = vrot.lane.b32.xlu1 %v1548_v14, %s1307_s8 }
  0xa0   : > { %v618_v49 = vpop.permute.xlu1 %617  ;;  %555 = vrot.lane.b32.xlu0 %v1551_v16, %s1307_s8  ;;  %s1124_s8 = sshll.u32 %s1832_s16, 5 }
  0xa1   : > { %580 = vrot.lane.b32.xlu2 %v1384_v0, %s1306_s6 }
  0xa2   : > { %v614_v51 = vpop.permute.xlu0 %613 }
  0xa3   : > { %v1626_v52 = vpop.permute.xlu2 %574 }
  0xa6   : > { %576 = vrot.lane.b32.xlu1 %v1458_v54, %s1306_s6  ;;  %s1123_s6 = sshll.u32 %s1836_s22, 1 }
  0xa8   : > { %v654_v58 = vpop.permute.xlu1 %653  ;;  %709 = vrot.lane.b32.xlu0 %v694_v55, %s1313_s27 }
  0xa9   : > { %626 = vrot.lane.b32.xlu2 %v1508_v34, %s1309_s12  ;;  %v725_v34 = vsel %vm711_vm3, %v1388_v2, %v525_v46 }
  0xaa   : > { %v637_v59 = vpop.permute.xlu0 %636  ;;  %v742_v3 = vsel %vm728_vm4, %v725_v34, %v566_v44 }
  0xab   : > { %v610_v60 = vpop.permute.xlu2 %609  ;;  %v759_v0 = vsel %vm745_vm5, %v742_v3, %v1579_v18 }
  0xac   : > { %v776_v7 = vsel %vm762_vm6, %v759_v0, %v618_v49 }
  0xad   : > { %v793_v11 = vsel %vm779_vm7, %v776_v7, %v637_v59 }
  0xae   : > { %611 = vrot.lane.b32.xlu1 %v1420_v28, %s1310_s24  ;;  %v738_v28 = vsel %vm728_vm4, %v721_v1, %v562_v33  ;;  %v810_v13 = vsel %vm796_vm8, %v793_v11, %v1594_v31 }
  0xaf   : > { %v755_v2 = vsel %vm745_vm5, %v738_v28, %v1571_v17 }
  0xb0   : > { %v517_v61 = vpop.permute.xlu1 %516  ;;  %607 = vrot.lane.b32.xlu0 %v1497_v21, %s1310_s24  ;;  %v772_v10 = vsel %vm762_vm6, %v755_v2, %v614_v51 }
  0xb1   : > { %651 = vrot.lane.b32.xlu2 %v1395_v9, %s1311_s25  ;;  %v717_v42 = vsel %vm711_vm3, %v1458_v54, %v517_v61 }
  0xb2   : > { %v513_v62 = vpop.permute.xlu0 %512  ;;  %v734_v29 = vsel %vm728_vm4, %v717_v42, %v1615_v53 }
  0xb3   : > { %v646_v21 = vpop.permute.xlu2 %645  ;;  %v713_v63 = vsel %vm711_vm3, %v1464_v57, %v513_v62 }
  0xb6   : > { %647 = vrot.lane.b32.xlu1 %v1512_v37, %s1311_s25 }
  0xb8   : > { %v554_v4 = vpop.permute.xlu1 %553  ;;  %630 = vrot.lane.b32.xlu0 %v1414_v22, %s1309_s12  ;;  %v789_v22 = vsel %vm779_vm7, %v772_v10, %v1588_v26  ;;  %s316_s12 = sadd.s32 %s1124_s8, %s1123_s6 }
  0xb9   : > { %697 = vrot.lane.b32.xlu2 %v1548_v14, %s1313_s27  ;;  %v806_v12 = vsel %vm796_vm8, %v789_v22, %v654_v58  ;;  %v730_v32 = vsel %vm728_vm4, %v713_v63, %v554_v4  ;;  %s1125_s13 = sshll.u32 %s316_s12, 2 }
  0xba   : > { %v689_v5 = vpop.permute.xlu0 %688  ;;  %v747_v38 = vsel %vm745_vm5, %v730_v32, %v1626_v52  ;;  %s1752_s23 = scalar_lea.vmem %s1819_s4, %s1125_s13 }
  0xbb   : > { %v827_v14 = vsel %vm813_vm10, %v810_v13, %v689_v5  ;;  %v681_v18 = vpop.permute.xlu2 %680 }
  0xbe   : > { %682 = vrot.lane.b32.xlu1 %v1461_v56, %s1312_s26  ;;  %v823_v56 = vsel %vm813_vm10, %v806_v12, %v1604_v39 }
  0xc0   : > { %v708_v16 = vpop.permute.xlu1 %707  ;;  %678 = vrot.lane.b32.xlu0 %v1533_v6, %s1312_s26 }
  0xc1   : > { %v844_v17 = vsel %vm830_vm9, %v827_v14, %v708_v16 }
  0xc2   : > { %1180 = vmatmul.msk.bf16.vlgmr.msra.gmra.mxu3 %vm871_vm11, %v844_v17  ;;  %v704_v19 = vpop.permute.xlu0 %703 }
  0xc3   : > { %v840_v20 = vsel %vm830_vm9, %v823_v56, %v704_v19  ;;  %v523_v25 = vpop.permute.xlu2 %522 }
  0xc4   : > { %1178 = vmatmul.msk.bf16.vlgmr.msra.gmra.mxu2 %vm871_vm11, %v840_v20  ;;  %v723_v61 = vsel %vm711_vm3, %v1395_v9, %v523_v25 }
  0xc8   : > { %v606_v23 = vpop.permute.xlu1 %605  ;;  %701 = vrot.lane.b32.xlu0 %v1444_v48, %s1313_s27 }
  0xc9   : > { %v764_v35 = vsel %vm762_vm6, %v747_v38, %v606_v23 }
  0xca   : > { %v579_v24 = vpop.permute.xlu0 %578 }
  0xcb   : > { %v568_v27 = vpop.permute.xlu2 %567  ;;  %v751_v30 = vsel %vm745_vm5, %v734_v29, %v579_v24 }
  0xcc   : > { %v768_v33 = vsel %vm762_vm6, %v751_v30, %v610_v60 }
  0xd0   : > { %v629_v6 = vpop.permute.xlu1 %628 }
  0xd1   : > { %v785_v54 = vsel %vm779_vm7, %v768_v33, %v629_v6 }
  0xd2   : > { %v625_v26 = vpop.permute.xlu0 %624 }
  0xd3   : > { %v781_v39 = vsel %vm779_vm7, %v764_v35, %v625_v26  ;;  %v616_v57 = vpop.permute.xlu2 %615 }
  0xd4   : > { %v798_v44 = vsel %vm796_vm8, %v781_v39, %v646_v21 }
  0xd8   : > { %v677_v31 = vpop.permute.xlu1 %676 }
  0xd9   : > { %v815_v46 = vsel %vm813_vm10, %v798_v44, %v677_v31 }
  0xda   : > { %v650_v48 = vpop.permute.xlu0 %649 }
  0xdb   : > { %v802_v36 = vsel %vm796_vm8, %v785_v54, %v650_v48  ;;  %v639_v8 = vpop.permute.xlu2 %638 }
  0xdc   : > { %v819_v41 = vsel %vm813_vm10, %v802_v36, %v681_v18 }
  0xe0   : > { %v700_v40 = vpop.permute.xlu1 %699 }
  0xe1   : > { %v836_v45 = vsel %vm830_vm9, %v819_v41, %v700_v40 }
  0xe2   : > { %1176 = vmatmul.msk.bf16.vlgmr.msra.gmra.mxu1 %vm871_vm11, %v836_v45  ;;  %v696_v53 = vpop.permute.xlu0 %695 }
  0xe3   : > { %v832_v47 = vsel %vm830_vm9, %v815_v46, %v696_v53  ;;  %v515_v55 = vpop.permute.xlu2 %514  ;;  %v1745_v46 = vld [vmem:[%s1818_s3] ss:$0 sm:$0xff] }
  0xe4   : > { %1174 = vmatmul.msk.bf16.vlgmr.msra.gmra.mxu0 %vm871_vm11, %v832_v47  ;;  %v715_v42 = vsel %vm711_vm3, %v1518_v43, %v515_v55 }
  0xe8   : > { %v564_v49 = vpop.permute.xlu1 %563 }
  0xe9   : > { %v740_v1 = vsel %vm728_vm4, %v723_v61, %v564_v49 }
  0xea   : > { %v527_v50 = vpop.permute.xlu0 %526 }
  0xeb   : > { %v691_v60 = vpop.permute.xlu2 %690  ;;  %v727_v9 = vsel %vm711_vm3, %v1401_v15, %v527_v50 }
  0xec   : > { %v744_v22 = vsel %vm728_vm4, %v727_v9, %v568_v27 }
  0xf0   : > { %v589_v51 = vpop.permute.xlu1 %588 }
  0xf1   : > { %v761_v12 = vsel %vm745_vm5, %v744_v22, %v589_v51 }
  0xf2   : > { %v585_v52 = vpop.permute.xlu0 %584 }
  0xf3   : > { %v757_v28 = vsel %vm745_vm5, %v740_v1, %v585_v52  ;;  %v706_v4 = vpop.permute.xlu2 %705 }
  0xf4   : > { %v774_v3 = vsel %vm762_vm6, %v757_v28, %v616_v57 }
  0xf8   : > { %v635_v58 = vpop.permute.xlu1 %634 }
  0xf9   : > { %v791_v21 = vsel %vm779_vm7, %v774_v3, %v635_v58 }
  0xfa   : > { %v620_v59 = vpop.permute.xlu0 %619 }
  0xfb   : > { %v778_v14 = vsel %vm762_vm6, %v761_v12, %v620_v59  ;;  %v581_v16 = vpop.permute.xlu2 %580 }
  0xfc   : > { %v795_v17 = vsel %vm779_vm7, %v778_v14, %v639_v8 }
 0x100   : > { %v660_v62 = vpop.permute.xlu1 %659 }
 0x101   : > { %v812_v18 = vsel %vm796_vm8, %v795_v17, %v660_v62 }
 0x102   : > { %v656_v34 = vpop.permute.xlu0 %655  ;;  %v829_v19 = vsel %vm813_vm10, %v812_v18, %v691_v60 }
 0x103   : > { %v808_v0 = vsel %vm796_vm8, %v791_v21, %v656_v34  ;;  %v627_v15 = vpop.permute.xlu2 %626 }
 0x108   : > { %v687_v2 = vpop.permute.xlu1 %686 }
 0x109   : > { %v825_v5 = vsel %vm813_vm10, %v808_v0, %v687_v2 }
 0x10a   : > { %v519_v7 = vpop.permute.xlu0 %518  ;;  %v842_v10 = vsel %vm830_vm9, %v825_v5, %v706_v4 }
 0x10b   : > { %1179 = vmatmul.msk.bf16.gmra.mxu2 %vm871_vm11, %v842_v10  ;;  %v652_v6 = vpop.permute.xlu2 %651  ;;  %v719_v31 = vsel %vm711_vm3, %v1512_v37, %v519_v7 }
 0x110   : > { %v560_v11 = vpop.permute.xlu1 %559 }
 0x111   : > { %v736_v32 = vsel %vm728_vm4, %v719_v31, %v560_v11 }
 0x112   : > { %v556_v13 = vpop.permute.xlu0 %555  ;;  %v753_v35 = vsel %vm745_vm5, %v736_v32, %v581_v16 }
 0x113   : > { %v732_v27 = vsel %vm728_vm4, %v715_v42, %v556_v13  ;;  %v698_v33 = vpop.permute.xlu2 %697 }
 0x118   : > { %v577_v56 = vpop.permute.xlu1 %576 }
 0x119   : > { %v749_v29 = vsel %vm745_vm5, %v732_v27, %v577_v56 }
 0x11a   : > { %v710_v20 = vpop.permute.xlu0 %709 }
 0x11b   : > { %v846_v23 = vsel %vm830_vm9, %v829_v19, %v710_v20 }
 0x11c   : > { %1181 = vmatmul.msk.bf16.gmra.mxu3 %vm871_vm11, %v846_v23 }
 0x120   : > { %v612_v25 = vpop.permute.xlu1 %611 }
 0x121   : > { %v770_v39 = vsel %vm762_vm6, %v753_v35, %v612_v25 }
 0x122   : > { %v608_v24 = vpop.permute.xlu0 %607 }
 0x123   : > { %v766_v30 = vsel %vm762_vm6, %v749_v29, %v608_v24 }
 0x124   : > { %v783_v48 = vsel %vm779_vm7, %v766_v30, %v627_v15 }
 0x128   : > { %v648_v63 = vpop.permute.xlu1 %647 }
 0x129   : > { %v800_v38 = vsel %vm796_vm8, %v783_v48, %v648_v63 }
 0x12a   : > { %v631_v26 = vpop.permute.xlu0 %630 }
 0x12b   : > { %v787_v37 = vsel %vm779_vm7, %v770_v39, %v631_v26 }
 0x12c   : > { %v804_v40 = vsel %vm796_vm8, %v787_v37, %v652_v6 }
 0x130   : > { %v683_v57 = vpop.permute.xlu1 %682 }
 0x131   : > { %v821_v41 = vsel %vm813_vm10, %v804_v40, %v683_v57 }
 0x132   : > { %v679_v43 = vpop.permute.xlu0 %678 }
 0x133   : > { %v817_v54 = vsel %vm813_vm10, %v800_v38, %v679_v43 }
 0x134   : > { %v834_v36 = vsel %vm830_vm9, %v817_v54, %v698_v33 }
 0x135   : > { %1175 = vmatmul.msk.bf16.gmra.mxu0 %vm871_vm11, %v834_v36 }
 0x13a   : > { %v702_v44 = vpop.permute.xlu0 %701 }
 0x13b   : > { %v838_v45 = vsel %vm830_vm9, %v821_v41, %v702_v44 }
 0x13c   : > { %1177 = vmatmul.msk.bf16.gmra.mxu1 %vm871_vm11, %v838_v45 }
 0x145   : > { %v931_v53 = vpop.f32.mrf.mxu3 }
 0x146   : > { %v932_v47 = vadd.f32 %v1745_v46, %v931_v53 }
 0x147   : > { %v921_v49 = vpop.f32.mrf.mxu2 }
 0x148   : > { %v953_v8 = vmax.f32 %v932_v47, 0.0  ;;  %v922_v50 = vadd.f32 %v1745_v46, %v921_v49 }
 0x14a   : > { %v969_v51 = vpack.c.bf16 %v953_v8, %v953_v8  ;;  %v949_v52 = vmax.f32 %v922_v50, 0.0 }
 0x14c   : > { %986 = vst.msk [vmem:[%s1752_s23 + $0x30] sm:$0xf] %vm973_vm12, %v969_v51  ;;  %v965_v55 = vpack.c.bf16 %v949_v52, %v949_v52 }
 0x14d   : > { %v933_v58 = vpop.f32.mrf.mxu3 }
 0x14e   : > { %982 = vst.msk [vmem:[%s1752_s23 + $0x20] sm:$0xf] %vm973_vm12, %v965_v55  ;;  %v934_v59 = vadd.f32 %v1745_v46, %v933_v58 }
 0x14f   : > { %v923_v60 = vpop.f32.mrf.mxu2 }
 0x150   : > { %v954_v61 = vmax.f32 %v934_v59, 0.0  ;;  %v924_v62 = vadd.f32 %v1745_v46, %v923_v60 }
 0x152   : > { %v970_v1 = vpack.c.bf16 %v954_v61, %v954_v61  ;;  %v950_v34 = vmax.f32 %v924_v62, 0.0 }
 0x154   : > { %987 = vst.msk [vmem:[%s1752_s23 + $0x34] sm:$0xf] %vm973_vm12, %v970_v1  ;;  %v966_v28 = vpack.c.bf16 %v950_v34, %v950_v34 }
 0x156   : > { %983 = vst.msk [vmem:[%s1752_s23 + $0x24] sm:$0xf] %vm973_vm12, %v966_v28 }
 0x15f   : > { %v911_v3 = vpop.f32.mrf.mxu1 }
 0x160   : > { %v912_v21 = vadd.f32 %v1745_v46, %v911_v3 }
 0x161   : > { %v901_v4 = vpop.f32.mrf.mxu0 }
 0x162   : > { %v945_v0 = vmax.f32 %v912_v21, 0.0  ;;  %v902_v2 = vadd.f32 %v1745_v46, %v901_v4 }
 0x164   : > { %v961_v5 = vpack.c.bf16 %v945_v0, %v945_v0  ;;  %v941_v7 = vmax.f32 %v902_v2, 0.0 }
 0x166   : > { %978 = vst.msk [vmem:[%s1752_s23 + $0x10] sm:$0xf] %vm973_vm12, %v961_v5  ;;  %v957_v10 = vpack.c.bf16 %v941_v7, %v941_v7 }
 0x167   : > { %v913_v9 = vpop.f32.mrf.mxu1 }
 0x168   : > { %974 = vst.msk [vmem:[%s1752_s23] sm:$0xf] %vm973_vm12, %v957_v10  ;;  %v914_v11 = vadd.f32 %v1745_v46, %v913_v9 }
 0x169   : > { %v903_v22 = vpop.f32.mrf.mxu0 }
 0x16a   : > { %v946_v12 = vmax.f32 %v914_v11, 0.0  ;;  %v904_v13 = vadd.f32 %v1745_v46, %v903_v22 }
 0x16c   : > { %v962_v14 = vpack.c.bf16 %v946_v12, %v946_v12  ;;  %v942_v16 = vmax.f32 %v904_v13, 0.0 }
 0x16e   : > { %979 = vst.msk [vmem:[%s1752_s23 + $0x14] sm:$0xf] %vm973_vm12, %v962_v14  ;;  %v958_v17 = vpack.c.bf16 %v942_v16, %v942_v16 }
 0x170   : > { %975 = vst.msk [vmem:[%s1752_s23 + $0x4] sm:$0xf] %vm973_vm12, %v958_v17 }
 0x18e   : > { %v926_v18 = vpop.f32.mrf.mxu2 }
 0x18f   : > { %v927_v56 = vadd.f32 %v1745_v46, %v926_v18 }
 0x191   : > { %v951_v19 = vmax.f32 %v927_v56, 0.0 }
 0x193   : > { %v967_v20 = vpack.c.bf16 %v951_v19, %v951_v19 }
 0x195   : > { %984 = vst.msk [vmem:[%s1752_s23 + $0x28] sm:$0xf] %vm973_vm12, %v967_v20 }
 0x196   : > { %v928_v23 = vpop.f32.mrf.mxu2 }
 0x197   : > { %v929_v15 = vadd.f32 %v1745_v46, %v928_v23 }
 0x199   : > { %v952_v24 = vmax.f32 %v929_v15, 0.0 }
 0x19b   : > { %v968_v25 = vpack.c.bf16 %v952_v24, %v952_v24 }
 0x19d   : > { %985 = vst.msk [vmem:[%s1752_s23 + $0x2c] sm:$0xf] %vm973_vm12, %v968_v25 }
 0x19f   : > { %v936_v6 = vpop.f32.mrf.mxu3 }
 0x1a0   : > { %v937_v26 = vadd.f32 %v1745_v46, %v936_v6 }
 0x1a2   : > { %v955_v42 = vmax.f32 %v937_v26, 0.0 }
 0x1a4   : > { %v971_v27 = vpack.c.bf16 %v955_v42, %v955_v42 }
 0x1a6   : > { %988 = vst.msk [vmem:[%s1752_s23 + $0x38] sm:$0xf] %vm973_vm12, %v971_v27 }
 0x1a7   : > { %v938_v29 = vpop.f32.mrf.mxu3 }
 0x1a8   : > { %v939_v63 = vadd.f32 %v1745_v46, %v938_v29 }
 0x1aa   : > { %v956_v30 = vmax.f32 %v939_v63, 0.0 }
 0x1ac   : > { %v972_v31 = vpack.c.bf16 %v956_v30, %v956_v30 }
 0x1ae   : > { %989 = vst.msk [vmem:[%s1752_s23 + $0x3c] sm:$0xf] %vm973_vm12, %v972_v31 }
 0x1b2   : > { %v906_v32 = vpop.f32.mrf.mxu0 }
 0x1b3   : > { %v907_v48 = vadd.f32 %v1745_v46, %v906_v32 }
 0x1b5   : > { %v943_v33 = vmax.f32 %v907_v48, 0.0 }
 0x1b7   : > { %v959_v38 = vpack.c.bf16 %v943_v33, %v943_v33 }
 0x1b9   : > { %976 = vst.msk [vmem:[%s1752_s23 + $0x8] sm:$0xf] %vm973_vm12, %v959_v38  ;;  %v916_v43 = vpop.f32.mrf.mxu1 }
 0x1ba   : > { %v917_v54 = vadd.f32 %v1745_v46, %v916_v43  ;;  %v908_v35 = vpop.f32.mrf.mxu0 }
 0x1bb   : > { %v909_v36 = vadd.f32 %v1745_v46, %v908_v35 }
 0x1bc   : > { %v947_v39 = vmax.f32 %v917_v54, 0.0 }
 0x1bd   : > { %v944_v37 = vmax.f32 %v909_v36, 0.0 }
 0x1be   : > { %v963_v57 = vpack.c.bf16 %v947_v39, %v947_v39 }
 0x1bf   : > { %v960_v40 = vpack.c.bf16 %v944_v37, %v944_v37 }
 0x1c0   : > { %980 = vst.msk [vmem:[%s1752_s23 + $0x18] sm:$0xf] %vm973_vm12, %v963_v57 }
 0x1c1   : > { %977 = vst.msk [vmem:[%s1752_s23 + $0xc] sm:$0xf] %vm973_vm12, %v960_v40  ;;  %v918_v41 = vpop.f32.mrf.mxu1 }
 0x1c2   : > { %v919_v44 = vadd.f32 %v1745_v46, %v918_v41 }
 0x1c4   : > { %v948_v45 = vmax.f32 %v919_v44, 0.0 }
 0x1c6   : > { %v964_v53 = vpack.c.bf16 %v948_v45, %v948_v45 }
 0x1c8   : > { %981 = vst.msk [vmem:[%s1752_s23 + $0x1c] sm:$0xf] %vm973_vm12, %v964_v53 }
 0x1c9 PF: > { %s14_s19 = sadd.s32 1, %s1304_s19   ;;  %s1821_s15 = smov %s1296_s17 }
 0x1ca   : > { %p11_p9 = scmp.ge.s32.totalorder %s14_s19, 6   ;;  %s1822_s16 = smov %s1300_s18 }
 0x1cb   : > { %s1823_s17 = smov %s1826_s20  ;;  %s1824_s18 = smov %s1830_s21 }
 0x1cc   :  { %13 = sbr.rel (!%p11_p9) target bundleno = 3 (0x3), region = 69 }

// kernel: rsu4_forward.12
= control target key start
LH: loop header
LB: loop body
LE: loop exit
PB: predicated region body
PF: predicated region fallthrough
CT: control target
= control target key end

     0   :  { %s798_s15 = smov 0   ;;  %s800_s16 = smov 0   ;;  %s910_s0 = inlined_call_operand.vmem [shape: bf16[2,8,8,8], index: 0, kind: input, shape index: {}, may-alias: {0,1}]   ;;  %s911_s1 = inlined_call_operand.vmem [shape: bf16[2,8,8,8], index: 1, kind: input, shape index: {}, may-alias: {0,1}]   ;;  %s912_s2 = inlined_call_operand.vmem [shape: bf16[72,8], index: 2, kind: input, shape index: {}]   ;;  %s913_s3 = inlined_call_operand.vmem [shape: f32[1,8], index: 3, kind: input, shape index: {}]   ;;  %s914_s4 = inlined_call_operand.vmem [shape: bf16[2,4,4,8], index: 4, kind: output, shape index: {}]  }
   0x1   :  { %s802_s17 = smov 0  }
   0x2 LB: > { %s26_s18 = sadd.s32 1, %s759_s16  ;;  %p664_p0 = scmp.ge.s32.totalorder %s763_s17, 1  ;;  %s763_s17 = sphi %s802_s17, %s14_s17   ;;  %s759_s16 = sphi %s800_s16, %s916_s16   ;;  %s755_s15 = sphi %s798_s15, %s915_s15  }
   0x3   : > { %p28_p1 = scmp.ge.s32.totalorder %s26_s18, 2  ;;  %p204_p2 = scmp.lt.s32.totalorder %s763_s17, 3 }
   0x5   : > { %s918_s18 = smov (%p28_p1, %s26_s18), 0  ;;  %p205_p3 = pnand %p664_p0, %p204_p2 }
   0x6   : > { %p249_p4 = scmp.lt.s32.totalorder (!%p205_p3), %s755_s15, 1  ;;  %s765_s23 = smov (!%p205_p3), 8  }
   0x7   : > { %208 = sbr.rel (%p205_p3) target bundleno = 370 (0x172), region = 36  ;;  %s766_s24 = smov (!%p205_p3), 16  }
   0x8   : > { %s767_s29 = smov (!%p205_p3), 24   ;;  %s768_s30 = smov (!%p205_p3), 32  }
   0x9   : > { %s769_s5 = smov (!%p205_p3), 40   ;;  %s770_s6 = smov (!%p205_p3), 48  }
   0xa   : > { %s771_s7 = smov (!%p205_p3), 56   ;;  %s772_s8 = smov (!%p205_p3), 64  }
   0xc   : > { %s920_s15 = smov (!%p249_p4, %s755_s15), 1  ;;  %vm393_vm0 = vcmask 64512   ;;  %vm406_vm1 = vcmask 130048   ;;  %v477_v57 = vld [vmem:[%s912_s2 + $0x20] sm:$0xf]  ;;  %vm520_vm2 = vcmask 1043456  }
   0xd   : > { %s690_s19 = sshll.u32 %s920_s15, 5  ;;  %v507_v58 = vunpack.c.l.b16 %v477_v57  ;;  %v697_v63 = vld [vmem:[%s912_s2 + $0x18] sm:$0xff]  ;;  %vm415_vm3 = vcmask 195584   ;;  %vm424_vm4 = vcmask 261120   ;;  %vm433_vm5 = vcmask 326656  }
   0xe   : > { %s256_s22 = scalar_lea.vmem %s910_s0, %s690_s19  ;;  %s692_s25 = sadd.s32 16, %s690_s19  ;;  %vm442_vm6 = vcmask 392192   ;;  %vm460_vm7 = vcmask 523264   ;;  %vm451_vm8 = vcmask 457728   ;;  %vm517_vm9 = vcmask 588800  }
   0xf   : > { %v822_v0 = vld [vmem:[%s256_s22 + $0x8] sm:$0xf]  ;;  %v824_v1 = vld [vmem:[%s256_s22] sm:$0xf]  ;;  %v826_v2 = vld [vmem:[%s256_s22 + $0xc] sm:$0xf]  ;;  %s267_s28 = scalar_lea.vmem %s911_s1, %s692_s25  ;;  %v512_v59 = vpack.c.b16 %v507_v58, %v507_v58 }
  0x10   : > { %v295_v3 = vunpack.c.l.b16 %v822_v0  ;;  %v293_v4 = vunpack.c.l.b16 %v824_v1  ;;  %v830_v5 = vld [vmem:[%s256_s22 + $0x4] sm:$0xf]  ;;  %v296_v8 = vunpack.c.l.b16 %v826_v2  ;;  %v707_v29 = vld [vmem:[%s267_s28 + $0x8] sm:$0xff]   ;;  %s693_s25 = sshll.u32 %s920_s15, 3  ;;  %vm550_vm10 = vcmask 58368  }
  0x11   : > { %v294_v9 = vunpack.c.l.b16 %v830_v5  ;;  %v699_v20 = vld [vmem:[%s267_s28] sm:$0xff]   ;;  %v704_v30 = vunpack.c.l.b16 %v707_v29  ;;  %v705_v31 = vunpack.c.h.b16 %v707_v29  ;;  %v522_v60 = vsel %vm520_vm2, %v512_v59, 0  ;;  %s278_s28 = scalar_lea.vmem %s914_s4, %s693_s25 }
  0x12   : > { %v299_v6 = vpack.c.b16 %v295_v3, %v295_v3  ;;  %v297_v7 = vpack.c.b16 %v293_v4, %v293_v4  ;;  %v300_v13 = vpack.c.b16 %v296_v8, %v296_v8  ;;  %v700_v21 = vunpack.c.l.b16 %v699_v20  ;;  %527 = vmatpush.bf16.msra.mxu0 %v522_v60  ;;  %v696_v3 = vld [vmem:[%s912_s2 + $0x10] sm:$0xff]  ;;  %v694_v8 = vld [vmem:[%s912_s2] sm:$0xff] }
  0x13   : > { %v298_v14 = vpack.c.b16 %v294_v9, %v294_v9  ;;  %v701_v22 = vunpack.c.h.b16 %v699_v20  ;;  %v363_v32 = vpack.c.b16 %v704_v30, %v704_v30  ;;  %v364_v33 = vpack.c.b16 %v705_v31, %v705_v31 }
  0x14   : > { %v303_v10 = vrot.slane %v299_v6, 1  ;;  %v301_v11 = vrot.slane %v297_v7, 1  ;;  %v313_v12 = vrot.slane %v297_v7, 2  ;;  %v304_v15 = vrot.slane %v300_v13, 1  ;;  %v695_v7 = vld [vmem:[%s912_s2 + $0x8] sm:$0xff] }
  0x15   : > { %v302_v16 = vrot.slane %v298_v14, 1  ;;  %v314_v17 = vrot.slane %v298_v14, 2  ;;  %v316_v18 = vrot.slane %v300_v13, 2  ;;  %v315_v19 = vrot.slane %v299_v6, 2 }
  0x16   : > { %309 = vrot.lane.b32.xlu1 %v303_v10, %s765_s23  ;;  %305 = vrot.lane.b32.xlu0 %v301_v11, %s765_s23  ;;  %v329_v23 = vpack.c.b16 %v700_v21, %v700_v21  ;;  %v330_v24 = vpack.c.b16 %v701_v22, %v701_v22  ;;  %v373_v34 = vrot.slane %v363_v32, 1  ;;  %v374_v35 = vrot.slane %v364_v33, 1 }
  0x17   : > { %317 = vrot.lane.b32.xlu2 %v313_v12, %s766_s24  ;;  %v384_v36 = vrot.slane %v364_v33, 2  ;;  %v383_v37 = vrot.slane %v363_v32, 2  ;;  %528 = vmatpush.bf16.msra.mxu0 %v697_v63 }
  0x18   : > { %v339_v25 = vrot.slane %v329_v23, 1  ;;  %v340_v26 = vrot.slane %v330_v24, 1  ;;  %v350_v27 = vrot.slane %v330_v24, 2  ;;  %v349_v28 = vrot.slane %v329_v23, 2 }
  0x1b   : > { %529 = vmatpush.bf16.msra.mxu0 %v696_v3 }
  0x1e   : > { %311 = vrot.lane.b32.xlu1 %v304_v15, %s765_s23  ;;  %307 = vrot.lane.b32.xlu0 %v302_v16, %s765_s23 }
  0x1f   : > { %319 = vrot.lane.b32.xlu2 %v314_v17, %s766_s24  ;;  %530 = vmatpush.bf16.msra.mxu0 %v695_v7 }
  0x23   : > { %531 = vmatpush.bf16.msra.mxu0 %v694_v8 }
  0x26   : > { %323 = vrot.lane.b32.xlu1 %v316_v18, %s766_s24  ;;  %321 = vrot.lane.b32.xlu0 %v315_v19, %s766_s24 }
  0x27   : > { %331 = vrot.lane.b32.xlu2 %v299_v6, %s767_s29 }
  0x2e   : > { %335 = vrot.lane.b32.xlu1 %v329_v23, %s767_s29  ;;  %333 = vrot.lane.b32.xlu0 %v300_v13, %s767_s29 }
  0x2f   : > { %337 = vrot.lane.b32.xlu2 %v330_v24, %s767_s29 }
  0x36   : > { %343 = vrot.lane.b32.xlu1 %v304_v15, %s768_s30  ;;  %341 = vrot.lane.b32.xlu0 %v303_v10, %s768_s30 }
  0x37   : > { %345 = vrot.lane.b32.xlu2 %v339_v25, %s768_s30 }
  0x3e   : > { %351 = vrot.lane.b32.xlu1 %v315_v19, %s769_s5  ;;  %347 = vrot.lane.b32.xlu0 %v340_v26, %s768_s30 }
  0x3f   : > { %353 = vrot.lane.b32.xlu2 %v316_v18, %s769_s5 }
  0x46   : > { %357 = vrot.lane.b32.xlu1 %v350_v27, %s769_s5  ;;  %355 = vrot.lane.b32.xlu0 %v349_v28, %s769_s5 }
  0x47   : > { %365 = vrot.lane.b32.xlu2 %v329_v23, %s770_s6 }
  0x4e   : > { %369 = vrot.lane.b32.xlu1 %v363_v32, %s770_s6  ;;  %367 = vrot.lane.b32.xlu0 %v330_v24, %s770_s6 }
  0x4f   : > { %371 = vrot.lane.b32.xlu2 %v364_v33, %s770_s6 }
  0x56   : > { %377 = vrot.lane.b32.xlu1 %v340_v26, %s771_s7  ;;  %375 = vrot.lane.b32.xlu0 %v339_v25, %s771_s7 }
  0x57   : > { %379 = vrot.lane.b32.xlu2 %v373_v34, %s771_s7 }
  0x5e   : > { %385 = vrot.lane.b32.xlu1 %v349_v28, %s772_s8  ;;  %381 = vrot.lane.b32.xlu0 %v374_v35, %s771_s7 }
  0x5f   : > { %387 = vrot.lane.b32.xlu2 %v350_v27, %s772_s8 }
  0x66   : > { %391 = vrot.lane.b32.xlu1 %v384_v36, %s772_s8  ;;  %389 = vrot.lane.b32.xlu0 %v383_v37, %s772_s8 }
  0x71   : > { %v318_v38 = vpop.permute.xlu2 %317 }
  0x79   : > { %v320_v39 = vpop.permute.xlu2 %319 }
  0x81   : > { %v332_v40 = vpop.permute.xlu2 %331 }
  0x88   : > { %v310_v41 = vpop.permute.xlu1 %309  ;;  %v306_v42 = vpop.permute.xlu0 %305 }
  0x89   : > { %v396_v43 = vsel %vm393_vm0, %v824_v1, %v306_v42  ;;  %v840_v45 = vpop.permute.xlu2 %337  ;;  %v402_v25 = vsel %vm393_vm0, %v822_v0, %v310_v41 }
  0x8a   : > { %v408_v44 = vsel %vm406_vm1, %v396_v43, %v318_v38 }
  0x8b   : > { %v417_v21 = vsel %vm415_vm3, %v408_v44, %v332_v40 }
  0x90   : > { %v312_v46 = vpop.permute.xlu1 %311  ;;  %v308_v47 = vpop.permute.xlu0 %307 }
  0x91   : > { %v842_v48 = vpop.permute.xlu2 %345  ;;  %v399_v10 = vsel %vm393_vm0, %v830_v5, %v308_v47  ;;  %v405_v26 = vsel %vm393_vm0, %v826_v2, %v312_v46  ;;  %v740_v47 = vld [vmem:[%s913_s3] ss:$0 sm:$0xff] }
  0x92   : > { %v410_v13 = vsel %vm406_vm1, %v399_v10, %v320_v39 }
  0x98   : > { %v324_v49 = vpop.permute.xlu1 %323  ;;  %v322_v50 = vpop.permute.xlu0 %321 }
  0x99   : > { %v354_v51 = vpop.permute.xlu2 %353  ;;  %v414_v27 = vsel %vm406_vm1, %v405_v26, %v324_v49  ;;  %v412_v28 = vsel %vm406_vm1, %v402_v25, %v322_v50 }
  0x9a   : > { %v423_v0 = vsel %vm415_vm3, %v414_v27, %v840_v45 }
  0xa0   : > { %v336_v52 = vpop.permute.xlu1 %335  ;;  %v334_v53 = vpop.permute.xlu0 %333 }
  0xa1   : > { %v366_v56 = vpop.permute.xlu2 %365  ;;  %v419_v14 = vsel %vm415_vm3, %v410_v13, %v334_v53  ;;  %v421_v30 = vsel %vm415_vm3, %v412_v28, %v336_v52 }
  0xa2   : > { %v430_v2 = vsel %vm424_vm4, %v421_v30, %v842_v48 }
  0xa8   : > { %v344_v54 = vpop.permute.xlu1 %343  ;;  %v342_v55 = vpop.permute.xlu0 %341 }
  0xa9   : > { %v372_v1 = vpop.permute.xlu2 %371  ;;  %v428_v15 = vsel %vm424_vm4, %v419_v14, %v344_v54  ;;  %v426_v23 = vsel %vm424_vm4, %v417_v21, %v342_v55 }
  0xaa   : > { %v437_v16 = vsel %vm433_vm5, %v428_v15, %v354_v51 }
  0xb0   : > { %v352_v61 = vpop.permute.xlu1 %351  ;;  %v348_v62 = vpop.permute.xlu0 %347 }
  0xb1   : > { %v380_v9 = vpop.permute.xlu2 %379  ;;  %v435_v24 = vsel %vm433_vm5, %v426_v23, %v352_v61  ;;  %v432_v35 = vsel %vm424_vm4, %v423_v0, %v348_v62 }
  0xb2   : > { %v444_v29 = vsel %vm442_vm6, %v435_v24, %v366_v56 }
  0xb8   : > { %v358_v4 = vpop.permute.xlu1 %357  ;;  %v356_v6 = vpop.permute.xlu0 %355 }
  0xb9   : > { %v388_v17 = vpop.permute.xlu2 %387  ;;  %v441_v36 = vsel %vm433_vm5, %v432_v35, %v358_v4  ;;  %v439_v37 = vsel %vm433_vm5, %v430_v2, %v356_v6 }
  0xba   : > { %v450_v39 = vsel %vm442_vm6, %v441_v36, %v372_v1 }
  0xc0   : > { %v370_v11 = vpop.permute.xlu1 %369  ;;  %v368_v12 = vpop.permute.xlu0 %367 }
  0xc1   : > { %v446_v18 = vsel %vm442_vm6, %v437_v16, %v368_v12  ;;  %v448_v38 = vsel %vm442_vm6, %v439_v37, %v370_v11 }
  0xc2   : > { %v457_v40 = vsel %vm451_vm8, %v448_v38, %v380_v9 }
  0xc8   : > { %v378_v5 = vpop.permute.xlu1 %377  ;;  %v376_v19 = vpop.permute.xlu0 %375 }
  0xc9   : > { %v455_v20 = vsel %vm451_vm8, %v446_v18, %v378_v5  ;;  %v453_v31 = vsel %vm451_vm8, %v444_v29, %v376_v19 }
  0xca   : > { %v464_v22 = vsel %vm460_vm7, %v455_v20, %v388_v17 }
  0xcb   : > { %484 = vst [vmem:[#allocation1 + $0x1] ss:$4 sm:$0xff] %v464_v22 }
  0xd0   : > { %v386_v32 = vpop.permute.xlu1 %385  ;;  %v382_v33 = vpop.permute.xlu0 %381 }
  0xd1   : > { %v462_v34 = vsel %vm460_vm7, %v453_v31, %v386_v32  ;;  %v459_v41 = vsel %vm451_vm8, %v450_v39, %v382_v33 }
  0xd2   : > { %482 = vst [vmem:[#allocation1] ss:$4 sm:$0xff] %v462_v34 }
  0xd8   : > { %v392_v42 = vpop.permute.xlu1 %391  ;;  %v390_v43 = vpop.permute.xlu0 %389 }
  0xd9   : > { %v468_v44 = vsel %vm460_vm7, %v459_v41, %v392_v42  ;;  %v466_v45 = vsel %vm460_vm7, %v457_v40, %v390_v43 }
  0xda   : > { %488 = vst [vmem:[#allocation1 + $0x3] ss:$4 sm:$0xff] %v468_v44 }
  0xdb   : > { %486 = vst [vmem:[#allocation1 + $0x2] ss:$4 sm:$0xff] %v466_v45 }
  0xe2   : > { %v489_v46 = vld.sshfl [vmem:[#allocation1] sm:$0xff pattern:$0x73625140] }
  0xe3   : > { %687 = vmatmul.msk.bf16.vlgmr.msra.gmra.mxu0 %vm517_vm9, %v489_v46 }
 0x160   : > { %v533_v48 = vpop.f32.mrf.mxu0 }
 0x161   : > { %v534_v49 = vadd.f32 %v740_v47, %v533_v48 }
 0x163   : > { %v538_v50 = vmax.f32 %v534_v49, 0.0 }
 0x165   : > { %v542_v51 = vrot.slane %v538_v50, 4  ;;  %v546_v52 = vpack.c.bf16 %v538_v50, %v538_v50 }
 0x167   : > { %v547_v53 = vpack.c.bf16 %v542_v51, %v542_v51  ;;  %551 = vst.msk [vmem:[%s278_s28] sm:$0x3] %vm550_vm10, %v546_v52 }
 0x168   : > { %v535_v54 = vpop.f32.mrf.mxu0 }
 0x169   : > { %552 = vst.msk [vmem:[%s278_s28 + $0x2] sm:$0x3] %vm550_vm10, %v547_v53  ;;  %v536_v55 = vadd.f32 %v740_v47, %v535_v54 }
 0x16b   : > { %v539_v56 = vmax.f32 %v536_v55, 0.0 }
 0x16d   : > { %v543_v57 = vrot.slane %v539_v56, 4  ;;  %v548_v58 = vpack.c.bf16 %v539_v56, %v539_v56 }
 0x16f   : > { %v549_v59 = vpack.c.bf16 %v543_v57, %v543_v57  ;;  %553 = vst.msk [vmem:[%s278_s28 + $0x4] sm:$0x3] %vm550_vm10, %v548_v58 }
 0x171   : > { %554 = vst.msk [vmem:[%s278_s28 + $0x6] sm:$0x3] %vm550_vm10, %v549_v59 }
 0x172 PF: > { %s14_s17 = sadd.s32 1, %s763_s17   ;;  %s915_s15 = smov %s759_s16 }
 0x173   : > { %p11_p5 = scmp.ge.s32.totalorder %s14_s17, 4   ;;  %s916_s16 = smov %s918_s18 }
 0x175   :  { %13 = sbr.rel (!%p11_p5) target bundleno = 2 (0x2), region = 72 }

// kernel: rsu4_forward.11
= control target key start
LH: loop header
LB: loop body
LE: loop exit
PB: predicated region body
PF: predicated region fallthrough
CT: control target
= control target key end

     0   :  { %s744_s15 = smov 0   ;;  %s746_s16 = smov 0   ;;  %s838_s0 = inlined_call_operand.vmem [shape: bf16[2,6,6,8], index: 0, kind: input, shape index: {}, may-alias: {0,1}]   ;;  %s839_s1 = inlined_call_operand.vmem [shape: bf16[2,6,6,8], index: 1, kind: input, shape index: {}, may-alias: {0,1}]   ;;  %s840_s2 = inlined_call_operand.vmem [shape: bf16[72,8], index: 2, kind: input, shape index: {}]   ;;  %s841_s3 = inlined_call_operand.vmem [shape: f32[1,8], index: 3, kind: input, shape index: {}]   ;;  %s842_s4 = inlined_call_operand.vmem [shape: bf16[2,4,4,8], index: 4, kind: output, shape index: {}]  }
   0x1   :  { %s748_s17 = smov 0   ;;  %s750_s18 = smov 0  }
   0x2   :  { %s752_s19 = smov 0  }
   0x3 LB: > { %s23_s20 = sadd.s32 1, %s701_s17  ;;  %s26_s21 = sadd.s32 1, %s705_s18  ;;  %s709_s19 = sphi %s752_s19, %s14_s19   ;;  %s705_s18 = sphi %s750_s18, %s846_s18   ;;  %s701_s17 = sphi %s748_s17, %s845_s17   ;;  %s697_s16 = sphi %s746_s16, %s844_s16   ;;  %s693_s15 = sphi %s744_s15, %s843_s15  }
   0x4   : > { %p24_p0 = scmp.ge.s32.totalorder %s23_s20, 2  ;;  %p588_p1 = scmp.ge.s32.totalorder %s709_s19, 1 }
   0x5   : > { %p204_p2 = scmp.lt.s32.totalorder %s709_s19, 5 }
   0x6   : > { %s848_s20 = smov (%p24_p0, %s23_s20), 0  ;;  %s850_s21 = smov (!%p24_p0, %s26_s21), %s705_s18 }
   0x7   : > { %p205_p3 = pnand %p588_p1, %p204_p2  ;;  %p28_p4 = scmp.ge.s32.totalorder %s850_s21, 2 }
   0x8   : > { %s774_s22 = sshll.u32 (!%p205_p3), %s693_s15, 1  ;;  %p249_p5 = scmp.lt.s32.totalorder (!%p205_p3), %s697_s16, 1 }
   0x9   : > { %s852_s21 = smov (%p28_p4, %s850_s21), 0  ;;  %208 = sbr.rel (%p205_p3) target bundleno = 331 (0x14b), region = 36 }
   0xa   : > { %p251_p6 = scmp.lt.s32.totalorder (!%p205_p3), %s774_s22, 5  ;;  %s616_s23 = sadd.s32 (!%p205_p3), 2, %s774_s22 }
   0xb   : > { %p262_p7 = scmp.lt.s32.totalorder (!%p205_p3), %s616_s23, 5  ;;  %s711_s10 = smov (!%p205_p3), 24  }
   0xc   : > { %s712_s11 = smov (!%p205_p3), 16   ;;  %s713_s12 = smov (!%p205_p3), 8  }
   0xd   : > { %s714_s13 = smov (!%p205_p3), 40   ;;  %s715_s14 = smov (!%p205_p3), 32  }
   0xe   : > { %s854_s16 = smov (!%p249_p5, %s697_s16), 1  ;;  %s856_s23 = smov (!%p262_p7, %s616_s23), 5  ;;  %v411_v33 = vld [vmem:[%s840_s2 + $0x20] sm:$0xf]  ;;  %vm450_vm0 = vcmask 1043456   ;;  %v620_v40 = vld [vmem:[%s840_s2 + $0x18] sm:$0xff] }
   0xf   : > { %s252_s24 = scalar_select %p251_p6, %s774_s22, 5  ;;  %v437_v34 = vunpack.c.l.b16 %v411_v33  ;;  %v619_v41 = vld [vmem:[%s840_s2 + $0x10] sm:$0xff]  ;;  %v618_v44 = vld [vmem:[%s840_s2 + $0x8] sm:$0xff]  ;;  %v617_v46 = vld [vmem:[%s840_s2] sm:$0xff]  ;;  %vm361_vm1 = vcmask 64512   ;;  %vm368_vm2 = vcmask 130048  }
  0x10   : > { %s621_s25 = smul.u32 6, %s854_s16  ;;  %s716_s15 = smov 48   ;;  %vm373_vm3 = vcmask 195584   ;;  %vm378_vm4 = vcmask 261120   ;;  %vm383_vm5 = vcmask 326656   ;;  %vm388_vm6 = vcmask 392192  }
  0x11   : > { %p273_p8 = scmp.lt.s32.totalorder %s774_s22, 3  ;;  %v442_v35 = vpack.c.b16 %v437_v34, %v437_v34  ;;  %vm398_vm7 = vcmask 523264   ;;  %vm393_vm8 = vcmask 457728   ;;  %vm447_vm9 = vcmask 588800  }
  0x12   : > { %s254_s26 = sadd.s32 %s621_s25, %s252_s24  ;;  %s265_s5 = sadd.s32 %s621_s25, %s856_s23  ;;  %vm473_vm10 = vcmask 58368  }
  0x13   : > { %s590_s27 = sshll.u32 %s254_s26, 2  ;;  %s592_s6 = sshll.u32 %s265_s5, 2  ;;  %v452_v37 = vsel %vm450_vm0, %v442_v35, 0 }
  0x14   : > { %s256_s30 = scalar_lea.vmem %s838_s0, %s590_s27  ;;  %s267_s9 = scalar_lea.vmem %s839_s1, %s592_s6  ;;  %457 = vmatpush.bf16.msra.mxu0 %v452_v37 }
  0x15   : > { %v785_v0 = vld [vmem:[%s256_s30] sm:$0x7]  ;;  %v787_v1 = vld [vmem:[%s256_s30 + $0x4] sm:$0x7]  ;;  %s717_s23 = smov 64   ;;  %s718_s24 = smov 56  }
  0x16   : > { %v287_v2 = vunpack.c.l.b16 %v785_v0  ;;  %v288_v3 = vunpack.c.l.b16 %v787_v1  ;;  %v283_v6 = vld [vmem:[%s267_s9] sm:$0x7]  ;;  %v284_v21 = vld [vmem:[%s267_s9 + $0x4] sm:$0x7]  ;;  %s594_s25 = sshll.u32 %s854_s16, 2  ;;  %s858_s22 = smov (!%p273_p8, %s774_s22), 3 }
  0x17   : > { %v316_v8 = vunpack.c.l.b16 %v283_v6  ;;  %v339_v24 = vunpack.c.l.b16 %v284_v21  ;;  %s797_s26 = sadd.s32 %s594_s25, %s858_s22 }
  0x18   : > { %v289_v4 = vpack.c.b16 %v287_v2, %v287_v2  ;;  %v290_v5 = vpack.c.b16 %v288_v3, %v288_v3  ;;  %458 = vmatpush.bf16.msra.mxu0 %v620_v40 }
  0x19   : > { %v317_v11 = vpack.c.b16 %v316_v8, %v316_v8  ;;  %v340_v25 = vpack.c.b16 %v339_v24, %v339_v24 }
  0x1a   : > { %v309_v7 = vrot.slane %v289_v4, 1  ;;  %318 = vrot.lane.b32.xlu2 %v290_v5, %s711_s10  ;;  %v292_v9 = vshrl.u32 %v289_v4, 16  ;;  %v294_v10 = vshll.u32 %v289_v4, 16  ;;  %v301_v13 = vshll.u32 %v290_v5, 16 }
  0x1b   : > { %v310_v15 = vrot.slane %v290_v5, 1  ;;  %v325_v16 = vshll.u32 %v317_v11, 16  ;;  %v299_v17 = vshrl.u32 %v290_v5, 16  ;;  %v323_v19 = vshrl.u32 %v317_v11, 16 }
  0x1c   : > { %311 = vrot.lane.b32.xlu1 %v309_v7, %s712_s11  ;;  %v296_v12 = vrot.slane %v294_v10, 1  ;;  %v303_v18 = vrot.slane %v301_v13, 1  ;;  %v348_v26 = vshll.u32 %v340_v25, 16  ;;  %v346_v27 = vshrl.u32 %v340_v25, 16  ;;  %459 = vmatpush.bf16.msra.mxu0 %v619_v41 }
  0x1d   : > { %v327_v20 = vrot.slane %v325_v16, 1  ;;  %v333_v29 = vrot.slane %v317_v11, 1  ;;  %v356_v31 = vrot.slane %v340_v25, 1 }
  0x1e   : > { %v297_v14 = vor.u32 %v296_v12, %v292_v9  ;;  %v304_v22 = vor.u32 %v303_v18, %v299_v17  ;;  %v350_v28 = vrot.slane %v348_v26, 1  ;;  %v670_v9 = vld [vmem:[%s841_s3] ss:$0 sm:$0xff] }
  0x1f   : > { %v328_v23 = vor.u32 %v327_v20, %v323_v19 }
  0x20   : > { %305 = vrot.lane.b32.xlu0 %v297_v14, %s713_s12  ;;  %v351_v30 = vor.u32 %v350_v28, %v346_v27  ;;  %460 = vmatpush.bf16.msra.mxu0 %v618_v44 }
  0x22   : > { %320 = vrot.lane.b32.xlu2 %v317_v11, %s711_s10 }
  0x24   : > { %313 = vrot.lane.b32.xlu1 %v310_v15, %s712_s11  ;;  %461 = vmatpush.bf16.msra.mxu0 %v617_v46  ;;  %s595_s11 = sshll.u32 %s797_s26, 1 }
  0x28   : > { %307 = vrot.lane.b32.xlu0 %v304_v22, %s713_s12 }
  0x2a   : > { %334 = vrot.lane.b32.xlu2 %v310_v15, %s714_s13 }
  0x2c   : > { %331 = vrot.lane.b32.xlu1 %v328_v23, %s715_s14 }
  0x30   : > { %329 = vrot.lane.b32.xlu0 %v304_v22, %s715_s14  ;;  %s278_s14 = scalar_lea.vmem %s842_s4, %s595_s11 }
  0x32   : > { %343 = vrot.lane.b32.xlu2 %v340_v25, %s716_s15 }
  0x34   : > { %341 = vrot.lane.b32.xlu1 %v317_v11, %s716_s15 }
  0x38   : > { %336 = vrot.lane.b32.xlu0 %v333_v29, %s714_s13 }
  0x3a   : > { %357 = vrot.lane.b32.xlu2 %v333_v29, %s717_s23 }
  0x3c   : > { %354 = vrot.lane.b32.xlu1 %v351_v30, %s718_s24 }
  0x40   : > { %352 = vrot.lane.b32.xlu0 %v328_v23, %s718_s24 }
  0x48   : > { %359 = vrot.lane.b32.xlu0 %v356_v31, %s717_s23 }
  0x74   : > { %v319_v32 = vpop.permute.xlu2 %318 }
  0x7c   : > { %v321_v39 = vpop.permute.xlu2 %320 }
  0x84   : > { %v335_v45 = vpop.permute.xlu2 %334 }
  0x8c   : > { %v344_v50 = vpop.permute.xlu2 %343 }
  0x8e   : > { %v312_v36 = vpop.permute.xlu1 %311 }
  0x92   : > { %v306_v38 = vpop.permute.xlu0 %305 }
  0x93   : > { %v364_v49 = vsel %vm361_vm1, %v785_v0, %v306_v38 }
  0x94   : > { %v370_v51 = vsel %vm368_vm2, %v364_v49, %v312_v36  ;;  %v358_v59 = vpop.permute.xlu2 %357 }
  0x95   : > { %v375_v54 = vsel %vm373_vm3, %v370_v51, %v319_v32 }
  0x96   : > { %v314_v42 = vpop.permute.xlu1 %313 }
  0x9a   : > { %v308_v43 = vpop.permute.xlu0 %307 }
  0x9b   : > { %v367_v53 = vsel %vm361_vm1, %v787_v1, %v308_v43 }
  0x9c   : > { %v372_v57 = vsel %vm368_vm2, %v367_v53, %v314_v42 }
  0x9d   : > { %v377_v60 = vsel %vm373_vm3, %v372_v57, %v321_v39 }
  0x9e   : > { %v332_v48 = vpop.permute.xlu1 %331 }
  0x9f   : > { %v382_v2 = vsel %vm378_vm4, %v377_v60, %v332_v48 }
  0xa2   : > { %v330_v47 = vpop.permute.xlu0 %329 }
  0xa3   : > { %v380_v56 = vsel %vm378_vm4, %v375_v54, %v330_v47 }
  0xa4   : > { %v385_v58 = vsel %vm383_vm5, %v380_v56, %v335_v45 }
  0xa6   : > { %v342_v55 = vpop.permute.xlu1 %341 }
  0xa7   : > { %v390_v61 = vsel %vm388_vm6, %v385_v58, %v342_v55 }
  0xaa   : > { %v337_v52 = vpop.permute.xlu0 %336 }
  0xab   : > { %v387_v1 = vsel %vm383_vm5, %v382_v2, %v337_v52 }
  0xac   : > { %v392_v4 = vsel %vm388_vm6, %v387_v1, %v344_v50 }
  0xae   : > { %v355_v3 = vpop.permute.xlu1 %354 }
  0xaf   : > { %v397_v5 = vsel %vm393_vm8, %v392_v4, %v355_v3 }
  0xb2   : > { %v353_v62 = vpop.permute.xlu0 %352 }
  0xb3   : > { %v395_v63 = vsel %vm393_vm8, %v390_v61, %v353_v62 }
  0xb4   : > { %v400_v0 = vsel %vm398_vm7, %v395_v63, %v358_v59 }
  0xb5   : > { %416 = vst [vmem:[#allocation1] ss:$4 sm:$0xff] %v400_v0 }
  0xba   : > { %v360_v6 = vpop.permute.xlu0 %359 }
  0xbb   : > { %v402_v7 = vsel %vm398_vm7, %v397_v5, %v360_v6 }
  0xbc   : > { %418 = vst [vmem:[#allocation1 + $0x1] ss:$4 sm:$0xff] %v402_v7 }
  0xc3   : > { %v419_v8 = vld.sshfl [vmem:[#allocation1] sm:$0xff pattern:$0x73625140] }
  0xc4   : > { %612 = vmatmul.msk.bf16.vlgmr.msra.gmra.mxu0 %vm447_vm9, %v419_v8 }
 0x141   : > { %v463_v10 = vpop.f32.mrf.mxu0 }
 0x142   : > { %v464_v11 = vadd.f32 %v670_v9, %v463_v10 }
 0x144   : > { %v467_v12 = vmax.f32 %v464_v11, 0.0 }
 0x146   : > { %v469_v13 = vrot.slane %v467_v12, 4  ;;  %v471_v14 = vpack.c.bf16 %v467_v12, %v467_v12 }
 0x148   : > { %v472_v15 = vpack.c.bf16 %v469_v13, %v469_v13  ;;  %474 = vst.msk [vmem:[%s278_s14] sm:$0x3] %vm473_vm10, %v471_v14 }
 0x149   : > { %v465_v16 = vpop.f32.mrf.mxu0 }
 0x14a   : > { %475 = vst.msk [vmem:[%s278_s14 + $0x2] sm:$0x3] %vm473_vm10, %v472_v15 }
 0x14b PF: > { %s14_s19 = sadd.s32 1, %s709_s19   ;;  %s843_s15 = smov %s701_s17 }
 0x14c   : > { %p11_p9 = scmp.ge.s32.totalorder %s14_s19, 6   ;;  %s844_s16 = smov %s705_s18 }
 0x14d   : > { %s845_s17 = smov %s848_s20  ;;  %s846_s18 = smov %s852_s21 }
 0x14e   :  { %13 = sbr.rel (!%p11_p9) target bundleno = 3 (0x3), region = 70 }

// kernel: rsu4_forward.13
= control target key start
LH: loop header
LB: loop body
LE: loop exit
PB: predicated region body
PF: predicated region fallthrough
CT: control target
= control target key end

     0   :  { %s1155_s24 = smov 0   ;;  %s1157_s25 = smov 0   ;;  %s1357_s0 = inlined_call_operand.vmem [shape: bf16[2,6,6,8], index: 0, kind: input, shape index: {}, may-alias: {0,1}]   ;;  %s1358_s1 = inlined_call_operand.vmem [shape: bf16[2,6,6,8], index: 1, kind: input, shape index: {}, may-alias: {0,1}]   ;;  %s1359_s2 = inlined_call_operand.vmem [shape: bf16[2,6,6,8], index: 2, kind: input, shape index: {}, may-alias: {2,3}]   ;;  %s1360_s3 = inlined_call_operand.vmem [shape: bf16[2,6,6,8], index: 3, kind: input, shape index: {}, may-alias: {2,3}]   ;;  %s1361_s4 = inlined_call_operand.vmem [shape: bf16[72,8], index: 4, kind: input, shape index: {}]   ;;  %s1362_s5 = inlined_call_operand.vmem [shape: bf16[72,8], index: 5, kind: input, shape index: {}]   ;;  %s1363_s6 = inlined_call_operand.vmem [shape: f32[1,8], index: 6, kind: input, shape index: {}]   ;;  %s1364_s7 = inlined_call_operand.vmem [shape: bf16[2,4,4,8], index: 7, kind: output, shape index: {}]  }
   0x1   :  { %s1159_s26 = smov 0   ;;  %s1161_s27 = smov 0  }
   0x2   :  { %s1163_s28 = smov 0  }
   0x3 LB: > { %s26_s29 = sadd.s32 1, %s1097_s26  ;;  %s29_s30 = sadd.s32 1, %s1101_s27  ;;  %s1105_s28 = sphi %s1163_s28, %s17_s28   ;;  %s1101_s27 = sphi %s1161_s27, %s1368_s27   ;;  %s1097_s26 = sphi %s1159_s26, %s1367_s26   ;;  %s1093_s25 = sphi %s1157_s25, %s1366_s25   ;;  %s1089_s24 = sphi %s1155_s24, %s1365_s24  }
   0x4   : > { %p27_p0 = scmp.ge.s32.totalorder %s26_s29, 2  ;;  %p957_p1 = scmp.ge.s32.totalorder %s1105_s28, 1 }
   0x5   : > { %p317_p2 = scmp.lt.s32.totalorder %s1105_s28, 5 }
   0x6   : > { %s1370_s29 = smov (%p27_p0, %s26_s29), 0  ;;  %s1372_s30 = smov (!%p27_p0, %s29_s30), %s1101_s27 }
   0x7   : > { %p318_p3 = pnand %p957_p1, %p317_p2  ;;  %p31_p4 = scmp.ge.s32.totalorder %s1372_s30, 2 }
   0x8   : > { %s1185_s8 = sshll.u32 (!%p318_p3), %s1089_s24, 1  ;;  %p387_p5 = scmp.lt.s32.totalorder (!%p318_p3), %s1093_s25, 1 }
   0x9   : > { %s1374_s30 = smov (%p31_p4, %s1372_s30), 0  ;;  %321 = sbr.rel (%p318_p3) target bundleno = 373 (0x175), region = 48 }
   0xa   : > { %p389_p6 = scmp.lt.s32.totalorder (!%p318_p3), %s1185_s8, 5  ;;  %s1006_s9 = sadd.s32 (!%p318_p3), 2, %s1185_s8 }
   0xb   : > { %p400_p7 = scmp.lt.s32.totalorder (!%p318_p3), %s1006_s9, 5  ;;  %s1107_s22 = smov (!%p318_p3), 24  }
   0xc   : > { %s1108_s23 = smov (!%p318_p3), 16   ;;  %s1109_s24 = smov (!%p318_p3), 8  }
   0xd   : > { %s1110_s14 = smov (!%p318_p3), 40   ;;  %s1111_s15 = smov (!%p318_p3), 32  }
   0xe   : > { %s1376_s25 = smov (!%p387_p5, %s1093_s25), 1  ;;  %s1378_s9 = smov (!%p400_p7, %s1006_s9), 5  ;;  %vm729_vm0 = vcmask 1043456   ;;  %vm521_vm1 = vcmask 64512   ;;  %vm528_vm2 = vcmask 130048   ;;  %vm533_vm3 = vcmask 195584  }
   0xf   : > { %s390_s10 = scalar_select %p389_p6, %s1185_s8, 5  ;;  %vm538_vm4 = vcmask 261120   ;;  %vm543_vm5 = vcmask 326656   ;;  %vm548_vm6 = vcmask 392192   ;;  %vm558_vm7 = vcmask 523264  }
  0x10   : > { %s1017_s11 = smul.u32 6, %s1376_s25  ;;  %vm553_vm8 = vcmask 457728   ;;  %vm726_vm9 = vcmask 588800   ;;  %p433_p8 = scmp.lt.s32.totalorder %s1185_s8, 3  ;;  %vm806_vm10 = vcmask 58368  }
  0x12   : > { %s1193_s12 = sadd.s32 %s1017_s11, %s390_s10  ;;  %s1201_s17 = sadd.s32 %s1017_s11, %s1378_s9 }
  0x13   : > { %s959_s13 = sshll.u32 %s1193_s12, 2  ;;  %s961_s18 = sshll.u32 %s1201_s17, 2 }
  0x14   : > { %s416_s16 = scalar_lea.vmem %s1359_s2, %s959_s13  ;;  %s427_s21 = scalar_lea.vmem %s1360_s3, %s961_s18 }
  0x15   : > { %v1203_v0 = vld [vmem:[%s416_s16] sm:$0x7]  ;;  %v1205_v1 = vld [vmem:[%s416_s16 + $0x4] sm:$0x7]  ;;  %s394_s11 = scalar_lea.vmem %s1357_s0, %s959_s13  ;;  %s1112_s12 = smov 48  }
  0x16   : > { %v578_v2 = vunpack.c.l.b16 %v1203_v0  ;;  %v579_v3 = vunpack.c.l.b16 %v1205_v1  ;;  %v574_v4 = vld [vmem:[%s427_s21] sm:$0x7]  ;;  %v575_v22 = vld [vmem:[%s427_s21 + $0x4] sm:$0x7]  ;;  %s1113_s13 = smov 64   ;;  %s1114_s16 = smov 56  }
  0x17   : > { %v607_v7 = vunpack.c.l.b16 %v574_v4  ;;  %v630_v24 = vunpack.c.l.b16 %v575_v22  ;;  %v1228_v26 = vld [vmem:[%s394_s11] sm:$0x7]  ;;  %v1230_v27 = vld [vmem:[%s394_s11 + $0x4] sm:$0x7]  ;;  %s405_s21 = scalar_lea.vmem %s1358_s1, %s961_s18  ;;  %s1380_s8 = smov (!%p433_p8, %s1185_s8), 3 }
  0x18   : > { %v580_v5 = vpack.c.b16 %v578_v2, %v578_v2  ;;  %v581_v6 = vpack.c.b16 %v579_v3, %v579_v3  ;;  %v447_v29 = vunpack.c.l.b16 %v1228_v26  ;;  %v448_v30 = vunpack.c.l.b16 %v1230_v27  ;;  %v443_v43 = vld [vmem:[%s405_s21] sm:$0x7]  ;;  %v444_v54 = vld [vmem:[%s405_s21 + $0x4] sm:$0x7] }
  0x19   : > { %v608_v11 = vpack.c.b16 %v607_v7, %v607_v7  ;;  %v631_v25 = vpack.c.b16 %v630_v24, %v630_v24  ;;  %v476_v46 = vunpack.c.l.b16 %v443_v43  ;;  %v499_v56 = vunpack.c.l.b16 %v444_v54  ;;  %v694_v4 = vld [vmem:[%s1362_s5 + $0x20] sm:$0xf]  ;;  %v1010_v54 = vld [vmem:[%s1361_s4 + $0x8] sm:$0xff] }
  0x1a   : > { %v600_v8 = vrot.slane %v580_v5, 1  ;;  %v583_v9 = vshrl.u32 %v580_v5, 16  ;;  %v585_v10 = vshll.u32 %v580_v5, 16  ;;  %609 = vrot.lane.b32.xlu2 %v581_v6, %s1107_s22  ;;  %v592_v13 = vshll.u32 %v581_v6, 16 }
  0x1b   : > { %v601_v15 = vrot.slane %v581_v6, 1  ;;  %v590_v16 = vshrl.u32 %v581_v6, 16  ;;  %v616_v18 = vshll.u32 %v608_v11, 16  ;;  %v614_v20 = vshrl.u32 %v608_v11, 16 }
  0x1c   : > { %602 = vrot.lane.b32.xlu1 %v600_v8, %s1108_s23  ;;  %v587_v12 = vrot.slane %v585_v10, 1  ;;  %v594_v17 = vrot.slane %v592_v13, 1  ;;  %v639_v28 = vshll.u32 %v631_v25, 16  ;;  %v624_v31 = vrot.slane %v608_v11, 1  ;;  %v1016_v10 = vld [vmem:[%s1362_s5 + $0x18] sm:$0xff]  ;;  %v1015_v13 = vld [vmem:[%s1362_s5 + $0x10] sm:$0xff] }
  0x1d   : > { %v618_v21 = vrot.slane %v616_v18, 1  ;;  %v637_v32 = vshrl.u32 %v631_v25, 16  ;;  %v449_v34 = vpack.c.b16 %v447_v29, %v447_v29  ;;  %v450_v35 = vpack.c.b16 %v448_v30, %v448_v30  ;;  %v1013_v18 = vld [vmem:[%s1362_s5] sm:$0xff] }
  0x1e   : > { %v588_v14 = vor.u32 %v587_v12, %v583_v9  ;;  %v595_v19 = vor.u32 %v594_v17, %v590_v16  ;;  %v641_v33 = vrot.slane %v639_v28, 1  ;;  %v647_v47 = vrot.slane %v631_v25, 1 }
  0x1f   : > { %v619_v23 = vor.u32 %v618_v21, %v614_v20  ;;  %v454_v37 = vshll.u32 %v449_v34, 16  ;;  %v461_v38 = vshll.u32 %v450_v35, 16  ;;  %v452_v39 = vshrl.u32 %v449_v34, 16 }
  0x20   : > { %596 = vrot.lane.b32.xlu0 %v588_v14, %s1109_s24  ;;  %v642_v36 = vor.u32 %v641_v33, %v637_v32  ;;  %v459_v41 = vshrl.u32 %v450_v35, 16  ;;  %v477_v48 = vpack.c.b16 %v476_v46, %v476_v46  ;;  %v470_v49 = vrot.slane %v450_v35, 1 }
  0x21   : > { %v456_v40 = vrot.slane %v454_v37, 1  ;;  %v463_v42 = vrot.slane %v461_v38, 1  ;;  %v469_v51 = vrot.slane %v449_v34, 1  ;;  %v500_v57 = vpack.c.b16 %v499_v56, %v499_v56 }
  0x22   : > { %611 = vrot.lane.b32.xlu2 %v608_v11, %s1107_s22  ;;  %v485_v50 = vshll.u32 %v477_v48, 16  ;;  %v483_v52 = vshrl.u32 %v477_v48, 16  ;;  %v493_v59 = vrot.slane %v477_v48, 1  ;;  %v716_v5 = vunpack.c.l.b16 %v694_v4 }
  0x23   : > { %v457_v44 = vor.u32 %v456_v40, %v452_v39  ;;  %v464_v45 = vor.u32 %v463_v42, %v459_v41  ;;  %v508_v58 = vshll.u32 %v500_v57, 16  ;;  %v506_v60 = vshrl.u32 %v500_v57, 16 }
  0x24   : > { %604 = vrot.lane.b32.xlu1 %v601_v15, %s1108_s23  ;;  %v487_v53 = vrot.slane %v485_v50, 1  ;;  %v516_v63 = vrot.slane %v500_v57, 1  ;;  %v721_v7 = vpack.c.b16 %v716_v5, %v716_v5 }
  0x25   : > { %v510_v61 = vrot.slane %v508_v58, 1 }
  0x26   : > { %v488_v55 = vor.u32 %v487_v53, %v483_v52  ;;  %v731_v8 = vsel %vm729_vm0, %v721_v7, 0 }
  0x27   : > { %v511_v62 = vor.u32 %v510_v61, %v506_v60  ;;  %736 = vmatpush.bf16.msra.mxu0 %v731_v8 }
  0x28   : > { %598 = vrot.lane.b32.xlu0 %v595_v19, %s1109_s24 }
  0x2a   : > { %625 = vrot.lane.b32.xlu2 %v601_v15, %s1110_s14  ;;  %v1014_v15 = vld [vmem:[%s1362_s5 + $0x8] sm:$0xff] }
  0x2b   : > { %737 = vmatpush.bf16.msra.mxu0 %v1016_v10 }
  0x2c   : > { %622 = vrot.lane.b32.xlu1 %v619_v23, %s1111_s15 }
  0x2f   : > { %738 = vmatpush.bf16.msra.mxu0 %v1015_v13 }
  0x30   : > { %620 = vrot.lane.b32.xlu0 %v595_v19, %s1111_s15 }
  0x32   : > { %634 = vrot.lane.b32.xlu2 %v631_v25, %s1112_s12 }
  0x33   : > { %739 = vmatpush.bf16.msra.mxu0 %v1014_v15 }
  0x34   : > { %632 = vrot.lane.b32.xlu1 %v608_v11, %s1112_s12 }
  0x37   : > { %740 = vmatpush.bf16.msra.mxu0 %v1013_v18 }
  0x38   : > { %627 = vrot.lane.b32.xlu0 %v624_v31, %s1110_s14 }
  0x3a   : > { %648 = vrot.lane.b32.xlu2 %v624_v31, %s1113_s13 }
  0x3c   : > { %645 = vrot.lane.b32.xlu1 %v642_v36, %s1114_s16  ;;  %v571_v36 = vld [vmem:[%s1361_s4 + $0x20] sm:$0xf] }
  0x3d   : > { %v767_v38 = vunpack.c.l.b16 %v571_v36 }
  0x3f   : > { %v772_v42 = vpack.c.b16 %v767_v38, %v767_v38 }
  0x40   : > { %643 = vrot.lane.b32.xlu0 %v619_v23, %s1114_s16 }
  0x41   : > { %v780_v43 = vsel %vm729_vm0, %v772_v42, 0 }
  0x42   : > { %467 = vrot.lane.b32.xlu2 %v464_v45, %s1109_s24  ;;  %785 = vmatpush.bf16.msra.mxu1 %v780_v43 }
  0x44   : > { %465 = vrot.lane.b32.xlu1 %v457_v44, %s1109_s24  ;;  %s967_s24 = sshll.u32 %s1376_s25, 2 }
  0x45   : > { %s436_s11 = sadd.s32 %s967_s24, %s1380_s8 }
  0x48   : > { %650 = vrot.lane.b32.xlu0 %v647_v47, %s1113_s13 }
  0x4a   : > { %478 = vrot.lane.b32.xlu2 %v450_v35, %s1107_s22 }
  0x4c   : > { %473 = vrot.lane.b32.xlu1 %v470_v49, %s1108_s23 }
  0x50   : > { %471 = vrot.lane.b32.xlu0 %v469_v51, %s1108_s23  ;;  %v1011_v51 = vld [vmem:[%s1361_s4 + $0x10] sm:$0xff] }
  0x52   : > { %491 = vrot.lane.b32.xlu2 %v488_v55, %s1111_s15 }
  0x54   : > { %489 = vrot.lane.b32.xlu1 %v464_v45, %s1111_s15 }
  0x58   : > { %480 = vrot.lane.b32.xlu0 %v477_v48, %s1107_s22 }
  0x5a   : > { %501 = vrot.lane.b32.xlu2 %v477_v48, %s1112_s12  ;;  %v1012_v48 = vld [vmem:[%s1361_s4 + $0x18] sm:$0xff] }
  0x5b   : > { %786 = vmatpush.bf16.msra.mxu1 %v1012_v48 }
  0x5c   : > { %496 = vrot.lane.b32.xlu1 %v493_v59, %s1110_s14 }
  0x5f   : > { %787 = vmatpush.bf16.msra.mxu1 %v1011_v51 }
  0x60   : > { %494 = vrot.lane.b32.xlu0 %v470_v49, %s1110_s14  ;;  %s968_s14 = sshll.u32 %s436_s11, 1 }
  0x62   : > { %514 = vrot.lane.b32.xlu2 %v511_v62, %s1114_s16 }
  0x63   : > { %788 = vmatpush.bf16.msra.mxu1 %v1010_v54 }
  0x64   : > { %512 = vrot.lane.b32.xlu1 %v488_v55, %s1114_s16  ;;  %v1009_v55 = vld [vmem:[%s1361_s4] sm:$0xff] }
  0x67   : > { %789 = vmatpush.bf16.msra.mxu1 %v1009_v55 }
  0x68   : > { %503 = vrot.lane.b32.xlu0 %v500_v57, %s1112_s12 }
  0x6c   : > { %519 = vrot.lane.b32.xlu1 %v516_v63, %s1113_s13 }
  0x70   : > { %517 = vrot.lane.b32.xlu0 %v493_v59, %s1113_s13  ;;  %s438_s13 = scalar_lea.vmem %s1364_s7, %s968_s14 }
  0x74   : > { %v610_v2 = vpop.permute.xlu2 %609 }
  0x7c   : > { %v612_v3 = vpop.permute.xlu2 %611 }
  0x84   : > { %v626_v11 = vpop.permute.xlu2 %625 }
  0x8c   : > { %v635_v17 = vpop.permute.xlu2 %634 }
  0x8e   : > { %v603_v6 = vpop.permute.xlu1 %602 }
  0x92   : > { %v597_v9 = vpop.permute.xlu0 %596 }
  0x93   : > { %v654_v21 = vsel %vm521_vm1, %v1203_v0, %v597_v9 }
  0x94   : > { %v649_v22 = vpop.permute.xlu2 %648  ;;  %v659_v23 = vsel %vm528_vm2, %v654_v21, %v603_v6 }
  0x95   : > { %v663_v28 = vsel %vm533_vm3, %v659_v23, %v610_v2 }
  0x96   : > { %v605_v12 = vpop.permute.xlu1 %604 }
  0x9a   : > { %v599_v14 = vpop.permute.xlu0 %598 }
  0x9b   : > { %v657_v25 = vsel %vm521_vm1, %v1205_v1, %v599_v14 }
  0x9c   : > { %v661_v31 = vsel %vm528_vm2, %v657_v25, %v605_v12  ;;  %v468_v35 = vpop.permute.xlu2 %467 }
  0x9d   : > { %v665_v32 = vsel %vm533_vm3, %v661_v31, %v612_v3  ;;  %v527_v61 = vsel %vm521_vm1, %v1230_v27, %v468_v35 }
  0x9e   : > { %v623_v16 = vpop.permute.xlu1 %622 }
  0x9f   : > { %v669_v39 = vsel %vm538_vm4, %v665_v32, %v623_v16 }
  0xa2   : > { %v621_v19 = vpop.permute.xlu0 %620 }
  0xa3   : > { %v667_v29 = vsel %vm538_vm4, %v663_v28, %v621_v19 }
  0xa4   : > { %v671_v0 = vsel %vm543_vm5, %v667_v29, %v626_v11  ;;  %v479_v49 = vpop.permute.xlu2 %478 }
  0xa6   : > { %v633_v20 = vpop.permute.xlu1 %632 }
  0xa7   : > { %v675_v33 = vsel %vm548_vm6, %v671_v0, %v633_v20 }
  0xaa   : > { %v628_v24 = vpop.permute.xlu0 %627 }
  0xab   : > { %v673_v40 = vsel %vm543_vm5, %v669_v39, %v628_v24 }
  0xac   : > { %v677_v44 = vsel %vm548_vm6, %v673_v40, %v635_v17  ;;  %v492_v57 = vpop.permute.xlu2 %491 }
  0xae   : > { %v646_v30 = vpop.permute.xlu1 %645 }
  0xaf   : > { %v681_v45 = vsel %vm553_vm8, %v677_v44, %v646_v30 }
  0xb2   : > { %v644_v34 = vpop.permute.xlu0 %643 }
  0xb3   : > { %v679_v1 = vsel %vm553_vm8, %v675_v33, %v644_v34 }
  0xb4   : > { %v683_v37 = vsel %vm558_vm7, %v679_v1, %v649_v22  ;;  %v502_v60 = vpop.permute.xlu2 %501  ;;  %v1066_v22 = vld [vmem:[%s1363_s6] ss:$0 sm:$0xff] }
  0xb5   : > { %695 = vst [vmem:[#allocation1] ss:$4 sm:$0xff] %v683_v37 }
  0xb6   : > { %v466_v41 = vpop.permute.xlu1 %465 }
  0xb7   : > { %v524_v4 = vsel %vm521_vm1, %v1228_v26, %v466_v41 }
  0xba   : > { %v651_v46 = vpop.permute.xlu0 %650 }
  0xbb   : > { %v685_v47 = vsel %vm558_vm7, %v681_v45, %v651_v46 }
  0xbc   : > { %697 = vst [vmem:[#allocation1 + $0x1] ss:$4 sm:$0xff] %v685_v47  ;;  %v515_v10 = vpop.permute.xlu2 %514 }
  0xbe   : > { %v474_v50 = vpop.permute.xlu1 %473 }
  0xbf   : > { %v532_v63 = vsel %vm528_vm2, %v527_v61, %v474_v50 }
  0xc2   : > { %v472_v52 = vpop.permute.xlu0 %471 }
  0xc3   : > { %v698_v53 = vld.sshfl [vmem:[#allocation1] sm:$0xff pattern:$0x73625140]  ;;  %v530_v5 = vsel %vm528_vm2, %v524_v4, %v472_v52 }
  0xc4   : > { %985 = vmatmul.msk.bf16.vlgmr.msra.gmra.mxu0 %vm726_vm9, %v698_v53  ;;  %v535_v27 = vsel %vm533_vm3, %v530_v5, %v479_v49 }
  0xc6   : > { %v490_v56 = vpop.permute.xlu1 %489 }
  0xc7   : > { %v540_v11 = vsel %vm538_vm4, %v535_v27, %v490_v56 }
  0xca   : > { %v481_v58 = vpop.permute.xlu0 %480 }
  0xcb   : > { %v537_v2 = vsel %vm533_vm3, %v532_v63, %v481_v58 }
  0xcc   : > { %v542_v6 = vsel %vm538_vm4, %v537_v2, %v492_v57 }
  0xce   : > { %v497_v59 = vpop.permute.xlu1 %496 }
  0xcf   : > { %v547_v7 = vsel %vm543_vm5, %v542_v6, %v497_v59 }
  0xd2   : > { %v495_v62 = vpop.permute.xlu0 %494 }
  0xd3   : > { %v545_v12 = vsel %vm543_vm5, %v540_v11, %v495_v62 }
  0xd4   : > { %v550_v15 = vsel %vm548_vm6, %v545_v12, %v502_v60 }
  0xd6   : > { %v513_v3 = vpop.permute.xlu1 %512 }
  0xd7   : > { %v555_v16 = vsel %vm553_vm8, %v550_v15, %v513_v3 }
  0xda   : > { %v504_v8 = vpop.permute.xlu0 %503 }
  0xdb   : > { %v552_v9 = vsel %vm548_vm6, %v547_v7, %v504_v8 }
  0xdc   : > { %v557_v26 = vsel %vm553_vm8, %v552_v9, %v515_v10 }
  0xde   : > { %v520_v13 = vpop.permute.xlu1 %519 }
  0xdf   : > { %v562_v14 = vsel %vm558_vm7, %v557_v26, %v520_v13 }
  0xe0   : > { %748 = vst [vmem:[#allocation1 + $0x1] ss:$4 sm:$0xff] %v562_v14 }
  0xe2   : > { %v518_v17 = vpop.permute.xlu0 %517 }
  0xe3   : > { %v560_v18 = vsel %vm558_vm7, %v555_v16, %v518_v17 }
  0xe4   : > { %746 = vst [vmem:[#allocation1] ss:$4 sm:$0xff] %v560_v18 }
  0xeb   : > { %v749_v19 = vld.sshfl [vmem:[#allocation1] sm:$0xff pattern:$0x73625140] }
  0xec   : > { %1002 = vmatmul.msk.bf16.vlgmr.msra.gmra.mxu1 %vm726_vm9, %v749_v19 }
 0x141   : > { %v742_v20 = vpop.f32.mrf.mxu0 }
 0x149   : > { %v744_v21 = vpop.f32.mrf.mxu0 }
 0x169   : > { %v791_v23 = vpop.f32.mrf.mxu1 }
 0x16a   : > { %v792_v24 = vadd.f32 %v791_v23, %v742_v20 }
 0x16c   : > { %v799_v25 = vadd.f32 %v1066_v22, %v792_v24 }
 0x16e   : > { %v800_v28 = vmax.f32 %v799_v25, 0.0 }
 0x170   : > { %v802_v29 = vrot.slane %v800_v28, 4  ;;  %v804_v30 = vpack.c.bf16 %v800_v28, %v800_v28 }
 0x171   : > { %v793_v31 = vpop.f32.mrf.mxu1 }
 0x172   : > { %v805_v0 = vpack.c.bf16 %v802_v29, %v802_v29  ;;  %807 = vst.msk [vmem:[%s438_s13] sm:$0x3] %vm806_vm10, %v804_v30 }
 0x174   : > { %808 = vst.msk [vmem:[%s438_s13 + $0x2] sm:$0x3] %vm806_vm10, %v805_v0 }
 0x175 PF: > { %s17_s28 = sadd.s32 1, %s1105_s28   ;;  %s1365_s24 = smov %s1097_s26 }
 0x176   : > { %p14_p9 = scmp.ge.s32.totalorder %s17_s28, 6   ;;  %s1366_s25 = smov %s1101_s27 }
 0x177   : > { %s1367_s26 = smov %s1370_s29  ;;  %s1368_s27 = smov %s1374_s30 }
 0x178   :  { %16 = sbr.rel (!%p14_p9) target bundleno = 3 (0x3), region = 89 }

// kernel: rsu4_forward.14
= control target key start
LH: loop header
LB: loop body
LE: loop exit
PB: predicated region body
PF: predicated region fallthrough
CT: control target
= control target key end

     0   :  { %s1554_s24 = smov 0   ;;  %s1556_s25 = smov 0   ;;  %s2023_s0 = inlined_call_operand.vmem [shape: bf16[2,10,10,8], index: 0, kind: input, shape index: {}, may-alias: {0,1}]   ;;  %s2024_s1 = inlined_call_operand.vmem [shape: bf16[2,10,10,8], index: 1, kind: input, shape index: {}, may-alias: {0,1}]   ;;  %s2025_s2 = inlined_call_operand.vmem [shape: bf16[2,10,10,8], index: 2, kind: input, shape index: {}, may-alias: {2,3}]   ;;  %s2026_s3 = inlined_call_operand.vmem [shape: bf16[2,10,10,8], index: 3, kind: input, shape index: {}, may-alias: {2,3}]   ;;  %s2027_s4 = inlined_call_operand.vmem [shape: bf16[72,8], index: 4, kind: input, shape index: {}]   ;;  %s2028_s5 = inlined_call_operand.vmem [shape: bf16[72,8], index: 5, kind: input, shape index: {}]   ;;  %s2029_s6 = inlined_call_operand.vmem [shape: f32[1,8], index: 6, kind: input, shape index: {}]   ;;  %s2030_s7 = inlined_call_operand.vmem [shape: bf16[2,8,8,8], index: 7, kind: output, shape index: {}]  }
   0x1   :  { %s1558_s26 = smov 0   ;;  %s1560_s27 = smov 0  }
   0x2   :  { %s1562_s28 = smov 0  }
   0x3 LB: > { %s26_s29 = sadd.s32 1, %s1496_s26  ;;  %s29_s30 = sadd.s32 1, %s1500_s27  ;;  %s1504_s28 = sphi %s1562_s28, %s17_s28   ;;  %s1500_s27 = sphi %s1560_s27, %s2035_s27   ;;  %s1496_s26 = sphi %s1558_s26, %s2034_s26   ;;  %s1492_s25 = sphi %s1556_s25, %s2033_s25   ;;  %s1488_s24 = sphi %s1554_s24, %s2032_s24  }
   0x4   : > { %p27_p0 = scmp.ge.s32.totalorder %s26_s29, 2  ;;  %p1314_p1 = scmp.ge.s32.totalorder %s1504_s28, 1 }
   0x5   : > { %p349_p2 = scmp.lt.s32.totalorder %s1504_s28, 5 }
   0x6   : > { %s2037_s29 = smov (%p27_p0, %s26_s29), 0  ;;  %s2039_s30 = smov (!%p27_p0, %s29_s30), %s1500_s27 }
   0x7   : > { %p350_p3 = pnand %p1314_p1, %p349_p2  ;;  %p31_p4 = scmp.ge.s32.totalorder %s2039_s30, 2 }
   0x8   : > { %s1584_s8 = sshll.u32 (!%p350_p3), %s1488_s24, 2  ;;  %p440_p5 = scmp.lt.s32.totalorder (!%p350_p3), %s1492_s25, 1 }
   0x9   : > { %s2041_s30 = smov (%p31_p4, %s2039_s30), 0  ;;  %353 = sbr.rel (%p350_p3) target bundleno = 460 (0x1cc), region = 48 }
   0xa   : > { %p442_p6 = scmp.lt.s32.totalorder (!%p350_p3), %s1584_s8, 9  ;;  %s1403_s13 = sadd.s32 (!%p350_p3), 4, %s1584_s8 }
   0xb   : > { %p1594_p7 = scmp.lt.s32.totalorder (!%p350_p3), %s1403_s13, 9  ;;  %s1506_s22 = smov (!%p350_p3), 24  }
   0xc   : > { %s1507_s24 = smov (!%p350_p3), 16   ;;  %s1509_s19 = smov (!%p350_p3), 32  }
   0xd   : > { %s1510_s20 = smov (!%p350_p3), 40   ;;  %p509_p8 = scmp.lt.s32.totalorder (!%p350_p3), %s1584_s8, 7 }
   0xe   : > { %s2043_s25 = smov (!%p440_p5, %s1492_s25), 1  ;;  %s2045_s13 = smov (!%p1594_p7, %s1403_s13), 9  ;;  %vm676_vm0 = vcmask 64512   ;;  %vm689_vm1 = vcmask 130048   ;;  %vm698_vm2 = vcmask 195584   ;;  %vm707_vm3 = vcmask 261120  }
   0xf   : > { %s443_s9 = scalar_select %p442_p6, %s1584_s8, 9  ;;  %vm1041_vm4 = vcmask 1043456   ;;  %vm716_vm5 = vcmask 326656   ;;  %vm725_vm6 = vcmask 392192   ;;  %vm734_vm7 = vcmask 457728  }
  0x10   : > { %s1416_s10 = smul.u32 20, %s2043_s25  ;;  %s1320_s23 = sshll.u32 %s2045_s13, 1  ;;  %vm743_vm8 = vcmask 523264   ;;  %vm1034_vm9 = vcmask 588800   ;;  %vm1145_vm10 = vcmask 60416  }
  0x11   : > { %s1316_s11 = sshll.u32 %s443_s9, 1  ;;  %s2047_s8 = smov (!%p509_p8, %s1584_s8), 7 }
  0x12   : > { %s446_s12 = sadd.s32 %s1416_s10, %s1316_s11  ;;  %s464_s9 = sadd.s32 %s1416_s10, %s1320_s23 }
  0x13   : > { %s1317_s14 = sshll.u32 %s446_s12, 2  ;;  %s1321_s11 = sshll.u32 %s464_s9, 2 }
  0x14   : > { %s1601_s18 = scalar_lea.vmem %s2025_s2, %s1317_s14  ;;  %s1606_s21 = scalar_lea.vmem %s2023_s0, %s1317_s14 }
  0x15   : > { %v1609_v0 = vld [vmem:[%s1601_s18 + $0x18] sm:$0xf]  ;;  %v768_v1 = vld [vmem:[%s1601_s18 + $0x1c] sm:$0x1]  ;;  %v1613_v2 = vld [vmem:[%s1601_s18 + $0x10] sm:$0xf]  ;;  %s1666_s14 = scalar_lea.vmem %s2024_s1, %s1321_s11  ;;  %s1674_s17 = scalar_lea.vmem %s2026_s3, %s1321_s11 }
  0x16   : > { %v1616_v3 = vunpack.c.l.b16 %v1609_v0  ;;  %v788_v4 = vunpack.c.l.b16 %v768_v1  ;;  %v766_v5 = vld [vmem:[%s1601_s18 + $0x14] sm:$0x1]  ;;  %v1620_v6 = vunpack.c.l.b16 %v1613_v2  ;;  %v1623_v7 = vld [vmem:[%s1606_s21 + $0x18] sm:$0xf]  ;;  %v524_v8 = vld [vmem:[%s1606_s21 + $0x1c] sm:$0x1] }
  0x17   : > { %v786_v9 = vunpack.c.l.b16 %v766_v5  ;;  %v543_v10 = vunpack.c.l.b16 %v1623_v7  ;;  %v1628_v11 = vld [vmem:[%s1606_s21 + $0x10] sm:$0xf]  ;;  %v522_v12 = vld [vmem:[%s1606_s21 + $0x14] sm:$0x1]  ;;  %v544_v17 = vunpack.c.l.b16 %v524_v8  ;;  %s1508_s12 = smov 8   ;;  %s1511_s23 = smov 48  }
  0x18   : > { %v792_v13 = vpack.c.b16 %v788_v4, %v1616_v3  ;;  %v1635_v14 = vunpack.c.l.b16 %v1628_v11  ;;  %v542_v15 = vunpack.c.l.b16 %v522_v12  ;;  %v526_v38 = vld [vmem:[%s1666_s14 + $0x4] sm:$0x1]  ;;  %v525_v40 = vld [vmem:[%s1666_s14] sm:$0xf]  ;;  %v1695_v50 = vpack.c.b16 %v1616_v3, %v1616_v3  ;;  %v1723_v63 = vld [vmem:[%s1606_s21 + $0x8] sm:$0xf] }
  0x19   : > { %v791_v16 = vpack.c.b16 %v786_v9, %v1620_v6  ;;  %v1638_v18 = vpack.c.b16 %v543_v10, %v543_v10  ;;  %v548_v25 = vpack.c.b16 %v544_v17, %v543_v10  ;;  %v612_v42 = vunpack.c.l.b16 %v526_v38  ;;  %v769_v43 = vld [vmem:[%s1674_s17] sm:$0xf]  ;;  %v770_v48 = vld [vmem:[%s1674_s17 + $0x4] sm:$0x1]  ;;  %v520_v1 = vld [vmem:[%s1606_s21 + $0xc] sm:$0x1] }
  0x1a   : > { %v1640_v19 = vrot.slane %v792_v13, 1  ;;  %v547_v20 = vpack.c.b16 %v542_v15, %v1635_v14  ;;  %v817_v31 = vshll.u32 %v792_v13, 16  ;;  %v815_v34 = vshrl.u32 %v792_v13, 16  ;;  %v771_v4 = vld [vmem:[%s1674_s17 + $0x8] sm:$0xf]  ;;  %s1512_s9 = smov 56  }
  0x1b   : > { %v1643_v21 = vrot.slane %v791_v16, 1  ;;  %607 = vrot.lane.b32.xlu2 %v1638_v18, %s1506_s22  ;;  %v810_v22 = vshll.u32 %v791_v16, 16  ;;  %v808_v23 = vshrl.u32 %v791_v16, 16  ;;  %v573_v33 = vshll.u32 %v548_v25, 16  ;;  %v527_v9 = vld [vmem:[%s1666_s14 + $0x8] sm:$0xf] }
  0x1c   : > { %839 = vrot.lane.b32.xlu1 %v1640_v19, %s1507_s24  ;;  %v566_v24 = vshll.u32 %v547_v20, 16  ;;  %v564_v27 = vshrl.u32 %v547_v20, 16  ;;  %v1653_v29 = vrot.slane %v547_v20, 1  ;;  %v819_v35 = vrot.slane %v817_v31, 1  ;;  %v1334_v10 = vld [vmem:[%s1606_s21] sm:$0xf] }
  0x1d   : > { %837 = vrot.lane.b32.xlu0 %v1643_v21, %s1507_s24  ;;  %v812_v26 = vrot.slane %v810_v22, 1  ;;  %v571_v36 = vshrl.u32 %v548_v25, 16  ;;  %v575_v37 = vrot.slane %v573_v33, 1  ;;  %v1676_v39 = vrot.slane %v548_v25, 1  ;;  %v1392_v12 = vld [vmem:[%s1606_s21] sm:$0x10] }
  0x1e   : > { %v568_v28 = vrot.slane %v566_v24, 1  ;;  %v1679_v41 = vor.u32 %v819_v35, %v815_v34  ;;  %v598_v45 = vunpack.c.l.b16 %v525_v40  ;;  %v842_v46 = vunpack.c.l.b16 %v769_v43  ;;  %v1742_v16 = vld [vmem:[%s1601_s18 + $0x8] sm:$0xf]  ;;  %v764_v17 = vld [vmem:[%s1601_s18 + $0xc] sm:$0x1]  ;;  %s1513_s11 = smov 64  }
  0x1f   : > { %v1655_v30 = vor.u32 %v812_v26, %v808_v23  ;;  %v1682_v44 = vor.u32 %v575_v37, %v571_v36  ;;  %v856_v53 = vunpack.c.l.b16 %v770_v48  ;;  %v1729_v5 = vunpack.c.l.b16 %v1723_v63  ;;  %v528_v23 = vld [vmem:[%s1666_s14 + $0xc] sm:$0x1]  ;;  %v1338_v34 = vld [vmem:[%s1601_s18] sm:$0xf]  ;;  %v1397_v35 = vld [vmem:[%s1601_s18] sm:$0x10] }
  0x20   : > { %v1657_v32 = vor.u32 %v568_v28, %v564_v27  ;;  %v1688_v47 = vpack.c.b16 %v612_v42, %v598_v45  ;;  %v846_v49 = vpack.c.b16 %v842_v46, %v842_v46  ;;  %v602_v52 = vpack.c.b16 %v598_v45, %v598_v45  ;;  %v772_v43 = vld [vmem:[%s1674_s17 + $0xc] sm:$0x1] }
  0x21   : > { %v1703_v56 = vpack.c.b16 %v856_v53, %v842_v46  ;;  %v540_v8 = vunpack.c.l.b16 %v520_v1  ;;  %v883_v13 = vunpack.c.l.b16 %v771_v4  ;;  %v639_v20 = vunpack.c.l.b16 %v527_v9 }
  0x22   : > { %v617_v51 = vshll.u32 %v1688_v47, 16  ;;  %v615_v54 = vshrl.u32 %v1688_v47, 16  ;;  %v629_v61 = vrot.slane %v1688_v47, 1  ;;  %v1335_v22 = vor.u32 %v1392_v12, %v1334_v10 }
  0x23   : > { %593 = vrot.lane.b32.xlu2 %v1653_v29, %s1507_s24  ;;  %v861_v58 = vshll.u32 %v1703_v56, 16  ;;  %v859_v59 = vshrl.u32 %v1703_v56, 16  ;;  %v873_v3 = vrot.slane %v1703_v56, 1  ;;  %v1739_v15 = vpack.c.b16 %v540_v8, %v1729_v5 }
  0x24   : > { %825 = vrot.lane.b32.xlu1 %v1655_v30, %s1508_s12  ;;  %v619_v55 = vrot.slane %v617_v51, 1  ;;  %v884_v24 = vpack.c.b16 %v883_v13, %v883_v13  ;;  %v1749_v25 = vunpack.c.l.b16 %v1742_v16  ;;  %v784_v26 = vunpack.c.l.b16 %v764_v17 }
  0x25   : > { %581 = vrot.lane.b32.xlu0 %v1657_v32, %s1508_s12  ;;  %v863_v60 = vrot.slane %v861_v58, 1  ;;  %v559_v27 = vshll.u32 %v1739_v15, 16  ;;  %v640_v28 = vpack.c.b16 %v639_v20, %v639_v20  ;;  %v650_v31 = vunpack.c.l.b16 %v528_v23 }
  0x26   : > { %v620_v57 = vor.u32 %v619_v55, %v615_v54  ;;  %v552_v33 = vshll.u32 %v1335_v22, 16  ;;  %v1756_v36 = vpack.c.b16 %v784_v26, %v1749_v25  ;;  %v557_v37 = vshrl.u32 %v1739_v15, 16 }
  0x27   : > { %v1713_v62 = vor.u32 %v863_v60, %v859_v59  ;;  %v561_v38 = vrot.slane %v559_v27, 1  ;;  %v1339_v40 = vor.u32 %v1397_v35, %v1338_v34  ;;  %v651_v42 = vpack.c.b16 %v650_v31, %v639_v20 }
  0x28   : > { %v550_v45 = vshrl.u32 %v1335_v22, 16  ;;  %v554_v46 = vrot.slane %v552_v33, 1  ;;  %v803_v48 = vshll.u32 %v1756_v36, 16  ;;  %v894_v51 = vunpack.c.l.b16 %v772_v43 }
  0x29   : > { %v796_v53 = vshll.u32 %v1339_v40, 16  ;;  %v655_v55 = vshll.u32 %v651_v42, 16  ;;  %v794_v60 = vshrl.u32 %v1339_v40, 16  ;;  %v653_v4 = vshrl.u32 %v651_v42, 16 }
  0x2a   : > { %v555_v54 = vor.u32 %v554_v46, %v550_v45  ;;  %v805_v58 = vrot.slane %v803_v48, 1  ;;  %v895_v59 = vpack.c.b16 %v894_v51, %v883_v13  ;;  %v585_v13 = vrot.slane %v1335_v22, 1 }
  0x2b   : > { %595 = vrot.lane.b32.xlu2 %v1676_v39, %s1507_s24  ;;  %v798_v1 = vrot.slane %v796_v53, 1  ;;  %v657_v8 = vrot.slane %v655_v55, 1  ;;  %v586_v26 = vrot.slane %v1739_v15, 1  ;;  %v830_v27 = vrot.slane %v1756_v36, 1 }
  0x2c   : > { %827 = vrot.lane.b32.xlu1 %v1679_v41, %s1508_s12  ;;  %v899_v12 = vshll.u32 %v895_v59, 16  ;;  %v600_v15 = vpack.c.b16 %v1635_v14, %v1635_v14  ;;  %v599_v47 = vpack.c.b16 %v1729_v5, %v1729_v5  ;;  %v843_v31 = vpack.c.b16 %v1749_v25, %v1749_v25 }
  0x2d   : > { %583 = vrot.lane.b32.xlu0 %v1682_v44, %s1508_s12  ;;  %v799_v10 = vor.u32 %v798_v1, %v794_v60  ;;  %v658_v17 = vor.u32 %v657_v8, %v653_v4 }
  0x2e   : > { %v901_v20 = vrot.slane %v899_v12, 1 }
  0x33   : > { %853 = vrot.lane.b32.xlu2 %v846_v49, %s1506_s22 }
  0x34   : > { %851 = vrot.lane.b32.xlu1 %v1695_v50, %s1506_s22 }
  0x35   : > { %609 = vrot.lane.b32.xlu0 %v602_v52, %s1506_s22 }
  0x3b   : > { %869 = vrot.lane.b32.xlu2 %v1679_v41, %s1509_s19 }
  0x3c   : > { %627 = vrot.lane.b32.xlu1 %v620_v57, %s1509_s19 }
  0x3d   : > { %625 = vrot.lane.b32.xlu0 %v1682_v44, %s1509_s19 }
  0x43   : > { %636 = vrot.lane.b32.xlu2 %v629_v61, %s1510_s20 }
  0x44   : > { %634 = vrot.lane.b32.xlu1 %v1676_v39, %s1510_s20 }
  0x45   : > { %871 = vrot.lane.b32.xlu0 %v1713_v62, %s1509_s19 }
  0x4b   : > { %645 = vrot.lane.b32.xlu2 %v602_v52, %s1511_s23  ;;  %v562_v52 = vor.u32 %v561_v38, %v557_v37 }
  0x4c   : > { %880 = vrot.lane.b32.xlu1 %v873_v3, %s1510_s20 }
  0x4d   : > { %878 = vrot.lane.b32.xlu0 %v1640_v19, %s1510_s20 }
  0x53   : > { %891 = vrot.lane.b32.xlu2 %v884_v24, %s1511_s23  ;;  %v667_v24 = vrot.slane %v651_v42, 1 }
  0x54   : > { %889 = vrot.lane.b32.xlu1 %v846_v49, %s1511_s23  ;;  %v801_v49 = vshrl.u32 %v1756_v36, 16 }
  0x55   : > { %647 = vrot.lane.b32.xlu0 %v640_v28, %s1511_s23  ;;  %v829_v28 = vrot.slane %v1339_v40, 1 }
  0x56   : > { %v806_v9 = vor.u32 %v805_v58, %v801_v49 }
  0x5b   : > { %663 = vrot.lane.b32.xlu2 %v620_v57, %s1512_s9  ;;  %v897_v57 = vshrl.u32 %v895_v59, 16 }
  0x5c   : > { %579 = vrot.lane.b32.xlu1 %v562_v52, %s1508_s12 }
  0x5d   : > { %577 = vrot.lane.b32.xlu0 %v555_v54, %s1508_s12  ;;  %v902_v23 = vor.u32 %v901_v20, %v897_v57  ;;  %v1393_v57 = vld [vmem:[%s2027_s4] sm:$0xff] }
  0x63   : > { %823 = vrot.lane.b32.xlu2 %v806_v9, %s1508_s12 }
  0x64   : > { %821 = vrot.lane.b32.xlu1 %v799_v10, %s1508_s12 }
  0x65   : > { %665 = vrot.lane.b32.xlu0 %v658_v17, %s1512_s9 }
  0x6b   : > { %589 = vrot.lane.b32.xlu2 %v585_v13, %s1507_s24  ;;  %v517_v13 = vld [vmem:[%s1606_s21] sm:$0xf] }
  0x6c   : > { %909 = vrot.lane.b32.xlu1 %v902_v23, %s1512_s9 }
  0x6d   : > { %907 = vrot.lane.b32.xlu0 %v1713_v62, %s1512_s9 }
  0x73   : > { %674 = vrot.lane.b32.xlu2 %v667_v24, %s1513_s11 }
  0x74   : > { %672 = vrot.lane.b32.xlu1 %v629_v61, %s1513_s11  ;;  %v911_v61 = vrot.slane %v895_v59, 1 }
  0x75   : > { %591 = vrot.lane.b32.xlu0 %v586_v26, %s1507_s24  ;;  %v608_v22 = vpop.permute.xlu2 %607 }
  0x7b   : > { %916 = vrot.lane.b32.xlu2 %v873_v3, %s1513_s11  ;;  %v844_v3 = vpack.c.b16 %v1620_v6, %v1620_v6 }
  0x7c   : > { %835 = vrot.lane.b32.xlu1 %v830_v27, %s1507_s24 }
  0x7d   : > { %833 = vrot.lane.b32.xlu0 %v829_v28, %s1507_s24  ;;  %v594_v62 = vpop.permute.xlu2 %593  ;;  %v1400_v28 = vld [vmem:[%s2028_s5 + $0x10] sm:$0xff] }
  0x83   : > { %605 = vrot.lane.b32.xlu2 %v600_v15, %s1506_s22 }
  0x84   : > { %603 = vrot.lane.b32.xlu1 %v599_v47, %s1506_s22  ;;  %v761_v47 = vld [vmem:[%s1601_s18] sm:$0xf]  ;;  %s1330_s18 = sshll.u32 %s2043_s25, 3 }
  0x85   : > { %918 = vrot.lane.b32.xlu0 %v911_v61, %s1513_s11  ;;  %v596_v56 = vpop.permute.xlu2 %595  ;;  %s512_s16 = sadd.s32 %s1330_s18, %s2047_s8 }
  0x86   : > { %s1331_s17 = sshll.u32 %s512_s16, 2 }
  0x8b   : > { %621 = vrot.lane.b32.xlu2 %v562_v52, %s1509_s19 }
  0x8c   : > { %849 = vrot.lane.b32.xlu1 %v844_v3, %s1506_s22 }
  0x8d   : > { %847 = vrot.lane.b32.xlu0 %v843_v31, %s1506_s22  ;;  %v854_v14 = vpop.permute.xlu2 %853 }
  0x8e   : > { %v840_v5 = vpop.permute.xlu1 %839 }
  0x8f   : > { %v838_v33 = vpop.permute.xlu0 %837 }
  0x93   : > { %867 = vrot.lane.b32.xlu2 %v1655_v30, %s1509_s19 }
  0x94   : > { %865 = vrot.lane.b32.xlu1 %v806_v9, %s1509_s19 }
  0x95   : > { %623 = vrot.lane.b32.xlu0 %v1657_v32, %s1509_s19  ;;  %v870_v6 = vpop.permute.xlu2 %869 }
  0x96   : > { %v826_v25 = vpop.permute.xlu1 %825 }
  0x97   : > { %v928_v34 = vsel %vm676_vm0, %v1613_v2, %v826_v25  ;;  %v582_v35 = vpop.permute.xlu0 %581 }
  0x98   : > { %v685_v36 = vsel %vm676_vm0, %v1628_v11, %v582_v35  ;;  %v937_v37 = vsel %vm689_vm1, %v928_v34, %v838_v33 }
  0x99   : > { %v695_v38 = vsel %vm689_vm1, %v685_v36, %v594_v62 }
  0x9a   : > { %v1812_v40 = vsel %vm698_vm2, %v695_v38, %v608_v22 }
  0x9b   : > { %874 = vrot.lane.b32.xlu2 %v830_v27, %s1510_s20 }
  0x9c   : > { %632 = vrot.lane.b32.xlu1 %v1653_v29, %s1510_s20 }
  0x9d   : > { %630 = vrot.lane.b32.xlu0 %v586_v26, %s1510_s20  ;;  %v1818_v2 = vpop.permute.xlu2 %636 }
  0x9e   : > { %v828_v42 = vpop.permute.xlu1 %827 }
  0x9f   : > { %v931_v11 = vsel %vm676_vm0, %v1609_v0, %v828_v42  ;;  %v584_v43 = vpop.permute.xlu0 %583 }
  0xa0   : > { %v939_v45 = vsel %vm689_vm1, %v931_v11, %v840_v5  ;;  %v688_v46 = vsel %vm676_vm0, %v1623_v7, %v584_v43 }
  0xa1   : > { %v1826_v48 = vsel %vm689_vm1, %v688_v46, %v596_v56  ;;  %v1829_v51 = vsel %vm698_vm2, %v939_v45, %v854_v14 }
  0xa3   : > { %643 = vrot.lane.b32.xlu2 %v1638_v18, %s1511_s23 }
  0xa4   : > { %641 = vrot.lane.b32.xlu1 %v600_v15, %s1511_s23  ;;  %v1399_v15 = vld [vmem:[%s2028_s5 + $0x8] sm:$0xff] }
  0xa5   : > { %876 = vrot.lane.b32.xlu0 %v1643_v21, %s1510_s20  ;;  %v1836_v0 = vpop.permute.xlu2 %645 }
  0xa6   : > { %v852_v52 = vpop.permute.xlu1 %851 }
  0xa7   : > { %v945_v7 = vsel %vm698_vm2, %v937_v37, %v852_v52  ;;  %v1839_v53 = vpop.permute.xlu0 %609 }
  0xa8   : > { %v1842_v54 = vsel %vm707_vm3, %v945_v7, %v870_v6  ;;  %v706_v14 = vsel %vm698_vm2, %v1826_v48, %v1839_v53 }
  0xab   : > { %659 = vrot.lane.b32.xlu2 %v1657_v32, %s1512_s9  ;;  %v760_v32 = vld [vmem:[%s2027_s4 + $0x20] sm:$0xf] }
  0xac   : > { %887 = vrot.lane.b32.xlu1 %v1695_v50, %s1511_s23  ;;  %v1091_v58 = vunpack.c.l.b16 %v760_v32 }
  0xad   : > { %885 = vrot.lane.b32.xlu0 %v844_v3, %s1511_s23  ;;  %v1849_v18 = vpop.permute.xlu2 %891  ;;  %v1398_v3 = vld [vmem:[%s2028_s5] sm:$0xff]  ;;  %s514_s23 = scalar_lea.vmem %s2030_s7, %s1331_s17 }
  0xae   : > { %v1851_v55 = vpop.permute.xlu1 %627  ;;  %v1096_v1 = vpack.c.b16 %v1091_v58, %v1091_v58 }
  0xaf   : > { %v1853_v49 = vpop.permute.xlu0 %625  ;;  %v715_v5 = vsel %vm707_vm3, %v706_v14, %v1851_v55 }
  0xb0   : > { %v713_v6 = vsel %vm707_vm3, %v1812_v40, %v1853_v49  ;;  %v724_v35 = vsel %vm716_vm5, %v715_v5, %v1818_v2 }
  0xb3   : > { %905 = vrot.lane.b32.xlu2 %v1679_v41, %s1512_s9  ;;  %v1108_v41 = vsel %vm1041_vm4, %v1096_v1, 0 }
  0xb4   : > { %903 = vrot.lane.b32.xlu1 %v1655_v30, %s1512_s9  ;;  %1411 = vmatpush.bf16.msra.mxu3 %v1108_v41  ;;  %v1396_v30 = vld [vmem:[%s2027_s4 + $0x18] sm:$0xff] }
  0xb5   : > { %661 = vrot.lane.b32.xlu0 %v1682_v44, %s1512_s9  ;;  %v1864_v50 = vpop.permute.xlu2 %663  ;;  %1113 = vmatpush.bf16.msra.mxu1 %v1108_v41 }
  0xb6   : > { %v1866_v59 = vpop.permute.xlu1 %634 }
  0xb7   : > { %v1868_v60 = vpop.permute.xlu0 %871  ;;  %v722_v34 = vsel %vm716_vm5, %v713_v6, %v1866_v59 }
  0xb8   : > { %1412 = vmatpush.bf16.msra.mxu3 %v1396_v30  ;;  %v731_v38 = vsel %vm725_vm6, %v722_v34, %v1836_v0  ;;  %v955_v58 = vsel %vm707_vm3, %v1829_v51, %v1868_v60 }
  0xb9   : > { %1114 = vmatpush.bf16.msra.mxu1 %v1396_v30  ;;  %v740_v11 = vsel %vm734_vm7, %v731_v38, %v1864_v50 }
  0xbb   : > { %912 = vrot.lane.b32.xlu2 %v1643_v21, %s1513_s11  ;;  %v1395_v21 = vld [vmem:[%s2027_s4 + $0x10] sm:$0xff] }
  0xbc   : > { %670 = vrot.lane.b32.xlu1 %v1676_v39, %s1513_s11  ;;  %1413 = vmatpush.bf16.msra.mxu3 %v1395_v21  ;;  %v996_v39 = vld [vmem:[%s2028_s5 + $0x20] sm:$0xf] }
  0xbd   : > { %668 = vrot.lane.b32.xlu0 %v1653_v29, %s1513_s11  ;;  %v824_v44 = vpop.permute.xlu2 %823  ;;  %v1394_v29 = vld [vmem:[%s2027_s4 + $0x8] sm:$0xff]  ;;  %1115 = vmatpush.bf16.msra.mxu1 %v1395_v21 }
  0xbe   : > { %v1880_v4 = vpop.permute.xlu1 %880  ;;  %v1884_v8 = vsel %vm676_vm0, %v1742_v16, %v824_v44  ;;  %v1024_v16 = vunpack.c.l.b16 %v996_v39 }
  0xbf   : > { %v1886_v9 = vpop.permute.xlu0 %878  ;;  %v963_v1 = vsel %vm716_vm5, %v955_v58, %v1880_v4 }
  0xc0   : > { %1414 = vmatpush.bf16.msra.mxu3 %v1394_v29  ;;  %v1029_v17 = vpack.c.b16 %v1024_v16, %v1024_v16  ;;  %v961_v50 = vsel %vm716_vm5, %v1842_v54, %v1886_v9  ;;  %v971_v30 = vsel %vm725_vm6, %v963_v1, %v1849_v18  ;;  %v1465_v1 = vld [vmem:[%s2029_s6] ss:$0 sm:$0xff] }
  0xc1   : > { %1116 = vmatpush.bf16.msra.mxu1 %v1394_v29 }
  0xc2   : > { %v1043_v20 = vsel %vm1041_vm4, %v1029_v17, 0 }
  0xc3   : > { %1406 = vmatpush.bf16.msra.mxu2 %v1043_v20  ;;  %1048 = vmatpush.bf16.msra.mxu0 %v1043_v20 }
  0xc4   : > { %1415 = vmatpush.bf16.msra.mxu3 %v1393_v57 }
  0xc5   : > { %914 = vrot.lane.b32.xlu0 %v1640_v19, %s1513_s11  ;;  %1117 = vmatpush.bf16.msra.mxu1 %v1393_v57  ;;  %v1401_v19 = vld [vmem:[%s2028_s5 + $0x18] sm:$0xff]  ;;  %v590_v24 = vpop.permute.xlu2 %589 }
  0xc6   : > { %v1899_v10 = vpop.permute.xlu1 %889 }
  0xc7   : > { %v648_v12 = vpop.permute.xlu0 %647  ;;  %1407 = vmatpush.bf16.msra.mxu2 %v1401_v19  ;;  %1049 = vmatpush.bf16.msra.mxu0 %v1401_v19  ;;  %v969_v59 = vsel %vm725_vm6, %v961_v50, %v1899_v10 }
  0xc8   : > { %v733_v36 = vsel %vm725_vm6, %v724_v35, %v648_v12 }
  0xcb   : > { %1408 = vmatpush.bf16.msra.mxu2 %v1400_v28  ;;  %1050 = vmatpush.bf16.msra.mxu0 %v1400_v28 }
  0xcd   : > { %v675_v31 = vpop.permute.xlu2 %674 }
  0xce   : > { %v580_v23 = vpop.permute.xlu1 %579 }
  0xcf   : > { %v682_v26 = vsel %vm676_vm0, %v1723_v63, %v580_v23  ;;  %v578_v22 = vpop.permute.xlu0 %577  ;;  %1409 = vmatpush.bf16.msra.mxu2 %v1399_v15  ;;  %1051 = vmatpush.bf16.msra.mxu0 %v1399_v15 }
  0xd0   : > { %v679_v27 = vsel %vm676_vm0, %v517_v13, %v578_v22 }
  0xd1   : > { %v1916_v62 = vsel %vm689_vm1, %v679_v27, %v590_v24 }
  0xd3   : > { %1410 = vmatpush.bf16.msra.mxu2 %v1398_v3  ;;  %1052 = vmatpush.bf16.msra.mxu0 %v1398_v3 }
  0xd5   : > { %v917_v40 = vpop.permute.xlu2 %916 }
  0xd6   : > { %v822_v61 = vpop.permute.xlu1 %821 }
  0xd7   : > { %v922_v63 = vsel %vm676_vm0, %v761_v47, %v822_v61  ;;  %v666_v56 = vpop.permute.xlu0 %665 }
  0xd8   : > { %v742_v37 = vsel %vm734_vm7, %v733_v36, %v666_v56 }
  0xd9   : > { %v751_v42 = vsel %vm743_vm8, %v742_v37, %v675_v31 }
  0xda   : > { %v1071_v2 = vunpack.c.l.b16 %v751_v42 }
  0xdd   : > { %v606_v0 = vpop.permute.xlu2 %605 }
  0xde   : > { %v910_v33 = vpop.permute.xlu1 %909 }
  0xdf   : > { %v908_v25 = vpop.permute.xlu0 %907  ;;  %v979_v54 = vsel %vm734_vm7, %v971_v30, %v910_v33 }
  0xe0   : > { %v977_v41 = vsel %vm734_vm7, %v969_v59, %v908_v25 }
  0xe1   : > { %v985_v44 = vsel %vm743_vm8, %v977_v41, %v917_v40 }
  0xe2   : > { %v1003_v60 = vunpack.c.l.b16 %v985_v44 }
  0xe5   : > { %v622_v21 = vpop.permute.xlu2 %621 }
  0xe6   : > { %v673_v43 = vpop.permute.xlu1 %672 }
  0xe7   : > { %v749_v45 = vsel %vm743_vm8, %v740_v11, %v673_v43  ;;  %v592_v46 = vpop.permute.xlu0 %591 }
  0xe8   : > { %v1070_v48 = vunpack.c.l.b16 %v749_v45  ;;  %v693_v52 = vsel %vm689_vm1, %v682_v26, %v592_v46 }
  0xe9   : > { %v702_v47 = vsel %vm698_vm2, %v693_v52, %v606_v0 }
  0xea   : > { %v1073_v7 = vpack.c.b16 %v1071_v2, %v1070_v48 }
  0xec   : > { %1375 = vmatmul.msk.bf16.vlgmr.msra.gmra.mxu3 %vm1034_vm9, %v1073_v7 }
  0xed   : > { %v868_v10 = vpop.permute.xlu2 %867 }
  0xee   : > { %v836_v53 = vpop.permute.xlu1 %835 }
  0xef   : > { %v935_v55 = vsel %vm689_vm1, %v1884_v8, %v836_v53  ;;  %v834_v49 = vpop.permute.xlu0 %833 }
  0xf0   : > { %v933_v32 = vsel %vm689_vm1, %v922_v63, %v834_v49 }
  0xf5   : > { %v875_v18 = vpop.permute.xlu2 %874 }
  0xf6   : > { %v604_v8 = vpop.permute.xlu1 %603 }
  0xf7   : > { %v919_v9 = vpop.permute.xlu0 %918  ;;  %v700_v28 = vsel %vm698_vm2, %v1916_v62, %v604_v8 }
  0xf8   : > { %v987_v51 = vsel %vm743_vm8, %v979_v54, %v919_v9  ;;  %v709_v56 = vsel %vm707_vm3, %v700_v28, %v622_v21 }
  0xf9   : > { %v1004_v29 = vunpack.c.l.b16 %v987_v51 }
  0xfb   : > { %v1006_v39 = vpack.c.b16 %v1004_v29, %v1003_v60 }
  0xfd   : > { %1357 = vmatmul.msk.bf16.vlgmr.msra.gmra.mxu2 %vm1034_vm9, %v1006_v39  ;;  %v644_v19 = vpop.permute.xlu2 %643 }
  0xfe   : > { %v850_v4 = vpop.permute.xlu1 %849 }
  0xff   : > { %v848_v16 = vpop.permute.xlu0 %847  ;;  %v943_v34 = vsel %vm698_vm2, %v935_v55, %v850_v4 }
 0x100   : > { %v941_v5 = vsel %vm698_vm2, %v933_v32, %v848_v16  ;;  %v951_v43 = vsel %vm707_vm3, %v943_v34, %v868_v10 }
 0x105   : > { %v660_v26 = vpop.permute.xlu2 %659 }
 0x106   : > { %v866_v12 = vpop.permute.xlu1 %865 }
 0x107   : > { %v624_v17 = vpop.permute.xlu0 %623  ;;  %v949_v62 = vsel %vm707_vm3, %v941_v5, %v866_v12 }
 0x108   : > { %v711_v61 = vsel %vm707_vm3, %v702_v47, %v624_v17  ;;  %v957_v40 = vsel %vm716_vm5, %v949_v62, %v875_v18 }
 0x10d   : > { %v906_v63 = vpop.permute.xlu2 %905 }
 0x10e   : > { %v633_v57 = vpop.permute.xlu1 %632 }
 0x10f   : > { %v631_v20 = vpop.permute.xlu0 %630  ;;  %v720_v3 = vsel %vm716_vm5, %v711_v61, %v633_v57 }
 0x110   : > { %v718_v31 = vsel %vm716_vm5, %v709_v56, %v631_v20  ;;  %v729_v33 = vsel %vm725_vm6, %v720_v3, %v644_v19 }
 0x115   : > { %v913_v48 = vpop.permute.xlu2 %912 }
 0x116   : > { %v642_v13 = vpop.permute.xlu1 %641 }
 0x117   : > { %v877_v23 = vpop.permute.xlu0 %876  ;;  %v727_v14 = vsel %vm725_vm6, %v718_v31, %v642_v13 }
 0x118   : > { %v736_v35 = vsel %vm734_vm7, %v727_v14, %v660_v26  ;;  %v959_v46 = vsel %vm716_vm5, %v951_v43, %v877_v23 }
 0x11e   : > { %v888_v24 = vpop.permute.xlu1 %887 }
 0x11f   : > { %v886_v22 = vpop.permute.xlu0 %885  ;;  %v967_v7 = vsel %vm725_vm6, %v959_v46, %v888_v24 }
 0x120   : > { %v965_v45 = vsel %vm725_vm6, %v957_v40, %v886_v22  ;;  %v975_v0 = vsel %vm734_vm7, %v967_v7, %v906_v63 }
 0x126   : > { %v904_v27 = vpop.permute.xlu1 %903 }
 0x127   : > { %v662_v15 = vpop.permute.xlu0 %661  ;;  %v973_v2 = vsel %vm734_vm7, %v965_v45, %v904_v27 }
 0x128   : > { %v738_v6 = vsel %vm734_vm7, %v729_v33, %v662_v15  ;;  %v981_v53 = vsel %vm743_vm8, %v973_v2, %v913_v48 }
 0x129   : > { %v1001_v32 = vunpack.c.l.b16 %v981_v53 }
 0x12e   : > { %v671_v25 = vpop.permute.xlu1 %670 }
 0x12f   : > { %v747_v36 = vsel %vm743_vm8, %v738_v6, %v671_v25  ;;  %v669_v37 = vpop.permute.xlu0 %668 }
 0x130   : > { %v1069_v38 = vunpack.c.l.b16 %v747_v36  ;;  %v745_v42 = vsel %vm743_vm8, %v736_v35, %v669_v37 }
 0x131   : > { %v1068_v11 = vunpack.c.l.b16 %v745_v42 }
 0x133   : > { %v1072_v52 = vpack.c.b16 %v1069_v38, %v1068_v11 }
 0x135   : > { %1374 = vmatmul.msk.bf16.vlgmr.msra.gmra.mxu1 %vm1034_vm9, %v1072_v52 }
 0x137   : > { %v915_v55 = vpop.permute.xlu0 %914 }
 0x138   : > { %v983_v49 = vsel %vm743_vm8, %v975_v0, %v915_v55 }
 0x139   : > { %v1002_v50 = vunpack.c.l.b16 %v983_v49 }
 0x13b   : > { %v1005_v58 = vpack.c.b16 %v1002_v50, %v1001_v32 }
 0x13d   : > { %1356 = vmatmul.msk.bf16.vlgmr.msra.gmra.mxu0 %vm1034_vm9, %v1005_v58 }
 0x16f   : > { %v1124_v59 = vpop.f32.mrf.mxu3 }
 0x177   : > { %v1126_v9 = vpop.f32.mrf.mxu3 }
 0x180   : > { %v1059_v41 = vpop.f32.mrf.mxu2 }
 0x181   : > { %v1125_v30 = vadd.f32 %v1124_v59, %v1059_v41 }
 0x183   : > { %v1135_v44 = vadd.f32 %v1465_v1, %v1125_v30 }
 0x185   : > { %v1139_v8 = vmax.f32 %v1135_v44, 0.0 }
 0x187   : > { %v1143_v54 = vpack.c.bf16 %v1139_v8, %v1139_v8 }
 0x188   : > { %v1061_v21 = vpop.f32.mrf.mxu2 }
 0x189   : > { %1148 = vst.msk [vmem:[%s514_s23 + $0x8] sm:$0xf] %vm1145_vm10, %v1143_v54  ;;  %v1127_v51 = vadd.f32 %v1126_v9, %v1061_v21 }
 0x18b   : > { %v1136_v60 = vadd.f32 %v1465_v1, %v1127_v51 }
 0x18d   : > { %v1140_v29 = vmax.f32 %v1136_v60, 0.0 }
 0x18f   : > { %v1144_v39 = vpack.c.bf16 %v1140_v29, %v1140_v29 }
 0x191   : > { %1149 = vst.msk [vmem:[%s514_s23 + $0xc] sm:$0xf] %vm1145_vm10, %v1144_v39 }
 0x1b2   : > { %v1119_v4 = vpop.f32.mrf.mxu1 }
 0x1ba   : > { %v1054_v16 = vpop.f32.mrf.mxu0  ;;  %v1121_v57 = vpop.f32.mrf.mxu1 }
 0x1bb   : > { %v1120_v10 = vadd.f32 %v1119_v4, %v1054_v16 }
 0x1bd   : > { %v1133_v12 = vadd.f32 %v1465_v1, %v1120_v10 }
 0x1bf   : > { %v1137_v17 = vmax.f32 %v1133_v12, 0.0 }
 0x1c1   : > { %v1141_v18 = vpack.c.bf16 %v1137_v17, %v1137_v17 }
 0x1c2   : > { %v1056_v20 = vpop.f32.mrf.mxu0 }
 0x1c3   : > { %1146 = vst.msk [vmem:[%s514_s23] sm:$0xf] %vm1145_vm10, %v1141_v18  ;;  %v1122_v19 = vadd.f32 %v1121_v57, %v1056_v20 }
 0x1c5   : > { %v1134_v13 = vadd.f32 %v1465_v1, %v1122_v19 }
 0x1c7   : > { %v1138_v23 = vmax.f32 %v1134_v13, 0.0 }
 0x1c9   : > { %v1142_v24 = vpack.c.bf16 %v1138_v23, %v1138_v23 }
 0x1cb   : > { %1147 = vst.msk [vmem:[%s514_s23 + $0x4] sm:$0xf] %vm1145_vm10, %v1142_v24 }
 0x1cc PF: > { %s17_s28 = sadd.s32 1, %s1504_s28   ;;  %s2032_s24 = smov %s1496_s26 }
 0x1cd   : > { %p14_p9 = scmp.ge.s32.totalorder %s17_s28, 6   ;;  %s2033_s25 = smov %s1500_s27 }
 0x1ce   : > { %s2034_s26 = smov %s2037_s29  ;;  %s2035_s27 = smov %s2041_s30 }
 0x1cf   :  { %16 = sbr.rel (!%p14_p9) target bundleno = 3 (0x3), region = 87 }

// kernel: rsu4_forward.15
= control target key start
LH: loop header
LB: loop body
LE: loop exit
PB: predicated region body
PF: predicated region fallthrough
CT: control target
= control target key end

     0   :  { %s2534_s27 = smov 0   ;;  %s2536_s28 = smov 0   ;;  %s3471_s0 = inlined_call_operand.vmem [shape: bf16[2,18,18,8], index: 0, kind: input, shape index: {}, may-alias: {0,1}]   ;;  %s3472_s1 = inlined_call_operand.vmem [shape: bf16[2,18,18,8], index: 1, kind: input, shape index: {}, may-alias: {0,1}]   ;;  %s3473_s2 = inlined_call_operand.vmem [shape: bf16[2,18,18,8], index: 2, kind: input, shape index: {}, may-alias: {2,3}]   ;;  %s3474_s3 = inlined_call_operand.vmem [shape: bf16[2,18,18,8], index: 3, kind: input, shape index: {}, may-alias: {2,3}]   ;;  %s3475_s4 = inlined_call_operand.vmem [shape: bf16[72,4], index: 4, kind: input, shape index: {}]   ;;  %s3476_s5 = inlined_call_operand.vmem [shape: bf16[72,4], index: 5, kind: input, shape index: {}]   ;;  %s3477_s6 = inlined_call_operand.vmem [shape: f32[1,4], index: 6, kind: input, shape index: {}]   ;;  %s3478_s7 = inlined_call_operand.vmem [shape: bf16[2,16,16,4], index: 7, kind: input, shape index: {}]   ;;  %s3479_s8 = inlined_call_operand.vmem [shape: bf16[2,16,16,4], index: 8, kind: output, shape index: {}]  }
   0x1   :  { %s2538_s29 = smov 0   ;;  %s2540_s30 = smov 0  }
   0x2   :  { %s2542_s9 = smov 0  }
   0x3 LB: > { %s27_s10 = sadd.s32 1, %s2471_s29  ;;  %s30_s11 = sadd.s32 1, %s2475_s30  ;;  %s2479_s9 = sphi %s2542_s9, %s18_s9   ;;  %s2475_s30 = sphi %s2540_s30, %s3488_s30   ;;  %s2471_s29 = sphi %s2538_s29, %s3487_s29   ;;  %s2467_s28 = sphi %s2536_s28, %s3486_s28   ;;  %s2463_s27 = sphi %s2534_s27, %s3485_s27  }
   0x4   : > { %p28_p0 = scmp.ge.s32.totalorder %s27_s10, 2  ;;  %p2145_p1 = scmp.ge.s32.totalorder %s2479_s9, 1 }
   0x5   : > { %p392_p2 = scmp.lt.s32.totalorder %s2479_s9, 5 }
   0x6   : > { %s3490_s10 = smov (%p28_p0, %s27_s10), 0  ;;  %s3492_s11 = smov (!%p28_p0, %s30_s11), %s2475_s30 }
   0x7   : > { %p393_p3 = pnand %p2145_p1, %p392_p2  ;;  %p32_p4 = scmp.ge.s32.totalorder %s3492_s11, 2 }
   0x8   : > { %s2564_s12 = sshll.u32 (!%p393_p3), %s2463_s27, 3  ;;  %p496_p5 = scmp.lt.s32.totalorder (!%p393_p3), %s2467_s28, 1 }
   0x9   : > { %s3494_s11 = smov (%p32_p4, %s3492_s11), 0  ;;  %396 = sbr.rel (%p393_p3) target bundleno = 630 (0x276), region = 52 }
   0xa   : > { %p498_p6 = scmp.lt.s32.totalorder (!%p393_p3), %s2564_s12, 17  ;;  %s2481_s21 = smov (!%p393_p3), 16  }
   0xb   : > { %s2482_s22 = smov (!%p393_p3), 8   ;;  %s2369_s23 = sadd.s32 (!%p393_p3), 8, %s2564_s12 }
   0xc   : > { %p516_p7 = scmp.lt.s32.totalorder (!%p393_p3), %s2369_s23, 17  ;;  %s2483_s25 = smov (!%p393_p3), 24  }
   0xd   : > { %s3481_s19 = smov (!%p393_p3), 40   ;;  %p565_p8 = scmp.lt.s32.totalorder (!%p393_p3), %s2564_s12, 15 }
   0xe   : > { %s3496_s28 = smov (!%p496_p5, %s2467_s28), 1  ;;  %vm679_vm0 = vsmask.f32 7424  ;;  %vm792_vm1 = vcmask 1046528   ;;  %s3498_s23 = smov (!%p516_p7, %s2369_s23), 17  ;;  %vm975_vm2 = vcmask 64512  }
   0xf   : > { %s499_s13 = scalar_select %p498_p6, %s2564_s12, 17  ;;  %vm992_vm3 = vcmask 130048   ;;  %vm1009_vm4 = vcmask 195584   ;;  %vm1026_vm5 = vcmask 261120   ;;  %vm1043_vm6 = vcmask 326656  }
  0x10   : > { %s2390_s14 = smul.u32 54, %s3496_s28  ;;  %vm1689_vm7 = vcmask 1043456   ;;  %vm1060_vm8 = vcmask 392192   ;;  %vm1077_vm9 = vcmask 457728   ;;  %vm1094_vm10 = vcmask 523264   ;;  %s3500_s12 = smov (!%p565_p8, %s2564_s12), 15 }
  0x11   : > { %s2389_s15 = smul.u32 3, %s499_s13  ;;  %s2488_s13 = smov 64   ;;  %vm1672_vm11 = vcmask 588800   ;;  %vm1937_vm12 = vcmask 27648  }
  0x12   : > { %s2391_s24 = smul.u32 3, %s3498_s23  ;;  %s3484_s23 = smov 40  }
  0x13   : > { %s2573_s16 = sadd.s32 %s2390_s14, %s2389_s15 }
  0x14   : > { %s2147_s17 = sshll.u32 %s2573_s16, 2  ;;  %s2729_s26 = sadd.s32 %s2391_s24, %s2390_s14 }
  0x15   : > { %s2581_s20 = scalar_lea.vmem %s3471_s0, %s2147_s17  ;;  %s3480_s27 = sshll.u32 %s2729_s26, 2 }
  0x16   : > { %v2584_v0 = vld [vmem:[%s2581_s20] sm:$0xff]  ;;  %v587_v1 = vld [vmem:[%s2581_s20 + $0x8] sm:$0x1]  ;;  %v2588_v2 = vld [vmem:[%s2581_s20 + $0x18] sm:$0xff]  ;;  %s2739_s18 = scalar_lea.vmem %s3472_s1, %s3480_s27  ;;  %s2484_s14 = smov 32  }
  0x17   : > { %v663_v3 = vunpack.c.l.b16 %v587_v1  ;;  %v593_v4 = vld [vmem:[%s2581_s20 + $0x20] sm:$0x1]  ;;  %v2592_v5 = vld [vmem:[%s2581_s20 + $0x30] sm:$0xff]  ;;  %v599_v6 = vld [vmem:[%s2581_s20 + $0x38] sm:$0x1]  ;;  %v793_v7 = vrot.slane %v2584_v0, 1  ;;  %s2788_s24 = scalar_lea.vmem %s3473_s2, %s2147_s17 }
  0x18   : > { %v665_v8 = vunpack.c.l.b16 %v593_v4  ;;  %v705_v9 = vshrl.u32 %v2588_v2, 16  ;;  %v707_v10 = vshll.u32 %v2588_v2, 16  ;;  %v681_v12 = vshrl.u32 %v2584_v0, 16  ;;  %v596_v15 = vld [vmem:[%s2581_s20 + $0x2c] sm:$0x1]  ;;  %v2608_v24 = vld [vmem:[%s2581_s20 + $0x24] sm:$0xff] }
  0x19   : > { %v671_v11 = vpack.c.b16 %v663_v3, %v663_v3  ;;  %v683_v13 = vshll.u32 %v2584_v0, 16  ;;  %v667_v14 = vunpack.c.l.b16 %v599_v6  ;;  %v729_v18 = vshrl.u32 %v2592_v5, 16  ;;  %v2612_v29 = vld [vmem:[%s2581_s20 + $0xc] sm:$0xff]  ;;  %v590_v30 = vld [vmem:[%s2581_s20 + $0x14] sm:$0x1]  ;;  %v2622_v39 = vld [vmem:[%s2581_s20 + $0x3c] sm:$0xff] }
  0x1a   : > { %v2601_v16 = vpack.c.b16 %v665_v8, %v665_v8  ;;  %v709_v17 = vrot.slane %v707_v10, 1  ;;  %v731_v19 = vshll.u32 %v2592_v5, 16  ;;  %v666_v28 = vunpack.c.l.b16 %v596_v15  ;;  %v602_v40 = vld [vmem:[%s2581_s20 + $0x44] sm:$0x1]  ;;  %v2635_v49 = vld [vmem:[%s2581_s20 + $0x54] sm:$0xff]  ;;  %v2646_v63 = vld [vmem:[%s2581_s20 + $0x48] sm:$0xff] }
  0x1b   : > { %v794_v20 = vrot.slane %v671_v11, 1  ;;  %v685_v21 = vrot.slane %v683_v13, 1  ;;  %v688_v22 = vshll.u32 %v671_v11, 16  ;;  %v2605_v23 = vpack.c.b16 %v667_v14, %v667_v14  ;;  %v608_v50 = vld [vmem:[%s2581_s20 + $0x5c] sm:$0x1]  ;;  %s2486_s16 = smov 48  }
  0x1c   : > { %v710_v25 = vor.u32 %v709_v17, %v705_v9  ;;  %v712_v26 = vshll.u32 %v2601_v16, 16  ;;  %v733_v27 = vrot.slane %v731_v19, 1  ;;  %v2618_v37 = vpack.c.b16 %v666_v28, %v666_v28  ;;  %v605_v1 = vld [vmem:[%s2581_s20 + $0x50] sm:$0x1]  ;;  %s2487_s17 = smov 56   ;;  %s3483_s20 = sshll.u32 %s2729_s26, 2 }
  0x1d   : > { %v795_v31 = vsel %vm792_vm1, %v793_v7, %v794_v20  ;;  %v686_v32 = vor.u32 %v685_v21, %v681_v12  ;;  %v690_v33 = vrot.slane %v688_v22, 1  ;;  %v736_v34 = vshll.u32 %v2605_v23, 16 }
  0x1e   : > { %817 = vrot.lane.b32.xlu2 %v795_v31, %s2481_s21  ;;  %v714_v35 = vrot.slane %v712_v26, 1  ;;  %v734_v36 = vor.u32 %v733_v27, %v729_v18  ;;  %v717_v38 = vshrl.u32 %v2608_v24, 16  ;;  %v719_v43 = vshll.u32 %v2608_v24, 16 }
  0x1f   : > { %v691_v41 = vsel %vm679_vm0, %v686_v32, %v690_v33  ;;  %v738_v42 = vrot.slane %v736_v34, 1  ;;  %v664_v44 = vunpack.c.l.b16 %v590_v30  ;;  %v724_v46 = vshll.u32 %v2618_v37, 16 }
  0x20   : > { %v2628_v45 = vsel %vm679_vm0, %v710_v25, %v714_v35  ;;  %776 = vrot.lane.b32.xlu0 %v691_v41, %s2482_s22  ;;  %v693_v47 = vshrl.u32 %v2612_v29, 16  ;;  %v695_v48 = vshll.u32 %v2612_v29, 16  ;;  %v721_v52 = vrot.slane %v719_v43, 1 }
  0x21   : > { %780 = vrot.lane.b32.xlu1 %v2628_v45, %s2482_s22  ;;  %v2641_v51 = vsel %vm679_vm0, %v734_v36, %v738_v42  ;;  %v672_v53 = vpack.c.b16 %v664_v44, %v664_v44  ;;  %v668_v54 = vunpack.c.l.b16 %v602_v40  ;;  %v726_v55 = vrot.slane %v724_v46, 1 }
  0x22   : > { %v697_v56 = vrot.slane %v695_v48, 1  ;;  %v741_v57 = vshrl.u32 %v2622_v39, 16  ;;  %v743_v58 = vshll.u32 %v2622_v39, 16  ;;  %v722_v59 = vor.u32 %v721_v52, %v717_v38 }
  0x23   : > { %v700_v60 = vshll.u32 %v672_v53, 16  ;;  %v676_v61 = vpack.c.b16 %v668_v54, %v668_v54  ;;  %v670_v62 = vunpack.c.l.b16 %v608_v50  ;;  %v765_v6 = vshrl.u32 %v2635_v49, 16 }
  0x24   : > { %v698_v3 = vor.u32 %v697_v56, %v693_v47  ;;  %v745_v4 = vrot.slane %v743_v58, 1  ;;  %v767_v7 = vshll.u32 %v2635_v49, 16  ;;  %v2652_v8 = vsel %vm679_vm0, %v722_v59, %v726_v55  ;;  %v611_v58 = vld [vmem:[%s2739_s18 + $0x8] sm:$0x1] }
  0x25   : > { %v702_v9 = vrot.slane %v700_v60, 1  ;;  %v748_v10 = vshll.u32 %v676_v61, 16  ;;  %v678_v11 = vpack.c.b16 %v670_v62, %v670_v62  ;;  %v669_v14 = vunpack.c.l.b16 %v605_v1 }
  0x26   : > { %784 = vrot.lane.b32.xlu2 %v2641_v51, %s2482_s22  ;;  %v746_v12 = vor.u32 %v745_v4, %v741_v57  ;;  %v769_v13 = vrot.slane %v767_v7, 1  ;;  %v753_v15 = vshrl.u32 %v2646_v63, 16  ;;  %v755_v20 = vshll.u32 %v2646_v63, 16  ;;  %v2746_v57 = vld [vmem:[%s2739_s18] sm:$0xff] }
  0x27   : > { %v2658_v17 = vsel %vm679_vm0, %v698_v3, %v702_v9  ;;  %v750_v18 = vrot.slane %v748_v10, 1  ;;  %v772_v19 = vshll.u32 %v678_v11, 16  ;;  %v677_v21 = vpack.c.b16 %v669_v14, %v669_v14  ;;  %v1134_v10 = vld [vmem:[%s2788_s24 + $0x38] sm:$0x1]  ;;  %v2801_v14 = vld [vmem:[%s2788_s24 + $0x30] sm:$0xff] }
  0x28   : > { %778 = vrot.lane.b32.xlu0 %v2658_v17, %s2482_s22  ;;  %v757_v22 = vrot.slane %v755_v20, 1  ;;  %v770_v25 = vor.u32 %v769_v13, %v765_v6  ;;  %v802_v34 = vrot.slane %v2608_v24, 1  ;;  %v803_v35 = vrot.slane %v2618_v37, 1 }
  0x29   : > { %782 = vrot.lane.b32.xlu1 %v2652_v8, %s2482_s22  ;;  %v774_v26 = vrot.slane %v772_v19, 1  ;;  %v760_v27 = vshll.u32 %v677_v21, 16  ;;  %v2666_v28 = vsel %vm679_vm0, %v746_v12, %v750_v18  ;;  %v796_v36 = vrot.slane %v2612_v29, 1 }
  0x2a   : > { %v758_v30 = vor.u32 %v757_v22, %v753_v15  ;;  %v797_v38 = vrot.slane %v672_v53, 1  ;;  %v799_v40 = vrot.slane %v2588_v2, 1  ;;  %v800_v41 = vrot.slane %v2601_v16, 1 }
  0x2b   : > { %v762_v31 = vrot.slane %v760_v27, 1  ;;  %v2671_v32 = vsel %vm679_vm0, %v770_v25, %v774_v26  ;;  %v2686_v42 = vsel %vm792_vm1, %v802_v34, %v803_v35  ;;  %v811_v44 = vrot.slane %v2646_v63, 1  ;;  %v2818_v27 = vld [vmem:[%s2788_s24 + $0x3c] sm:$0xff] }
  0x2c   : > { %v798_v43 = vsel %vm792_vm1, %v796_v36, %v797_v38  ;;  %v2692_v37 = vsel %vm792_vm1, %v799_v40, %v800_v41  ;;  %v812_v46 = vrot.slane %v677_v21, 1  ;;  %v805_v16 = vrot.slane %v2592_v5, 1  ;;  %v1137_v21 = vld [vmem:[%s2788_s24 + $0x44] sm:$0x1] }
  0x2d   : > { %v2674_v33 = vsel %vm679_vm0, %v758_v30, %v762_v31  ;;  %v806_v47 = vrot.slane %v2605_v23, 1  ;;  %v808_v48 = vrot.slane %v2622_v39, 1  ;;  %v809_v50 = vrot.slane %v676_v61, 1 }
  0x2e   : > { %786 = vrot.lane.b32.xlu2 %v2666_v28, %s2482_s22  ;;  %v2703_v52 = vsel %vm792_vm1, %v811_v44, %v812_v46  ;;  %v814_v23 = vrot.slane %v2635_v49, 1  ;;  %v815_v55 = vrot.slane %v678_v11, 1  ;;  %v855_v59 = vunpack.c.l.b16 %v611_v58 }
  0x2f   : > { %v2706_v53 = vsel %vm792_vm1, %v805_v16, %v806_v47  ;;  %v2711_v54 = vsel %vm792_vm1, %v808_v48, %v809_v50  ;;  %v860_v61 = vshll.u32 %v2746_v57, 16  ;;  %v858_v62 = vshrl.u32 %v2746_v57, 16 }
  0x30   : > { %788 = vrot.lane.b32.xlu0 %v2674_v33, %s2482_s22  ;;  %v2719_v56 = vsel %vm792_vm1, %v814_v23, %v815_v55  ;;  %v856_v60 = vpack.c.b16 %v855_v59, %v855_v59  ;;  %v885_v12 = vrot.slane %v2746_v57, 1  ;;  %v1202_v15 = vunpack.c.l.b16 %v1134_v10  ;;  %v2862_v10 = vld [vmem:[%s2788_s24 + $0x48] sm:$0xff] }
  0x31   : > { %790 = vrot.lane.b32.xlu1 %v2671_v32, %s2482_s22  ;;  %v862_v1 = vrot.slane %v860_v61, 1  ;;  %v1265_v19 = vshll.u32 %v2801_v14, 16  ;;  %v1263_v22 = vshrl.u32 %v2801_v14, 16  ;;  %v1203_v30 = vunpack.c.l.b16 %v1137_v21 }
  0x32   : > { %v865_v3 = vshll.u32 %v856_v60, 16  ;;  %v886_v13 = vrot.slane %v856_v60, 1  ;;  %v1210_v18 = vpack.c.b16 %v1202_v15, %v1202_v15  ;;  %v1277_v36 = vshll.u32 %v2818_v27, 16  ;;  %v1122_v60 = vld [vmem:[%s2788_s24 + $0x8] sm:$0x1] }
  0x33   : > { %v863_v4 = vor.u32 %v862_v1, %v858_v62  ;;  %v1267_v25 = vrot.slane %v1265_v19, 1  ;;  %v1211_v35 = vpack.c.b16 %v1203_v30, %v1203_v30  ;;  %v1275_v46 = vshrl.u32 %v2818_v27, 16  ;;  %v1140_v1 = vld [vmem:[%s2788_s24 + $0x50] sm:$0x1] }
  0x34   : > { %v867_v6 = vrot.slane %v865_v3, 1  ;;  %v1270_v26 = vshll.u32 %v1210_v18, 16  ;;  %v1279_v16 = vrot.slane %v1277_v36, 1  ;;  %v1339_v58 = vrot.slane %v1210_v18, 1 }
  0x35   : > { %v1268_v31 = vor.u32 %v1267_v25, %v1263_v22  ;;  %v1282_v47 = vshll.u32 %v1211_v35, 16  ;;  %v1342_v15 = vrot.slane %v1211_v35, 1  ;;  %v1289_v25 = vshll.u32 %v2862_v10, 16 }
  0x36   : > { %823 = vrot.lane.b32.xlu2 %v2686_v42, %s2481_s21  ;;  %v2771_v7 = vsel %vm679_vm0, %v863_v4, %v867_v6  ;;  %v1272_v34 = vrot.slane %v1270_v26, 1  ;;  %v1280_v50 = vor.u32 %v1279_v16, %v1275_v46  ;;  %v2854_v6 = vld [vmem:[%s2788_s24] sm:$0xff] }
  0x37   : > { %v1284_v23 = vrot.slane %v1282_v47, 1  ;;  %v1217_v19 = vshll.u32 %v2854_v6, 16 }
  0x38   : > { %819 = vrot.lane.b32.xlu0 %v798_v43, %s2481_s21  ;;  %v2828_v41 = vsel %vm679_vm0, %v1268_v31, %v1272_v34  ;;  %v1215_v34 = vshrl.u32 %v2854_v6, 16 }
  0x39   : > { %821 = vrot.lane.b32.xlu1 %v2692_v37, %s2481_s21  ;;  %v2845_v62 = vsel %vm679_vm0, %v1280_v50, %v1284_v23  ;;  %v1219_v35 = vrot.slane %v1217_v19, 1 }
  0x3b   : > { %v1220_v16 = vor.u32 %v1219_v35, %v1215_v34 }
  0x3e   : > { %829 = vrot.lane.b32.xlu2 %v2703_v52, %s2481_s21 }
  0x40   : > { %825 = vrot.lane.b32.xlu0 %v2706_v53, %s2481_s21 }
  0x41   : > { %827 = vrot.lane.b32.xlu1 %v2711_v54, %s2481_s21 }
  0x46   : > { %840 = vrot.lane.b32.xlu2 %v2588_v2, %s2483_s25 }
  0x48   : > { %831 = vrot.lane.b32.xlu0 %v2719_v56, %s2481_s21 }
  0x49   : > { %838 = vrot.lane.b32.xlu1 %v2612_v29, %s2483_s25 }
  0x4e   : > { %846 = vrot.lane.b32.xlu2 %v2622_v39, %s2483_s25 }
  0x50   : > { %842 = vrot.lane.b32.xlu0 %v2608_v24, %s2483_s25 }
  0x51   : > { %844 = vrot.lane.b32.xlu1 %v2592_v5, %s2483_s25 }
  0x56   : > { %852 = vrot.lane.b32.xlu2 %v2746_v57, %s2483_s25 }
  0x58   : > { %848 = vrot.lane.b32.xlu0 %v2646_v63, %s2483_s25 }
  0x59   : > { %850 = vrot.lane.b32.xlu1 %v2635_v49, %s2483_s25 }
  0x5e   : > { %873 = vrot.lane.b32.xlu2 %v2652_v8, %s2484_s14 }
  0x60   : > { %869 = vrot.lane.b32.xlu0 %v2658_v17, %s2484_s14  ;;  %v2804_v17 = vsel %vm792_vm1, %v885_v12, %v886_v13  ;;  %v1204_v12 = vunpack.c.l.b16 %v1140_v1 }
  0x61   : > { %871 = vrot.lane.b32.xlu1 %v2628_v45, %s2484_s14 }
  0x62   : > { %v1212_v22 = vpack.c.b16 %v1204_v12, %v1204_v12 }
  0x64   : > { %v1294_v46 = vshll.u32 %v1212_v22, 16 }
  0x66   : > { %879 = vrot.lane.b32.xlu2 %v2674_v33, %s2484_s14 }
  0x68   : > { %875 = vrot.lane.b32.xlu0 %v2641_v51, %s2484_s14 }
  0x69   : > { %877 = vrot.lane.b32.xlu1 %v2666_v28, %s2484_s14 }
  0x6e   : > { %888 = vrot.lane.b32.xlu2 %v798_v43, %s3481_s19 }
  0x70   : > { %881 = vrot.lane.b32.xlu0 %v2671_v32, %s2484_s14 }
  0x71   : > { %883 = vrot.lane.b32.xlu1 %v2771_v7, %s2484_s14 }
  0x76   : > { %894 = vrot.lane.b32.xlu2 %v2706_v53, %s3481_s19 }
  0x78   : > { %v818_v9 = vpop.permute.xlu2 %817  ;;  %890 = vrot.lane.b32.xlu0 %v2692_v37, %s3481_s19 }
  0x79   : > { %892 = vrot.lane.b32.xlu1 %v2686_v42, %s3481_s19 }
  0x7e   : > { %900 = vrot.lane.b32.xlu2 %v2719_v56, %s3481_s19 }
  0x80   : > { %v2793_v11 = vpop.permute.xlu2 %784  ;;  %896 = vrot.lane.b32.xlu0 %v2711_v54, %s3481_s19 }
  0x81   : > { %898 = vrot.lane.b32.xlu1 %v2703_v52, %s3481_s19 }
  0x86   : > { %911 = vrot.lane.b32.xlu2 %v2608_v24, %s2486_s16 }
  0x88   : > { %v2809_v20 = vpop.permute.xlu2 %786  ;;  %902 = vrot.lane.b32.xlu0 %v2804_v17, %s3481_s19 }
  0x89   : > { %909 = vrot.lane.b32.xlu1 %v2588_v2, %s2486_s16 }
  0x8e   : > { %917 = vrot.lane.b32.xlu2 %v2646_v63, %s2486_s16 }
  0x90   : > { %v824_v38 = vpop.permute.xlu2 %823  ;;  %913 = vrot.lane.b32.xlu0 %v2592_v5, %s2486_s16 }
  0x91   : > { %915 = vrot.lane.b32.xlu1 %v2622_v39, %s2486_s16 }
  0x92   : > { %v777_v40 = vpop.permute.xlu0 %776 }
  0x93   : > { %v781_v43 = vpop.permute.xlu1 %780  ;;  %v977_v44 = vsel %vm975_vm2, %v2584_v0, %v777_v40  ;;  %v1338_v0 = vrot.slane %v2801_v14, 1  ;;  %v1287_v40 = vshrl.u32 %v2862_v10, 16 }
  0x94   : > { %v2834_v48 = vsel %vm992_vm3, %v977_v44, %v818_v9  ;;  %v1198_v9 = vunpack.c.l.b16 %v1122_v60  ;;  %v1291_v44 = vrot.slane %v1289_v25, 1  ;;  %v1345_v25 = vrot.slane %v1212_v22, 1 }
  0x95   : > { %v2851_v4 = vsel %vm792_vm1, %v1338_v0, %v1339_v58  ;;  %v1125_v0 = vld [vmem:[%s2788_s24 + $0x14] sm:$0x1]  ;;  %v981_v58 = vsel %vm975_vm2, %v2588_v2, %v781_v43  ;;  %v2908_v2 = vld [vmem:[%s2788_s24 + $0xc] sm:$0xff] }
  0x96   : > { %1318 = vrot.lane.b32.xlu2 %v2828_v41, %s2482_s22  ;;  %v1206_v18 = vpack.c.b16 %v1198_v9, %v1198_v9  ;;  %v1199_v12 = vunpack.c.l.b16 %v1125_v0 }
  0x98   : > { %v830_v55 = vpop.permute.xlu2 %829  ;;  %919 = vrot.lane.b32.xlu0 %v2635_v49, %s2486_s16  ;;  %v1222_v36 = vshll.u32 %v1206_v18, 16 }
  0x99   : > { %921 = vrot.lane.b32.xlu1 %v2746_v57, %s2486_s16 }
  0x9a   : > { %v779_v59 = vpop.permute.xlu0 %778  ;;  %v1224_v47 = vrot.slane %v1222_v36, 1 }
  0x9b   : > { %v783_v61 = vpop.permute.xlu1 %782  ;;  %v979_v50 = vsel %vm975_vm2, %v2612_v29, %v779_v59  ;;  %v1326_v59 = vrot.slane %v2854_v6, 1 }
  0x9c   : > { %v983_v3 = vsel %vm975_vm2, %v2608_v24, %v783_v61  ;;  %v1341_v24 = vrot.slane %v2818_v27, 1  ;;  %v1225_v9 = vsel %vm679_vm0, %v1220_v16, %v1224_v47  ;;  %v2937_v16 = vld [vmem:[%s2788_s24 + $0x18] sm:$0xff] }
  0x9d   : > { %v2857_v57 = vsel %vm992_vm3, %v983_v3, %v824_v38 }
  0x9e   : > { %1410 = vrot.lane.b32.xlu2 %v2845_v62, %s2484_s14  ;;  %v2876_v31 = vsel %vm792_vm1, %v1341_v24, %v1342_v15  ;;  %v1207_v24 = vpack.c.b16 %v1199_v12, %v1199_v12  ;;  %v1229_v15 = vshll.u32 %v2908_v2, 16 }
  0xa0   : > { %v841_v13 = vpop.permute.xlu2 %840  ;;  %1358 = vrot.lane.b32.xlu0 %v2851_v4, %s2481_s21  ;;  %v1234_v22 = vshll.u32 %v1207_v24, 16 }
  0xa1   : > { %1379 = vrot.lane.b32.xlu1 %v2818_v27, %s2483_s25 }
  0xa2   : > { %v789_v21 = vpop.permute.xlu0 %788 }
  0xa3   : > { %v2871_v26 = vpop.permute.xlu1 %790  ;;  %v989_v30 = vsel %vm975_vm2, %v2646_v63, %v789_v21  ;;  %v1344_v21 = vrot.slane %v2862_v10, 1 }
  0xa4   : > { %v2880_v38 = vsel %vm992_vm3, %v989_v30, %v830_v55  ;;  %v1296_v55 = vrot.slane %v1294_v46, 1  ;;  %v987_v30 = vsel %vm975_vm2, %v2622_v39, %v2809_v20 }
  0xa5   : > { %v2933_v39 = vsel %vm792_vm1, %v1344_v21, %v1345_v25 }
  0xa6   : > { %948 = vrot.lane.b32.xlu2 %v2674_v33, %s2487_s17  ;;  %v1292_v33 = vor.u32 %v1291_v44, %v1287_v40  ;;  %v1231_v44 = vrot.slane %v1229_v15, 1 }
  0xa8   : > { %v847_v63 = vpop.permute.xlu2 %846  ;;  %1429 = vrot.lane.b32.xlu0 %v2876_v31, %s3481_s19  ;;  %v2905_v29 = vsel %vm679_vm0, %v1292_v33, %v1296_v55  ;;  %v1330_v55 = vrot.slane %v1207_v24, 1 }
  0xa9   : > { %1450 = vrot.lane.b32.xlu1 %v2862_v10, %s2486_s16 }
  0xaa   : > { %v820_v23 = vpop.permute.xlu0 %819 }
  0xab   : > { %v822_v60 = vpop.permute.xlu1 %821  ;;  %v996_v61 = vsel %vm992_vm3, %v979_v50, %v820_v23  ;;  %v1236_v50 = vrot.slane %v1234_v22, 1  ;;  %v991_v23 = vsel %vm975_vm2, %v2635_v49, %v2871_v26  ;;  %v1239_v26 = vshrl.u32 %v2937_v16, 16 }
  0xac   : > { %v2896_v1 = vsel %vm992_vm3, %v981_v58, %v822_v60  ;;  %v2899_v3 = vsel %vm1009_vm4, %v996_v61, %v841_v13  ;;  %v1327_v13 = vrot.slane %v1206_v18, 1  ;;  %v1128_v18 = vld [vmem:[%s2788_s24 + $0x20] sm:$0x1]  ;;  %v1241_v58 = vshll.u32 %v2937_v16, 16 }
  0xad   : > { %v1200_v20 = vunpack.c.l.b16 %v1128_v18 }
  0xae   : > { %967 = vrot.lane.b32.xlu2 %v2703_v52, %s2488_s13  ;;  %v985_v52 = vsel %vm975_vm2, %v2592_v5, %v2793_v11  ;;  %v1328_v5 = vsel %vm792_vm1, %v1326_v59, %v1327_v13  ;;  %v1227_v11 = vshrl.u32 %v2908_v2, 16  ;;  %v1243_v13 = vrot.slane %v1241_v58, 1 }
  0xaf   : > { %v1208_v0 = vpack.c.b16 %v1200_v20, %v1200_v20  ;;  %v1119_v20 = vld [vmem:[%s3475_s4 + $0x20] sm:$0xf] }
  0xb0   : > { %v853_v43 = vpop.permute.xlu2 %852  ;;  %1310 = vrot.lane.b32.xlu0 %v1225_v9, %s2482_s22  ;;  %v1232_v47 = vor.u32 %v1231_v44, %v1227_v11 }
  0xb1   : > { %1481 = vrot.lane.b32.xlu1 %v2905_v29, %s2487_s17  ;;  %v1246_v24 = vshll.u32 %v1208_v0, 16 }
  0xb2   : > { %v826_v19 = vpop.permute.xlu0 %825  ;;  %v2953_v59 = vsel %vm679_vm0, %v1232_v47, %v1236_v50  ;;  %v1759_v47 = vunpack.c.l.b16 %v1119_v20  ;;  %v1131_v20 = vld [vmem:[%s2788_s24 + $0x2c] sm:$0x1] }
  0xb3   : > { %v828_v34 = vpop.permute.xlu1 %827  ;;  %v1002_v35 = vsel %vm992_vm3, %v985_v52, %v826_v19  ;;  %v1248_v52 = vrot.slane %v1246_v24, 1 }
  0xb4   : > { %v1004_v36 = vsel %vm992_vm3, %v987_v30, %v828_v34  ;;  %v2926_v40 = vsel %vm1009_vm4, %v1002_v35, %v847_v63  ;;  %v1329_v63 = vrot.slane %v2908_v2, 1 }
  0xb6   : > { %1371 = vrot.lane.b32.xlu2 %v2908_v2, %s2483_s25  ;;  %v2958_v49 = vsel %vm792_vm1, %v1329_v63, %v1330_v55 }
  0xb8   : > { %v874_v46 = vpop.permute.xlu2 %873  ;;  %1350 = vrot.lane.b32.xlu0 %v1328_v5, %s2481_s21 }
  0xb9   : > { %1500 = vrot.lane.b32.xlu1 %v2933_v39, %s2488_s13 }
  0xba   : > { %v832_v33 = vpop.permute.xlu0 %831 }
  0xbb   : > { %v839_v60 = vpop.permute.xlu1 %838  ;;  %v1008_v61 = vsel %vm992_vm3, %v991_v23, %v832_v33  ;;  %v3008_v33 = vld [vmem:[%s2788_s24 + $0x54] sm:$0xff] }
  0xbc   : > { %v1011_v9 = vsel %vm1009_vm4, %v2834_v48, %v839_v60  ;;  %v2950_v12 = vsel %vm1009_vm4, %v1008_v61, %v853_v43  ;;  %v1244_v43 = vor.u32 %v1243_v13, %v1239_v26  ;;  %v1301_v61 = vshll.u32 %v3008_v33, 16  ;;  %v2321_v26 = vld [vmem:[%s3475_s4 + $0x18] sm:$0xff] }
  0xbe   : > { %1442 = vrot.lane.b32.xlu2 %v2937_v16, %s2486_s16  ;;  %v2975_v34 = vsel %vm679_vm0, %v1244_v43, %v1248_v52  ;;  %v1303_v43 = vrot.slane %v1301_v61, 1 }
  0xc0   : > { %v880_v15 = vpop.permute.xlu2 %879  ;;  %1402 = vrot.lane.b32.xlu0 %v2953_v59, %s2484_s14 }
  0xc1   : > { %1421 = vrot.lane.b32.xlu1 %v2958_v49, %s3481_s19 }
  0xc2   : > { %v843_v48 = vpop.permute.xlu0 %842 }
  0xc3   : > { %v845_v19 = vpop.permute.xlu1 %844  ;;  %v1015_v21 = vsel %vm1009_vm4, %v2896_v1, %v843_v48  ;;  %v1332_v1 = vrot.slane %v2937_v16, 1  ;;  %v1299_v48 = vshrl.u32 %v3008_v33, 16 }
  0xc4   : > { %v1017_v25 = vsel %vm1009_vm4, %v2857_v57, %v845_v19  ;;  %v2970_v30 = vsel %vm1026_vm5, %v1015_v21, %v874_v46  ;;  %v1333_v57 = vrot.slane %v1208_v0, 1  ;;  %v1764_v0 = vpack.c.b16 %v1759_v47, %v1759_v47 }
  0xc6   : > { %959 = vrot.lane.b32.xlu2 %v2692_v37, %s2488_s13  ;;  %v1786_v58 = vsel %vm1689_vm7, %v1764_v0, 0  ;;  %v1201_v0 = vunpack.c.l.b16 %v1131_v20 }
  0xc7   : > { %2384 = vmatpush.bf16.msra.mxu3 %v1786_v58  ;;  %1791 = vmatpush.bf16.msra.mxu1 %v1786_v58 }
  0xc8   : > { %v889_v35 = vpop.permute.xlu2 %888  ;;  %940 = vrot.lane.b32.xlu0 %v2628_v45, %s2487_s17  ;;  %v2989_v45 = vsel %vm792_vm1, %v1332_v1, %v1333_v57  ;;  %v2319_v57 = vld [vmem:[%s3475_s4 + $0x8] sm:$0xff] }
  0xc9   : > { %1473 = vrot.lane.b32.xlu1 %v2975_v34, %s2487_s17 }
  0xca   : > { %v849_v18 = vpop.permute.xlu0 %848 }
  0xcb   : > { %v851_v5 = vpop.permute.xlu1 %850  ;;  %v1021_v11 = vsel %vm1009_vm4, %v1004_v36, %v849_v18  ;;  %2385 = vmatpush.bf16.msra.mxu3 %v2321_v26  ;;  %1792 = vmatpush.bf16.msra.mxu1 %v2321_v26 }
  0xcc   : > { %v1023_v37 = vsel %vm1009_vm4, %v2880_v38, %v851_v5  ;;  %v2986_v44 = vsel %vm1026_vm5, %v1021_v11, %v880_v15  ;;  %v1143_v38 = vld [vmem:[%s2788_s24 + $0x5c] sm:$0x1]  ;;  %v2320_v15 = vld [vmem:[%s3475_s4 + $0x10] sm:$0xff] }
  0xcd   : > { %v1205_v55 = vunpack.c.l.b16 %v1143_v38 }
  0xce   : > { %1360 = vrot.lane.b32.xlu2 %v2876_v31, %s2481_s21 }
  0xcf   : > { %2386 = vmatpush.bf16.msra.mxu3 %v2320_v15  ;;  %1793 = vmatpush.bf16.msra.mxu1 %v2320_v15 }
  0xd0   : > { %v895_v22 = vpop.permute.xlu2 %894  ;;  %1492 = vrot.lane.b32.xlu0 %v2989_v45, %s2488_s13 }
  0xd1   : > { %1320 = vrot.lane.b32.xlu1 %v2845_v62, %s2482_s22 }
  0xd2   : > { %v870_v36 = vpop.permute.xlu0 %869 }
  0xd3   : > { %v872_v46 = vpop.permute.xlu1 %871  ;;  %v1028_v63 = vsel %vm1026_vm5, %v1011_v9, %v870_v36  ;;  %2387 = vmatpush.bf16.msra.mxu3 %v2319_v57  ;;  %1794 = vmatpush.bf16.msra.mxu1 %v2319_v57 }
  0xd4   : > { %v1030_v50 = vsel %vm1026_vm5, %v2899_v3, %v872_v46  ;;  %v3005_v23 = vsel %vm1043_vm6, %v1028_v63, %v889_v35  ;;  %v1213_v3 = vpack.c.b16 %v1205_v55, %v1205_v55 }
  0xd6   : > { %1431 = vrot.lane.b32.xlu2 %v2933_v39, %s3481_s19  ;;  %v1306_v52 = vshll.u32 %v1213_v3, 16  ;;  %v1348_v36 = vrot.slane %v1213_v3, 1 }
  0xd8   : > { %v901_v60 = vpop.permute.xlu2 %900  ;;  %1381 = vrot.lane.b32.xlu0 %v2862_v10, %s2483_s25  ;;  %v1308_v35 = vrot.slane %v1306_v52, 1 }
  0xd9   : > { %1412 = vrot.lane.b32.xlu1 %v2905_v29, %s2484_s14 }
  0xda   : > { %v876_v9 = vpop.permute.xlu0 %875 }
  0xdb   : > { %v3021_v13 = vpop.permute.xlu1 %877  ;;  %v1034_v24 = vsel %vm1026_vm5, %v1017_v25, %v876_v9  ;;  %v1304_v25 = vor.u32 %v1303_v43, %v1299_v48  ;;  %v1644_v9 = vld [vmem:[%s3476_s5 + $0x20] sm:$0xf] }
  0xdc   : > { %v3029_v19 = vsel %vm1043_vm6, %v1034_v24, %v895_v22  ;;  %v1662_v48 = vunpack.c.l.b16 %v1644_v9 }
  0xdd   : > { %v3050_v22 = vsel %vm679_vm0, %v1304_v25, %v1308_v35 }
  0xde   : > { %1312 = vrot.lane.b32.xlu2 %v2953_v59, %s2482_s22 }
  0xe0   : > { %v912_v21 = vpop.permute.xlu2 %911  ;;  %1452 = vrot.lane.b32.xlu0 %v3008_v33, %s2486_s16 }
  0xe1   : > { %950 = vrot.lane.b32.xlu1 %v2671_v32, %s2487_s17  ;;  %v2318_v32 = vld [vmem:[%s3475_s4] sm:$0xff] }
  0xe2   : > { %v882_v1 = vpop.permute.xlu0 %881  ;;  %2388 = vmatpush.bf16.msra.mxu3 %v2318_v32  ;;  %1795 = vmatpush.bf16.msra.mxu1 %v2318_v32  ;;  %v2335_v32 = vld [vmem:[%s3476_s5 + $0x18] sm:$0xff] }
  0xe3   : > { %v884_v18 = vpop.permute.xlu1 %883  ;;  %v1040_v5 = vsel %vm1026_vm5, %v1023_v37, %v882_v1 }
  0xe4   : > { %v1042_v59 = vsel %vm1026_vm5, %v2950_v12, %v884_v18  ;;  %v3047_v11 = vsel %vm1043_vm6, %v1040_v5, %v901_v60  ;;  %v1347_v12 = vrot.slane %v3008_v33, 1 }
  0xe6   : > { %1352 = vrot.lane.b32.xlu2 %v2958_v49, %s2481_s21  ;;  %v3069_v55 = vsel %vm792_vm1, %v1347_v12, %v1348_v36  ;;  %v2334_v36 = vld [vmem:[%s3476_s5 + $0x10] sm:$0xff] }
  0xe8   : > { %v3054_v37 = vpop.permute.xlu2 %917  ;;  %1483 = vrot.lane.b32.xlu0 %v3050_v22, %s2487_s17 }
  0xe9   : > { %969 = vrot.lane.b32.xlu1 %v2719_v56, %s2488_s13  ;;  %v3072_v56 = vld [vmem:[%s2788_s24 + $0x24] sm:$0xff] }
  0xea   : > { %v891_v38 = vpop.permute.xlu0 %890  ;;  %v1251_v26 = vshrl.u32 %v3072_v56, 16  ;;  %v1335_v43 = vrot.slane %v3072_v56, 1 }
  0xeb   : > { %v893_v46 = vpop.permute.xlu1 %892  ;;  %v1047_v49 = vsel %vm1043_vm6, %v1030_v50, %v891_v38  ;;  %v1253_v50 = vshll.u32 %v3072_v56, 16 }
  0xec   : > { %v1049_v63 = vsel %vm1043_vm6, %v2970_v30, %v893_v46  ;;  %v3066_v47 = vsel %vm1060_vm8, %v1047_v49, %v912_v21  ;;  %v1209_v30 = vpack.c.b16 %v1201_v0, %v1201_v0  ;;  %v1667_v21 = vpack.c.b16 %v1662_v48, %v1662_v48 }
  0xed   : > { %v1255_v24 = vrot.slane %v1253_v50, 1  ;;  %v1036_v46 = vsel %vm1026_vm5, %v2926_v40, %v3021_v13 }
  0xee   : > { %1404 = vrot.lane.b32.xlu2 %v2975_v34, %s2484_s14  ;;  %v1258_v15 = vshll.u32 %v1209_v30, 16  ;;  %v1336_v52 = vrot.slane %v1209_v30, 1  ;;  %v1691_v1 = vsel %vm1689_vm7, %v1667_v21, 0 }
  0xef   : > { %2379 = vmatpush.bf16.msra.mxu2 %v1691_v1  ;;  %1696 = vmatpush.bf16.msra.mxu0 %v1691_v1 }
  0xf0   : > { %v3076_v58 = vpop.permute.xlu2 %1318  ;;  %1502 = vrot.lane.b32.xlu0 %v3069_v55, %s2488_s13  ;;  %v1260_v35 = vrot.slane %v1258_v15, 1  ;;  %v3107_v5 = vsel %vm792_vm1, %v1335_v43, %v1336_v52 }
  0xf1   : > { %1373 = vrot.lane.b32.xlu1 %v2937_v16, %s2483_s25 }
  0xf2   : > { %v897_v60 = vpop.permute.xlu0 %896 }
  0xf3   : > { %v899_v3 = vpop.permute.xlu1 %898  ;;  %2380 = vmatpush.bf16.msra.mxu2 %v2335_v32  ;;  %1697 = vmatpush.bf16.msra.mxu0 %v2335_v32 }
  0xf4   : > { %v3085_v61 = vsel %vm1043_vm6, %v2986_v44, %v899_v3  ;;  %v1256_v44 = vor.u32 %v1255_v24, %v1251_v26  ;;  %v1053_v3 = vsel %vm1043_vm6, %v1036_v46, %v897_v60  ;;  %v2332_v26 = vld [vmem:[%s3476_s5] sm:$0xff]  ;;  %v1517_v46 = vsel %vm975_vm2, %v2801_v14, %v3076_v58 }
  0xf5   : > { %v1070_v40 = vsel %vm1060_vm8, %v1053_v3, %v3054_v37 }
  0xf6   : > { %942 = vrot.lane.b32.xlu2 %v2652_v8, %s2487_s17  ;;  %v3113_v12 = vsel %vm679_vm0, %v1256_v44, %v1260_v35 }
  0xf7   : > { %2381 = vmatpush.bf16.msra.mxu2 %v2334_v36  ;;  %1698 = vmatpush.bf16.msra.mxu0 %v2334_v36 }
  0xf8   : > { %v3094_v25 = vpop.permute.xlu2 %1410  ;;  %1423 = vrot.lane.b32.xlu0 %v2989_v45, %s3481_s19  ;;  %s3120_s19 = scalar_lea.vmem %s3474_s3, %s3483_s20 }
  0xf9   : > { %1444 = vrot.lane.b32.xlu1 %v3072_v56, %s2486_s16  ;;  %v1146_v38 = vld [vmem:[%s3120_s19 + $0x8] sm:$0x1]  ;;  %v3139_v30 = vld [vmem:[%s3120_s19] sm:$0xff] }
  0xfa   : > { %v903_v57 = vpop.permute.xlu0 %902  ;;  %v1388_v50 = vunpack.c.l.b16 %v1146_v38 }
  0xfb   : > { %v3101_v8 = vpop.permute.xlu1 %909  ;;  %v3104_v18 = vsel %vm1043_vm6, %v1042_v59, %v903_v57 }
  0xfc   : > { %v1389_v13 = vpack.c.b16 %v1388_v50, %v1388_v50 }
  0xfe   : > { %1494 = vrot.lane.b32.xlu2 %v3107_v5, %s2488_s13  ;;  %v1398_v52 = vshll.u32 %v1389_v13, 16  ;;  %v1419_v32 = vrot.slane %v1389_v13, 1 }
 0x100   : > { %v949_v59 = vpop.permute.xlu2 %948  ;;  %1475 = vrot.lane.b32.xlu0 %v3113_v12, %s2487_s17  ;;  %v1400_v44 = vrot.slane %v1398_v52, 1 }
 0x101   : > { %961 = vrot.lane.b32.xlu1 %v2686_v42, %s2488_s13  ;;  %v2333_v42 = vld [vmem:[%s3476_s5 + $0x8] sm:$0xff] }
 0x102   : > { %v914_v20 = vpop.permute.xlu0 %913  ;;  %2382 = vmatpush.bf16.msra.mxu2 %v2333_v42  ;;  %1699 = vmatpush.bf16.msra.mxu0 %v2333_v42 }
 0x103   : > { %v916_v49 = vpop.permute.xlu1 %915  ;;  %v3136_v0 = vsel %vm1060_vm8, %v1049_v63, %v914_v20  ;;  %v1393_v63 = vshll.u32 %v3139_v30, 16 }
 0x104   : > { %v3144_v9 = vsel %vm1060_vm8, %v3029_v19, %v916_v49  ;;  %v1087_v19 = vsel %vm1077_vm9, %v1070_v40, %v949_v59 }
 0x105   : > { %v1395_v43 = vrot.slane %v1393_v63, 1 }
 0x106   : > { %1383 = vrot.lane.b32.xlu2 %v3008_v33, %s2483_s25  ;;  %2383 = vmatpush.bf16.msra.mxu2 %v2332_v26 }
 0x107   : > { %1700 = vmatpush.bf16.msra.mxu0 %v2332_v26 }
 0x108   : > { %v968_v60 = vpop.permute.xlu2 %967  ;;  %1322 = vrot.lane.b32.xlu0 %v2905_v29, %s2482_s22  ;;  %v1391_v29 = vshrl.u32 %v3139_v30, 16 }
 0x109   : > { %1362 = vrot.lane.b32.xlu1 %v2933_v39, %s2481_s21  ;;  %v1104_v37 = vsel %vm1094_vm10, %v1087_v19, %v968_v60 }
 0x10a   : > { %2288 = vmatmul.msk.bf16.vlgmr.msra.gmra.mxu3 %vm1672_vm11, %v1104_v37  ;;  %v920_v24 = vpop.permute.xlu0 %919  ;;  %v1396_v39 = vor.u32 %v1395_v43, %v1391_v29  ;;  %v1149_v29 = vld [vmem:[%s3120_s19 + $0x14] sm:$0x1] }
 0x10b   : > { %v922_v15 = vpop.permute.xlu1 %921  ;;  %v3166_v48 = vsel %vm1060_vm8, %v3085_v61, %v920_v24 }
 0x10c   : > { %v3171_v21 = vsel %vm1060_vm8, %v3047_v11, %v922_v15  ;;  %v1401_v57 = vsel %vm679_vm0, %v1396_v39, %v1400_v44  ;;  %v1418_v11 = vrot.slane %v3139_v30, 1 }
 0x10e   : > { %1454 = vrot.lane.b32.xlu2 %v3139_v30, %s2486_s16  ;;  %v3187_v20 = vsel %vm792_vm1, %v1418_v11, %v1419_v32  ;;  %v2317_v11 = vld [vmem:[%s2739_s18 + $0xc] sm:$0xff] }
 0x110   : > { %v1372_v35 = vpop.permute.xlu2 %1371  ;;  %1414 = vrot.lane.b32.xlu0 %v3050_v22, %s2484_s14 }
 0x111   : > { %1433 = vrot.lane.b32.xlu1 %v3069_v55, %s3484_s23 }
 0x112   : > { %v1359_v61 = vpop.permute.xlu0 %1358 }
 0x113   : > { %v1380_v1 = vpop.permute.xlu1 %1379  ;;  %v1533_v49 = vsel %vm992_vm3, %v1517_v46, %v1359_v61  ;;  %v2331_v61 = vld [vmem:[%s3120_s19 + $0xc] sm:$0xff] }
 0x116   : > { %1485 = vrot.lane.b32.xlu2 %v1401_v57, %s2487_s17 }
 0x118   : > { %v1443_v59 = vpop.permute.xlu2 %1442  ;;  %952 = vrot.lane.b32.xlu0 %v2771_v7, %s2487_s17 }
 0x119   : > { %1314 = vrot.lane.b32.xlu1 %v2975_v34, %s2482_s22  ;;  %v1549_v34 = vsel %vm1009_vm4, %v1533_v49, %v1380_v1  ;;  %v1459_v1 = vunpack.c.l.b16 %v1149_v29  ;;  %v931_v49 = vshll.u32 %v2317_v11, 16  ;;  %v1489_v29 = vrot.slane %v2331_v61, 1 }
 0x11a   : > { %v1430_v36 = vpop.permute.xlu0 %1429  ;;  %v1565_v42 = vsel %vm1026_vm5, %v1549_v34, %v3094_v25 }
 0x11b   : > { %v1451_v38 = vpop.permute.xlu1 %1450  ;;  %v1581_v58 = vsel %vm1043_vm6, %v1565_v42, %v1430_v36 }
 0x11e   : > { %1504 = vrot.lane.b32.xlu2 %v3187_v20, %s2488_s13 }
 0x120   : > { %v960_v50 = vpop.permute.xlu2 %959  ;;  %971 = vrot.lane.b32.xlu0 %v2804_v17, %s2488_s13  ;;  %v1597_v17 = vsel %vm1060_vm8, %v1581_v58, %v1451_v38 }
 0x121   : > { %1354 = vrot.lane.b32.xlu1 %v2989_v45, %s2481_s21 }
 0x122   : > { %v1311_v7 = vpop.permute.xlu0 %1310 }
 0x123   : > { %v1482_v3 = vpop.permute.xlu1 %1481  ;;  %v1509_v37 = vsel %vm975_vm2, %v2854_v6, %v1311_v7 }
 0x124   : > { %v1613_v13 = vsel %vm1077_vm9, %v1597_v17, %v1482_v3  ;;  %v1462_v3 = vshrl.u32 %v2331_v61, 16  ;;  %v929_v17 = vshrl.u32 %v2317_v11, 16 }
 0x126   : > { %1425 = vrot.lane.b32.xlu2 %v3107_v5, %s3484_s23 }
 0x128   : > { %v3205_v40 = vpop.permute.xlu2 %1360  ;;  %1375 = vrot.lane.b32.xlu0 %v3072_v56, %s2483_s25 }
 0x129   : > { %1406 = vrot.lane.b32.xlu1 %v3113_v12, %s2484_s14 }
 0x12a   : > { %v1351_v45 = vpop.permute.xlu0 %1350 }
 0x12b   : > { %v1501_v25 = vpop.permute.xlu1 %1500  ;;  %v1525_v24 = vsel %vm992_vm3, %v1509_v37, %v1351_v45 }
 0x12c   : > { %v1629_v63 = vsel %vm1094_vm10, %v1613_v13, %v1501_v25  ;;  %v1541_v6 = vsel %vm1009_vm4, %v1525_v24, %v1372_v35 }
 0x12d   : > { %2264 = vmatmul.msk.bf16.vlgmr.msra.gmra.mxu2 %vm1672_vm11, %v1629_v63 }
 0x12e   : > { %1477 = vrot.lane.b32.xlu2 %v2828_v41, %s2487_s17 }
 0x130   : > { %v3217_v19 = vpop.permute.xlu2 %1431  ;;  %1446 = vrot.lane.b32.xlu0 %v2801_v14, %s2486_s16 }
 0x131   : > { %944 = vrot.lane.b32.xlu1 %v2641_v51, %s2487_s17  ;;  %v1062_v51 = vsel %vm1060_vm8, %v3005_v23, %v3101_v8  ;;  %v1460_v23 = vpack.c.b16 %v1459_v1, %v1459_v1  ;;  %v1464_v8 = vshll.u32 %v2331_v61, 16 }
 0x132   : > { %v1403_v60 = vpop.permute.xlu0 %1402 }
 0x133   : > { %v1422_v26 = vpop.permute.xlu1 %1421  ;;  %v1557_v52 = vsel %vm1026_vm5, %v1541_v6, %v1403_v60  ;;  %v1466_v42 = vrot.slane %v1464_v8, 1  ;;  %v1469_v58 = vshll.u32 %v1460_v23, 16 }
 0x134   : > { %v1573_v36 = vsel %vm1043_vm6, %v1557_v52, %v1422_v26 }
 0x135   : > { %v1589_v38 = vsel %vm1060_vm8, %v1573_v36, %v1443_v59  ;;  %v1467_v59 = vor.u32 %v1466_v42, %v1462_v3 }
 0x136   : > { %1324 = vrot.lane.b32.xlu2 %v3050_v22, %s2482_s22  ;;  %v614_v22 = vld [vmem:[%s2739_s18 + $0x14] sm:$0x1] }
 0x137   : > { %v926_v32 = vunpack.c.l.b16 %v614_v22 }
 0x138   : > { %v3228_v15 = vpop.permute.xlu2 %1312  ;;  %963 = vrot.lane.b32.xlu0 %v2706_v53, %s2488_s13 }
 0x139   : > { %1496 = vrot.lane.b32.xlu1 %v2851_v4, %s2488_s13  ;;  %v927_v46 = vpack.c.b16 %v926_v32, %v926_v32 }
 0x13a   : > { %v941_v43 = vpop.permute.xlu0 %940 }
 0x13b   : > { %v1474_v39 = vpop.permute.xlu1 %1473  ;;  %v1079_v44 = vsel %vm1077_vm9, %v1062_v51, %v941_v43  ;;  %v936_v45 = vshll.u32 %v927_v46, 16  ;;  %v1490_v51 = vrot.slane %v1460_v23, 1  ;;  %v957_v43 = vrot.slane %v927_v46, 1 }
 0x13c   : > { %v1096_v53 = vsel %vm1094_vm10, %v1079_v44, %v960_v50  ;;  %v1605_v50 = vsel %vm1077_vm9, %v1589_v38, %v1474_v39 }
 0x13d   : > { %2284 = vmatmul.msk.bf16.vlgmr.msra.gmra.mxu1 %vm1672_vm11, %v1096_v53  ;;  %v938_v63 = vrot.slane %v936_v45, 1  ;;  %v1491_v39 = vsel %vm792_vm1, %v1489_v29, %v1490_v51 }
 0x13e   : > { %1416 = vrot.lane.b32.xlu2 %v1401_v57, %s2484_s14 }
 0x140   : > { %v3248_v35 = vpop.permute.xlu2 %1352  ;;  %1364 = vrot.lane.b32.xlu0 %v3069_v55, %s2481_s21  ;;  %v933_v55 = vrot.slane %v931_v49, 1 }
 0x141   : > { %1385 = vrot.lane.b32.xlu1 %v3139_v30, %s2483_s25  ;;  %v1471_v30 = vrot.slane %v1469_v58, 1 }
 0x142   : > { %v1493_v7 = vpop.permute.xlu0 %1492  ;;  %v934_v25 = vor.u32 %v933_v55, %v929_v17 }
 0x143   : > { %v1321_v34 = vpop.permute.xlu1 %1320  ;;  %v1621_v57 = vsel %vm1094_vm10, %v1605_v50, %v1493_v7  ;;  %v1472_v37 = vsel %vm679_vm0, %v1467_v59, %v1471_v30 }
 0x144   : > { %2260 = vmatmul.msk.bf16.vlgmr.msra.gmra.mxu0 %vm1672_vm11, %v1621_v57  ;;  %v939_v24 = vsel %vm679_vm0, %v934_v25, %v938_v63  ;;  %v1519_v1 = vsel %vm975_vm2, %v2818_v27, %v1321_v34 }
 0x145   : > { %v1535_v53 = vsel %vm992_vm3, %v1519_v1, %v3205_v40 }
 0x146   : > { %1456 = vrot.lane.b32.xlu2 %v2331_v61, %s2486_s16 }
 0x148   : > { %v1405_v13 = vpop.permute.xlu2 %1404  ;;  %1435 = vrot.lane.b32.xlu0 %v3187_v20, %s3484_s23  ;;  %v956_v20 = vrot.slane %v2317_v11, 1 }
 0x149   : > { %923 = vrot.lane.b32.xlu1 %v2317_v11, %s2486_s16 }
 0x14a   : > { %v1382_v60 = vpop.permute.xlu0 %1381  ;;  %v958_v44 = vsel %vm792_vm1, %v956_v20, %v957_v43 }
 0x14b   : > { %v1413_v26 = vpop.permute.xlu1 %1412 }
 0x14e   : > { %1487 = vrot.lane.b32.xlu2 %v1472_v37, %s2487_s17 }
 0x150   : > { %v943_v6 = vpop.permute.xlu2 %942  ;;  %954 = vrot.lane.b32.xlu0 %v939_v24, %s2487_s17 }
 0x151   : > { %1316 = vrot.lane.b32.xlu1 %v3113_v12, %s2482_s22  ;;  %v1551_v12 = vsel %vm1009_vm4, %v1535_v53, %v1382_v60  ;;  %s2158_s22 = sshll.u32 %s3496_s28, 5 }
 0x152   : > { %v1453_v22 = vpop.permute.xlu0 %1452  ;;  %v1567_v8 = vsel %vm1026_vm5, %v1551_v12, %v1413_v26 }
 0x153   : > { %v951_v52 = vpop.permute.xlu1 %950  ;;  %v1583_v40 = vsel %vm1043_vm6, %v1567_v8, %v3217_v19 }
 0x154   : > { %v1089_v32 = vsel %vm1077_vm9, %v3166_v48, %v951_v52  ;;  %v1599_v38 = vsel %vm1060_vm8, %v1583_v40, %v1453_v22 }
 0x156   : > { %1506 = vrot.lane.b32.xlu2 %v1491_v39, %s2488_s13 }
 0x158   : > { %973 = vrot.lane.b32.xlu0 %v958_v44, %s2488_s13  ;;  %v1495_v61 = vpop.permute.xlu2 %1494 }
 0x159   : > { %1356 = vrot.lane.b32.xlu1 %v3107_v5, %s2481_s21  ;;  %s2157_s21 = sshll.u32 %s3500_s12, 1 }
 0x15a   : > { %v1484_v11 = vpop.permute.xlu0 %1483 }
 0x15b   : > { %v970_v36 = vpop.permute.xlu1 %969  ;;  %v1615_v48 = vsel %vm1077_vm9, %v1599_v38, %v1484_v11 }
 0x15c   : > { %v1106_v23 = vsel %vm1094_vm10, %v1089_v32, %v970_v36 }
 0x15d   : > { %2289 = vmatmul.msk.bf16.gmra.mxu3 %vm1672_vm11, %v1106_v23 }
 0x15e   : > { %1427 = vrot.lane.b32.xlu2 %v2851_v4, %s3484_s23 }
 0x160   : > { %1377 = vrot.lane.b32.xlu0 %v2801_v14, %s2483_s25  ;;  %v1384_v5 = vpop.permute.xlu2 %1383  ;;  %v1511_v14 = vsel %vm975_vm2, %v2908_v2, %v3228_v15  ;;  %v1081_v15 = vsel %vm1077_vm9, %v3066_v47, %v943_v6  ;;  %s3345_s25 = sadd.s32 %s2158_s22, %s2157_s21 }
 0x161   : > { %1408 = vrot.lane.b32.xlu1 %v2828_v41, %s2484_s14  ;;  %v1527_v41 = vsel %vm992_vm3, %v1511_v14, %v3248_v35  ;;  %s2159_s18 = sshll.u32 %s3345_s25, 2 }
 0x162   : > { %v1503_v46 = vpop.permute.xlu0 %1502  ;;  %s3359_s14 = scalar_lea.vmem %s3478_s7, %s2159_s18  ;;  %s3375_s15 = scalar_lea.vmem %s3479_s8, %s2159_s18 }
 0x163   : > { %v1374_v49 = vpop.permute.xlu1 %1373  ;;  %v1631_v50 = vsel %vm1094_vm10, %v1615_v48, %v1503_v46  ;;  %v3364_v46 = vld [vmem:[%s3477_s6] ss:$0 sm:$0xff] }
 0x164   : > { %2265 = vmatmul.msk.bf16.gmra.mxu2 %vm1672_vm11, %v1631_v50  ;;  %v1543_v7 = vsel %vm1009_vm4, %v1527_v41, %v1374_v49  ;;  %v2375_v50 = vld [vmem:[%s3359_s14 + $0x20] sm:$0xff]  }
 0x166   : > { %1479 = vrot.lane.b32.xlu2 %v2845_v62, %s2487_s17  ;;  %v1559_v62 = vsel %vm1026_vm5, %v1543_v7, %v1405_v13 }
 0x168   : > { %1448 = vrot.lane.b32.xlu0 %v2818_v27, %s2486_s16  ;;  %v1455_v4 = vpop.permute.xlu2 %1454 }
 0x169   : > { %946 = vrot.lane.b32.xlu1 %v2666_v28, %s2487_s17 }
 0x16a   : > { %v1424_v19 = vpop.permute.xlu0 %1423 }
 0x16b   : > { %v1445_v34 = vpop.permute.xlu1 %1444  ;;  %v1575_v57 = vsel %vm1043_vm6, %v1559_v62, %v1424_v19 }
 0x16c   : > { %v1591_v28 = vsel %vm1060_vm8, %v1575_v57, %v1445_v34  ;;  %v2354_v34 = vunpack.c.l.bf16 %v2375_v50 }
 0x170   : > { %965 = vrot.lane.b32.xlu0 %v2711_v54, %s2488_s13  ;;  %v1486_v2 = vpop.permute.xlu2 %1485 }
 0x171   : > { %1498 = vrot.lane.b32.xlu1 %v2876_v31, %s2488_s13 }
 0x172   : > { %v1476_v27 = vpop.permute.xlu0 %1475 }
 0x173   : > { %v962_v35 = vpop.permute.xlu1 %961  ;;  %v1607_v3 = vsel %vm1077_vm9, %v1591_v28, %v1476_v27 }
 0x174   : > { %v1098_v42 = vsel %vm1094_vm10, %v1081_v15, %v962_v35  ;;  %v1623_v58 = vsel %vm1094_vm10, %v1607_v3, %v1495_v61 }
 0x175   : > { %2285 = vmatmul.msk.bf16.gmra.mxu1 %vm1672_vm11, %v1098_v42  ;;  %2261 = vmatmul.msk.bf16.gmra.mxu0 %vm1672_vm11, %v1623_v58 }
 0x178   : > { %v1505_v54 = vpop.permute.xlu2 %1504 }
 0x17a   : > { %v1323_v17 = vpop.permute.xlu0 %1322 }
 0x17b   : > { %v1363_v31 = vpop.permute.xlu1 %1362  ;;  %v1521_v55 = vsel %vm975_vm2, %v2862_v10, %v1323_v17  ;;  %v2355_v17 = vunpack.c.h.bf16 %v2375_v50 }
 0x17c   : > { %v1537_v45 = vsel %vm992_vm3, %v1521_v55, %v1363_v31 }
 0x17d   : > { %v1553_v59 = vsel %vm1009_vm4, %v1537_v45, %v1384_v5 }
 0x180   : > { %v1426_v47 = vpop.permute.xlu2 %1425 }
 0x182   : > { %v1415_v30 = vpop.permute.xlu0 %1414 }
 0x183   : > { %v1434_v13 = vpop.permute.xlu1 %1433  ;;  %v1569_v25 = vsel %vm1026_vm5, %v1553_v59, %v1415_v30 }
 0x184   : > { %v1585_v63 = vsel %vm1043_vm6, %v1569_v25, %v1434_v13 }
 0x185   : > { %v1601_v60 = vsel %vm1060_vm8, %v1585_v63, %v1455_v4 }
 0x186   : > { %v1617_v26 = vsel %vm1077_vm9, %v1601_v60, %v1486_v2 }
 0x187   : > { %v1633_v37 = vsel %vm1094_vm10, %v1617_v26, %v1505_v54 }
 0x188   : > { %2266 = vmatmul.msk.bf16.gmra.mxu2 %vm1672_vm11, %v1633_v37  ;;  %v1478_v10 = vpop.permute.xlu2 %1477  ;;  %v2337_v37 = vld [vmem:[%s3359_s14] sm:$0xff]  }
 0x18a   : > { %v953_v24 = vpop.permute.xlu0 %952 }
 0x18b   : > { %v1315_v29 = vpop.permute.xlu1 %1314  ;;  %v1091_v51 = vsel %vm1077_vm9, %v3171_v21, %v953_v24 }
 0x18c   : > { %v1513_v1 = vsel %vm975_vm2, %v2937_v16, %v1315_v29 }
 0x190   : > { %v1325_v22 = vpop.permute.xlu2 %1324 }
 0x191   : > { %v1523_v14 = vsel %vm975_vm2, %v3008_v33, %v1325_v22 }
 0x192   : > { %v972_v6 = vpop.permute.xlu0 %971 }
 0x193   : > { %v1355_v20 = vpop.permute.xlu1 %1354  ;;  %v1108_v43 = vsel %vm1094_vm10, %v1091_v51, %v972_v6  ;;  %v2338_v6 = vunpack.c.l.bf16 %v2337_v37 }
 0x194   : > { %2290 = vmatmul.msk.bf16.gmra.mxu3 %vm1672_vm11, %v1108_v43  ;;  %v1529_v61 = vsel %vm992_vm3, %v1513_v1, %v1355_v20 }
 0x198   : > { %v1417_v44 = vpop.permute.xlu2 %1416 }
 0x19a   : > { %v1376_v52 = vpop.permute.xlu0 %1375 }
 0x19b   : > { %v1407_v39 = vpop.permute.xlu1 %1406  ;;  %v1545_v21 = vsel %vm1009_vm4, %v1529_v61, %v1376_v52 }
 0x19c   : > { %v1561_v11 = vsel %vm1026_vm5, %v1545_v21, %v1407_v39 }
 0x19d   : > { %v1577_v32 = vsel %vm1043_vm6, %v1561_v11, %v1426_v47 }
 0x1a0   : > { %v1457_v36 = vpop.permute.xlu2 %1456 }
 0x1a2   : > { %v1447_v53 = vpop.permute.xlu0 %1446 }
 0x1a3   : > { %v945_v12 = vpop.permute.xlu1 %944  ;;  %v1593_v23 = vsel %vm1060_vm8, %v1577_v32, %v1447_v53  ;;  %v2339_v32 = vunpack.c.h.bf16 %v2337_v37 }
 0x1a4   : > { %v1083_v16 = vsel %vm1077_vm9, %v3136_v0, %v945_v12  ;;  %v1609_v5 = vsel %vm1077_vm9, %v1593_v23, %v1478_v10  ;;  %v1817_v0 = vpop.f32.mrf.mxu3 }
 0x1a8   : > { %v1488_v41 = vpop.permute.xlu2 %1487 }
 0x1aa   : > { %v964_v8 = vpop.permute.xlu0 %963 }
 0x1ab   : > { %v1497_v40 = vpop.permute.xlu1 %1496  ;;  %v1100_v38 = vsel %vm1094_vm10, %v1083_v16, %v964_v8 }
 0x1ac   : > { %v1625_v48 = vsel %vm1094_vm10, %v1609_v5, %v1497_v40  ;;  %2286 = vmatmul.msk.bf16.gmra.mxu1 %vm1672_vm11, %v1100_v38  ;;  %v1819_v15 = vpop.f32.mrf.mxu3 }
 0x1ad   : > { %2262 = vmatmul.msk.bf16.gmra.mxu0 %vm1672_vm11, %v1625_v48 }
 0x1b0   : > { %v1722_v49 = vpop.f32.mrf.mxu2  ;;  %v1507_v45 = vpop.permute.xlu2 %1506 }
 0x1b1   : > { %v1818_v4 = vadd.f32 %v1817_v0, %v1722_v49 }
 0x1b2   : > { %v1365_v19 = vpop.permute.xlu0 %1364 }
 0x1b3   : > { %v1849_v7 = vadd.f32 %v3364_v46, %v1818_v4  ;;  %v1386_v62 = vpop.permute.xlu1 %1385  ;;  %v1539_v57 = vsel %vm992_vm3, %v1523_v14, %v1365_v19 }
 0x1b4   : > { %v1555_v27 = vsel %vm1009_vm4, %v1539_v57, %v1386_v62 }
 0x1b5   : > { %v1865_v2 = vmax.f32 %v1849_v7, 0.0  ;;  %v1571_v42 = vsel %vm1026_vm5, %v1555_v27, %v1417_v44  ;;  %v2376_v27 = vld [vmem:[%s3359_s14 + $0x28] sm:$0xff]  }
 0x1b7   : > { %v1913_v28 = vadd.f32 %v2354_v34, %v1865_v2 }
 0x1b8   : > { %v1724_v33 = vpop.f32.mrf.mxu2  ;;  %v1428_v40 = vpop.permute.xlu2 %1427 }
 0x1b9   : > { %v1929_v35 = vpack.c.bf16 %v1913_v28, %v1913_v28  ;;  %v1820_v3 = vadd.f32 %v1819_v15, %v1724_v33  ;;  %v2358_v33 = vunpack.c.l.bf16 %v2376_v27 }
 0x1ba   : > { %v1436_v58 = vpop.permute.xlu0 %1435  ;;  %v1797_v63 = vpop.f32.mrf.mxu1 }
 0x1bb   : > { %1946 = vst.msk [vmem:[%s3375_s15 + $0x20] sm:$0xf] %vm1937_vm12, %v1929_v35  ;;  %v1850_v54 = vadd.f32 %v3364_v46, %v1820_v3  ;;  %v924_v31 = vpop.permute.xlu1 %923  ;;  %v1587_v55 = vsel %vm1043_vm6, %v1571_v42, %v1436_v58 }
 0x1bc   : > { %v1603_v47 = vsel %vm1060_vm8, %v1587_v55, %v1457_v36  ;;  %v1076_v22 = vsel %vm1060_vm8, %v3104_v18, %v924_v31  ;;  %v2359_v55 = vunpack.c.h.bf16 %v2376_v27 }
 0x1bd   : > { %v1866_v59 = vmax.f32 %v1850_v54, 0.0  ;;  %v1619_v30 = vsel %vm1077_vm9, %v1603_v47, %v1488_v41 }
 0x1be   : > { %v1635_v13 = vsel %vm1094_vm10, %v1619_v30, %v1507_v45 }
 0x1bf   : > { %v1914_v25 = vadd.f32 %v2355_v17, %v1866_v59  ;;  %2267 = vmatmul.msk.bf16.gmra.mxu2 %vm1672_vm11, %v1635_v13  ;;  %v2372_v59 = vld [vmem:[%s3359_s14 + $0x8] sm:$0xff]  }
 0x1c0   : > { %v1480_v41 = vpop.permute.xlu2 %1479 }
 0x1c1   : > { %v1930_v60 = vpack.c.bf16 %v1914_v25, %v1914_v25  ;;  %v1702_v26 = vpop.f32.mrf.mxu0 }
 0x1c2   : > { %v1798_v10 = vadd.f32 %v1797_v63, %v1702_v26  ;;  %v955_v24 = vpop.permute.xlu0 %954  ;;  %v1799_v52 = vpop.f32.mrf.mxu1  ;;  %v2342_v63 = vunpack.c.l.bf16 %v2372_v59 }
 0x1c3   : > { %1947 = vst.msk [vmem:[%s3375_s15 + $0x24] sm:$0xf] %vm1937_vm12, %v1930_v60  ;;  %v1317_v29 = vpop.permute.xlu1 %1316  ;;  %v1093_v1 = vsel %vm1077_vm9, %v1076_v22, %v955_v24 }
 0x1c4   : > { %v1841_v51 = vadd.f32 %v3364_v46, %v1798_v10  ;;  %v1515_v5 = vsel %vm975_vm2, %v3072_v56, %v1317_v29 }
 0x1c6   : > { %v1857_v20 = vmax.f32 %v1841_v51, 0.0 }
 0x1c8   : > { %v1905_v43 = vadd.f32 %v2338_v6, %v1857_v20 }
 0x1c9   : > { %v1704_v39 = vpop.f32.mrf.mxu0 }
 0x1ca   : > { %v1921_v44 = vpack.c.bf16 %v1905_v43, %v1905_v43  ;;  %v1800_v61 = vadd.f32 %v1799_v52, %v1704_v39  ;;  %v974_v21 = vpop.permute.xlu0 %973  ;;  %v2343_v43 = vunpack.c.h.bf16 %v2372_v59 }
 0x1cb   : > { %v1357_v53 = vpop.permute.xlu1 %1356  ;;  %v1110_v12 = vsel %vm1094_vm10, %v1093_v1, %v974_v21 }
 0x1cc   : > { %1938 = vst.msk [vmem:[%s3375_s15] sm:$0xf] %vm1937_vm12, %v1921_v44  ;;  %v1842_v11 = vadd.f32 %v3364_v46, %v1800_v61  ;;  %2291 = vmatmul.msk.bf16.gmra.mxu3 %vm1672_vm11, %v1110_v12  ;;  %v1531_v38 = vsel %vm992_vm3, %v1515_v5, %v1357_v53  ;;  %v2377_v61 = vld [vmem:[%s3359_s14 + $0x30] sm:$0xff]  }
 0x1cd   : > { %v2362_v12 = vunpack.c.l.bf16 %v2377_v61 }
 0x1ce   : > { %v1858_v36 = vmax.f32 %v1842_v11, 0.0 }
 0x1d0   : > { %v1906_v18 = vadd.f32 %v2339_v32, %v1858_v36 }
 0x1d2   : > { %v1922_v23 = vpack.c.bf16 %v1906_v18, %v1906_v18  ;;  %v1378_v16 = vpop.permute.xlu0 %1377 }
 0x1d3   : > { %v1409_v8 = vpop.permute.xlu1 %1408  ;;  %v1547_v48 = vsel %vm1009_vm4, %v1531_v38, %v1378_v16 }
 0x1d4   : > { %1939 = vst.msk [vmem:[%s3375_s15 + $0x4] sm:$0xf] %vm1937_vm12, %v1922_v23  ;;  %v1563_v50 = vsel %vm1026_vm5, %v1547_v48, %v1409_v8 }
 0x1d5   : > { %v1579_v14 = vsel %vm1043_vm6, %v1563_v50, %v1428_v40  ;;  %v2363_v40 = vunpack.c.h.bf16 %v2377_v61  ;;  %v2373_v50 = vld [vmem:[%s3359_s14 + $0x10] sm:$0xff]  }
 0x1da   : > { %v1449_v0 = vpop.permute.xlu0 %1448 }
 0x1db   : > { %v947_v49 = vpop.permute.xlu1 %946  ;;  %v1595_v4 = vsel %vm1060_vm8, %v1579_v14, %v1449_v0 }
 0x1dc   : > { %v1085_v19 = vsel %vm1077_vm9, %v3144_v9, %v947_v49  ;;  %v1611_v56 = vsel %vm1077_vm9, %v1595_v4, %v1480_v41  ;;  %v2346_v41 = vunpack.c.l.bf16 %v2373_v50 }
 0x1e0   : > { %v1822_v2 = vpop.f32.mrf.mxu3 }
 0x1e2   : > { %v966_v7 = vpop.permute.xlu0 %965 }
 0x1e3   : > { %v1499_v34 = vpop.permute.xlu1 %1498  ;;  %v1102_v62 = vsel %vm1094_vm10, %v1085_v19, %v966_v7 }
 0x1e4   : > { %v1627_v57 = vsel %vm1094_vm10, %v1611_v56, %v1499_v34  ;;  %2287 = vmatmul.msk.bf16.gmra.mxu1 %vm1672_vm11, %v1102_v62 }
 0x1e5   : > { %2263 = vmatmul.msk.bf16.gmra.mxu0 %vm1672_vm11, %v1627_v57 }
 0x1e7   : > { %v1727_v28 = vpop.f32.mrf.mxu2 }
 0x1e8   : > { %v1823_v15 = vadd.f32 %v1822_v2, %v1727_v28  ;;  %v1824_v42 = vpop.f32.mrf.mxu3  ;;  %v2347_v28 = vunpack.c.h.bf16 %v2373_v50 }
 0x1ea   : > { %v1851_v9 = vadd.f32 %v3364_v46, %v1823_v15 }
 0x1ec   : > { %v1867_v35 = vmax.f32 %v1851_v9, 0.0 }
 0x1ee   : > { %v1915_v3 = vadd.f32 %v2358_v33, %v1867_v35 }
 0x1ef   : > { %v1729_v58 = vpop.f32.mrf.mxu2 }
 0x1f0   : > { %v1931_v54 = vpack.c.bf16 %v1915_v3, %v1915_v3  ;;  %v1825_v17 = vadd.f32 %v1824_v42, %v1729_v58  ;;  %v2378_v3 = vld [vmem:[%s3359_s14 + $0x38] sm:$0xff]  }
 0x1f2   : > { %1948 = vst.msk [vmem:[%s3375_s15 + $0x28] sm:$0xf] %vm1937_vm12, %v1931_v54  ;;  %v1852_v31 = vadd.f32 %v3364_v46, %v1825_v17  ;;  %v1802_v45 = vpop.f32.mrf.mxu1  ;;  %v1707_v47 = vpop.f32.mrf.mxu0  ;;  %v2366_v54 = vunpack.c.l.bf16 %v2378_v3 }
 0x1f3   : > { %v1803_v30 = vadd.f32 %v1802_v45, %v1707_v47 }
 0x1f4   : > { %v1868_v13 = vmax.f32 %v1852_v31, 0.0 }
 0x1f5   : > { %v1843_v25 = vadd.f32 %v3364_v46, %v1803_v30 }
 0x1f6   : > { %v1916_v60 = vadd.f32 %v2359_v55, %v1868_v13  ;;  %v2367_v13 = vunpack.c.h.bf16 %v2378_v3 }
 0x1f7   : > { %v1859_v26 = vmax.f32 %v1843_v25, 0.0 }
 0x1f8   : > { %v1932_v37 = vpack.c.bf16 %v1916_v60, %v1916_v60 }
 0x1f9   : > { %v1907_v10 = vadd.f32 %v2342_v63, %v1859_v26 }
 0x1fa   : > { %1949 = vst.msk [vmem:[%s3375_s15 + $0x2c] sm:$0xf] %vm1937_vm12, %v1932_v37  ;;  %v1804_v24 = vpop.f32.mrf.mxu1  ;;  %v1709_v29 = vpop.f32.mrf.mxu0 }
 0x1fb   : > { %v1923_v51 = vpack.c.bf16 %v1907_v10, %v1907_v10  ;;  %v1805_v6 = vadd.f32 %v1804_v24, %v1709_v29  ;;  %v2374_v10 = vld [vmem:[%s3359_s14 + $0x18] sm:$0xff]  }
 0x1fd   : > { %1940 = vst.msk [vmem:[%s3375_s15 + $0x8] sm:$0xf] %vm1937_vm12, %v1923_v51  ;;  %v1844_v20 = vadd.f32 %v3364_v46, %v1805_v6  ;;  %v2350_v51 = vunpack.c.l.bf16 %v2374_v10 }
 0x1ff   : > { %v1860_v22 = vmax.f32 %v1844_v20, 0.0 }
 0x201   : > { %v1908_v52 = vadd.f32 %v2343_v43, %v1860_v22 }
 0x203   : > { %v1924_v39 = vpack.c.bf16 %v1908_v52, %v1908_v52 }
 0x205   : > { %1941 = vst.msk [vmem:[%s3375_s15 + $0xc] sm:$0xf] %vm1937_vm12, %v1924_v39 }
 0x20b   : > { %v1732_v44 = vpop.f32.mrf.mxu2 }
 0x213   : > { %v1734_v36 = vpop.f32.mrf.mxu2 }
 0x217   : > { %v1827_v1 = vpop.f32.mrf.mxu3 }
 0x218   : > { %v1828_v21 = vadd.f32 %v1827_v1, %v1732_v44  ;;  %v2351_v1 = vunpack.c.h.bf16 %v2374_v10 }
 0x21a   : > { %v1853_v53 = vadd.f32 %v3364_v46, %v1828_v21 }
 0x21c   : > { %v1869_v11 = vmax.f32 %v1853_v53, 0.0 }
 0x21e   : > { %v1917_v32 = vadd.f32 %v2362_v12, %v1869_v11 }
 0x21f   : > { %v1829_v18 = vpop.f32.mrf.mxu3 }
 0x220   : > { %v1933_v23 = vpack.c.bf16 %v1917_v32, %v1917_v32  ;;  %v1830_v16 = vadd.f32 %v1829_v18, %v1734_v36 }
 0x222   : > { %1950 = vst.msk [vmem:[%s3375_s15 + $0x30] sm:$0xf] %vm1937_vm12, %v1933_v23  ;;  %v1854_v8 = vadd.f32 %v3364_v46, %v1830_v16 }
 0x224   : > { %v1870_v5 = vmax.f32 %v1854_v8, 0.0 }
 0x226   : > { %v1918_v38 = vadd.f32 %v2363_v40, %v1870_v5 }
 0x228   : > { %v1934_v48 = vpack.c.bf16 %v1918_v38, %v1918_v38 }
 0x229   : > { %v1807_v0 = vpop.f32.mrf.mxu1 }
 0x22a   : > { %1951 = vst.msk [vmem:[%s3375_s15 + $0x34] sm:$0xf] %vm1937_vm12, %v1934_v48  ;;  %v1712_v49 = vpop.f32.mrf.mxu0 }
 0x22b   : > { %v1808_v14 = vadd.f32 %v1807_v0, %v1712_v49 }
 0x22d   : > { %v1845_v4 = vadd.f32 %v3364_v46, %v1808_v14 }
 0x22f   : > { %v1861_v19 = vmax.f32 %v1845_v4, 0.0 }
 0x231   : > { %v1909_v7 = vadd.f32 %v2346_v41, %v1861_v19  ;;  %v1809_v56 = vpop.f32.mrf.mxu1 }
 0x232   : > { %v1714_v34 = vpop.f32.mrf.mxu0 }
 0x233   : > { %v1925_v62 = vpack.c.bf16 %v1909_v7, %v1909_v7  ;;  %v1810_v57 = vadd.f32 %v1809_v56, %v1714_v34 }
 0x235   : > { %1942 = vst.msk [vmem:[%s3375_s15 + $0x10] sm:$0xf] %vm1937_vm12, %v1925_v62  ;;  %v1846_v2 = vadd.f32 %v3364_v46, %v1810_v57 }
 0x237   : > { %v1862_v27 = vmax.f32 %v1846_v2, 0.0 }
 0x239   : > { %v1910_v15 = vadd.f32 %v2347_v28, %v1862_v27 }
 0x23b   : > { %v1926_v9 = vpack.c.bf16 %v1910_v15, %v1910_v15 }
 0x23d   : > { %1943 = vst.msk [vmem:[%s3375_s15 + $0x14] sm:$0xf] %vm1937_vm12, %v1926_v9 }
 0x242   : > { %v1737_v33 = vpop.f32.mrf.mxu2 }
 0x24a   : > { %v1739_v55 = vpop.f32.mrf.mxu2 }
 0x24f   : > { %v1832_v35 = vpop.f32.mrf.mxu3 }
 0x250   : > { %v1833_v42 = vadd.f32 %v1832_v35, %v1737_v33 }
 0x252   : > { %v1855_v58 = vadd.f32 %v3364_v46, %v1833_v42 }
 0x254   : > { %v1871_v17 = vmax.f32 %v1855_v58, 0.0 }
 0x256   : > { %v1919_v31 = vadd.f32 %v2366_v54, %v1871_v17 }
 0x257   : > { %v1834_v45 = vpop.f32.mrf.mxu3 }
 0x258   : > { %v1935_v47 = vpack.c.bf16 %v1919_v31, %v1919_v31  ;;  %v1835_v59 = vadd.f32 %v1834_v45, %v1739_v55 }
 0x25a   : > { %1952 = vst.msk [vmem:[%s3375_s15 + $0x38] sm:$0xf] %vm1937_vm12, %v1935_v47  ;;  %v1856_v30 = vadd.f32 %v3364_v46, %v1835_v59 }
 0x25c   : > { %v1872_v25 = vmax.f32 %v1856_v30, 0.0 }
 0x25e   : > { %v1920_v63 = vadd.f32 %v2367_v13, %v1872_v25 }
 0x260   : > { %v1936_v60 = vpack.c.bf16 %v1920_v63, %v1920_v63 }
 0x261   : > { %v1812_v26 = vpop.f32.mrf.mxu1 }
 0x262   : > { %1953 = vst.msk [vmem:[%s3375_s15 + $0x3c] sm:$0xf] %vm1937_vm12, %v1936_v60  ;;  %v1717_v37 = vpop.f32.mrf.mxu0 }
 0x263   : > { %v1813_v24 = vadd.f32 %v1812_v26, %v1717_v37 }
 0x265   : > { %v1847_v29 = vadd.f32 %v3364_v46, %v1813_v24 }
 0x267   : > { %v1863_v6 = vmax.f32 %v1847_v29, 0.0 }
 0x269   : > { %v1911_v20 = vadd.f32 %v2350_v51, %v1863_v6  ;;  %v1814_v43 = vpop.f32.mrf.mxu1 }
 0x26a   : > { %v1719_v22 = vpop.f32.mrf.mxu0 }
 0x26b   : > { %v1927_v52 = vpack.c.bf16 %v1911_v20, %v1911_v20  ;;  %v1815_v39 = vadd.f32 %v1814_v43, %v1719_v22 }
 0x26d   : > { %1944 = vst.msk [vmem:[%s3375_s15 + $0x18] sm:$0xf] %vm1937_vm12, %v1927_v52  ;;  %v1848_v44 = vadd.f32 %v3364_v46, %v1815_v39 }
 0x26f   : > { %v1864_v61 = vmax.f32 %v1848_v44, 0.0 }
 0x271   : > { %v1912_v21 = vadd.f32 %v2351_v1, %v1864_v61 }
 0x273   : > { %v1928_v53 = vpack.c.bf16 %v1912_v21, %v1912_v21 }
 0x275   : > { %1945 = vst.msk [vmem:[%s3375_s15 + $0x1c] sm:$0xf] %vm1937_vm12, %v1928_v53 }
 0x276 PF: > { %s18_s9 = sadd.s32 1, %s2479_s9   ;;  %s3485_s27 = smov %s2471_s29 }
 0x277   : > { %p15_p9 = scmp.ge.s32.totalorder %s18_s9, 6   ;;  %s3486_s28 = smov %s2475_s30 }
 0x278   : > { %s3487_s29 = smov %s3490_s10  ;;  %s3488_s30 = smov %s3494_s11 }
 0x279   :  { %17 = sbr.rel (!%p15_p9) target bundleno = 3 (0x3), region = 94 }

</bundles_post_ra>
